<compile_context>
chip_gen: v7x
topology: tpu7x:2x2x1
jax: 0.10.0
libtpu: 0.0.40
codegen_flags: <defaults>
</compile_context>

<pallas_src>
from functools import partial
import math

import jax
import jax.numpy as jnp
from jax import lax
from jax.experimental import pallas as pl
from jax.experimental.pallas import tpu as pltpu

NORM_EPS = 1e-5
BN_SCALE = 1.0 / math.sqrt(1.0 + NORM_EPS)   # BN with default running stats

# ------------------------- model hyper-params (small) -------------------------
STEM_CHS = [16, 16, 32]     # stem channel plan (stem_chs)
FEAT_C = 64                 # stand-in for the final MedViT feature channel count
EMB = 32                    # embed_dim of the adapter branch
NUM_CLASSES = 10

CH = 4                      # conv output rows per in-kernel chunk
                            # -> f32 accumulator (CH*32, Cout<=32) = 16 vregs max


def _round_up(x, m):
    return ((x + m - 1) // m) * m


# ============================== Pallas kernels ================================
def _stem_kernel(xph_ref, w1_ref, w2_ref, w3_ref, w4_ref, o_ref, s1, s2, s3):
    """Fused stem: 4x ConvBNReLU(3x3) with intermediates in VMEM scratch.

    xph_ref : (1, 4, H/2+1, W/2+1, 3) bf16 poly-phase split of the padded input
    w*_ref  : (9, Cin, Cout) bf16 weights (BN folded)
    o_ref   : (1, H/2, W/2, 32) bf16 last conv at stride-1 resolution
              (wrapper takes [:, ::2, ::2, :] to realize the final stride 2)
    s1..s3  : zero-bordered (H/2+2, W/2+2, C) bf16 intermediates
    """
    Ho = o_ref.shape[1]
    Wo = o_ref.shape[2]

    # zero scratch so the 1-pixel borders act as conv padding; interiors are
    # fully rewritten each grid step (cheap: < 0.3 MB of VMEM stores per image,
    # and correct regardless of how the batch axis is sharded across cores).
    s1[...] = jnp.zeros_like(s1)
    s2[...] = jnp.zeros_like(s2)
    s3[...] = jnp.zeros_like(s3)

    # ---- conv 0: stride 2 handled by the wrapper's poly-phase split ----------
    def conv1_chunk(c, carry):
        h0 = pl.multiple_of(c * CH, CH)
        cout = s1.shape[-1]
        acc = jnp.zeros((CH * Wo, cout), jnp.float32)
        for ki in range(3):
            for kj in range(3):
                t = ki * 3 + kj
                p = (ki % 2) * 2 + (kj % 2)
                xs = xph_ref[0, p, pl.ds(h0 + ki // 2, CH), pl.ds(kj // 2, Wo), :]
                acc = acc + jnp.dot(xs.reshape(CH * Wo, xs.shape[-1]), w1_ref[t],
                                    preferred_element_type=jnp.float32)
        y = jnp.maximum(acc, 0.0).astype(jnp.bfloat16).reshape(CH, Wo, cout)
        s1[pl.ds(1 + h0, CH), pl.ds(1, Wo), :] = y
        return carry

    lax.fori_loop(0, Ho // CH, conv1_chunk, 0)

    # ---- convs 1..3: stride-1 3x3 over zero-padded VMEM intermediates --------
    def conv_s1(src, w_ref, store_fn):
        cin = src.shape[-1]
        cout = w_ref.shape[-1]

        def chunk(c, carry):
            h0 = pl.multiple_of(c * CH, CH)
            acc = jnp.zeros((CH * Wo, cout), jnp.float32)
            for t in range(9):
                ki, kj = t // 3, t % 3
                xs = src[pl.ds(h0 + ki, CH), pl.ds(kj, Wo), :]
                acc = acc + jnp.dot(xs.reshape(CH * Wo, cin), w_ref[t],
                                    preferred_element_type=jnp.float32)
            y = jnp.maximum(acc, 0.0).astype(jnp.bfloat16).reshape(CH, Wo, cout)
            store_fn(h0, y)
            return carry

        lax.fori_loop(0, Ho // CH, chunk, 0)

    def _store_pad(dst):
        def fn(h0, y):
            dst[pl.ds(1 + h0, CH), pl.ds(1, Wo), :] = y
        return fn

    def _store_out(h0, y):
        o_ref[0, pl.ds(h0, CH), :, :] = y

    conv_s1(s1, w2_ref, _store_pad(s2))     # stem.1: 16 -> 16, stride 1
    conv_s1(s2, w3_ref, _store_pad(s3))     # stem.2: 16 -> 32, stride 1
    conv_s1(s3, w4_ref, _store_out)         # stem.3: 32 -> 32, at stride-1 res.


def fused_stem(x_nhwc_f32, stem_w):
    """stem: 4x ConvBNReLU(3x3) fused into one Pallas call; returns (B,H/4,W/4,32)."""
    B, H, W, _ = x_nhwc_f32.shape
    assert H % 8 == 0 and W % 8 == 0
    Ho, Wo = H // 2, W // 2
    assert Ho % CH == 0

    x = x_nhwc_f32.astype(jnp.bfloat16)                     # bf16 cast in wrapper
    xp = jnp.pad(x, ((0, 0), (1, 1), (1, 1), (0, 0)))
    # 4-way poly-phase split of the padded input -> unit-stride taps in-kernel
    phases = jnp.stack([xp[:, pi::2, pj::2, :]
                        for pi in range(2) for pj in range(2)], axis=1)
    Hph, Wph = phases.shape[2], phases.shape[3]             # = H/2 + 1

    w_mats = []
    for w in stem_w:
        ci, co = w.shape[2], w.shape[3]
        w_mats.append((w * BN_SCALE).reshape(9, ci, co).astype(jnp.bfloat16))

    out_full = pl.pallas_call(
        _stem_kernel,
        out_shape=jax.ShapeDtypeStruct((B, Ho, Wo, STEM_CHS[2]), jnp.bfloat16),
        grid_spec=pltpu.PrefetchScalarGridSpec(
            num_scalar_prefetch=0,
            grid=(B,),
            in_specs=[pl.BlockSpec((1, 4, Hph, Wph, 3), lambda b: (b, 0, 0, 0, 0)),
                      pl.BlockSpec(w_mats[0].shape, lambda b: (0, 0, 0)),
                      pl.BlockSpec(w_mats[1].shape, lambda b: (0, 0, 0)),
                      pl.BlockSpec(w_mats[2].shape, lambda b: (0, 0, 0)),
                      pl.BlockSpec(w_mats[3].shape, lambda b: (0, 0, 0))],
            out_specs=pl.BlockSpec((1, Ho, Wo, STEM_CHS[2]), lambda b: (b, 0, 0, 0)),
            scratch_shapes=[
                pltpu.VMEM((Ho + 2, Wo + 2, STEM_CHS[0]), jnp.bfloat16),
                pltpu.VMEM((Ho + 2, Wo + 2, STEM_CHS[1]), jnp.bfloat16),
                pltpu.VMEM((Ho + 2, Wo + 2, STEM_CHS[2]), jnp.bfloat16),
            ],
        ),
        compiler_params=pltpu.CompilerParams(dimension_semantics=("parallel",)),
    )(phases, *w_mats)
    # realize the last conv's stride 2 (exact: even rows / even cols)
    return out_full[:, ::2, ::2, :]


def _mm_bias_kernel(x_ref, w_ref, b_ref, o_ref):
    """(x @ w + b) — bf16 MXU operands, f32 accumulate; one grid row tile each."""
    o_ref[...] = (jnp.dot(x_ref[...], w_ref[...],
                          preferred_element_type=jnp.float32) + b_ref[...])


def pallas_matmul_bias(x, w, b):
    """x:[M,K] @ w:[K,N] + b -> f32 [M,N]. Lane-dense N (padded to 128), bf16
    operands cast in the wrapper, and M split into >=2 'parallel' row tiles so
    both v7x TensorCores get work (single-TC chips unaffected)."""
    M, K = x.shape
    N = w.shape[1]
    Np = _round_up(N, 128)
    if M >= 16:
        TM = min(512, _round_up(pl.cdiv(M, 2), 8))
    else:
        TM = _round_up(M, 8)
    Mp = _round_up(M, TM)
    xp = jnp.pad(x.astype(jnp.bfloat16), ((0, Mp - M), (0, 0)))
    wp = jnp.pad(w, ((0, 0), (0, Np - N))).astype(jnp.bfloat16)
    bp = jnp.pad(b.astype(jnp.float32), (0, Np - N)).reshape(1, Np)
    out = pl.pallas_call(
        _mm_bias_kernel,
        out_shape=jax.ShapeDtypeStruct((Mp, Np), jnp.float32),
        grid_spec=pltpu.PrefetchScalarGridSpec(
            num_scalar_prefetch=0,
            grid=(Mp // TM,),
            in_specs=[pl.BlockSpec((TM, K), lambda i: (i, 0)),
                      pl.BlockSpec((K, Np), lambda i: (0, 0)),
                      pl.BlockSpec((1, Np), lambda i: (0, 0))],
            out_specs=pl.BlockSpec((TM, Np), lambda i: (i, 0)),
        ),
        compiler_params=pltpu.CompilerParams(dimension_semantics=("parallel",)),
    )(xp, wp, bp)
    return out[:M, :N]


def _head_kernel(seg_lens, n_feat_tokens, c_ref, xf_ref, wf_ref, wfc_ref, bfc_ref,
                 o_ref):
    """Fused head: norm1..4 (BN default stats) + 4 adaptive avg-pools over the
    level segments, the feature-branch 1x1 proj/ReLU/BN/avg-pool, and the final
    fc — all in one launch per batch element."""
    parts = []
    off = 0
    for ln in seg_lens:
        seg = c_ref[0, pl.ds(off, ln), :].astype(jnp.float32)
        parts.append(jnp.sum(seg, axis=0, keepdims=True) * (BN_SCALE / ln))
        off += ln
    # features stand-in: fused 1x1 conv + ReLU, then self.norm (BN) + avgpool
    y = jnp.dot(xf_ref[0], wf_ref[...], preferred_element_type=jnp.float32)
    y = jnp.maximum(y, 0.0)
    parts.append(jnp.sum(y, axis=0, keepdims=True) * (BN_SCALE / n_feat_tokens))

    # fc: accumulate per-part row blocks (avoids a lane concat of small pieces)
    logits = bfc_ref[...]
    row = 0
    for p in parts:
        width = p.shape[-1]
        w_rows = wfc_ref[pl.ds(row, width), :]
        logits = logits + jnp.dot(p.astype(jnp.bfloat16), w_rows,
                                  preferred_element_type=jnp.float32)
        row += width
    o_ref[0] = logits


def pallas_head(c_tokens, seg_lens, xf_tokens, w_feat, w_fc, b_fc):
    """c_tokens: (B, sum(seg_lens), EMB) f32; xf_tokens: (B, Lf, Cstem) bf16."""
    B, L, C = c_tokens.shape
    Lf = xf_tokens.shape[1]
    Kfc, Nfc = w_fc.shape
    assert Kfc == 4 * C + w_feat.shape[1]
    Np = _round_up(Nfc, 128)
    wfc = jnp.pad(w_fc, ((0, 0), (0, Np - Nfc))).astype(jnp.bfloat16)
    bfc = jnp.pad(b_fc.astype(jnp.float32), (0, Np - Nfc)).reshape(1, Np)
    wf = w_feat.astype(jnp.bfloat16)
    out = pl.pallas_call(
        partial(_head_kernel, tuple(seg_lens), Lf),
        out_shape=jax.ShapeDtypeStruct((B, 1, Np), jnp.float32),
        grid_spec=pltpu.PrefetchScalarGridSpec(
            num_scalar_prefetch=0,
            grid=(B,),
            in_specs=[pl.BlockSpec((1, L, C), lambda b: (b, 0, 0)),
                      pl.BlockSpec((1, Lf, xf_tokens.shape[2]), lambda b: (b, 0, 0)),
                      pl.BlockSpec(wf.shape, lambda b: (0, 0)),
                      pl.BlockSpec(wfc.shape, lambda b: (0, 0)),
                      pl.BlockSpec((1, Np), lambda b: (0, 0))],
            out_specs=pl.BlockSpec((1, 1, Np), lambda b: (b, 0, 0)),
        ),
        compiler_params=pltpu.CompilerParams(dimension_semantics=("parallel",)),
    )(c_tokens, xf_tokens, wf, wfc, bfc)
    return out.reshape(B, Np)[:, :Nfc]


# ================================ JAX glue ====================================
def block_avg_pool(x, factor):
    """Non-overlapping average pool (NHWC)."""
    B, H, W, C = x.shape
    return x.reshape(B, H // factor, factor, W // factor, factor, C).mean(axis=(2, 4))


# =============================== parameters ===================================
def init_params(key):
    keys = iter(jax.random.split(key, 16))

    def tn(shape, std=0.02):
        # TODO(synk): trunc_normal_(std=0.02) approximated by a plain normal.
        return (std * jax.random.normal(next(keys), shape)).astype(jnp.float32)

    p = {}
    # stem: ConvBNReLU(3->16 s2), (16->16 s1), (16->32 s1), (32->32 s2)
    cins = [3, STEM_CHS[0], STEM_CHS[1], STEM_CHS[2]]
    couts = [STEM_CHS[0], STEM_CHS[1], STEM_CHS[2], STEM_CHS[2]]
    p['stem_w'] = [tn((3, 3, ci, co)) for ci, co in zip(cins, couts)]
    # features stand-in: 1x1 conv STEM_CHS[-1] -> FEAT_C
    p['feat_w'] = tn((STEM_CHS[-1], FEAT_C))
    # SpatialPriorModule stand-in: per-level 1x1 conv 3 -> EMB
    p['spm_w'] = [tn((3, EMB)) for _ in range(4)]
    p['spm_b'] = [jnp.zeros((EMB,), jnp.float32) for _ in range(4)]
    # level_embed ~ normal_() (std 1)
    p['level_embed'] = jax.random.normal(next(keys), (3, EMB)).astype(jnp.float32)
    # up = ConvTranspose2d(EMB, EMB, 2, 2); stored (cin, kh, kw, cout)
    p['up_w'] = tn((EMB, 2, 2, EMB))
    p['up_b'] = jnp.zeros((EMB,), jnp.float32)
    # fc: Linear(4*EMB + FEAT_C -> NUM_CLASSES)
    p['fc_w'] = tn((4 * EMB + FEAT_C, NUM_CLASSES))
    p['fc_b'] = jnp.zeros((NUM_CLASSES,), jnp.float32)
    return p


# ================================ forward =====================================
def forward(params, x_nchw):
    x_in = jnp.transpose(x_nchw, (0, 2, 3, 1)).astype(jnp.float32)   # NCHW -> NHWC
    B, H, W, _ = x_in.shape
    assert H % 32 == 0 and W % 32 == 0

    # ----- stem: 4x ConvBNReLU(3x3), fully fused (one Pallas launch) -----
    x_stem = fused_stem(x_in, params['stem_w'])              # (B, H/4, W/4, 32) bf16

    # ----- features stack (ECB/LTB) + self.norm + avgpool + flatten -----
    # TODO(synk): ECB/LTB not defined in the provided source; approximated by the
    # net stride /8 plus a fused 1x1 conv-BN-ReLU projection; the projection,
    # self.norm, the global pool and the classifier are fused into pallas_head.
    xf = block_avg_pool(x_stem.astype(jnp.float32), 8)       # (B, H/32, W/32, 32)
    xf_tokens = xf.reshape(B, -1, STEM_CHS[-1]).astype(jnp.bfloat16)

    # ----- SpatialPriorModule stand-in: progressive pooling + per-level 1x1
    #       projections.  K=3 is flop-trivial and lane-sparse -> left to XLA. -----
    Hp, Wp = H // 16, W // 16
    p4 = block_avg_pool(x_in, 4)
    p8 = block_avg_pool(p4, 2)
    p16 = block_avg_pool(p8, 2)
    p32 = block_avg_pool(p16, 2)

    def spm_proj(p, w, b):
        t = p.reshape(B, -1, 3)
        return jnp.maximum(jnp.einsum('blk,ke->ble', t, w) + b, 0.0)

    c1 = spm_proj(p4, params['spm_w'][0], params['spm_b'][0])    # (B, 16*Hp*Wp, EMB)
    c2 = spm_proj(p8, params['spm_w'][1], params['spm_b'][1])    # (B, 4*Hp*Wp, EMB)
    c3 = spm_proj(p16, params['spm_w'][2], params['spm_b'][2])   # (B, Hp*Wp, EMB)
    c4 = spm_proj(p32, params['spm_w'][3], params['spm_b'][3])   # (B, Hp*Wp/4, EMB)

    # _add_level_embed (tiny broadcast -> plain JAX glue)
    c2 = c2 + params['level_embed'][0]
    c3 = c3 + params['level_embed'][1]
    c4 = c4 + params['level_embed'][2]

    # TODO(synk): patch_embed / pos_embed / InteractionBlock stack is empty in the
    # source (`range(len([]))`), so `outs` is empty and add_vit_feature is skipped.

    # c1 = self.up(c2) + c1 : ConvTranspose2d(EMB,EMB,2,2) as one lane-dense
    # N=4*EMB=128 Pallas matmul, reassembled with cheap wrapper reshapes.
    n1, n2, n3, n4 = c1.shape[1], c2.shape[1], c3.shape[1], c4.shape[1]
    w_up = params['up_w'].reshape(EMB, 4 * EMB)                   # cols = (kh, kw, c)
    b_up = jnp.tile(params['up_b'], 4)
    upf = pallas_matmul_bias(c2.reshape(-1, EMB), w_up, b_up)     # (B*n2, 4*EMB) f32
    upf = upf.reshape(B, 2 * Hp, 2 * Wp, 2, 2, EMB)
    up_img = upf.transpose(0, 1, 3, 2, 4, 5).reshape(B, 4 * Hp, 4 * Wp, EMB)
    c1 = (c1.reshape(B, 4 * Hp, 4 * Wp, EMB) + up_img).reshape(B, n1, EMB)

    # ----- norm1..4 + adaptive pools + feature branch + fc : one fused kernel -----
    c_tokens = jnp.concatenate([c1, c2, c3, c4], axis=1)          # (B, n1+..+n4, EMB)
    logits = pallas_head(c_tokens, (n1, n2, n3, n4), xf_tokens,
                         params['feat_w'] * BN_SCALE,             # inner BN folded
                         params['fc_w'], params['fc_b'])
    return logits                                                  # (B, NUM_CLASSES)


# ================================== main ======================================
if __name__ == "__main__":
    key = jax.random.PRNGKey(0)
    k_par, k_in = jax.random.split(key)
    params = init_params(k_par)
    # NCHW input like the PyTorch module (3 channels, spatial divisible by 32)
    x = jax.random.normal(k_in, (2, 3, 64, 64), dtype=jnp.float32)
    out = jax.jit(forward)(params, x)
    out = jax.block_until_ready(out)
    assert out.shape == (2, NUM_CLASSES)
    print("KERNEL_OK")
</pallas_src>

<mosaic_0001>
module attributes {stable_mosaic.version = 11 : i64} {
  func.func @_stem_kernel(%arg0: i32, %arg1: memref<1x4x33x33x3xbf16, #tpu.memory_space<vmem>>, %arg2: memref<9x3x16xbf16, #tpu.memory_space<vmem>>, %arg3: memref<9x16x16xbf16, #tpu.memory_space<vmem>>, %arg4: memref<9x16x32xbf16, #tpu.memory_space<vmem>>, %arg5: memref<9x32x32xbf16, #tpu.memory_space<vmem>>, %arg6: memref<1x32x32x32xbf16, #tpu.memory_space<vmem>>, %arg7: memref<34x34x16xbf16, #tpu.memory_space<vmem>>, %arg8: memref<34x34x16xbf16, #tpu.memory_space<vmem>>, %arg9: memref<34x34x32xbf16, #tpu.memory_space<vmem>>) attributes {dimension_semantics = [#tpu.dimension_semantics<parallel>], iteration_bounds = array<i64: 2>, scalar_prefetch = 0 : i64, scratch_operands = 3 : i64, tpu.core_type = #tpu.core_type<tc>, window_params = [{transform_indices = @transform_0, window_bounds = array<i64: 1, 4, 33, 33, 3>}, {pipeline_mode = #tpu.pipeline_mode<synchronous>, transform_indices = @transform_1, window_bounds = array<i64: 9, 3, 16>}, {pipeline_mode = #tpu.pipeline_mode<synchronous>, transform_indices = @transform_2, window_bounds = array<i64: 9, 16, 16>}, {pipeline_mode = #tpu.pipeline_mode<synchronous>, transform_indices = @transform_3, window_bounds = array<i64: 9, 16, 32>}, {pipeline_mode = #tpu.pipeline_mode<synchronous>, transform_indices = @transform_4, window_bounds = array<i64: 9, 32, 32>}, {transform_indices = @transform_5, window_bounds = array<i64: 1, 32, 32, 32>}]} {
    %cst = arith.constant 0.000000e+00 : bf16
    %0 = vector.broadcast %cst : bf16 to vector<34x34x16xbf16>
    %c0 = arith.constant 0 : index
    %c0_0 = arith.constant 0 : index
    %c0_1 = arith.constant 0 : index
    %1 = vector.load %arg7[%c0, %c0_0, %c0_1] : memref<34x34x16xbf16, #tpu.memory_space<vmem>>, vector<34x34x16xbf16>
    tpu.vector_store %arg7[%c0, %c0_0, %c0_1], %0 {strides = array<i32>} : memref<34x34x16xbf16, #tpu.memory_space<vmem>>, vector<34x34x16xbf16>,
    %cst_2 = arith.constant 0.000000e+00 : bf16
    %2 = vector.broadcast %cst_2 : bf16 to vector<34x34x16xbf16>
    %c0_3 = arith.constant 0 : index
    %c0_4 = arith.constant 0 : index
    %c0_5 = arith.constant 0 : index
    %3 = vector.load %arg8[%c0_3, %c0_4, %c0_5] : memref<34x34x16xbf16, #tpu.memory_space<vmem>>, vector<34x34x16xbf16>
    tpu.vector_store %arg8[%c0_3, %c0_4, %c0_5], %2 {strides = array<i32>} : memref<34x34x16xbf16, #tpu.memory_space<vmem>>, vector<34x34x16xbf16>,
    %cst_6 = arith.constant 0.000000e+00 : bf16
    %4 = vector.broadcast %cst_6 : bf16 to vector<34x34x32xbf16>
    %c0_7 = arith.constant 0 : index
    %c0_8 = arith.constant 0 : index
    %c0_9 = arith.constant 0 : index
    %5 = vector.load %arg9[%c0_7, %c0_8, %c0_9] : memref<34x34x32xbf16, #tpu.memory_space<vmem>>, vector<34x34x32xbf16>
    tpu.vector_store %arg9[%c0_7, %c0_8, %c0_9], %4 {strides = array<i32>} : memref<34x34x32xbf16, #tpu.memory_space<vmem>>, vector<34x34x32xbf16>,
    %c0_i32 = arith.constant 0 : i32
    %c8_i32 = arith.constant 8 : i32
    %6 = arith.addi %c0_i32, %c8_i32 : i32
    %c1_i32 = arith.constant 1 : i32
    scf.for %arg10 = %c0_i32 to %6 step %c1_i32  : i32 {
      %c4_i32 = arith.constant 4 : i32
      %10 = arith.muli %arg10, %c4_i32 : i32
      %11 = tpu.assume_multiple %10, 4 : i32
      %cst_23 = arith.constant 0.000000e+00 : f32
      %12 = vector.broadcast %cst_23 : f32 to vector<128x16xf32>
      %c0_i32_24 = arith.constant 0 : i32
      %13 = arith.addi %11, %c0_i32_24 : i32
      %c0_25 = arith.constant 0 : index
      %c0_26 = arith.constant 0 : index
      %14 = arith.index_cast %13 : i32 to index
      %c0_27 = arith.constant 0 : index
      %c0_28 = arith.constant 0 : index
      %15 = vector.load %arg1[%c0_25, %c0_26, %14, %c0_27, %c0_28] : memref<1x4x33x33x3xbf16, #tpu.memory_space<vmem>>, vector<1x1x4x32x3xbf16>
      %16 = vector.shape_cast %15 : vector<1x1x4x32x3xbf16> to vector<4x32x3xbf16>
      %17 = vector.shape_cast %16 : vector<4x32x3xbf16> to vector<128x3xbf16>
      %c0_29 = arith.constant 0 : index
      %c0_30 = arith.constant 0 : index
      %c0_31 = arith.constant 0 : index
      %18 = vector.load %arg2[%c0_29, %c0_30, %c0_31] : memref<9x3x16xbf16, #tpu.memory_space<vmem>>, vector<1x3x16xbf16>
      %19 = vector.shape_cast %18 : vector<1x3x16xbf16> to vector<3x16xbf16>
      %cst_32 = arith.constant dense<0.000000e+00> : vector<128x16xf32>
      %20 = tpu.matmul %17, %19, %cst_32 {dimension_numbers = #tpu.dot_dimension_numbers<[1], [0], [0], [1], [0, 0, 1, 1], [], []>} : vector<128x3xbf16>, vector<3x16xbf16>, vector<128x16xf32> -> vector<128x16xf32>
      %21 = arith.addf %12, %20 : vector<128x16xf32>
      %c0_i32_33 = arith.constant 0 : i32
      %22 = arith.addi %11, %c0_i32_33 : i32
      %c0_34 = arith.constant 0 : index
      %c1 = arith.constant 1 : index
      %23 = arith.index_cast %22 : i32 to index
      %c0_35 = arith.constant 0 : index
      %c0_36 = arith.constant 0 : index
      %24 = vector.load %arg1[%c0_34, %c1, %23, %c0_35, %c0_36] : memref<1x4x33x33x3xbf16, #tpu.memory_space<vmem>>, vector<1x1x4x32x3xbf16>
      %25 = vector.shape_cast %24 : vector<1x1x4x32x3xbf16> to vector<4x32x3xbf16>
      %26 = vector.shape_cast %25 : vector<4x32x3xbf16> to vector<128x3xbf16>
      %c1_37 = arith.constant 1 : index
      %c0_38 = arith.constant 0 : index
      %c0_39 = arith.constant 0 : index
      %27 = vector.load %arg2[%c1_37, %c0_38, %c0_39] : memref<9x3x16xbf16, #tpu.memory_space<vmem>>, vector<1x3x16xbf16>
      %28 = vector.shape_cast %27 : vector<1x3x16xbf16> to vector<3x16xbf16>
      %cst_40 = arith.constant dense<0.000000e+00> : vector<128x16xf32>
      %29 = tpu.matmul %26, %28, %cst_40 {dimension_numbers = #tpu.dot_dimension_numbers<[1], [0], [0], [1], [0, 0, 1, 1], [], []>} : vector<128x3xbf16>, vector<3x16xbf16>, vector<128x16xf32> -> vector<128x16xf32>
      %30 = arith.addf %21, %29 : vector<128x16xf32>
      %c0_i32_41 = arith.constant 0 : i32
      %31 = arith.addi %11, %c0_i32_41 : i32
      %c0_42 = arith.constant 0 : index
      %c0_43 = arith.constant 0 : index
      %32 = arith.index_cast %31 : i32 to index
      %c1_44 = arith.constant 1 : index
      %c0_45 = arith.constant 0 : index
      %33 = vector.load %arg1[%c0_42, %c0_43, %32, %c1_44, %c0_45] : memref<1x4x33x33x3xbf16, #tpu.memory_space<vmem>>, vector<1x1x4x32x3xbf16>
      %34 = vector.shape_cast %33 : vector<1x1x4x32x3xbf16> to vector<4x32x3xbf16>
      %35 = vector.shape_cast %34 : vector<4x32x3xbf16> to vector<128x3xbf16>
      %c2 = arith.constant 2 : index
      %c0_46 = arith.constant 0 : index
      %c0_47 = arith.constant 0 : index
      %36 = vector.load %arg2[%c2, %c0_46, %c0_47] : memref<9x3x16xbf16, #tpu.memory_space<vmem>>, vector<1x3x16xbf16>
      %37 = vector.shape_cast %36 : vector<1x3x16xbf16> to vector<3x16xbf16>
      %cst_48 = arith.constant dense<0.000000e+00> : vector<128x16xf32>
      %38 = tpu.matmul %35, %37, %cst_48 {dimension_numbers = #tpu.dot_dimension_numbers<[1], [0], [0], [1], [0, 0, 1, 1], [], []>} : vector<128x3xbf16>, vector<3x16xbf16>, vector<128x16xf32> -> vector<128x16xf32>
      %39 = arith.addf %30, %38 : vector<128x16xf32>
      %c0_i32_49 = arith.constant 0 : i32
      %40 = arith.addi %11, %c0_i32_49 : i32
      %c0_50 = arith.constant 0 : index
      %c2_51 = arith.constant 2 : index
      %41 = arith.index_cast %40 : i32 to index
      %c0_52 = arith.constant 0 : index
      %c0_53 = arith.constant 0 : index
      %42 = vector.load %arg1[%c0_50, %c2_51, %41, %c0_52, %c0_53] : memref<1x4x33x33x3xbf16, #tpu.memory_space<vmem>>, vector<1x1x4x32x3xbf16>
      %43 = vector.shape_cast %42 : vector<1x1x4x32x3xbf16> to vector<4x32x3xbf16>
      %44 = vector.shape_cast %43 : vector<4x32x3xbf16> to vector<128x3xbf16>
      %c3 = arith.constant 3 : index
      %c0_54 = arith.constant 0 : index
      %c0_55 = arith.constant 0 : index
      %45 = vector.load %arg2[%c3, %c0_54, %c0_55] : memref<9x3x16xbf16, #tpu.memory_space<vmem>>, vector<1x3x16xbf16>
      %46 = vector.shape_cast %45 : vector<1x3x16xbf16> to vector<3x16xbf16>
      %cst_56 = arith.constant dense<0.000000e+00> : vector<128x16xf32>
      %47 = tpu.matmul %44, %46, %cst_56 {dimension_numbers = #tpu.dot_dimension_numbers<[1], [0], [0], [1], [0, 0, 1, 1], [], []>} : vector<128x3xbf16>, vector<3x16xbf16>, vector<128x16xf32> -> vector<128x16xf32>
      %48 = arith.addf %39, %47 : vector<128x16xf32>
      %c0_i32_57 = arith.constant 0 : i32
      %49 = arith.addi %11, %c0_i32_57 : i32
      %c0_58 = arith.constant 0 : index
      %c3_59 = arith.constant 3 : index
      %50 = arith.index_cast %49 : i32 to index
      %c0_60 = arith.constant 0 : index
      %c0_61 = arith.constant 0 : index
      %51 = vector.load %arg1[%c0_58, %c3_59, %50, %c0_60, %c0_61] : memref<1x4x33x33x3xbf16, #tpu.memory_space<vmem>>, vector<1x1x4x32x3xbf16>
      %52 = vector.shape_cast %51 : vector<1x1x4x32x3xbf16> to vector<4x32x3xbf16>
      %53 = vector.shape_cast %52 : vector<4x32x3xbf16> to vector<128x3xbf16>
      %c4 = arith.constant 4 : index
      %c0_62 = arith.constant 0 : index
      %c0_63 = arith.constant 0 : index
      %54 = vector.load %arg2[%c4, %c0_62, %c0_63] : memref<9x3x16xbf16, #tpu.memory_space<vmem>>, vector<1x3x16xbf16>
      %55 = vector.shape_cast %54 : vector<1x3x16xbf16> to vector<3x16xbf16>
      %cst_64 = arith.constant dense<0.000000e+00> : vector<128x16xf32>
      %56 = tpu.matmul %53, %55, %cst_64 {dimension_numbers = #tpu.dot_dimension_numbers<[1], [0], [0], [1], [0, 0, 1, 1], [], []>} : vector<128x3xbf16>, vector<3x16xbf16>, vector<128x16xf32> -> vector<128x16xf32>
      %57 = arith.addf %48, %56 : vector<128x16xf32>
      %c0_i32_65 = arith.constant 0 : i32
      %58 = arith.addi %11, %c0_i32_65 : i32
      %c0_66 = arith.constant 0 : index
      %c2_67 = arith.constant 2 : index
      %59 = arith.index_cast %58 : i32 to index
      %c1_68 = arith.constant 1 : index
      %c0_69 = arith.constant 0 : index
      %60 = vector.load %arg1[%c0_66, %c2_67, %59, %c1_68, %c0_69] : memref<1x4x33x33x3xbf16, #tpu.memory_space<vmem>>, vector<1x1x4x32x3xbf16>
      %61 = vector.shape_cast %60 : vector<1x1x4x32x3xbf16> to vector<4x32x3xbf16>
      %62 = vector.shape_cast %61 : vector<4x32x3xbf16> to vector<128x3xbf16>
      %c5 = arith.constant 5 : index
      %c0_70 = arith.constant 0 : index
      %c0_71 = arith.constant 0 : index
      %63 = vector.load %arg2[%c5, %c0_70, %c0_71] : memref<9x3x16xbf16, #tpu.memory_space<vmem>>, vector<1x3x16xbf16>
      %64 = vector.shape_cast %63 : vector<1x3x16xbf16> to vector<3x16xbf16>
      %cst_72 = arith.constant dense<0.000000e+00> : vector<128x16xf32>
      %65 = tpu.matmul %62, %64, %cst_72 {dimension_numbers = #tpu.dot_dimension_numbers<[1], [0], [0], [1], [0, 0, 1, 1], [], []>} : vector<128x3xbf16>, vector<3x16xbf16>, vector<128x16xf32> -> vector<128x16xf32>
      %66 = arith.addf %57, %65 : vector<128x16xf32>
      %c1_i32_73 = arith.constant 1 : i32
      %67 = arith.addi %11, %c1_i32_73 : i32
      %c0_74 = arith.constant 0 : index
      %c0_75 = arith.constant 0 : index
      %68 = arith.index_cast %67 : i32 to index
      %c0_76 = arith.constant 0 : index
      %c0_77 = arith.constant 0 : index
      %69 = vector.load %arg1[%c0_74, %c0_75, %68, %c0_76, %c0_77] : memref<1x4x33x33x3xbf16, #tpu.memory_space<vmem>>, vector<1x1x4x32x3xbf16>
      %70 = vector.shape_cast %69 : vector<1x1x4x32x3xbf16> to vector<4x32x3xbf16>
      %71 = vector.shape_cast %70 : vector<4x32x3xbf16> to vector<128x3xbf16>
      %c6 = arith.constant 6 : index
      %c0_78 = arith.constant 0 : index
      %c0_79 = arith.constant 0 : index
      %72 = vector.load %arg2[%c6, %c0_78, %c0_79] : memref<9x3x16xbf16, #tpu.memory_space<vmem>>, vector<1x3x16xbf16>
      %73 = vector.shape_cast %72 : vector<1x3x16xbf16> to vector<3x16xbf16>
      %cst_80 = arith.constant dense<0.000000e+00> : vector<128x16xf32>
      %74 = tpu.matmul %71, %73, %cst_80 {dimension_numbers = #tpu.dot_dimension_numbers<[1], [0], [0], [1], [0, 0, 1, 1], [], []>} : vector<128x3xbf16>, vector<3x16xbf16>, vector<128x16xf32> -> vector<128x16xf32>
      %75 = arith.addf %66, %74 : vector<128x16xf32>
      %c1_i32_81 = arith.constant 1 : i32
      %76 = arith.addi %11, %c1_i32_81 : i32
      %c0_82 = arith.constant 0 : index
      %c1_83 = arith.constant 1 : index
      %77 = arith.index_cast %76 : i32 to index
      %c0_84 = arith.constant 0 : index
      %c0_85 = arith.constant 0 : index
      %78 = vector.load %arg1[%c0_82, %c1_83, %77, %c0_84, %c0_85] : memref<1x4x33x33x3xbf16, #tpu.memory_space<vmem>>, vector<1x1x4x32x3xbf16>
      %79 = vector.shape_cast %78 : vector<1x1x4x32x3xbf16> to vector<4x32x3xbf16>
      %80 = vector.shape_cast %79 : vector<4x32x3xbf16> to vector<128x3xbf16>
      %c7 = arith.constant 7 : index
      %c0_86 = arith.constant 0 : index
      %c0_87 = arith.constant 0 : index
      %81 = vector.load %arg2[%c7, %c0_86, %c0_87] : memref<9x3x16xbf16, #tpu.memory_space<vmem>>, vector<1x3x16xbf16>
      %82 = vector.shape_cast %81 : vector<1x3x16xbf16> to vector<3x16xbf16>
      %cst_88 = arith.constant dense<0.000000e+00> : vector<128x16xf32>
      %83 = tpu.matmul %80, %82, %cst_88 {dimension_numbers = #tpu.dot_dimension_numbers<[1], [0], [0], [1], [0, 0, 1, 1], [], []>} : vector<128x3xbf16>, vector<3x16xbf16>, vector<128x16xf32> -> vector<128x16xf32>
      %84 = arith.addf %75, %83 : vector<128x16xf32>
      %c1_i32_89 = arith.constant 1 : i32
      %85 = arith.addi %11, %c1_i32_89 : i32
      %c0_90 = arith.constant 0 : index
      %c0_91 = arith.constant 0 : index
      %86 = arith.index_cast %85 : i32 to index
      %c1_92 = arith.constant 1 : index
      %c0_93 = arith.constant 0 : index
      %87 = vector.load %arg1[%c0_90, %c0_91, %86, %c1_92, %c0_93] : memref<1x4x33x33x3xbf16, #tpu.memory_space<vmem>>, vector<1x1x4x32x3xbf16>
      %88 = vector.shape_cast %87 : vector<1x1x4x32x3xbf16> to vector<4x32x3xbf16>
      %89 = vector.shape_cast %88 : vector<4x32x3xbf16> to vector<128x3xbf16>
      %c8 = arith.constant 8 : index
      %c0_94 = arith.constant 0 : index
      %c0_95 = arith.constant 0 : index
      %90 = vector.load %arg2[%c8, %c0_94, %c0_95] : memref<9x3x16xbf16, #tpu.memory_space<vmem>>, vector<1x3x16xbf16>
      %91 = vector.shape_cast %90 : vector<1x3x16xbf16> to vector<3x16xbf16>
      %cst_96 = arith.constant dense<0.000000e+00> : vector<128x16xf32>
      %92 = tpu.matmul %89, %91, %cst_96 {dimension_numbers = #tpu.dot_dimension_numbers<[1], [0], [0], [1], [0, 0, 1, 1], [], []>} : vector<128x3xbf16>, vector<3x16xbf16>, vector<128x16xf32> -> vector<128x16xf32>
      %93 = arith.addf %84, %92 : vector<128x16xf32>
      %cst_97 = arith.constant 0.000000e+00 : f32
      %94 = vector.broadcast %cst_97 : f32 to vector<128x16xf32>
      %95 = arith.maximumf %93, %94 : vector<128x16xf32>
      %96 = arith.truncf %95 : vector<128x16xf32> to vector<128x16xbf16>
      %97 = vector.shape_cast %96 : vector<128x16xbf16> to vector<4x32x16xbf16>
      %c1_i32_98 = arith.constant 1 : i32
      %98 = arith.addi %c1_i32_98, %11 : i32
      %99 = arith.index_cast %98 : i32 to index
      %c1_99 = arith.constant 1 : index
      %c0_100 = arith.constant 0 : index
      %100 = vector.load %arg7[%99, %c1_99, %c0_100] : memref<34x34x16xbf16, #tpu.memory_space<vmem>>, vector<4x32x16xbf16>
      tpu.vector_store %arg7[%99, %c1_99, %c0_100], %97 {strides = array<i32>} : memref<34x34x16xbf16, #tpu.memory_space<vmem>>, vector<4x32x16xbf16>,
    }
    %c8_i32_10 = arith.constant 8 : i32
    %c0_i32_11 = arith.constant 0 : i32
    %c8_i32_12 = arith.constant 8 : i32
    %7 = arith.addi %c0_i32_11, %c8_i32_12 : i32
    %c1_i32_13 = arith.constant 1 : i32
    scf.for %arg10 = %c0_i32_11 to %7 step %c1_i32_13  : i32 {
      %c4_i32 = arith.constant 4 : i32
      %10 = arith.muli %arg10, %c4_i32 : i32
      %11 = tpu.assume_multiple %10, 4 : i32
      %cst_23 = arith.constant 0.000000e+00 : f32
      %12 = vector.broadcast %cst_23 : f32 to vector<128x16xf32>
      %c0_i32_24 = arith.constant 0 : i32
      %13 = arith.addi %11, %c0_i32_24 : i32
      %14 = arith.index_cast %13 : i32 to index
      %c0_25 = arith.constant 0 : index
      %c0_26 = arith.constant 0 : index
      %15 = vector.load %arg7[%14, %c0_25, %c0_26] : memref<34x34x16xbf16, #tpu.memory_space<vmem>>, vector<4x32x16xbf16>
      %16 = vector.shape_cast %15 : vector<4x32x16xbf16> to vector<128x16xbf16>
      %c0_27 = arith.constant 0 : index
      %c0_28 = arith.constant 0 : index
      %c0_29 = arith.constant 0 : index
      %17 = vector.load %arg3[%c0_27, %c0_28, %c0_29] : memref<9x16x16xbf16, #tpu.memory_space<vmem>>, vector<1x16x16xbf16>
      %18 = vector.shape_cast %17 : vector<1x16x16xbf16> to vector<16x16xbf16>
      %cst_30 = arith.constant dense<0.000000e+00> : vector<128x16xf32>
      %19 = tpu.matmul %16, %18, %cst_30 {dimension_numbers = #tpu.dot_dimension_numbers<[1], [0], [0], [1], [0, 0, 1, 1], [], []>} : vector<128x16xbf16>, vector<16x16xbf16>, vector<128x16xf32> -> vector<128x16xf32>
      %20 = arith.addf %12, %19 : vector<128x16xf32>
      %c0_i32_31 = arith.constant 0 : i32
      %21 = arith.addi %11, %c0_i32_31 : i32
      %22 = arith.index_cast %21 : i32 to index
      %c1 = arith.constant 1 : index
      %c0_32 = arith.constant 0 : index
      %23 = vector.load %arg7[%22, %c1, %c0_32] : memref<34x34x16xbf16, #tpu.memory_space<vmem>>, vector<4x32x16xbf16>
      %24 = vector.shape_cast %23 : vector<4x32x16xbf16> to vector<128x16xbf16>
      %c1_33 = arith.constant 1 : index
      %c0_34 = arith.constant 0 : index
      %c0_35 = arith.constant 0 : index
      %25 = vector.load %arg3[%c1_33, %c0_34, %c0_35] : memref<9x16x16xbf16, #tpu.memory_space<vmem>>, vector<1x16x16xbf16>
      %26 = vector.shape_cast %25 : vector<1x16x16xbf16> to vector<16x16xbf16>
      %cst_36 = arith.constant dense<0.000000e+00> : vector<128x16xf32>
      %27 = tpu.matmul %24, %26, %cst_36 {dimension_numbers = #tpu.dot_dimension_numbers<[1], [0], [0], [1], [0, 0, 1, 1], [], []>} : vector<128x16xbf16>, vector<16x16xbf16>, vector<128x16xf32> -> vector<128x16xf32>
      %28 = arith.addf %20, %27 : vector<128x16xf32>
      %c0_i32_37 = arith.constant 0 : i32
      %29 = arith.addi %11, %c0_i32_37 : i32
      %30 = arith.index_cast %29 : i32 to index
      %c2 = arith.constant 2 : index
      %c0_38 = arith.constant 0 : index
      %31 = vector.load %arg7[%30, %c2, %c0_38] : memref<34x34x16xbf16, #tpu.memory_space<vmem>>, vector<4x32x16xbf16>
      %32 = vector.shape_cast %31 : vector<4x32x16xbf16> to vector<128x16xbf16>
      %c2_39 = arith.constant 2 : index
      %c0_40 = arith.constant 0 : index
      %c0_41 = arith.constant 0 : index
      %33 = vector.load %arg3[%c2_39, %c0_40, %c0_41] : memref<9x16x16xbf16, #tpu.memory_space<vmem>>, vector<1x16x16xbf16>
      %34 = vector.shape_cast %33 : vector<1x16x16xbf16> to vector<16x16xbf16>
      %cst_42 = arith.constant dense<0.000000e+00> : vector<128x16xf32>
      %35 = tpu.matmul %32, %34, %cst_42 {dimension_numbers = #tpu.dot_dimension_numbers<[1], [0], [0], [1], [0, 0, 1, 1], [], []>} : vector<128x16xbf16>, vector<16x16xbf16>, vector<128x16xf32> -> vector<128x16xf32>
      %36 = arith.addf %28, %35 : vector<128x16xf32>
      %c1_i32_43 = arith.constant 1 : i32
      %37 = arith.addi %11, %c1_i32_43 : i32
      %38 = arith.index_cast %37 : i32 to index
      %c0_44 = arith.constant 0 : index
      %c0_45 = arith.constant 0 : index
      %39 = vector.load %arg7[%38, %c0_44, %c0_45] : memref<34x34x16xbf16, #tpu.memory_space<vmem>>, vector<4x32x16xbf16>
      %40 = vector.shape_cast %39 : vector<4x32x16xbf16> to vector<128x16xbf16>
      %c3 = arith.constant 3 : index
      %c0_46 = arith.constant 0 : index
      %c0_47 = arith.constant 0 : index
      %41 = vector.load %arg3[%c3, %c0_46, %c0_47] : memref<9x16x16xbf16, #tpu.memory_space<vmem>>, vector<1x16x16xbf16>
      %42 = vector.shape_cast %41 : vector<1x16x16xbf16> to vector<16x16xbf16>
      %cst_48 = arith.constant dense<0.000000e+00> : vector<128x16xf32>
      %43 = tpu.matmul %40, %42, %cst_48 {dimension_numbers = #tpu.dot_dimension_numbers<[1], [0], [0], [1], [0, 0, 1, 1], [], []>} : vector<128x16xbf16>, vector<16x16xbf16>, vector<128x16xf32> -> vector<128x16xf32>
      %44 = arith.addf %36, %43 : vector<128x16xf32>
      %c1_i32_49 = arith.constant 1 : i32
      %45 = arith.addi %11, %c1_i32_49 : i32
      %46 = arith.index_cast %45 : i32 to index
      %c1_50 = arith.constant 1 : index
      %c0_51 = arith.constant 0 : index
      %47 = vector.load %arg7[%46, %c1_50, %c0_51] : memref<34x34x16xbf16, #tpu.memory_space<vmem>>, vector<4x32x16xbf16>
      %48 = vector.shape_cast %47 : vector<4x32x16xbf16> to vector<128x16xbf16>
      %c4 = arith.constant 4 : index
      %c0_52 = arith.constant 0 : index
      %c0_53 = arith.constant 0 : index
      %49 = vector.load %arg3[%c4, %c0_52, %c0_53] : memref<9x16x16xbf16, #tpu.memory_space<vmem>>, vector<1x16x16xbf16>
      %50 = vector.shape_cast %49 : vector<1x16x16xbf16> to vector<16x16xbf16>
      %cst_54 = arith.constant dense<0.000000e+00> : vector<128x16xf32>
      %51 = tpu.matmul %48, %50, %cst_54 {dimension_numbers = #tpu.dot_dimension_numbers<[1], [0], [0], [1], [0, 0, 1, 1], [], []>} : vector<128x16xbf16>, vector<16x16xbf16>, vector<128x16xf32> -> vector<128x16xf32>
      %52 = arith.addf %44, %51 : vector<128x16xf32>
      %c1_i32_55 = arith.constant 1 : i32
      %53 = arith.addi %11, %c1_i32_55 : i32
      %54 = arith.index_cast %53 : i32 to index
      %c2_56 = arith.constant 2 : index
      %c0_57 = arith.constant 0 : index
      %55 = vector.load %arg7[%54, %c2_56, %c0_57] : memref<34x34x16xbf16, #tpu.memory_space<vmem>>, vector<4x32x16xbf16>
      %56 = vector.shape_cast %55 : vector<4x32x16xbf16> to vector<128x16xbf16>
      %c5 = arith.constant 5 : index
      %c0_58 = arith.constant 0 : index
      %c0_59 = arith.constant 0 : index
      %57 = vector.load %arg3[%c5, %c0_58, %c0_59] : memref<9x16x16xbf16, #tpu.memory_space<vmem>>, vector<1x16x16xbf16>
      %58 = vector.shape_cast %57 : vector<1x16x16xbf16> to vector<16x16xbf16>
      %cst_60 = arith.constant dense<0.000000e+00> : vector<128x16xf32>
      %59 = tpu.matmul %56, %58, %cst_60 {dimension_numbers = #tpu.dot_dimension_numbers<[1], [0], [0], [1], [0, 0, 1, 1], [], []>} : vector<128x16xbf16>, vector<16x16xbf16>, vector<128x16xf32> -> vector<128x16xf32>
      %60 = arith.addf %52, %59 : vector<128x16xf32>
      %c2_i32 = arith.constant 2 : i32
      %61 = arith.addi %11, %c2_i32 : i32
      %62 = arith.index_cast %61 : i32 to index
      %c0_61 = arith.constant 0 : index
      %c0_62 = arith.constant 0 : index
      %63 = vector.load %arg7[%62, %c0_61, %c0_62] : memref<34x34x16xbf16, #tpu.memory_space<vmem>>, vector<4x32x16xbf16>
      %64 = vector.shape_cast %63 : vector<4x32x16xbf16> to vector<128x16xbf16>
      %c6 = arith.constant 6 : index
      %c0_63 = arith.constant 0 : index
      %c0_64 = arith.constant 0 : index
      %65 = vector.load %arg3[%c6, %c0_63, %c0_64] : memref<9x16x16xbf16, #tpu.memory_space<vmem>>, vector<1x16x16xbf16>
      %66 = vector.shape_cast %65 : vector<1x16x16xbf16> to vector<16x16xbf16>
      %cst_65 = arith.constant dense<0.000000e+00> : vector<128x16xf32>
      %67 = tpu.matmul %64, %66, %cst_65 {dimension_numbers = #tpu.dot_dimension_numbers<[1], [0], [0], [1], [0, 0, 1, 1], [], []>} : vector<128x16xbf16>, vector<16x16xbf16>, vector<128x16xf32> -> vector<128x16xf32>
      %68 = arith.addf %60, %67 : vector<128x16xf32>
      %c2_i32_66 = arith.constant 2 : i32
      %69 = arith.addi %11, %c2_i32_66 : i32
      %70 = arith.index_cast %69 : i32 to index
      %c1_67 = arith.constant 1 : index
      %c0_68 = arith.constant 0 : index
      %71 = vector.load %arg7[%70, %c1_67, %c0_68] : memref<34x34x16xbf16, #tpu.memory_space<vmem>>, vector<4x32x16xbf16>
      %72 = vector.shape_cast %71 : vector<4x32x16xbf16> to vector<128x16xbf16>
      %c7 = arith.constant 7 : index
      %c0_69 = arith.constant 0 : index
      %c0_70 = arith.constant 0 : index
      %73 = vector.load %arg3[%c7, %c0_69, %c0_70] : memref<9x16x16xbf16, #tpu.memory_space<vmem>>, vector<1x16x16xbf16>
      %74 = vector.shape_cast %73 : vector<1x16x16xbf16> to vector<16x16xbf16>
      %cst_71 = arith.constant dense<0.000000e+00> : vector<128x16xf32>
      %75 = tpu.matmul %72, %74, %cst_71 {dimension_numbers = #tpu.dot_dimension_numbers<[1], [0], [0], [1], [0, 0, 1, 1], [], []>} : vector<128x16xbf16>, vector<16x16xbf16>, vector<128x16xf32> -> vector<128x16xf32>
      %76 = arith.addf %68, %75 : vector<128x16xf32>
      %c2_i32_72 = arith.constant 2 : i32
      %77 = arith.addi %11, %c2_i32_72 : i32
      %78 = arith.index_cast %77 : i32 to index
      %c2_73 = arith.constant 2 : index
      %c0_74 = arith.constant 0 : index
      %79 = vector.load %arg7[%78, %c2_73, %c0_74] : memref<34x34x16xbf16, #tpu.memory_space<vmem>>, vector<4x32x16xbf16>
      %80 = vector.shape_cast %79 : vector<4x32x16xbf16> to vector<128x16xbf16>
      %c8 = arith.constant 8 : index
      %c0_75 = arith.constant 0 : index
      %c0_76 = arith.constant 0 : index
      %81 = vector.load %arg3[%c8, %c0_75, %c0_76] : memref<9x16x16xbf16, #tpu.memory_space<vmem>>, vector<1x16x16xbf16>
      %82 = vector.shape_cast %81 : vector<1x16x16xbf16> to vector<16x16xbf16>
      %cst_77 = arith.constant dense<0.000000e+00> : vector<128x16xf32>
      %83 = tpu.matmul %80, %82, %cst_77 {dimension_numbers = #tpu.dot_dimension_numbers<[1], [0], [0], [1], [0, 0, 1, 1], [], []>} : vector<128x16xbf16>, vector<16x16xbf16>, vector<128x16xf32> -> vector<128x16xf32>
      %84 = arith.addf %76, %83 : vector<128x16xf32>
      %cst_78 = arith.constant 0.000000e+00 : f32
      %85 = vector.broadcast %cst_78 : f32 to vector<128x16xf32>
      %86 = arith.maximumf %84, %85 : vector<128x16xf32>
      %87 = arith.truncf %86 : vector<128x16xf32> to vector<128x16xbf16>
      %88 = vector.shape_cast %87 : vector<128x16xbf16> to vector<4x32x16xbf16>
      %c1_i32_79 = arith.constant 1 : i32
      %89 = arith.addi %c1_i32_79, %11 : i32
      %90 = arith.index_cast %89 : i32 to index
      %c1_80 = arith.constant 1 : index
      %c0_81 = arith.constant 0 : index
      %91 = vector.load %arg8[%90, %c1_80, %c0_81] : memref<34x34x16xbf16, #tpu.memory_space<vmem>>, vector<4x32x16xbf16>
      tpu.vector_store %arg8[%90, %c1_80, %c0_81], %88 {strides = array<i32>} : memref<34x34x16xbf16, #tpu.memory_space<vmem>>, vector<4x32x16xbf16>,
    }
    %c8_i32_14 = arith.constant 8 : i32
    %c0_i32_15 = arith.constant 0 : i32
    %c8_i32_16 = arith.constant 8 : i32
    %8 = arith.addi %c0_i32_15, %c8_i32_16 : i32
    %c1_i32_17 = arith.constant 1 : i32
    scf.for %arg10 = %c0_i32_15 to %8 step %c1_i32_17  : i32 {
      %c4_i32 = arith.constant 4 : i32
      %10 = arith.muli %arg10, %c4_i32 : i32
      %11 = tpu.assume_multiple %10, 4 : i32
      %cst_23 = arith.constant 0.000000e+00 : f32
      %12 = vector.broadcast %cst_23 : f32 to vector<128x32xf32>
      %c0_i32_24 = arith.constant 0 : i32
      %13 = arith.addi %11, %c0_i32_24 : i32
      %14 = arith.index_cast %13 : i32 to index
      %c0_25 = arith.constant 0 : index
      %c0_26 = arith.constant 0 : index
      %15 = vector.load %arg8[%14, %c0_25, %c0_26] : memref<34x34x16xbf16, #tpu.memory_space<vmem>>, vector<4x32x16xbf16>
      %16 = vector.shape_cast %15 : vector<4x32x16xbf16> to vector<128x16xbf16>
      %c0_27 = arith.constant 0 : index
      %c0_28 = arith.constant 0 : index
      %c0_29 = arith.constant 0 : index
      %17 = vector.load %arg4[%c0_27, %c0_28, %c0_29] : memref<9x16x32xbf16, #tpu.memory_space<vmem>>, vector<1x16x32xbf16>
      %18 = vector.shape_cast %17 : vector<1x16x32xbf16> to vector<16x32xbf16>
      %cst_30 = arith.constant dense<0.000000e+00> : vector<128x32xf32>
      %19 = tpu.matmul %16, %18, %cst_30 {dimension_numbers = #tpu.dot_dimension_numbers<[1], [0], [0], [1], [0, 0, 1, 1], [], []>} : vector<128x16xbf16>, vector<16x32xbf16>, vector<128x32xf32> -> vector<128x32xf32>
      %20 = arith.addf %12, %19 : vector<128x32xf32>
      %c0_i32_31 = arith.constant 0 : i32
      %21 = arith.addi %11, %c0_i32_31 : i32
      %22 = arith.index_cast %21 : i32 to index
      %c1 = arith.constant 1 : index
      %c0_32 = arith.constant 0 : index
      %23 = vector.load %arg8[%22, %c1, %c0_32] : memref<34x34x16xbf16, #tpu.memory_space<vmem>>, vector<4x32x16xbf16>
      %24 = vector.shape_cast %23 : vector<4x32x16xbf16> to vector<128x16xbf16>
      %c1_33 = arith.constant 1 : index
      %c0_34 = arith.constant 0 : index
      %c0_35 = arith.constant 0 : index
      %25 = vector.load %arg4[%c1_33, %c0_34, %c0_35] : memref<9x16x32xbf16, #tpu.memory_space<vmem>>, vector<1x16x32xbf16>
      %26 = vector.shape_cast %25 : vector<1x16x32xbf16> to vector<16x32xbf16>
      %cst_36 = arith.constant dense<0.000000e+00> : vector<128x32xf32>
      %27 = tpu.matmul %24, %26, %cst_36 {dimension_numbers = #tpu.dot_dimension_numbers<[1], [0], [0], [1], [0, 0, 1, 1], [], []>} : vector<128x16xbf16>, vector<16x32xbf16>, vector<128x32xf32> -> vector<128x32xf32>
      %28 = arith.addf %20, %27 : vector<128x32xf32>
      %c0_i32_37 = arith.constant 0 : i32
      %29 = arith.addi %11, %c0_i32_37 : i32
      %30 = arith.index_cast %29 : i32 to index
      %c2 = arith.constant 2 : index
      %c0_38 = arith.constant 0 : index
      %31 = vector.load %arg8[%30, %c2, %c0_38] : memref<34x34x16xbf16, #tpu.memory_space<vmem>>, vector<4x32x16xbf16>
      %32 = vector.shape_cast %31 : vector<4x32x16xbf16> to vector<128x16xbf16>
      %c2_39 = arith.constant 2 : index
      %c0_40 = arith.constant 0 : index
      %c0_41 = arith.constant 0 : index
      %33 = vector.load %arg4[%c2_39, %c0_40, %c0_41] : memref<9x16x32xbf16, #tpu.memory_space<vmem>>, vector<1x16x32xbf16>
      %34 = vector.shape_cast %33 : vector<1x16x32xbf16> to vector<16x32xbf16>
      %cst_42 = arith.constant dense<0.000000e+00> : vector<128x32xf32>
      %35 = tpu.matmul %32, %34, %cst_42 {dimension_numbers = #tpu.dot_dimension_numbers<[1], [0], [0], [1], [0, 0, 1, 1], [], []>} : vector<128x16xbf16>, vector<16x32xbf16>, vector<128x32xf32> -> vector<128x32xf32>
      %36 = arith.addf %28, %35 : vector<128x32xf32>
      %c1_i32_43 = arith.constant 1 : i32
      %37 = arith.addi %11, %c1_i32_43 : i32
      %38 = arith.index_cast %37 : i32 to index
      %c0_44 = arith.constant 0 : index
      %c0_45 = arith.constant 0 : index
      %39 = vector.load %arg8[%38, %c0_44, %c0_45] : memref<34x34x16xbf16, #tpu.memory_space<vmem>>, vector<4x32x16xbf16>
      %40 = vector.shape_cast %39 : vector<4x32x16xbf16> to vector<128x16xbf16>
      %c3 = arith.constant 3 : index
      %c0_46 = arith.constant 0 : index
      %c0_47 = arith.constant 0 : index
      %41 = vector.load %arg4[%c3, %c0_46, %c0_47] : memref<9x16x32xbf16, #tpu.memory_space<vmem>>, vector<1x16x32xbf16>
      %42 = vector.shape_cast %41 : vector<1x16x32xbf16> to vector<16x32xbf16>
      %cst_48 = arith.constant dense<0.000000e+00> : vector<128x32xf32>
      %43 = tpu.matmul %40, %42, %cst_48 {dimension_numbers = #tpu.dot_dimension_numbers<[1], [0], [0], [1], [0, 0, 1, 1], [], []>} : vector<128x16xbf16>, vector<16x32xbf16>, vector<128x32xf32> -> vector<128x32xf32>
      %44 = arith.addf %36, %43 : vector<128x32xf32>
      %c1_i32_49 = arith.constant 1 : i32
      %45 = arith.addi %11, %c1_i32_49 : i32
      %46 = arith.index_cast %45 : i32 to index
      %c1_50 = arith.constant 1 : index
      %c0_51 = arith.constant 0 : index
      %47 = vector.load %arg8[%46, %c1_50, %c0_51] : memref<34x34x16xbf16, #tpu.memory_space<vmem>>, vector<4x32x16xbf16>
      %48 = vector.shape_cast %47 : vector<4x32x16xbf16> to vector<128x16xbf16>
      %c4 = arith.constant 4 : index
      %c0_52 = arith.constant 0 : index
      %c0_53 = arith.constant 0 : index
      %49 = vector.load %arg4[%c4, %c0_52, %c0_53] : memref<9x16x32xbf16, #tpu.memory_space<vmem>>, vector<1x16x32xbf16>
      %50 = vector.shape_cast %49 : vector<1x16x32xbf16> to vector<16x32xbf16>
      %cst_54 = arith.constant dense<0.000000e+00> : vector<128x32xf32>
      %51 = tpu.matmul %48, %50, %cst_54 {dimension_numbers = #tpu.dot_dimension_numbers<[1], [0], [0], [1], [0, 0, 1, 1], [], []>} : vector<128x16xbf16>, vector<16x32xbf16>, vector<128x32xf32> -> vector<128x32xf32>
      %52 = arith.addf %44, %51 : vector<128x32xf32>
      %c1_i32_55 = arith.constant 1 : i32
      %53 = arith.addi %11, %c1_i32_55 : i32
      %54 = arith.index_cast %53 : i32 to index
      %c2_56 = arith.constant 2 : index
      %c0_57 = arith.constant 0 : index
      %55 = vector.load %arg8[%54, %c2_56, %c0_57] : memref<34x34x16xbf16, #tpu.memory_space<vmem>>, vector<4x32x16xbf16>
      %56 = vector.shape_cast %55 : vector<4x32x16xbf16> to vector<128x16xbf16>
      %c5 = arith.constant 5 : index
      %c0_58 = arith.constant 0 : index
      %c0_59 = arith.constant 0 : index
      %57 = vector.load %arg4[%c5, %c0_58, %c0_59] : memref<9x16x32xbf16, #tpu.memory_space<vmem>>, vector<1x16x32xbf16>
      %58 = vector.shape_cast %57 : vector<1x16x32xbf16> to vector<16x32xbf16>
      %cst_60 = arith.constant dense<0.000000e+00> : vector<128x32xf32>
      %59 = tpu.matmul %56, %58, %cst_60 {dimension_numbers = #tpu.dot_dimension_numbers<[1], [0], [0], [1], [0, 0, 1, 1], [], []>} : vector<128x16xbf16>, vector<16x32xbf16>, vector<128x32xf32> -> vector<128x32xf32>
      %60 = arith.addf %52, %59 : vector<128x32xf32>
      %c2_i32 = arith.constant 2 : i32
      %61 = arith.addi %11, %c2_i32 : i32
      %62 = arith.index_cast %61 : i32 to index
      %c0_61 = arith.constant 0 : index
      %c0_62 = arith.constant 0 : index
      %63 = vector.load %arg8[%62, %c0_61, %c0_62] : memref<34x34x16xbf16, #tpu.memory_space<vmem>>, vector<4x32x16xbf16>
      %64 = vector.shape_cast %63 : vector<4x32x16xbf16> to vector<128x16xbf16>
      %c6 = arith.constant 6 : index
      %c0_63 = arith.constant 0 : index
      %c0_64 = arith.constant 0 : index
      %65 = vector.load %arg4[%c6, %c0_63, %c0_64] : memref<9x16x32xbf16, #tpu.memory_space<vmem>>, vector<1x16x32xbf16>
      %66 = vector.shape_cast %65 : vector<1x16x32xbf16> to vector<16x32xbf16>
      %cst_65 = arith.constant dense<0.000000e+00> : vector<128x32xf32>
      %67 = tpu.matmul %64, %66, %cst_65 {dimension_numbers = #tpu.dot_dimension_numbers<[1], [0], [0], [1], [0, 0, 1, 1], [], []>} : vector<128x16xbf16>, vector<16x32xbf16>, vector<128x32xf32> -> vector<128x32xf32>
      %68 = arith.addf %60, %67 : vector<128x32xf32>
      %c2_i32_66 = arith.constant 2 : i32
      %69 = arith.addi %11, %c2_i32_66 : i32
      %70 = arith.index_cast %69 : i32 to index
      %c1_67 = arith.constant 1 : index
      %c0_68 = arith.constant 0 : index
      %71 = vector.load %arg8[%70, %c1_67, %c0_68] : memref<34x34x16xbf16, #tpu.memory_space<vmem>>, vector<4x32x16xbf16>
      %72 = vector.shape_cast %71 : vector<4x32x16xbf16> to vector<128x16xbf16>
      %c7 = arith.constant 7 : index
      %c0_69 = arith.constant 0 : index
      %c0_70 = arith.constant 0 : index
      %73 = vector.load %arg4[%c7, %c0_69, %c0_70] : memref<9x16x32xbf16, #tpu.memory_space<vmem>>, vector<1x16x32xbf16>
      %74 = vector.shape_cast %73 : vector<1x16x32xbf16> to vector<16x32xbf16>
      %cst_71 = arith.constant dense<0.000000e+00> : vector<128x32xf32>
      %75 = tpu.matmul %72, %74, %cst_71 {dimension_numbers = #tpu.dot_dimension_numbers<[1], [0], [0], [1], [0, 0, 1, 1], [], []>} : vector<128x16xbf16>, vector<16x32xbf16>, vector<128x32xf32> -> vector<128x32xf32>
      %76 = arith.addf %68, %75 : vector<128x32xf32>
      %c2_i32_72 = arith.constant 2 : i32
      %77 = arith.addi %11, %c2_i32_72 : i32
      %78 = arith.index_cast %77 : i32 to index
      %c2_73 = arith.constant 2 : index
      %c0_74 = arith.constant 0 : index
      %79 = vector.load %arg8[%78, %c2_73, %c0_74] : memref<34x34x16xbf16, #tpu.memory_space<vmem>>, vector<4x32x16xbf16>
      %80 = vector.shape_cast %79 : vector<4x32x16xbf16> to vector<128x16xbf16>
      %c8 = arith.constant 8 : index
      %c0_75 = arith.constant 0 : index
      %c0_76 = arith.constant 0 : index
      %81 = vector.load %arg4[%c8, %c0_75, %c0_76] : memref<9x16x32xbf16, #tpu.memory_space<vmem>>, vector<1x16x32xbf16>
      %82 = vector.shape_cast %81 : vector<1x16x32xbf16> to vector<16x32xbf16>
      %cst_77 = arith.constant dense<0.000000e+00> : vector<128x32xf32>
      %83 = tpu.matmul %80, %82, %cst_77 {dimension_numbers = #tpu.dot_dimension_numbers<[1], [0], [0], [1], [0, 0, 1, 1], [], []>} : vector<128x16xbf16>, vector<16x32xbf16>, vector<128x32xf32> -> vector<128x32xf32>
      %84 = arith.addf %76, %83 : vector<128x32xf32>
      %cst_78 = arith.constant 0.000000e+00 : f32
      %85 = vector.broadcast %cst_78 : f32 to vector<128x32xf32>
      %86 = arith.maximumf %84, %85 : vector<128x32xf32>
      %87 = arith.truncf %86 : vector<128x32xf32> to vector<128x32xbf16>
      %88 = vector.shape_cast %87 : vector<128x32xbf16> to vector<4x32x32xbf16>
      %c1_i32_79 = arith.constant 1 : i32
      %89 = arith.addi %c1_i32_79, %11 : i32
      %90 = arith.index_cast %89 : i32 to index
      %c1_80 = arith.constant 1 : index
      %c0_81 = arith.constant 0 : index
      %91 = vector.load %arg9[%90, %c1_80, %c0_81] : memref<34x34x32xbf16, #tpu.memory_space<vmem>>, vector<4x32x32xbf16>
      tpu.vector_store %arg9[%90, %c1_80, %c0_81], %88 {strides = array<i32>} : memref<34x34x32xbf16, #tpu.memory_space<vmem>>, vector<4x32x32xbf16>,
    }
    %c8_i32_18 = arith.constant 8 : i32
    %c0_i32_19 = arith.constant 0 : i32
    %c8_i32_20 = arith.constant 8 : i32
    %9 = arith.addi %c0_i32_19, %c8_i32_20 : i32
    %c1_i32_21 = arith.constant 1 : i32
    scf.for %arg10 = %c0_i32_19 to %9 step %c1_i32_21  : i32 {
      %c4_i32 = arith.constant 4 : i32
      %10 = arith.muli %arg10, %c4_i32 : i32
      %11 = tpu.assume_multiple %10, 4 : i32
      %cst_23 = arith.constant 0.000000e+00 : f32
      %12 = vector.broadcast %cst_23 : f32 to vector<128x32xf32>
      %c0_i32_24 = arith.constant 0 : i32
      %13 = arith.addi %11, %c0_i32_24 : i32
      %14 = arith.index_cast %13 : i32 to index
      %c0_25 = arith.constant 0 : index
      %c0_26 = arith.constant 0 : index
      %15 = vector.load %arg9[%14, %c0_25, %c0_26] : memref<34x34x32xbf16, #tpu.memory_space<vmem>>, vector<4x32x32xbf16>
      %16 = vector.shape_cast %15 : vector<4x32x32xbf16> to vector<128x32xbf16>
      %c0_27 = arith.constant 0 : index
      %c0_28 = arith.constant 0 : index
      %c0_29 = arith.constant 0 : index
      %17 = vector.load %arg5[%c0_27, %c0_28, %c0_29] : memref<9x32x32xbf16, #tpu.memory_space<vmem>>, vector<1x32x32xbf16>
      %18 = vector.shape_cast %17 : vector<1x32x32xbf16> to vector<32x32xbf16>
      %cst_30 = arith.constant dense<0.000000e+00> : vector<128x32xf32>
      %19 = tpu.matmul %16, %18, %cst_30 {dimension_numbers = #tpu.dot_dimension_numbers<[1], [0], [0], [1], [0, 0, 1, 1], [], []>} : vector<128x32xbf16>, vector<32x32xbf16>, vector<128x32xf32> -> vector<128x32xf32>
      %20 = arith.addf %12, %19 : vector<128x32xf32>
      %c0_i32_31 = arith.constant 0 : i32
      %21 = arith.addi %11, %c0_i32_31 : i32
      %22 = arith.index_cast %21 : i32 to index
      %c1 = arith.constant 1 : index
      %c0_32 = arith.constant 0 : index
      %23 = vector.load %arg9[%22, %c1, %c0_32] : memref<34x34x32xbf16, #tpu.memory_space<vmem>>, vector<4x32x32xbf16>
      %24 = vector.shape_cast %23 : vector<4x32x32xbf16> to vector<128x32xbf16>
      %c1_33 = arith.constant 1 : index
      %c0_34 = arith.constant 0 : index
      %c0_35 = arith.constant 0 : index
      %25 = vector.load %arg5[%c1_33, %c0_34, %c0_35] : memref<9x32x32xbf16, #tpu.memory_space<vmem>>, vector<1x32x32xbf16>
      %26 = vector.shape_cast %25 : vector<1x32x32xbf16> to vector<32x32xbf16>
      %cst_36 = arith.constant dense<0.000000e+00> : vector<128x32xf32>
      %27 = tpu.matmul %24, %26, %cst_36 {dimension_numbers = #tpu.dot_dimension_numbers<[1], [0], [0], [1], [0, 0, 1, 1], [], []>} : vector<128x32xbf16>, vector<32x32xbf16>, vector<128x32xf32> -> vector<128x32xf32>
      %28 = arith.addf %20, %27 : vector<128x32xf32>
      %c0_i32_37 = arith.constant 0 : i32
      %29 = arith.addi %11, %c0_i32_37 : i32
      %30 = arith.index_cast %29 : i32 to index
      %c2 = arith.constant 2 : index
      %c0_38 = arith.constant 0 : index
      %31 = vector.load %arg9[%30, %c2, %c0_38] : memref<34x34x32xbf16, #tpu.memory_space<vmem>>, vector<4x32x32xbf16>
      %32 = vector.shape_cast %31 : vector<4x32x32xbf16> to vector<128x32xbf16>
      %c2_39 = arith.constant 2 : index
      %c0_40 = arith.constant 0 : index
      %c0_41 = arith.constant 0 : index
      %33 = vector.load %arg5[%c2_39, %c0_40, %c0_41] : memref<9x32x32xbf16, #tpu.memory_space<vmem>>, vector<1x32x32xbf16>
      %34 = vector.shape_cast %33 : vector<1x32x32xbf16> to vector<32x32xbf16>
      %cst_42 = arith.constant dense<0.000000e+00> : vector<128x32xf32>
      %35 = tpu.matmul %32, %34, %cst_42 {dimension_numbers = #tpu.dot_dimension_numbers<[1], [0], [0], [1], [0, 0, 1, 1], [], []>} : vector<128x32xbf16>, vector<32x32xbf16>, vector<128x32xf32> -> vector<128x32xf32>
      %36 = arith.addf %28, %35 : vector<128x32xf32>
      %c1_i32_43 = arith.constant 1 : i32
      %37 = arith.addi %11, %c1_i32_43 : i32
      %38 = arith.index_cast %37 : i32 to index
      %c0_44 = arith.constant 0 : index
      %c0_45 = arith.constant 0 : index
      %39 = vector.load %arg9[%38, %c0_44, %c0_45] : memref<34x34x32xbf16, #tpu.memory_space<vmem>>, vector<4x32x32xbf16>
      %40 = vector.shape_cast %39 : vector<4x32x32xbf16> to vector<128x32xbf16>
      %c3 = arith.constant 3 : index
      %c0_46 = arith.constant 0 : index
      %c0_47 = arith.constant 0 : index
      %41 = vector.load %arg5[%c3, %c0_46, %c0_47] : memref<9x32x32xbf16, #tpu.memory_space<vmem>>, vector<1x32x32xbf16>
      %42 = vector.shape_cast %41 : vector<1x32x32xbf16> to vector<32x32xbf16>
      %cst_48 = arith.constant dense<0.000000e+00> : vector<128x32xf32>
      %43 = tpu.matmul %40, %42, %cst_48 {dimension_numbers = #tpu.dot_dimension_numbers<[1], [0], [0], [1], [0, 0, 1, 1], [], []>} : vector<128x32xbf16>, vector<32x32xbf16>, vector<128x32xf32> -> vector<128x32xf32>
      %44 = arith.addf %36, %43 : vector<128x32xf32>
      %c1_i32_49 = arith.constant 1 : i32
      %45 = arith.addi %11, %c1_i32_49 : i32
      %46 = arith.index_cast %45 : i32 to index
      %c1_50 = arith.constant 1 : index
      %c0_51 = arith.constant 0 : index
      %47 = vector.load %arg9[%46, %c1_50, %c0_51] : memref<34x34x32xbf16, #tpu.memory_space<vmem>>, vector<4x32x32xbf16>
      %48 = vector.shape_cast %47 : vector<4x32x32xbf16> to vector<128x32xbf16>
      %c4 = arith.constant 4 : index
      %c0_52 = arith.constant 0 : index
      %c0_53 = arith.constant 0 : index
      %49 = vector.load %arg5[%c4, %c0_52, %c0_53] : memref<9x32x32xbf16, #tpu.memory_space<vmem>>, vector<1x32x32xbf16>
      %50 = vector.shape_cast %49 : vector<1x32x32xbf16> to vector<32x32xbf16>
      %cst_54 = arith.constant dense<0.000000e+00> : vector<128x32xf32>
      %51 = tpu.matmul %48, %50, %cst_54 {dimension_numbers = #tpu.dot_dimension_numbers<[1], [0], [0], [1], [0, 0, 1, 1], [], []>} : vector<128x32xbf16>, vector<32x32xbf16>, vector<128x32xf32> -> vector<128x32xf32>
      %52 = arith.addf %44, %51 : vector<128x32xf32>
      %c1_i32_55 = arith.constant 1 : i32
      %53 = arith.addi %11, %c1_i32_55 : i32
      %54 = arith.index_cast %53 : i32 to index
      %c2_56 = arith.constant 2 : index
      %c0_57 = arith.constant 0 : index
      %55 = vector.load %arg9[%54, %c2_56, %c0_57] : memref<34x34x32xbf16, #tpu.memory_space<vmem>>, vector<4x32x32xbf16>
      %56 = vector.shape_cast %55 : vector<4x32x32xbf16> to vector<128x32xbf16>
      %c5 = arith.constant 5 : index
      %c0_58 = arith.constant 0 : index
      %c0_59 = arith.constant 0 : index
      %57 = vector.load %arg5[%c5, %c0_58, %c0_59] : memref<9x32x32xbf16, #tpu.memory_space<vmem>>, vector<1x32x32xbf16>
      %58 = vector.shape_cast %57 : vector<1x32x32xbf16> to vector<32x32xbf16>
      %cst_60 = arith.constant dense<0.000000e+00> : vector<128x32xf32>
      %59 = tpu.matmul %56, %58, %cst_60 {dimension_numbers = #tpu.dot_dimension_numbers<[1], [0], [0], [1], [0, 0, 1, 1], [], []>} : vector<128x32xbf16>, vector<32x32xbf16>, vector<128x32xf32> -> vector<128x32xf32>
      %60 = arith.addf %52, %59 : vector<128x32xf32>
      %c2_i32 = arith.constant 2 : i32
      %61 = arith.addi %11, %c2_i32 : i32
      %62 = arith.index_cast %61 : i32 to index
      %c0_61 = arith.constant 0 : index
      %c0_62 = arith.constant 0 : index
      %63 = vector.load %arg9[%62, %c0_61, %c0_62] : memref<34x34x32xbf16, #tpu.memory_space<vmem>>, vector<4x32x32xbf16>
      %64 = vector.shape_cast %63 : vector<4x32x32xbf16> to vector<128x32xbf16>
      %c6 = arith.constant 6 : index
      %c0_63 = arith.constant 0 : index
      %c0_64 = arith.constant 0 : index
      %65 = vector.load %arg5[%c6, %c0_63, %c0_64] : memref<9x32x32xbf16, #tpu.memory_space<vmem>>, vector<1x32x32xbf16>
      %66 = vector.shape_cast %65 : vector<1x32x32xbf16> to vector<32x32xbf16>
      %cst_65 = arith.constant dense<0.000000e+00> : vector<128x32xf32>
      %67 = tpu.matmul %64, %66, %cst_65 {dimension_numbers = #tpu.dot_dimension_numbers<[1], [0], [0], [1], [0, 0, 1, 1], [], []>} : vector<128x32xbf16>, vector<32x32xbf16>, vector<128x32xf32> -> vector<128x32xf32>
      %68 = arith.addf %60, %67 : vector<128x32xf32>
      %c2_i32_66 = arith.constant 2 : i32
      %69 = arith.addi %11, %c2_i32_66 : i32
      %70 = arith.index_cast %69 : i32 to index
      %c1_67 = arith.constant 1 : index
      %c0_68 = arith.constant 0 : index
      %71 = vector.load %arg9[%70, %c1_67, %c0_68] : memref<34x34x32xbf16, #tpu.memory_space<vmem>>, vector<4x32x32xbf16>
      %72 = vector.shape_cast %71 : vector<4x32x32xbf16> to vector<128x32xbf16>
      %c7 = arith.constant 7 : index
      %c0_69 = arith.constant 0 : index
      %c0_70 = arith.constant 0 : index
      %73 = vector.load %arg5[%c7, %c0_69, %c0_70] : memref<9x32x32xbf16, #tpu.memory_space<vmem>>, vector<1x32x32xbf16>
      %74 = vector.shape_cast %73 : vector<1x32x32xbf16> to vector<32x32xbf16>
      %cst_71 = arith.constant dense<0.000000e+00> : vector<128x32xf32>
      %75 = tpu.matmul %72, %74, %cst_71 {dimension_numbers = #tpu.dot_dimension_numbers<[1], [0], [0], [1], [0, 0, 1, 1], [], []>} : vector<128x32xbf16>, vector<32x32xbf16>, vector<128x32xf32> -> vector<128x32xf32>
      %76 = arith.addf %68, %75 : vector<128x32xf32>
      %c2_i32_72 = arith.constant 2 : i32
      %77 = arith.addi %11, %c2_i32_72 : i32
      %78 = arith.index_cast %77 : i32 to index
      %c2_73 = arith.constant 2 : index
      %c0_74 = arith.constant 0 : index
      %79 = vector.load %arg9[%78, %c2_73, %c0_74] : memref<34x34x32xbf16, #tpu.memory_space<vmem>>, vector<4x32x32xbf16>
      %80 = vector.shape_cast %79 : vector<4x32x32xbf16> to vector<128x32xbf16>
      %c8 = arith.constant 8 : index
      %c0_75 = arith.constant 0 : index
      %c0_76 = arith.constant 0 : index
      %81 = vector.load %arg5[%c8, %c0_75, %c0_76] : memref<9x32x32xbf16, #tpu.memory_space<vmem>>, vector<1x32x32xbf16>
      %82 = vector.shape_cast %81 : vector<1x32x32xbf16> to vector<32x32xbf16>
      %cst_77 = arith.constant dense<0.000000e+00> : vector<128x32xf32>
      %83 = tpu.matmul %80, %82, %cst_77 {dimension_numbers = #tpu.dot_dimension_numbers<[1], [0], [0], [1], [0, 0, 1, 1], [], []>} : vector<128x32xbf16>, vector<32x32xbf16>, vector<128x32xf32> -> vector<128x32xf32>
      %84 = arith.addf %76, %83 : vector<128x32xf32>
      %cst_78 = arith.constant 0.000000e+00 : f32
      %85 = vector.broadcast %cst_78 : f32 to vector<128x32xf32>
      %86 = arith.maximumf %84, %85 : vector<128x32xf32>
      %87 = arith.truncf %86 : vector<128x32xf32> to vector<128x32xbf16>
      %88 = vector.shape_cast %87 : vector<128x32xbf16> to vector<4x32x32xbf16>
      %c0_79 = arith.constant 0 : index
      %89 = arith.index_cast %11 : i32 to index
      %c0_80 = arith.constant 0 : index
      %c0_81 = arith.constant 0 : index
      %90 = vector.load %arg6[%c0_79, %89, %c0_80, %c0_81] : memref<1x32x32x32xbf16, #tpu.memory_space<vmem>>, vector<1x4x32x32xbf16>
      %91 = vector.shape_cast %90 : vector<1x4x32x32xbf16> to vector<4x32x32xbf16>
      %92 = vector.shape_cast %88 : vector<4x32x32xbf16> to vector<1x4x32x32xbf16>
      tpu.vector_store %arg6[%c0_79, %89, %c0_80, %c0_81], %92 {strides = array<i32>} : memref<1x32x32x32xbf16, #tpu.memory_space<vmem>>, vector<1x4x32x32xbf16>,
    }
    %c8_i32_22 = arith.constant 8 : i32
    return
  }
  func.func @transform_0(%arg0: i32) -> (i32, i32, i32, i32, i32) {
    %c0_i32 = arith.constant 0 : i32
    %c0_i32_0 = arith.constant 0 : i32
    %c0_i32_1 = arith.constant 0 : i32
    %c0_i32_2 = arith.constant 0 : i32
    %c0_i32_3 = arith.constant 0 : i32
    return %arg0, %c0_i32, %c0_i32_0, %c0_i32_1, %c0_i32_2 : i32, i32, i32, i32, i32
  }
  func.func @transform_1(%arg0: i32) -> (i32, i32, i32) {
    %c0_i32 = arith.constant 0 : i32
    %c0_i32_0 = arith.constant 0 : i32
    %c0_i32_1 = arith.constant 0 : i32
    %c0_i32_2 = arith.constant 0 : i32
    return %c0_i32, %c0_i32_0, %c0_i32_1 : i32, i32, i32
  }
  func.func @transform_2(%arg0: i32) -> (i32, i32, i32) {
    %c0_i32 = arith.constant 0 : i32
    %c0_i32_0 = arith.constant 0 : i32
    %c0_i32_1 = arith.constant 0 : i32
    %c0_i32_2 = arith.constant 0 : i32
    return %c0_i32, %c0_i32_0, %c0_i32_1 : i32, i32, i32
  }
  func.func @transform_3(%arg0: i32) -> (i32, i32, i32) {
    %c0_i32 = arith.constant 0 : i32
    %c0_i32_0 = arith.constant 0 : i32
    %c0_i32_1 = arith.constant 0 : i32
    %c0_i32_2 = arith.constant 0 : i32
    return %c0_i32, %c0_i32_0, %c0_i32_1 : i32, i32, i32
  }
  func.func @transform_4(%arg0: i32) -> (i32, i32, i32) {
    %c0_i32 = arith.constant 0 : i32
    %c0_i32_0 = arith.constant 0 : i32
    %c0_i32_1 = arith.constant 0 : i32
    %c0_i32_2 = arith.constant 0 : i32
    return %c0_i32, %c0_i32_0, %c0_i32_1 : i32, i32, i32
  }
  func.func @transform_5(%arg0: i32) -> (i32, i32, i32, i32) {
    %c0_i32 = arith.constant 0 : i32
    %c0_i32_0 = arith.constant 0 : i32
    %c0_i32_1 = arith.constant 0 : i32
    %c0_i32_2 = arith.constant 0 : i32
    return %arg0, %c0_i32, %c0_i32_0, %c0_i32_1 : i32, i32, i32, i32
  }
}

module attributes {stable_mosaic.version = 11 : i64} {
  func.func @_mm_bias_kernel(%arg0: i32, %arg1: memref<64x32xbf16, #tpu.memory_space<vmem>>, %arg2: memref<32x128xbf16, #tpu.memory_space<vmem>>, %arg3: memref<1x128xf32, #tpu.memory_space<vmem>>, %arg4: memref<64x128xf32, #tpu.memory_space<vmem>>) attributes {dimension_semantics = [#tpu.dimension_semantics<parallel>], iteration_bounds = array<i64: 2>, scalar_prefetch = 0 : i64, scratch_operands = 0 : i64, tpu.core_type = #tpu.core_type<tc>, window_params = [{transform_indices = @transform_0, window_bounds = array<i64: 64, 32>}, {pipeline_mode = #tpu.pipeline_mode<synchronous>, transform_indices = @transform_1, window_bounds = array<i64: 32, 128>}, {pipeline_mode = #tpu.pipeline_mode<synchronous>, transform_indices = @transform_2, window_bounds = array<i64: 1, 128>}, {transform_indices = @transform_3, window_bounds = array<i64: 64, 128>}]} {
    %c0 = arith.constant 0 : index
    %c0_0 = arith.constant 0 : index
    %0 = vector.load %arg1[%c0, %c0_0] : memref<64x32xbf16, #tpu.memory_space<vmem>>, vector<64x32xbf16>
    %c0_1 = arith.constant 0 : index
    %c0_2 = arith.constant 0 : index
    %1 = vector.load %arg2[%c0_1, %c0_2] : memref<32x128xbf16, #tpu.memory_space<vmem>>, vector<32x128xbf16>
    %cst = arith.constant dense<0.000000e+00> : vector<64x128xf32>
    %2 = tpu.matmul %0, %1, %cst {dimension_numbers = #tpu.dot_dimension_numbers<[1], [0], [0], [1], [0, 0, 1, 1], [], []>} : vector<64x32xbf16>, vector<32x128xbf16>, vector<64x128xf32> -> vector<64x128xf32>
    %c0_3 = arith.constant 0 : index
    %c0_4 = arith.constant 0 : index
    %3 = vector.load %arg3[%c0_3, %c0_4] : memref<1x128xf32, #tpu.memory_space<vmem>>, vector<1x128xf32>
    %4 = vector.broadcast %3 : vector<1x128xf32> to vector<64x128xf32>
    %5 = arith.addf %2, %4 : vector<64x128xf32>
    %c0_5 = arith.constant 0 : index
    %c0_6 = arith.constant 0 : index
    %6 = vector.load %arg4[%c0_5, %c0_6] : memref<64x128xf32, #tpu.memory_space<vmem>>, vector<64x128xf32>
    tpu.vector_store %arg4[%c0_5, %c0_6], %5 {strides = array<i32>} : memref<64x128xf32, #tpu.memory_space<vmem>>, vector<64x128xf32>,
    return
  }
  func.func @transform_0(%arg0: i32) -> (i32, i32) {
    %c0_i32 = arith.constant 0 : i32
    %c0_i32_0 = arith.constant 0 : i32
    return %arg0, %c0_i32 : i32, i32
  }
  func.func @transform_1(%arg0: i32) -> (i32, i32) {
    %c0_i32 = arith.constant 0 : i32
    %c0_i32_0 = arith.constant 0 : i32
    %c0_i32_1 = arith.constant 0 : i32
    return %c0_i32, %c0_i32_0 : i32, i32
  }
  func.func @transform_2(%arg0: i32) -> (i32, i32) {
    %c0_i32 = arith.constant 0 : i32
    %c0_i32_0 = arith.constant 0 : i32
    %c0_i32_1 = arith.constant 0 : i32
    return %c0_i32, %c0_i32_0 : i32, i32
  }
  func.func @transform_3(%arg0: i32) -> (i32, i32) {
    %c0_i32 = arith.constant 0 : i32
    %c0_i32_0 = arith.constant 0 : i32
    return %arg0, %c0_i32 : i32, i32
  }
}

module attributes {stable_mosaic.version = 11 : i64} {
  func.func @_head_kernel(%arg0: i32, %arg1: memref<1x340x32xf32, #tpu.memory_space<vmem>>, %arg2: memref<1x4x32xbf16, #tpu.memory_space<vmem>>, %arg3: memref<32x64xbf16, #tpu.memory_space<vmem>>, %arg4: memref<192x128xbf16, #tpu.memory_space<vmem>>, %arg5: memref<1x128xf32, #tpu.memory_space<vmem>>, %arg6: memref<1x1x128xf32, #tpu.memory_space<vmem>>) attributes {dimension_semantics = [#tpu.dimension_semantics<parallel>], iteration_bounds = array<i64: 2>, scalar_prefetch = 0 : i64, scratch_operands = 0 : i64, tpu.core_type = #tpu.core_type<tc>, window_params = [{transform_indices = @transform_0, window_bounds = array<i64: 1, 340, 32>}, {transform_indices = @transform_1, window_bounds = array<i64: 1, 4, 32>}, {pipeline_mode = #tpu.pipeline_mode<synchronous>, transform_indices = @transform_2, window_bounds = array<i64: 32, 64>}, {pipeline_mode = #tpu.pipeline_mode<synchronous>, transform_indices = @transform_3, window_bounds = array<i64: 192, 128>}, {pipeline_mode = #tpu.pipeline_mode<synchronous>, transform_indices = @transform_4, window_bounds = array<i64: 1, 128>}, {transform_indices = @transform_5, window_bounds = array<i64: 1, 1, 128>}]} {
    %c0 = arith.constant 0 : index
    %c0_0 = arith.constant 0 : index
    %c0_1 = arith.constant 0 : index
    %0 = vector.load %arg1[%c0, %c0_0, %c0_1] : memref<1x340x32xf32, #tpu.memory_space<vmem>>, vector<1x256x32xf32>
    %1 = vector.shape_cast %0 : vector<1x256x32xf32> to vector<256x32xf32>
    %cst = arith.constant dense<0.000000e+00> : vector<32xf32>
    %2 = vector.multi_reduction <add>, %1, %cst [0] : vector<256x32xf32> to vector<32xf32>
    %3 = vector.shape_cast %2 : vector<32xf32> to vector<1x32xf32>
    %cst_2 = arith.constant 0.00390623044 : f32
    %4 = vector.broadcast %cst_2 : f32 to vector<1x32xf32>
    %5 = arith.mulf %3, %4 : vector<1x32xf32>
    %c0_3 = arith.constant 0 : index
    %c256 = arith.constant 256 : index
    %c0_4 = arith.constant 0 : index
    %6 = vector.load %arg1[%c0_3, %c256, %c0_4] : memref<1x340x32xf32, #tpu.memory_space<vmem>>, vector<1x64x32xf32>
    %7 = vector.shape_cast %6 : vector<1x64x32xf32> to vector<64x32xf32>
    %cst_5 = arith.constant dense<0.000000e+00> : vector<32xf32>
    %8 = vector.multi_reduction <add>, %7, %cst_5 [0] : vector<64x32xf32> to vector<32xf32>
    %9 = vector.shape_cast %8 : vector<32xf32> to vector<1x32xf32>
    %cst_6 = arith.constant 0.0156249218 : f32
    %10 = vector.broadcast %cst_6 : f32 to vector<1x32xf32>
    %11 = arith.mulf %9, %10 : vector<1x32xf32>
    %c0_7 = arith.constant 0 : index
    %c320 = arith.constant 320 : index
    %c0_8 = arith.constant 0 : index
    %12 = vector.load %arg1[%c0_7, %c320, %c0_8] : memref<1x340x32xf32, #tpu.memory_space<vmem>>, vector<1x16x32xf32>
    %13 = vector.shape_cast %12 : vector<1x16x32xf32> to vector<16x32xf32>
    %cst_9 = arith.constant dense<0.000000e+00> : vector<32xf32>
    %14 = vector.multi_reduction <add>, %13, %cst_9 [0] : vector<16x32xf32> to vector<32xf32>
    %15 = vector.shape_cast %14 : vector<32xf32> to vector<1x32xf32>
    %cst_10 = arith.constant 0.0624996871 : f32
    %16 = vector.broadcast %cst_10 : f32 to vector<1x32xf32>
    %17 = arith.mulf %15, %16 : vector<1x32xf32>
    %c0_11 = arith.constant 0 : index
    %c336 = arith.constant 336 : index
    %c0_12 = arith.constant 0 : index
    %18 = vector.load %arg1[%c0_11, %c336, %c0_12] : memref<1x340x32xf32, #tpu.memory_space<vmem>>, vector<1x4x32xf32>
    %19 = vector.shape_cast %18 : vector<1x4x32xf32> to vector<4x32xf32>
    %cst_13 = arith.constant dense<0.000000e+00> : vector<32xf32>
    %20 = vector.multi_reduction <add>, %19, %cst_13 [0] : vector<4x32xf32> to vector<32xf32>
    %21 = vector.shape_cast %20 : vector<32xf32> to vector<1x32xf32>
    %cst_14 = arith.constant 0.249998748 : f32
    %22 = vector.broadcast %cst_14 : f32 to vector<1x32xf32>
    %23 = arith.mulf %21, %22 : vector<1x32xf32>
    %c0_15 = arith.constant 0 : index
    %c0_16 = arith.constant 0 : index
    %c0_17 = arith.constant 0 : index
    %24 = vector.load %arg2[%c0_15, %c0_16, %c0_17] : memref<1x4x32xbf16, #tpu.memory_space<vmem>>, vector<1x4x32xbf16>
    %25 = vector.shape_cast %24 : vector<1x4x32xbf16> to vector<4x32xbf16>
    %c0_18 = arith.constant 0 : index
    %c0_19 = arith.constant 0 : index
    %26 = vector.load %arg3[%c0_18, %c0_19] : memref<32x64xbf16, #tpu.memory_space<vmem>>, vector<32x64xbf16>
    %cst_20 = arith.constant dense<0.000000e+00> : vector<4x64xf32>
    %27 = tpu.matmul %25, %26, %cst_20 {dimension_numbers = #tpu.dot_dimension_numbers<[1], [0], [0], [1], [0, 0, 1, 1], [], []>} : vector<4x32xbf16>, vector<32x64xbf16>, vector<4x64xf32> -> vector<4x64xf32>
    %cst_21 = arith.constant 0.000000e+00 : f32
    %28 = vector.broadcast %cst_21 : f32 to vector<4x64xf32>
    %29 = arith.maximumf %27, %28 : vector<4x64xf32>
    %cst_22 = arith.constant dense<0.000000e+00> : vector<64xf32>
    %30 = vector.multi_reduction <add>, %29, %cst_22 [0] : vector<4x64xf32> to vector<64xf32>
    %31 = vector.shape_cast %30 : vector<64xf32> to vector<1x64xf32>
    %cst_23 = arith.constant 0.249998748 : f32
    %32 = vector.broadcast %cst_23 : f32 to vector<1x64xf32>
    %33 = arith.mulf %31, %32 : vector<1x64xf32>
    %c0_24 = arith.constant 0 : index
    %c0_25 = arith.constant 0 : index
    %34 = vector.load %arg5[%c0_24, %c0_25] : memref<1x128xf32, #tpu.memory_space<vmem>>, vector<1x128xf32>
    %c0_26 = arith.constant 0 : index
    %c0_27 = arith.constant 0 : index
    %35 = vector.load %arg4[%c0_26, %c0_27] : memref<192x128xbf16, #tpu.memory_space<vmem>>, vector<32x128xbf16>
    %36 = arith.truncf %5 : vector<1x32xf32> to vector<1x32xbf16>
    %cst_28 = arith.constant dense<0.000000e+00> : vector<1x128xf32>
    %37 = tpu.matmul %36, %35, %cst_28 {dimension_numbers = #tpu.dot_dimension_numbers<[1], [0], [0], [1], [0, 0, 1, 1], [], []>} : vector<1x32xbf16>, vector<32x128xbf16>, vector<1x128xf32> -> vector<1x128xf32>
    %38 = arith.addf %34, %37 : vector<1x128xf32>
    %c32 = arith.constant 32 : index
    %c0_29 = arith.constant 0 : index
    %39 = vector.load %arg4[%c32, %c0_29] : memref<192x128xbf16, #tpu.memory_space<vmem>>, vector<32x128xbf16>
    %40 = arith.truncf %11 : vector<1x32xf32> to vector<1x32xbf16>
    %cst_30 = arith.constant dense<0.000000e+00> : vector<1x128xf32>
    %41 = tpu.matmul %40, %39, %cst_30 {dimension_numbers = #tpu.dot_dimension_numbers<[1], [0], [0], [1], [0, 0, 1, 1], [], []>} : vector<1x32xbf16>, vector<32x128xbf16>, vector<1x128xf32> -> vector<1x128xf32>
    %42 = arith.addf %38, %41 : vector<1x128xf32>
    %c64 = arith.constant 64 : index
    %c0_31 = arith.constant 0 : index
    %43 = vector.load %arg4[%c64, %c0_31] : memref<192x128xbf16, #tpu.memory_space<vmem>>, vector<32x128xbf16>
    %44 = arith.truncf %17 : vector<1x32xf32> to vector<1x32xbf16>
    %cst_32 = arith.constant dense<0.000000e+00> : vector<1x128xf32>
    %45 = tpu.matmul %44, %43, %cst_32 {dimension_numbers = #tpu.dot_dimension_numbers<[1], [0], [0], [1], [0, 0, 1, 1], [], []>} : vector<1x32xbf16>, vector<32x128xbf16>, vector<1x128xf32> -> vector<1x128xf32>
    %46 = arith.addf %42, %45 : vector<1x128xf32>
    %c96 = arith.constant 96 : index
    %c0_33 = arith.constant 0 : index
    %47 = vector.load %arg4[%c96, %c0_33] : memref<192x128xbf16, #tpu.memory_space<vmem>>, vector<32x128xbf16>
    %48 = arith.truncf %23 : vector<1x32xf32> to vector<1x32xbf16>
    %cst_34 = arith.constant dense<0.000000e+00> : vector<1x128xf32>
    %49 = tpu.matmul %48, %47, %cst_34 {dimension_numbers = #tpu.dot_dimension_numbers<[1], [0], [0], [1], [0, 0, 1, 1], [], []>} : vector<1x32xbf16>, vector<32x128xbf16>, vector<1x128xf32> -> vector<1x128xf32>
    %50 = arith.addf %46, %49 : vector<1x128xf32>
    %c128 = arith.constant 128 : index
    %c0_35 = arith.constant 0 : index
    %51 = vector.load %arg4[%c128, %c0_35] : memref<192x128xbf16, #tpu.memory_space<vmem>>, vector<64x128xbf16>
    %52 = arith.truncf %33 : vector<1x64xf32> to vector<1x64xbf16>
    %cst_36 = arith.constant dense<0.000000e+00> : vector<1x128xf32>
    %53 = tpu.matmul %52, %51, %cst_36 {dimension_numbers = #tpu.dot_dimension_numbers<[1], [0], [0], [1], [0, 0, 1, 1], [], []>} : vector<1x64xbf16>, vector<64x128xbf16>, vector<1x128xf32> -> vector<1x128xf32>
    %54 = arith.addf %50, %53 : vector<1x128xf32>
    %c0_37 = arith.constant 0 : index
    %c0_38 = arith.constant 0 : index
    %c0_39 = arith.constant 0 : index
    %55 = vector.load %arg6[%c0_37, %c0_38, %c0_39] : memref<1x1x128xf32, #tpu.memory_space<vmem>>, vector<1x1x128xf32>
    %56 = vector.shape_cast %55 : vector<1x1x128xf32> to vector<1x128xf32>
    %57 = vector.shape_cast %54 : vector<1x128xf32> to vector<1x1x128xf32>
    tpu.vector_store %arg6[%c0_37, %c0_38, %c0_39], %57 {strides = array<i32>} : memref<1x1x128xf32, #tpu.memory_space<vmem>>, vector<1x1x128xf32>,
    return
  }
  func.func @transform_0(%arg0: i32) -> (i32, i32, i32) {
    %c0_i32 = arith.constant 0 : i32
    %c0_i32_0 = arith.constant 0 : i32
    %c0_i32_1 = arith.constant 0 : i32
    return %arg0, %c0_i32, %c0_i32_0 : i32, i32, i32
  }
  func.func @transform_1(%arg0: i32) -> (i32, i32, i32) {
    %c0_i32 = arith.constant 0 : i32
    %c0_i32_0 = arith.constant 0 : i32
    %c0_i32_1 = arith.constant 0 : i32
    return %arg0, %c0_i32, %c0_i32_0 : i32, i32, i32
  }
  func.func @transform_2(%arg0: i32) -> (i32, i32) {
    %c0_i32 = arith.constant 0 : i32
    %c0_i32_0 = arith.constant 0 : i32
    %c0_i32_1 = arith.constant 0 : i32
    return %c0_i32, %c0_i32_0 : i32, i32
  }
  func.func @transform_3(%arg0: i32) -> (i32, i32) {
    %c0_i32 = arith.constant 0 : i32
    %c0_i32_0 = arith.constant 0 : i32
    %c0_i32_1 = arith.constant 0 : i32
    return %c0_i32, %c0_i32_0 : i32, i32
  }
  func.func @transform_4(%arg0: i32) -> (i32, i32) {
    %c0_i32 = arith.constant 0 : i32
    %c0_i32_0 = arith.constant 0 : i32
    %c0_i32_1 = arith.constant 0 : i32
    return %c0_i32, %c0_i32_0 : i32, i32
  }
  func.func @transform_5(%arg0: i32) -> (i32, i32, i32) {
    %c0_i32 = arith.constant 0 : i32
    %c0_i32_0 = arith.constant 0 : i32
    %c0_i32_1 = arith.constant 0 : i32
    return %arg0, %c0_i32, %c0_i32_0 : i32, i32, i32
  }
}

</mosaic_0001>

<bundles_post_ra>
// kernel: tile.8
= control target key start
LH: loop header
LB: loop body
LE: loop exit
PB: predicated region body
PF: predicated region fallthrough
CT: control target
= control target key end

     0   :  { %2 = vsyncpa [#allocation1], 0  ;;  %s44_s6 = smov [#allocation0]   ;;  %s70_s0 = inlined_call_operand.hbm [shape: f32[32], index: 0, kind: input, shape index: {}]   ;;  %s71_s1 = inlined_call_operand.vmem [shape: f32[4,32], index: 1, kind: output, shape index: {}]  }
   0x1   :  { %s9_s7 = sshll.u32 %s44_s6, 4  ;;  %s20_s10 = scalar_lea.hbm %s70_s0, 16  ;;  %s10_s7 = int_to_ptr.vmem [resolvable:$true] %s9_s7 }
   0x2   :  { %p21_p0 = scmp.ne.s32.totalorder %s70_s0, %s20_s10  ;;  %p24_p1 = scmp.lt.u32.totalorder %s20_s10, %s70_s0 }
   0x4   :  { %p26_p2 = pnand %p24_p1, %p21_p0 }
   0x6   :  { %29 = shalt.err (!%p26_p2)
}
   0x7   :  { %s30_s15 = scalar_lea.vmem %s10_s7, 16  ;;  %s34_s16 = scalar_lea.vmem %s10_s7, 32 }
   0x8   :  { %p31_p3 = scmp.ne.s32.totalorder %s10_s7, %s30_s15  ;;  %p35_p4 = scmp.lt.s32.totalorder %s10_s7, %s10_s7 }
   0x9   :  { %p36_p5 = scmp.lt.s32.totalorder %s34_s16, %s30_s15 }
   0xb   :  { %p37_p6 = por %p36_p5, %p35_p4 }
   0xd   :  { %p38_p7 = pnand %p37_p6, %p31_p3 }
   0xf   :  { %41 = shalt.err (!%p38_p7)
}
  0x10   :  { %12 = dma.hbm_to_vmem [thread:$0]  %s70_s0, 16, %s10_s7, [#allocation1]  }
  0x11   :  { %42 = dma.done.wait [#allocation1], 16  }
  0x12   :  { %43 = vsyncadd [#allocation1], 4294967280  ;;  %v16_v0 = vld [vmem:[#allocation0] ss:$0 sm:$0xff] }
  0x13   :  { %17 = vst [vmem:[%s71_s1] sm:$0xf] %v16_v0 }
  0x14   :  { %18 = vsyncpa [#allocation1], 1 }

// kernel: forward.4
= control target key start
LH: loop header
LB: loop body
LE: loop exit
PB: predicated region body
PF: predicated region fallthrough
CT: control target
= control target key end

     0   :  { %s454_s12 = smov 0   ;;  %s480_s0 = inlined_call_operand.vmem [shape: bf16[128,32], index: 0, kind: input, shape index: {}]   ;;  %s481_s1 = inlined_call_operand.vmem [shape: bf16[32,128], index: 1, kind: input, shape index: {}]   ;;  %s482_s2 = inlined_call_operand.vmem [shape: f32[1,128], index: 2, kind: input, shape index: {}]   ;;  %s483_s3 = inlined_call_operand.vmem [shape: f32[128,128], index: 3, kind: output, shape index: {}]  }
   0x1 LB: > { %s368_s13 = sadd.s32 4294967295, %s432_s12   ;;  %p372_p0 = scmp.ge.s32.totalorder %s432_s12, 1  ;;  %s432_s12 = sphi %s454_s12, %s13_s12  }
   0x2   : > { %p138_p1 = scmp.lt.s32.totalorder %s432_s12, 3 }
   0x4   : > { %p139_p2 = pnand %p372_p0, %p138_p1 }
   0x5   : > { %v420_v0 = vld [vmem:[%s481_s1] sm:$0xff] (!%p139_p2)   ;;  %s373_s16 = sshll.u32 (!%p139_p2), %s368_s13, 3  ;;  %v421_v1 = vld [vmem:[%s481_s1 + $0x8] sm:$0xff] (!%p139_p2)   ;;  %vm226_vm0 = vcmask (!%p139_p2), 261120  }
   0x6   : > { %142 = sbr.rel (%p139_p2) target bundleno = 236 (0xec), region = 32  ;;  %p163_p3 = scmp.lt.s32.totalorder (!%p139_p2), %s373_s16, 15  ;;  %396 = vmatprep.subr.bf16.mxu0 (!%p139_p2), %v420_v0  ;;  %408 = vmatprep.subr.bf16.mxu1 (!%p139_p2), %v420_v0  ;;  %v377_v6 = vld [vmem:[%s482_s2] ss:$0 sm:$0xff] (!%p139_p2) }
   0x7   : > { %397 = vmatpush3.bf16.msra.mxu0 (!%p139_p2), %v420_v0  ;;  %410 = vmatpush3.bf16.msra.mxu1 (!%p139_p2), %v420_v0 }
   0x8   : > { %398 = vmatprep.subr.bf16.mxu0 (!%p139_p2), %v421_v1  ;;  %409 = vmatprep.subr.bf16.mxu1 (!%p139_p2), %v421_v1 }
   0xb   : > { %399 = vmatpush3.bf16.msra.mxu0 (!%p139_p2), %v421_v1  ;;  %411 = vmatpush3.bf16.msra.mxu1 (!%p139_p2), %v421_v1 }
   0xd   : > { %s485_s16 = smov (!%p163_p3, %s373_s16), 15 }
   0xe   : > { %s374_s19 = sshll.u32 %s485_s16, 2  ;;  %s376_s23 = sshll.u32 %s485_s16, 3 }
   0xf   : > { %s166_s22 = scalar_lea.vmem %s480_s0, %s374_s19  ;;  %s172_s28 = scalar_lea.vmem %s483_s3, %s376_s23 }
  0x10   : > { %v422_v2 = vld [vmem:[%s166_s22] sm:$0xff]   ;;  %v423_v3 = vld [vmem:[%s166_s22 + $0x10] sm:$0xff]   ;;  %v424_v4 = vld [vmem:[%s166_s22 + $0x8] sm:$0xff]  }
  0x11   : > { %400 = vmatprep.mubr.msk.bf16.mxu0 %vm226_vm0, %v422_v2  ;;  %404 = vmatprep.mubr.msk.bf16.mxu1 %vm226_vm0, %v423_v3  ;;  %v425_v5 = vld [vmem:[%s166_s22 + $0x18] sm:$0xff]  }
  0x12   : > { %401 = vmatmul.mubr.msk.bf16.vlgmr.msra.gmra.mrb[0].mxu0 %vm226_vm0, %v424_v4  ;;  %405 = vmatmul.mubr.msk.bf16.vlgmr.msra.gmra.mrb[0].mxu1 %vm226_vm0, %v425_v5 }
  0xe5   : > { %v402_v7 = vpop.f32.mrb[0].mxu0  ;;  %v406_v9 = vpop.f32.mrb[0].mxu1 }
  0xe6   : > { %v282_v8 = vadd.f32 %v402_v7, %v377_v6  ;;  %v273_v10 = vpop.f32.mrb[1].mxu0  ;;  %v298_v11 = vadd.f32 %v406_v9, %v377_v6  ;;  %v289_v13 = vpop.f32.mrb[1].mxu1 }
  0xe7   : > { %v274_v12 = vadd.f32 %v377_v6, %v273_v10  ;;  %v403_v14 = vpop.f32.mrb[2].mxu0  ;;  %v290_v15 = vadd.f32 %v377_v6, %v289_v13  ;;  %v407_v17 = vpop.f32.mrb[2].mxu1 }
  0xe8   : > { %306 = vst [vmem:[%s172_s28 + $0x10] sm:$0xff] %v282_v8  ;;  %v285_v16 = vadd.f32 %v403_v14, %v377_v6  ;;  %v276_v18 = vpop.f32.mrb[3].mxu0  ;;  %310 = vst [vmem:[%s172_s28 + $0x30] sm:$0xff] %v298_v11  ;;  %v301_v19 = vadd.f32 %v407_v17, %v377_v6  ;;  %v292_v21 = vpop.f32.mrb[3].mxu1 }
  0xe9   : > { %304 = vst [vmem:[%s172_s28] sm:$0xff] %v274_v12  ;;  %v277_v20 = vadd.f32 %v377_v6, %v276_v18  ;;  %308 = vst [vmem:[%s172_s28 + $0x20] sm:$0xff] %v290_v15  ;;  %v293_v22 = vadd.f32 %v377_v6, %v292_v21 }
  0xea   : > { %307 = vst [vmem:[%s172_s28 + $0x18] sm:$0xff] %v285_v16  ;;  %311 = vst [vmem:[%s172_s28 + $0x38] sm:$0xff] %v301_v19 }
  0xeb   : > { %305 = vst [vmem:[%s172_s28 + $0x8] sm:$0xff] %v277_v20  ;;  %309 = vst [vmem:[%s172_s28 + $0x28] sm:$0xff] %v293_v22 }
  0xec PF: > { %s13_s12 = sadd.s32 1, %s432_s12  }
  0xed   : > { %p10_p4 = scmp.ge.s32.totalorder %s13_s12, 4  }
  0xef   :  { %12 = sbr.rel (!%p10_p4) target bundleno = 1 (0x1), region = 62 }

// kernel: forward.3
= control target key start
LH: loop header
LB: loop body
LE: loop exit
PB: predicated region body
PF: predicated region fallthrough
CT: control target
= control target key end

     0   :  { %s14501_s18 = smov 0   ;;  %s18717_s0 = inlined_call_operand.vmem [shape: bf16[2,4,33,33,3], index: 0, kind: input, shape index: {}]   ;;  %s18718_s1 = inlined_call_operand.vmem [shape: bf16[9,3,16], index: 1, kind: input, shape index: {}]   ;;  %s18719_s2 = inlined_call_operand.vmem [shape: bf16[9,16,16], index: 2, kind: input, shape index: {}]   ;;  %s18720_s3 = inlined_call_operand.vmem [shape: bf16[9,16,32], index: 3, kind: input, shape index: {}]   ;;  %s18721_s4 = inlined_call_operand.vmem [shape: bf16[9,32,32], index: 4, kind: input, shape index: {}]   ;;  %s18722_s5 = inlined_call_operand.vmem [shape: bf16[2,32,32,32], index: 5, kind: output, shape index: {}]  }
   0x1 LB: > { %s11356_s19 = sadd.s32 4294967295, %s14451_s18   ;;  %p11360_p0 = scmp.ge.s32.totalorder %s14451_s18, 1  ;;  %s14451_s18 = sphi %s14501_s18, %s15_s18  }
   0x2   : > { %p187_p1 = scmp.lt.s32.totalorder %s14451_s18, 3 }
   0x4   : > { %p188_p2 = pnand %p11360_p0, %p187_p1 }
   0x6   : > { %191 = sbr.rel (%p188_p2) target bundleno = 1876 (0x754), region = 40 }
   0xd   : > { %p14511_p3 = scmp.lt.s32.totalorder %s11356_s19, 1  ;;  %vm226_vm0 = vcmask 125952   ;;  %vm231_vm1 = vcmask 122880   ;;  %vm568_vm2 = vcmask 257024   ;;  %v14469_v0 = vmov 0   ;;  %s15553_s29 = smov 0  }
   0xe   : > { %227 = vst.msk [vmem:[#allocation2] sm:$0xf] %vm226_vm0, %v14469_v0  ;;  %228 = vst.msk [vmem:[#allocation2 + $0x4] sm:$0xf] %vm226_vm0, %v14469_v0  ;;  %vm573_vm3 = vcmask 253952  }
   0xf   : > { %229 = vst.msk [vmem:[#allocation2 + $0x8] sm:$0xf] %vm226_vm0, %v14469_v0  ;;  %230 = vst.msk [vmem:[#allocation2 + $0xc] sm:$0xf] %vm226_vm0, %v14469_v0  ;;  %s18772_s19 = smov (!%p14511_p3, %s11356_s19), 1 }
  0x10   : > { %233 = vst.msk [vmem:[#allocation2 + $0x14] sm:$0xf] %vm226_vm0, %v14469_v0  ;;  %234 = vst.msk [vmem:[#allocation2 + $0x18] sm:$0xf] %vm226_vm0, %v14469_v0  ;;  %s14226_s21 = smul.u32 2640, %s18772_s19  ;;  %s12634_s22 = sshll.u32 %s18772_s19, 9 }
  0x11   : > { %235 = vst.msk [vmem:[#allocation2 + $0x1c] sm:$0xf] %vm226_vm0, %v14469_v0  ;;  %236 = vst.msk [vmem:[#allocation2 + $0x20] sm:$0xf] %vm226_vm0, %v14469_v0  ;;  %s15546_s25 = scalar_lea.vmem %s18722_s5, %s12634_s22 }
  0x12   : > { %238 = vst.msk [vmem:[#allocation2 + $0x28] sm:$0xf] %vm226_vm0, %v14469_v0  ;;  %239 = vst.msk [vmem:[#allocation2 + $0x2c] sm:$0xf] %vm226_vm0, %v14469_v0  ;;  %s15551_s28 = scalar_lea.vmem %s18717_s0, %s14226_s21 }
  0x13   : > { %240 = vst.msk [vmem:[#allocation2 + $0x30] sm:$0xf] %vm226_vm0, %v14469_v0  ;;  %241 = vst.msk [vmem:[#allocation2 + $0x34] sm:$0xf] %vm226_vm0, %v14469_v0 }
  0x14   : > { %243 = vst.msk [vmem:[#allocation2 + $0x3c] sm:$0xf] %vm226_vm0, %v14469_v0  ;;  %244 = vst.msk [vmem:[#allocation2 + $0x40] sm:$0xf] %vm226_vm0, %v14469_v0 }
  0x15   : > { %245 = vst.msk [vmem:[#allocation2 + $0x44] sm:$0xf] %vm226_vm0, %v14469_v0  ;;  %246 = vst.msk [vmem:[#allocation2 + $0x48] sm:$0xf] %vm226_vm0, %v14469_v0 }
  0x16   : > { %248 = vst.msk [vmem:[#allocation2 + $0x50] sm:$0xf] %vm226_vm0, %v14469_v0  ;;  %249 = vst.msk [vmem:[#allocation2 + $0x54] sm:$0xf] %vm226_vm0, %v14469_v0 }
  0x17   : > { %250 = vst.msk [vmem:[#allocation2 + $0x58] sm:$0xf] %vm226_vm0, %v14469_v0  ;;  %251 = vst.msk [vmem:[#allocation2 + $0x5c] sm:$0xf] %vm226_vm0, %v14469_v0 }
  0x18   : > { %253 = vst.msk [vmem:[#allocation2 + $0x64] sm:$0xf] %vm226_vm0, %v14469_v0  ;;  %254 = vst.msk [vmem:[#allocation2 + $0x68] sm:$0xf] %vm226_vm0, %v14469_v0 }
  0x19   : > { %255 = vst.msk [vmem:[#allocation2 + $0x6c] sm:$0xf] %vm226_vm0, %v14469_v0  ;;  %256 = vst.msk [vmem:[#allocation2 + $0x70] sm:$0xf] %vm226_vm0, %v14469_v0 }
  0x1a   : > { %258 = vst.msk [vmem:[#allocation2 + $0x78] sm:$0xf] %vm226_vm0, %v14469_v0  ;;  %259 = vst.msk [vmem:[#allocation2 + $0x7c] sm:$0xf] %vm226_vm0, %v14469_v0 }
  0x1b   : > { %260 = vst.msk [vmem:[#allocation2 + $0x80] sm:$0xf] %vm226_vm0, %v14469_v0  ;;  %261 = vst.msk [vmem:[#allocation2 + $0x84] sm:$0xf] %vm226_vm0, %v14469_v0 }
  0x1c   : > { %263 = vst.msk [vmem:[#allocation2 + $0x8c] sm:$0xf] %vm226_vm0, %v14469_v0  ;;  %264 = vst.msk [vmem:[#allocation2 + $0x90] sm:$0xf] %vm226_vm0, %v14469_v0 }
  0x1d   : > { %265 = vst.msk [vmem:[#allocation2 + $0x94] sm:$0xf] %vm226_vm0, %v14469_v0  ;;  %266 = vst.msk [vmem:[#allocation2 + $0x98] sm:$0xf] %vm226_vm0, %v14469_v0 }
  0x1e   : > { %268 = vst.msk [vmem:[#allocation2 + $0xa0] sm:$0xf] %vm226_vm0, %v14469_v0  ;;  %269 = vst.msk [vmem:[#allocation2 + $0xa4] sm:$0xf] %vm226_vm0, %v14469_v0 }
  0x1f   : > { %270 = vst.msk [vmem:[#allocation2 + $0xa8] sm:$0xf] %vm226_vm0, %v14469_v0  ;;  %271 = vst.msk [vmem:[#allocation2 + $0xac] sm:$0xf] %vm226_vm0, %v14469_v0 }
  0x20   : > { %273 = vst.msk [vmem:[#allocation2 + $0xb4] sm:$0xf] %vm226_vm0, %v14469_v0  ;;  %274 = vst.msk [vmem:[#allocation2 + $0xb8] sm:$0xf] %vm226_vm0, %v14469_v0 }
  0x21   : > { %275 = vst.msk [vmem:[#allocation2 + $0xbc] sm:$0xf] %vm226_vm0, %v14469_v0  ;;  %276 = vst.msk [vmem:[#allocation2 + $0xc0] sm:$0xf] %vm226_vm0, %v14469_v0 }
  0x22   : > { %278 = vst.msk [vmem:[#allocation2 + $0xc8] sm:$0xf] %vm226_vm0, %v14469_v0  ;;  %279 = vst.msk [vmem:[#allocation2 + $0xcc] sm:$0xf] %vm226_vm0, %v14469_v0 }
  0x23   : > { %280 = vst.msk [vmem:[#allocation2 + $0xd0] sm:$0xf] %vm226_vm0, %v14469_v0  ;;  %281 = vst.msk [vmem:[#allocation2 + $0xd4] sm:$0xf] %vm226_vm0, %v14469_v0 }
  0x24   : > { %283 = vst.msk [vmem:[#allocation2 + $0xdc] sm:$0xf] %vm226_vm0, %v14469_v0  ;;  %284 = vst.msk [vmem:[#allocation2 + $0xe0] sm:$0xf] %vm226_vm0, %v14469_v0 }
  0x25   : > { %285 = vst.msk [vmem:[#allocation2 + $0xe4] sm:$0xf] %vm226_vm0, %v14469_v0  ;;  %286 = vst.msk [vmem:[#allocation2 + $0xe8] sm:$0xf] %vm226_vm0, %v14469_v0 }
  0x26   : > { %288 = vst.msk [vmem:[#allocation2 + $0xf0] sm:$0xf] %vm226_vm0, %v14469_v0  ;;  %289 = vst.msk [vmem:[#allocation2 + $0xf4] sm:$0xf] %vm226_vm0, %v14469_v0 }
  0x27   : > { %290 = vst.msk [vmem:[#allocation2 + $0xf8] sm:$0xf] %vm226_vm0, %v14469_v0  ;;  %291 = vst.msk [vmem:[#allocation2 + $0xfc] sm:$0xf] %vm226_vm0, %v14469_v0 }
  0x28   : > { %293 = vst.msk [vmem:[#allocation2 + $0x104] sm:$0xf] %vm226_vm0, %v14469_v0  ;;  %294 = vst.msk [vmem:[#allocation2 + $0x108] sm:$0xf] %vm226_vm0, %v14469_v0 }
  0x29   : > { %295 = vst.msk [vmem:[#allocation2 + $0x10c] sm:$0xf] %vm226_vm0, %v14469_v0  ;;  %296 = vst.msk [vmem:[#allocation2 + $0x110] sm:$0xf] %vm226_vm0, %v14469_v0 }
  0x2a   : > { %298 = vst.msk [vmem:[#allocation2 + $0x118] sm:$0xf] %vm226_vm0, %v14469_v0  ;;  %299 = vst.msk [vmem:[#allocation2 + $0x11c] sm:$0xf] %vm226_vm0, %v14469_v0 }
  0x2b   : > { %300 = vst.msk [vmem:[#allocation2 + $0x120] sm:$0xf] %vm226_vm0, %v14469_v0  ;;  %301 = vst.msk [vmem:[#allocation2 + $0x124] sm:$0xf] %vm226_vm0, %v14469_v0 }
  0x2c   : > { %303 = vst.msk [vmem:[#allocation2 + $0x12c] sm:$0xf] %vm226_vm0, %v14469_v0  ;;  %304 = vst.msk [vmem:[#allocation2 + $0x130] sm:$0xf] %vm226_vm0, %v14469_v0 }
  0x2d   : > { %305 = vst.msk [vmem:[#allocation2 + $0x134] sm:$0xf] %vm226_vm0, %v14469_v0  ;;  %306 = vst.msk [vmem:[#allocation2 + $0x138] sm:$0xf] %vm226_vm0, %v14469_v0 }
  0x2e   : > { %308 = vst.msk [vmem:[#allocation2 + $0x140] sm:$0xf] %vm226_vm0, %v14469_v0  ;;  %309 = vst.msk [vmem:[#allocation2 + $0x144] sm:$0xf] %vm226_vm0, %v14469_v0 }
  0x2f   : > { %310 = vst.msk [vmem:[#allocation2 + $0x148] sm:$0xf] %vm226_vm0, %v14469_v0  ;;  %311 = vst.msk [vmem:[#allocation2 + $0x14c] sm:$0xf] %vm226_vm0, %v14469_v0 }
  0x30   : > { %313 = vst.msk [vmem:[#allocation2 + $0x154] sm:$0xf] %vm226_vm0, %v14469_v0  ;;  %314 = vst.msk [vmem:[#allocation2 + $0x158] sm:$0xf] %vm226_vm0, %v14469_v0 }
  0x31   : > { %315 = vst.msk [vmem:[#allocation2 + $0x15c] sm:$0xf] %vm226_vm0, %v14469_v0  ;;  %316 = vst.msk [vmem:[#allocation2 + $0x160] sm:$0xf] %vm226_vm0, %v14469_v0 }
  0x32   : > { %318 = vst.msk [vmem:[#allocation2 + $0x168] sm:$0xf] %vm226_vm0, %v14469_v0  ;;  %319 = vst.msk [vmem:[#allocation2 + $0x16c] sm:$0xf] %vm226_vm0, %v14469_v0 }
  0x33   : > { %320 = vst.msk [vmem:[#allocation2 + $0x170] sm:$0xf] %vm226_vm0, %v14469_v0  ;;  %321 = vst.msk [vmem:[#allocation2 + $0x174] sm:$0xf] %vm226_vm0, %v14469_v0 }
  0x34   : > { %323 = vst.msk [vmem:[#allocation2 + $0x17c] sm:$0xf] %vm226_vm0, %v14469_v0  ;;  %324 = vst.msk [vmem:[#allocation2 + $0x180] sm:$0xf] %vm226_vm0, %v14469_v0 }
  0x35   : > { %325 = vst.msk [vmem:[#allocation2 + $0x184] sm:$0xf] %vm226_vm0, %v14469_v0  ;;  %326 = vst.msk [vmem:[#allocation2 + $0x188] sm:$0xf] %vm226_vm0, %v14469_v0 }
  0x36   : > { %328 = vst.msk [vmem:[#allocation2 + $0x190] sm:$0xf] %vm226_vm0, %v14469_v0  ;;  %329 = vst.msk [vmem:[#allocation2 + $0x194] sm:$0xf] %vm226_vm0, %v14469_v0 }
  0x37   : > { %330 = vst.msk [vmem:[#allocation2 + $0x198] sm:$0xf] %vm226_vm0, %v14469_v0  ;;  %331 = vst.msk [vmem:[#allocation2 + $0x19c] sm:$0xf] %vm226_vm0, %v14469_v0 }
  0x38   : > { %333 = vst.msk [vmem:[#allocation2 + $0x1a4] sm:$0xf] %vm226_vm0, %v14469_v0  ;;  %334 = vst.msk [vmem:[#allocation2 + $0x1a8] sm:$0xf] %vm226_vm0, %v14469_v0 }
  0x39   : > { %335 = vst.msk [vmem:[#allocation2 + $0x1ac] sm:$0xf] %vm226_vm0, %v14469_v0  ;;  %336 = vst.msk [vmem:[#allocation2 + $0x1b0] sm:$0xf] %vm226_vm0, %v14469_v0 }
  0x3a   : > { %338 = vst.msk [vmem:[#allocation2 + $0x1b8] sm:$0xf] %vm226_vm0, %v14469_v0  ;;  %339 = vst.msk [vmem:[#allocation2 + $0x1bc] sm:$0xf] %vm226_vm0, %v14469_v0 }
  0x3b   : > { %340 = vst.msk [vmem:[#allocation2 + $0x1c0] sm:$0xf] %vm226_vm0, %v14469_v0  ;;  %341 = vst.msk [vmem:[#allocation2 + $0x1c4] sm:$0xf] %vm226_vm0, %v14469_v0 }
  0x3c   : > { %343 = vst.msk [vmem:[#allocation2 + $0x1cc] sm:$0xf] %vm226_vm0, %v14469_v0  ;;  %344 = vst.msk [vmem:[#allocation2 + $0x1d0] sm:$0xf] %vm226_vm0, %v14469_v0 }
  0x3d   : > { %345 = vst.msk [vmem:[#allocation2 + $0x1d4] sm:$0xf] %vm226_vm0, %v14469_v0  ;;  %346 = vst.msk [vmem:[#allocation2 + $0x1d8] sm:$0xf] %vm226_vm0, %v14469_v0 }
  0x3e   : > { %348 = vst.msk [vmem:[#allocation2 + $0x1e0] sm:$0xf] %vm226_vm0, %v14469_v0  ;;  %349 = vst.msk [vmem:[#allocation2 + $0x1e4] sm:$0xf] %vm226_vm0, %v14469_v0 }
  0x3f   : > { %350 = vst.msk [vmem:[#allocation2 + $0x1e8] sm:$0xf] %vm226_vm0, %v14469_v0  ;;  %351 = vst.msk [vmem:[#allocation2 + $0x1ec] sm:$0xf] %vm226_vm0, %v14469_v0 }
  0x40   : > { %353 = vst.msk [vmem:[#allocation2 + $0x1f4] sm:$0xf] %vm226_vm0, %v14469_v0  ;;  %354 = vst.msk [vmem:[#allocation2 + $0x1f8] sm:$0xf] %vm226_vm0, %v14469_v0 }
  0x41   : > { %355 = vst.msk [vmem:[#allocation2 + $0x1fc] sm:$0xf] %vm226_vm0, %v14469_v0  ;;  %356 = vst.msk [vmem:[#allocation2 + $0x200] sm:$0xf] %vm226_vm0, %v14469_v0 }
  0x42   : > { %358 = vst.msk [vmem:[#allocation2 + $0x208] sm:$0xf] %vm226_vm0, %v14469_v0  ;;  %359 = vst.msk [vmem:[#allocation2 + $0x20c] sm:$0xf] %vm226_vm0, %v14469_v0 }
  0x43   : > { %360 = vst.msk [vmem:[#allocation2 + $0x210] sm:$0xf] %vm226_vm0, %v14469_v0  ;;  %361 = vst.msk [vmem:[#allocation2 + $0x214] sm:$0xf] %vm226_vm0, %v14469_v0 }
  0x44   : > { %363 = vst.msk [vmem:[#allocation2 + $0x21c] sm:$0xf] %vm226_vm0, %v14469_v0  ;;  %364 = vst.msk [vmem:[#allocation2 + $0x220] sm:$0xf] %vm226_vm0, %v14469_v0 }
  0x45   : > { %365 = vst.msk [vmem:[#allocation2 + $0x224] sm:$0xf] %vm226_vm0, %v14469_v0  ;;  %366 = vst.msk [vmem:[#allocation2 + $0x228] sm:$0xf] %vm226_vm0, %v14469_v0 }
  0x46   : > { %368 = vst.msk [vmem:[#allocation2 + $0x230] sm:$0xf] %vm226_vm0, %v14469_v0  ;;  %369 = vst.msk [vmem:[#allocation2 + $0x234] sm:$0xf] %vm226_vm0, %v14469_v0 }
  0x47   : > { %370 = vst.msk [vmem:[#allocation2 + $0x238] sm:$0xf] %vm226_vm0, %v14469_v0  ;;  %371 = vst.msk [vmem:[#allocation2 + $0x23c] sm:$0xf] %vm226_vm0, %v14469_v0 }
  0x48   : > { %373 = vst.msk [vmem:[#allocation2 + $0x244] sm:$0xf] %vm226_vm0, %v14469_v0  ;;  %374 = vst.msk [vmem:[#allocation2 + $0x248] sm:$0xf] %vm226_vm0, %v14469_v0 }
  0x49   : > { %375 = vst.msk [vmem:[#allocation2 + $0x24c] sm:$0xf] %vm226_vm0, %v14469_v0  ;;  %376 = vst.msk [vmem:[#allocation2 + $0x250] sm:$0xf] %vm226_vm0, %v14469_v0 }
  0x4a   : > { %378 = vst.msk [vmem:[#allocation2 + $0x258] sm:$0xf] %vm226_vm0, %v14469_v0  ;;  %379 = vst.msk [vmem:[#allocation2 + $0x25c] sm:$0xf] %vm226_vm0, %v14469_v0 }
  0x4b   : > { %380 = vst.msk [vmem:[#allocation2 + $0x260] sm:$0xf] %vm226_vm0, %v14469_v0  ;;  %381 = vst.msk [vmem:[#allocation2 + $0x264] sm:$0xf] %vm226_vm0, %v14469_v0 }
  0x4c   : > { %383 = vst.msk [vmem:[#allocation2 + $0x26c] sm:$0xf] %vm226_vm0, %v14469_v0  ;;  %384 = vst.msk [vmem:[#allocation2 + $0x270] sm:$0xf] %vm226_vm0, %v14469_v0 }
  0x4d   : > { %385 = vst.msk [vmem:[#allocation2 + $0x274] sm:$0xf] %vm226_vm0, %v14469_v0  ;;  %386 = vst.msk [vmem:[#allocation2 + $0x278] sm:$0xf] %vm226_vm0, %v14469_v0 }
  0x4e   : > { %388 = vst.msk [vmem:[#allocation2 + $0x280] sm:$0xf] %vm226_vm0, %v14469_v0  ;;  %389 = vst.msk [vmem:[#allocation2 + $0x284] sm:$0xf] %vm226_vm0, %v14469_v0 }
  0x4f   : > { %390 = vst.msk [vmem:[#allocation2 + $0x288] sm:$0xf] %vm226_vm0, %v14469_v0  ;;  %391 = vst.msk [vmem:[#allocation2 + $0x28c] sm:$0xf] %vm226_vm0, %v14469_v0 }
  0x50   : > { %393 = vst.msk [vmem:[#allocation2 + $0x294] sm:$0xf] %vm226_vm0, %v14469_v0  ;;  %394 = vst.msk [vmem:[#allocation2 + $0x298] sm:$0xf] %vm226_vm0, %v14469_v0 }
  0x51   : > { %395 = vst.msk [vmem:[#allocation2 + $0x29c] sm:$0xf] %vm226_vm0, %v14469_v0  ;;  %396 = vst.msk [vmem:[#allocation2 + $0x2a0] sm:$0xf] %vm226_vm0, %v14469_v0 }
  0x52   : > { %398 = vst.msk [vmem:[#allocation3] sm:$0xf] %vm226_vm0, %v14469_v0  ;;  %399 = vst.msk [vmem:[#allocation3 + $0x4] sm:$0xf] %vm226_vm0, %v14469_v0 }
  0x53   : > { %400 = vst.msk [vmem:[#allocation3 + $0x8] sm:$0xf] %vm226_vm0, %v14469_v0  ;;  %401 = vst.msk [vmem:[#allocation3 + $0xc] sm:$0xf] %vm226_vm0, %v14469_v0 }
  0x54   : > { %403 = vst.msk [vmem:[#allocation3 + $0x14] sm:$0xf] %vm226_vm0, %v14469_v0  ;;  %404 = vst.msk [vmem:[#allocation3 + $0x18] sm:$0xf] %vm226_vm0, %v14469_v0 }
  0x55   : > { %405 = vst.msk [vmem:[#allocation3 + $0x1c] sm:$0xf] %vm226_vm0, %v14469_v0  ;;  %406 = vst.msk [vmem:[#allocation3 + $0x20] sm:$0xf] %vm226_vm0, %v14469_v0 }
  0x56   : > { %408 = vst.msk [vmem:[#allocation3 + $0x28] sm:$0xf] %vm226_vm0, %v14469_v0  ;;  %409 = vst.msk [vmem:[#allocation3 + $0x2c] sm:$0xf] %vm226_vm0, %v14469_v0 }
  0x57   : > { %410 = vst.msk [vmem:[#allocation3 + $0x30] sm:$0xf] %vm226_vm0, %v14469_v0  ;;  %411 = vst.msk [vmem:[#allocation3 + $0x34] sm:$0xf] %vm226_vm0, %v14469_v0 }
  0x58   : > { %413 = vst.msk [vmem:[#allocation3 + $0x3c] sm:$0xf] %vm226_vm0, %v14469_v0  ;;  %414 = vst.msk [vmem:[#allocation3 + $0x40] sm:$0xf] %vm226_vm0, %v14469_v0 }
  0x59   : > { %415 = vst.msk [vmem:[#allocation3 + $0x44] sm:$0xf] %vm226_vm0, %v14469_v0  ;;  %416 = vst.msk [vmem:[#allocation3 + $0x48] sm:$0xf] %vm226_vm0, %v14469_v0 }
  0x5a   : > { %418 = vst.msk [vmem:[#allocation3 + $0x50] sm:$0xf] %vm226_vm0, %v14469_v0  ;;  %419 = vst.msk [vmem:[#allocation3 + $0x54] sm:$0xf] %vm226_vm0, %v14469_v0 }
  0x5b   : > { %420 = vst.msk [vmem:[#allocation3 + $0x58] sm:$0xf] %vm226_vm0, %v14469_v0  ;;  %421 = vst.msk [vmem:[#allocation3 + $0x5c] sm:$0xf] %vm226_vm0, %v14469_v0 }
  0x5c   : > { %423 = vst.msk [vmem:[#allocation3 + $0x64] sm:$0xf] %vm226_vm0, %v14469_v0  ;;  %424 = vst.msk [vmem:[#allocation3 + $0x68] sm:$0xf] %vm226_vm0, %v14469_v0 }
  0x5d   : > { %425 = vst.msk [vmem:[#allocation3 + $0x6c] sm:$0xf] %vm226_vm0, %v14469_v0  ;;  %426 = vst.msk [vmem:[#allocation3 + $0x70] sm:$0xf] %vm226_vm0, %v14469_v0 }
  0x5e   : > { %428 = vst.msk [vmem:[#allocation3 + $0x78] sm:$0xf] %vm226_vm0, %v14469_v0  ;;  %429 = vst.msk [vmem:[#allocation3 + $0x7c] sm:$0xf] %vm226_vm0, %v14469_v0 }
  0x5f   : > { %430 = vst.msk [vmem:[#allocation3 + $0x80] sm:$0xf] %vm226_vm0, %v14469_v0  ;;  %431 = vst.msk [vmem:[#allocation3 + $0x84] sm:$0xf] %vm226_vm0, %v14469_v0 }
  0x60   : > { %433 = vst.msk [vmem:[#allocation3 + $0x8c] sm:$0xf] %vm226_vm0, %v14469_v0  ;;  %434 = vst.msk [vmem:[#allocation3 + $0x90] sm:$0xf] %vm226_vm0, %v14469_v0 }
  0x61   : > { %435 = vst.msk [vmem:[#allocation3 + $0x94] sm:$0xf] %vm226_vm0, %v14469_v0  ;;  %436 = vst.msk [vmem:[#allocation3 + $0x98] sm:$0xf] %vm226_vm0, %v14469_v0 }
  0x62   : > { %438 = vst.msk [vmem:[#allocation3 + $0xa0] sm:$0xf] %vm226_vm0, %v14469_v0  ;;  %439 = vst.msk [vmem:[#allocation3 + $0xa4] sm:$0xf] %vm226_vm0, %v14469_v0 }
  0x63   : > { %440 = vst.msk [vmem:[#allocation3 + $0xa8] sm:$0xf] %vm226_vm0, %v14469_v0  ;;  %441 = vst.msk [vmem:[#allocation3 + $0xac] sm:$0xf] %vm226_vm0, %v14469_v0 }
  0x64   : > { %443 = vst.msk [vmem:[#allocation3 + $0xb4] sm:$0xf] %vm226_vm0, %v14469_v0  ;;  %444 = vst.msk [vmem:[#allocation3 + $0xb8] sm:$0xf] %vm226_vm0, %v14469_v0 }
  0x65   : > { %445 = vst.msk [vmem:[#allocation3 + $0xbc] sm:$0xf] %vm226_vm0, %v14469_v0  ;;  %446 = vst.msk [vmem:[#allocation3 + $0xc0] sm:$0xf] %vm226_vm0, %v14469_v0 }
  0x66   : > { %448 = vst.msk [vmem:[#allocation3 + $0xc8] sm:$0xf] %vm226_vm0, %v14469_v0  ;;  %449 = vst.msk [vmem:[#allocation3 + $0xcc] sm:$0xf] %vm226_vm0, %v14469_v0 }
  0x67   : > { %450 = vst.msk [vmem:[#allocation3 + $0xd0] sm:$0xf] %vm226_vm0, %v14469_v0  ;;  %451 = vst.msk [vmem:[#allocation3 + $0xd4] sm:$0xf] %vm226_vm0, %v14469_v0 }
  0x68   : > { %453 = vst.msk [vmem:[#allocation3 + $0xdc] sm:$0xf] %vm226_vm0, %v14469_v0  ;;  %454 = vst.msk [vmem:[#allocation3 + $0xe0] sm:$0xf] %vm226_vm0, %v14469_v0 }
  0x69   : > { %455 = vst.msk [vmem:[#allocation3 + $0xe4] sm:$0xf] %vm226_vm0, %v14469_v0  ;;  %456 = vst.msk [vmem:[#allocation3 + $0xe8] sm:$0xf] %vm226_vm0, %v14469_v0 }
  0x6a   : > { %458 = vst.msk [vmem:[#allocation3 + $0xf0] sm:$0xf] %vm226_vm0, %v14469_v0  ;;  %459 = vst.msk [vmem:[#allocation3 + $0xf4] sm:$0xf] %vm226_vm0, %v14469_v0 }
  0x6b   : > { %460 = vst.msk [vmem:[#allocation3 + $0xf8] sm:$0xf] %vm226_vm0, %v14469_v0  ;;  %461 = vst.msk [vmem:[#allocation3 + $0xfc] sm:$0xf] %vm226_vm0, %v14469_v0 }
  0x6c   : > { %463 = vst.msk [vmem:[#allocation3 + $0x104] sm:$0xf] %vm226_vm0, %v14469_v0  ;;  %464 = vst.msk [vmem:[#allocation3 + $0x108] sm:$0xf] %vm226_vm0, %v14469_v0 }
  0x6d   : > { %465 = vst.msk [vmem:[#allocation3 + $0x10c] sm:$0xf] %vm226_vm0, %v14469_v0  ;;  %466 = vst.msk [vmem:[#allocation3 + $0x110] sm:$0xf] %vm226_vm0, %v14469_v0 }
  0x6e   : > { %468 = vst.msk [vmem:[#allocation3 + $0x118] sm:$0xf] %vm226_vm0, %v14469_v0  ;;  %469 = vst.msk [vmem:[#allocation3 + $0x11c] sm:$0xf] %vm226_vm0, %v14469_v0 }
  0x6f   : > { %470 = vst.msk [vmem:[#allocation3 + $0x120] sm:$0xf] %vm226_vm0, %v14469_v0  ;;  %471 = vst.msk [vmem:[#allocation3 + $0x124] sm:$0xf] %vm226_vm0, %v14469_v0 }
  0x70   : > { %473 = vst.msk [vmem:[#allocation3 + $0x12c] sm:$0xf] %vm226_vm0, %v14469_v0  ;;  %474 = vst.msk [vmem:[#allocation3 + $0x130] sm:$0xf] %vm226_vm0, %v14469_v0 }
  0x71   : > { %475 = vst.msk [vmem:[#allocation3 + $0x134] sm:$0xf] %vm226_vm0, %v14469_v0  ;;  %476 = vst.msk [vmem:[#allocation3 + $0x138] sm:$0xf] %vm226_vm0, %v14469_v0 }
  0x72   : > { %478 = vst.msk [vmem:[#allocation3 + $0x140] sm:$0xf] %vm226_vm0, %v14469_v0  ;;  %479 = vst.msk [vmem:[#allocation3 + $0x144] sm:$0xf] %vm226_vm0, %v14469_v0 }
  0x73   : > { %480 = vst.msk [vmem:[#allocation3 + $0x148] sm:$0xf] %vm226_vm0, %v14469_v0  ;;  %481 = vst.msk [vmem:[#allocation3 + $0x14c] sm:$0xf] %vm226_vm0, %v14469_v0 }
  0x74   : > { %483 = vst.msk [vmem:[#allocation3 + $0x154] sm:$0xf] %vm226_vm0, %v14469_v0  ;;  %484 = vst.msk [vmem:[#allocation3 + $0x158] sm:$0xf] %vm226_vm0, %v14469_v0 }
  0x75   : > { %485 = vst.msk [vmem:[#allocation3 + $0x15c] sm:$0xf] %vm226_vm0, %v14469_v0  ;;  %486 = vst.msk [vmem:[#allocation3 + $0x160] sm:$0xf] %vm226_vm0, %v14469_v0 }
  0x76   : > { %488 = vst.msk [vmem:[#allocation3 + $0x168] sm:$0xf] %vm226_vm0, %v14469_v0  ;;  %489 = vst.msk [vmem:[#allocation3 + $0x16c] sm:$0xf] %vm226_vm0, %v14469_v0 }
  0x77   : > { %490 = vst.msk [vmem:[#allocation3 + $0x170] sm:$0xf] %vm226_vm0, %v14469_v0  ;;  %491 = vst.msk [vmem:[#allocation3 + $0x174] sm:$0xf] %vm226_vm0, %v14469_v0 }
  0x78   : > { %493 = vst.msk [vmem:[#allocation3 + $0x17c] sm:$0xf] %vm226_vm0, %v14469_v0  ;;  %494 = vst.msk [vmem:[#allocation3 + $0x180] sm:$0xf] %vm226_vm0, %v14469_v0 }
  0x79   : > { %495 = vst.msk [vmem:[#allocation3 + $0x184] sm:$0xf] %vm226_vm0, %v14469_v0  ;;  %496 = vst.msk [vmem:[#allocation3 + $0x188] sm:$0xf] %vm226_vm0, %v14469_v0 }
  0x7a   : > { %498 = vst.msk [vmem:[#allocation3 + $0x190] sm:$0xf] %vm226_vm0, %v14469_v0  ;;  %499 = vst.msk [vmem:[#allocation3 + $0x194] sm:$0xf] %vm226_vm0, %v14469_v0 }
  0x7b   : > { %500 = vst.msk [vmem:[#allocation3 + $0x198] sm:$0xf] %vm226_vm0, %v14469_v0  ;;  %501 = vst.msk [vmem:[#allocation3 + $0x19c] sm:$0xf] %vm226_vm0, %v14469_v0 }
  0x7c   : > { %503 = vst.msk [vmem:[#allocation3 + $0x1a4] sm:$0xf] %vm226_vm0, %v14469_v0  ;;  %504 = vst.msk [vmem:[#allocation3 + $0x1a8] sm:$0xf] %vm226_vm0, %v14469_v0 }
  0x7d   : > { %505 = vst.msk [vmem:[#allocation3 + $0x1ac] sm:$0xf] %vm226_vm0, %v14469_v0  ;;  %506 = vst.msk [vmem:[#allocation3 + $0x1b0] sm:$0xf] %vm226_vm0, %v14469_v0 }
  0x7e   : > { %508 = vst.msk [vmem:[#allocation3 + $0x1b8] sm:$0xf] %vm226_vm0, %v14469_v0  ;;  %509 = vst.msk [vmem:[#allocation3 + $0x1bc] sm:$0xf] %vm226_vm0, %v14469_v0 }
  0x7f   : > { %510 = vst.msk [vmem:[#allocation3 + $0x1c0] sm:$0xf] %vm226_vm0, %v14469_v0  ;;  %511 = vst.msk [vmem:[#allocation3 + $0x1c4] sm:$0xf] %vm226_vm0, %v14469_v0 }
  0x80   : > { %513 = vst.msk [vmem:[#allocation3 + $0x1cc] sm:$0xf] %vm226_vm0, %v14469_v0  ;;  %514 = vst.msk [vmem:[#allocation3 + $0x1d0] sm:$0xf] %vm226_vm0, %v14469_v0 }
  0x81   : > { %515 = vst.msk [vmem:[#allocation3 + $0x1d4] sm:$0xf] %vm226_vm0, %v14469_v0  ;;  %516 = vst.msk [vmem:[#allocation3 + $0x1d8] sm:$0xf] %vm226_vm0, %v14469_v0 }
  0x82   : > { %518 = vst.msk [vmem:[#allocation3 + $0x1e0] sm:$0xf] %vm226_vm0, %v14469_v0  ;;  %519 = vst.msk [vmem:[#allocation3 + $0x1e4] sm:$0xf] %vm226_vm0, %v14469_v0 }
  0x83   : > { %520 = vst.msk [vmem:[#allocation3 + $0x1e8] sm:$0xf] %vm226_vm0, %v14469_v0  ;;  %521 = vst.msk [vmem:[#allocation3 + $0x1ec] sm:$0xf] %vm226_vm0, %v14469_v0 }
  0x84   : > { %523 = vst.msk [vmem:[#allocation3 + $0x1f4] sm:$0xf] %vm226_vm0, %v14469_v0  ;;  %524 = vst.msk [vmem:[#allocation3 + $0x1f8] sm:$0xf] %vm226_vm0, %v14469_v0 }
  0x85   : > { %525 = vst.msk [vmem:[#allocation3 + $0x1fc] sm:$0xf] %vm226_vm0, %v14469_v0  ;;  %526 = vst.msk [vmem:[#allocation3 + $0x200] sm:$0xf] %vm226_vm0, %v14469_v0 }
  0x86   : > { %528 = vst.msk [vmem:[#allocation3 + $0x208] sm:$0xf] %vm226_vm0, %v14469_v0  ;;  %529 = vst.msk [vmem:[#allocation3 + $0x20c] sm:$0xf] %vm226_vm0, %v14469_v0 }
  0x87   : > { %530 = vst.msk [vmem:[#allocation3 + $0x210] sm:$0xf] %vm226_vm0, %v14469_v0  ;;  %531 = vst.msk [vmem:[#allocation3 + $0x214] sm:$0xf] %vm226_vm0, %v14469_v0 }
  0x88   : > { %533 = vst.msk [vmem:[#allocation3 + $0x21c] sm:$0xf] %vm226_vm0, %v14469_v0  ;;  %534 = vst.msk [vmem:[#allocation3 + $0x220] sm:$0xf] %vm226_vm0, %v14469_v0 }
  0x89   : > { %535 = vst.msk [vmem:[#allocation3 + $0x224] sm:$0xf] %vm226_vm0, %v14469_v0  ;;  %536 = vst.msk [vmem:[#allocation3 + $0x228] sm:$0xf] %vm226_vm0, %v14469_v0 }
  0x8a   : > { %538 = vst.msk [vmem:[#allocation3 + $0x230] sm:$0xf] %vm226_vm0, %v14469_v0  ;;  %539 = vst.msk [vmem:[#allocation3 + $0x234] sm:$0xf] %vm226_vm0, %v14469_v0 }
  0x8b   : > { %540 = vst.msk [vmem:[#allocation3 + $0x238] sm:$0xf] %vm226_vm0, %v14469_v0  ;;  %541 = vst.msk [vmem:[#allocation3 + $0x23c] sm:$0xf] %vm226_vm0, %v14469_v0 }
  0x8c   : > { %543 = vst.msk [vmem:[#allocation3 + $0x244] sm:$0xf] %vm226_vm0, %v14469_v0  ;;  %544 = vst.msk [vmem:[#allocation3 + $0x248] sm:$0xf] %vm226_vm0, %v14469_v0 }
  0x8d   : > { %545 = vst.msk [vmem:[#allocation3 + $0x24c] sm:$0xf] %vm226_vm0, %v14469_v0  ;;  %546 = vst.msk [vmem:[#allocation3 + $0x250] sm:$0xf] %vm226_vm0, %v14469_v0 }
  0x8e   : > { %548 = vst.msk [vmem:[#allocation3 + $0x258] sm:$0xf] %vm226_vm0, %v14469_v0  ;;  %549 = vst.msk [vmem:[#allocation3 + $0x25c] sm:$0xf] %vm226_vm0, %v14469_v0 }
  0x8f   : > { %550 = vst.msk [vmem:[#allocation3 + $0x260] sm:$0xf] %vm226_vm0, %v14469_v0  ;;  %551 = vst.msk [vmem:[#allocation3 + $0x264] sm:$0xf] %vm226_vm0, %v14469_v0 }
  0x90   : > { %553 = vst.msk [vmem:[#allocation3 + $0x26c] sm:$0xf] %vm226_vm0, %v14469_v0  ;;  %554 = vst.msk [vmem:[#allocation3 + $0x270] sm:$0xf] %vm226_vm0, %v14469_v0 }
  0x91   : > { %555 = vst.msk [vmem:[#allocation3 + $0x274] sm:$0xf] %vm226_vm0, %v14469_v0  ;;  %556 = vst.msk [vmem:[#allocation3 + $0x278] sm:$0xf] %vm226_vm0, %v14469_v0 }
  0x92   : > { %558 = vst.msk [vmem:[#allocation3 + $0x280] sm:$0xf] %vm226_vm0, %v14469_v0  ;;  %559 = vst.msk [vmem:[#allocation3 + $0x284] sm:$0xf] %vm226_vm0, %v14469_v0 }
  0x93   : > { %560 = vst.msk [vmem:[#allocation3 + $0x288] sm:$0xf] %vm226_vm0, %v14469_v0  ;;  %561 = vst.msk [vmem:[#allocation3 + $0x28c] sm:$0xf] %vm226_vm0, %v14469_v0 }
  0x94   : > { %563 = vst.msk [vmem:[#allocation3 + $0x294] sm:$0xf] %vm226_vm0, %v14469_v0  ;;  %564 = vst.msk [vmem:[#allocation3 + $0x298] sm:$0xf] %vm226_vm0, %v14469_v0 }
  0x95   : > { %565 = vst.msk [vmem:[#allocation3 + $0x29c] sm:$0xf] %vm226_vm0, %v14469_v0  ;;  %566 = vst.msk [vmem:[#allocation3 + $0x2a0] sm:$0xf] %vm226_vm0, %v14469_v0 }
  0x96   : > { %232 = vst.msk [vmem:[#allocation2 + $0x10] sm:$0x1] %vm231_vm1, %v14469_v0  ;;  %237 = vst.msk [vmem:[#allocation2 + $0x24] sm:$0x1] %vm231_vm1, %v14469_v0 }
  0x97   : > { %242 = vst.msk [vmem:[#allocation2 + $0x38] sm:$0x1] %vm231_vm1, %v14469_v0  ;;  %247 = vst.msk [vmem:[#allocation2 + $0x4c] sm:$0x1] %vm231_vm1, %v14469_v0 }
  0x98   : > { %252 = vst.msk [vmem:[#allocation2 + $0x60] sm:$0x1] %vm231_vm1, %v14469_v0  ;;  %257 = vst.msk [vmem:[#allocation2 + $0x74] sm:$0x1] %vm231_vm1, %v14469_v0 }
  0x99   : > { %262 = vst.msk [vmem:[#allocation2 + $0x88] sm:$0x1] %vm231_vm1, %v14469_v0  ;;  %267 = vst.msk [vmem:[#allocation2 + $0x9c] sm:$0x1] %vm231_vm1, %v14469_v0 }
  0x9a   : > { %272 = vst.msk [vmem:[#allocation2 + $0xb0] sm:$0x1] %vm231_vm1, %v14469_v0  ;;  %277 = vst.msk [vmem:[#allocation2 + $0xc4] sm:$0x1] %vm231_vm1, %v14469_v0 }
  0x9b   : > { %282 = vst.msk [vmem:[#allocation2 + $0xd8] sm:$0x1] %vm231_vm1, %v14469_v0  ;;  %287 = vst.msk [vmem:[#allocation2 + $0xec] sm:$0x1] %vm231_vm1, %v14469_v0 }
  0x9c   : > { %292 = vst.msk [vmem:[#allocation2 + $0x100] sm:$0x1] %vm231_vm1, %v14469_v0  ;;  %297 = vst.msk [vmem:[#allocation2 + $0x114] sm:$0x1] %vm231_vm1, %v14469_v0 }
  0x9d   : > { %302 = vst.msk [vmem:[#allocation2 + $0x128] sm:$0x1] %vm231_vm1, %v14469_v0  ;;  %307 = vst.msk [vmem:[#allocation2 + $0x13c] sm:$0x1] %vm231_vm1, %v14469_v0 }
  0x9e   : > { %312 = vst.msk [vmem:[#allocation2 + $0x150] sm:$0x1] %vm231_vm1, %v14469_v0  ;;  %317 = vst.msk [vmem:[#allocation2 + $0x164] sm:$0x1] %vm231_vm1, %v14469_v0 }
  0x9f   : > { %322 = vst.msk [vmem:[#allocation2 + $0x178] sm:$0x1] %vm231_vm1, %v14469_v0  ;;  %327 = vst.msk [vmem:[#allocation2 + $0x18c] sm:$0x1] %vm231_vm1, %v14469_v0 }
  0xa0   : > { %332 = vst.msk [vmem:[#allocation2 + $0x1a0] sm:$0x1] %vm231_vm1, %v14469_v0  ;;  %337 = vst.msk [vmem:[#allocation2 + $0x1b4] sm:$0x1] %vm231_vm1, %v14469_v0 }
  0xa1   : > { %342 = vst.msk [vmem:[#allocation2 + $0x1c8] sm:$0x1] %vm231_vm1, %v14469_v0  ;;  %347 = vst.msk [vmem:[#allocation2 + $0x1dc] sm:$0x1] %vm231_vm1, %v14469_v0 }
  0xa2   : > { %352 = vst.msk [vmem:[#allocation2 + $0x1f0] sm:$0x1] %vm231_vm1, %v14469_v0  ;;  %357 = vst.msk [vmem:[#allocation2 + $0x204] sm:$0x1] %vm231_vm1, %v14469_v0 }
  0xa3   : > { %362 = vst.msk [vmem:[#allocation2 + $0x218] sm:$0x1] %vm231_vm1, %v14469_v0  ;;  %367 = vst.msk [vmem:[#allocation2 + $0x22c] sm:$0x1] %vm231_vm1, %v14469_v0 }
  0xa4   : > { %372 = vst.msk [vmem:[#allocation2 + $0x240] sm:$0x1] %vm231_vm1, %v14469_v0  ;;  %377 = vst.msk [vmem:[#allocation2 + $0x254] sm:$0x1] %vm231_vm1, %v14469_v0 }
  0xa5   : > { %382 = vst.msk [vmem:[#allocation2 + $0x268] sm:$0x1] %vm231_vm1, %v14469_v0  ;;  %387 = vst.msk [vmem:[#allocation2 + $0x27c] sm:$0x1] %vm231_vm1, %v14469_v0 }
  0xa6   : > { %392 = vst.msk [vmem:[#allocation2 + $0x290] sm:$0x1] %vm231_vm1, %v14469_v0  ;;  %397 = vst.msk [vmem:[#allocation2 + $0x2a4] sm:$0x1] %vm231_vm1, %v14469_v0 }
  0xa7   : > { %402 = vst.msk [vmem:[#allocation3 + $0x10] sm:$0x1] %vm231_vm1, %v14469_v0  ;;  %407 = vst.msk [vmem:[#allocation3 + $0x24] sm:$0x1] %vm231_vm1, %v14469_v0 }
  0xa8   : > { %412 = vst.msk [vmem:[#allocation3 + $0x38] sm:$0x1] %vm231_vm1, %v14469_v0  ;;  %417 = vst.msk [vmem:[#allocation3 + $0x4c] sm:$0x1] %vm231_vm1, %v14469_v0 }
  0xa9   : > { %422 = vst.msk [vmem:[#allocation3 + $0x60] sm:$0x1] %vm231_vm1, %v14469_v0  ;;  %427 = vst.msk [vmem:[#allocation3 + $0x74] sm:$0x1] %vm231_vm1, %v14469_v0 }
  0xaa   : > { %432 = vst.msk [vmem:[#allocation3 + $0x88] sm:$0x1] %vm231_vm1, %v14469_v0  ;;  %437 = vst.msk [vmem:[#allocation3 + $0x9c] sm:$0x1] %vm231_vm1, %v14469_v0 }
  0xab   : > { %442 = vst.msk [vmem:[#allocation3 + $0xb0] sm:$0x1] %vm231_vm1, %v14469_v0  ;;  %447 = vst.msk [vmem:[#allocation3 + $0xc4] sm:$0x1] %vm231_vm1, %v14469_v0 }
  0xac   : > { %452 = vst.msk [vmem:[#allocation3 + $0xd8] sm:$0x1] %vm231_vm1, %v14469_v0  ;;  %457 = vst.msk [vmem:[#allocation3 + $0xec] sm:$0x1] %vm231_vm1, %v14469_v0 }
  0xad   : > { %462 = vst.msk [vmem:[#allocation3 + $0x100] sm:$0x1] %vm231_vm1, %v14469_v0  ;;  %467 = vst.msk [vmem:[#allocation3 + $0x114] sm:$0x1] %vm231_vm1, %v14469_v0 }
  0xae   : > { %472 = vst.msk [vmem:[#allocation3 + $0x128] sm:$0x1] %vm231_vm1, %v14469_v0  ;;  %477 = vst.msk [vmem:[#allocation3 + $0x13c] sm:$0x1] %vm231_vm1, %v14469_v0 }
  0xaf   : > { %482 = vst.msk [vmem:[#allocation3 + $0x150] sm:$0x1] %vm231_vm1, %v14469_v0  ;;  %487 = vst.msk [vmem:[#allocation3 + $0x164] sm:$0x1] %vm231_vm1, %v14469_v0 }
  0xb0   : > { %492 = vst.msk [vmem:[#allocation3 + $0x178] sm:$0x1] %vm231_vm1, %v14469_v0  ;;  %497 = vst.msk [vmem:[#allocation3 + $0x18c] sm:$0x1] %vm231_vm1, %v14469_v0 }
  0xb1   : > { %502 = vst.msk [vmem:[#allocation3 + $0x1a0] sm:$0x1] %vm231_vm1, %v14469_v0  ;;  %507 = vst.msk [vmem:[#allocation3 + $0x1b4] sm:$0x1] %vm231_vm1, %v14469_v0 }
  0xb2   : > { %512 = vst.msk [vmem:[#allocation3 + $0x1c8] sm:$0x1] %vm231_vm1, %v14469_v0  ;;  %517 = vst.msk [vmem:[#allocation3 + $0x1dc] sm:$0x1] %vm231_vm1, %v14469_v0 }
  0xb3   : > { %522 = vst.msk [vmem:[#allocation3 + $0x1f0] sm:$0x1] %vm231_vm1, %v14469_v0  ;;  %527 = vst.msk [vmem:[#allocation3 + $0x204] sm:$0x1] %vm231_vm1, %v14469_v0 }
  0xb4   : > { %532 = vst.msk [vmem:[#allocation3 + $0x218] sm:$0x1] %vm231_vm1, %v14469_v0  ;;  %537 = vst.msk [vmem:[#allocation3 + $0x22c] sm:$0x1] %vm231_vm1, %v14469_v0 }
  0xb5   : > { %542 = vst.msk [vmem:[#allocation3 + $0x240] sm:$0x1] %vm231_vm1, %v14469_v0  ;;  %547 = vst.msk [vmem:[#allocation3 + $0x254] sm:$0x1] %vm231_vm1, %v14469_v0 }
  0xb6   : > { %552 = vst.msk [vmem:[#allocation3 + $0x268] sm:$0x1] %vm231_vm1, %v14469_v0  ;;  %557 = vst.msk [vmem:[#allocation3 + $0x27c] sm:$0x1] %vm231_vm1, %v14469_v0 }
  0xb7   : > { %562 = vst.msk [vmem:[#allocation3 + $0x290] sm:$0x1] %vm231_vm1, %v14469_v0  ;;  %567 = vst.msk [vmem:[#allocation3 + $0x2a4] sm:$0x1] %vm231_vm1, %v14469_v0 }
  0xb8   : > { %569 = vst.msk [vmem:[#allocation4] sm:$0xf] %vm568_vm2, %v14469_v0  ;;  %570 = vst.msk [vmem:[#allocation4 + $0x4] sm:$0xf] %vm568_vm2, %v14469_v0 }
  0xb9   : > { %571 = vst.msk [vmem:[#allocation4 + $0x8] sm:$0xf] %vm568_vm2, %v14469_v0  ;;  %572 = vst.msk [vmem:[#allocation4 + $0xc] sm:$0xf] %vm568_vm2, %v14469_v0 }
  0xba   : > { %575 = vst.msk [vmem:[#allocation4 + $0x14] sm:$0xf] %vm568_vm2, %v14469_v0  ;;  %576 = vst.msk [vmem:[#allocation4 + $0x18] sm:$0xf] %vm568_vm2, %v14469_v0 }
  0xbb   : > { %577 = vst.msk [vmem:[#allocation4 + $0x1c] sm:$0xf] %vm568_vm2, %v14469_v0  ;;  %578 = vst.msk [vmem:[#allocation4 + $0x20] sm:$0xf] %vm568_vm2, %v14469_v0 }
  0xbc   : > { %580 = vst.msk [vmem:[#allocation4 + $0x28] sm:$0xf] %vm568_vm2, %v14469_v0  ;;  %581 = vst.msk [vmem:[#allocation4 + $0x2c] sm:$0xf] %vm568_vm2, %v14469_v0 }
  0xbd   : > { %582 = vst.msk [vmem:[#allocation4 + $0x30] sm:$0xf] %vm568_vm2, %v14469_v0  ;;  %583 = vst.msk [vmem:[#allocation4 + $0x34] sm:$0xf] %vm568_vm2, %v14469_v0 }
  0xbe   : > { %585 = vst.msk [vmem:[#allocation4 + $0x3c] sm:$0xf] %vm568_vm2, %v14469_v0  ;;  %586 = vst.msk [vmem:[#allocation4 + $0x40] sm:$0xf] %vm568_vm2, %v14469_v0 }
  0xbf   : > { %587 = vst.msk [vmem:[#allocation4 + $0x44] sm:$0xf] %vm568_vm2, %v14469_v0  ;;  %588 = vst.msk [vmem:[#allocation4 + $0x48] sm:$0xf] %vm568_vm2, %v14469_v0 }
  0xc0   : > { %590 = vst.msk [vmem:[#allocation4 + $0x50] sm:$0xf] %vm568_vm2, %v14469_v0  ;;  %591 = vst.msk [vmem:[#allocation4 + $0x54] sm:$0xf] %vm568_vm2, %v14469_v0 }
  0xc1   : > { %592 = vst.msk [vmem:[#allocation4 + $0x58] sm:$0xf] %vm568_vm2, %v14469_v0  ;;  %593 = vst.msk [vmem:[#allocation4 + $0x5c] sm:$0xf] %vm568_vm2, %v14469_v0 }
  0xc2   : > { %595 = vst.msk [vmem:[#allocation4 + $0x64] sm:$0xf] %vm568_vm2, %v14469_v0  ;;  %596 = vst.msk [vmem:[#allocation4 + $0x68] sm:$0xf] %vm568_vm2, %v14469_v0 }
  0xc3   : > { %597 = vst.msk [vmem:[#allocation4 + $0x6c] sm:$0xf] %vm568_vm2, %v14469_v0  ;;  %598 = vst.msk [vmem:[#allocation4 + $0x70] sm:$0xf] %vm568_vm2, %v14469_v0 }
  0xc4   : > { %600 = vst.msk [vmem:[#allocation4 + $0x78] sm:$0xf] %vm568_vm2, %v14469_v0  ;;  %601 = vst.msk [vmem:[#allocation4 + $0x7c] sm:$0xf] %vm568_vm2, %v14469_v0 }
  0xc5   : > { %602 = vst.msk [vmem:[#allocation4 + $0x80] sm:$0xf] %vm568_vm2, %v14469_v0  ;;  %603 = vst.msk [vmem:[#allocation4 + $0x84] sm:$0xf] %vm568_vm2, %v14469_v0 }
  0xc6   : > { %605 = vst.msk [vmem:[#allocation4 + $0x8c] sm:$0xf] %vm568_vm2, %v14469_v0  ;;  %606 = vst.msk [vmem:[#allocation4 + $0x90] sm:$0xf] %vm568_vm2, %v14469_v0 }
  0xc7   : > { %607 = vst.msk [vmem:[#allocation4 + $0x94] sm:$0xf] %vm568_vm2, %v14469_v0  ;;  %608 = vst.msk [vmem:[#allocation4 + $0x98] sm:$0xf] %vm568_vm2, %v14469_v0 }
  0xc8   : > { %610 = vst.msk [vmem:[#allocation4 + $0xa0] sm:$0xf] %vm568_vm2, %v14469_v0  ;;  %611 = vst.msk [vmem:[#allocation4 + $0xa4] sm:$0xf] %vm568_vm2, %v14469_v0 }
  0xc9   : > { %612 = vst.msk [vmem:[#allocation4 + $0xa8] sm:$0xf] %vm568_vm2, %v14469_v0  ;;  %613 = vst.msk [vmem:[#allocation4 + $0xac] sm:$0xf] %vm568_vm2, %v14469_v0 }
  0xca   : > { %615 = vst.msk [vmem:[#allocation4 + $0xb4] sm:$0xf] %vm568_vm2, %v14469_v0  ;;  %616 = vst.msk [vmem:[#allocation4 + $0xb8] sm:$0xf] %vm568_vm2, %v14469_v0 }
  0xcb   : > { %617 = vst.msk [vmem:[#allocation4 + $0xbc] sm:$0xf] %vm568_vm2, %v14469_v0  ;;  %618 = vst.msk [vmem:[#allocation4 + $0xc0] sm:$0xf] %vm568_vm2, %v14469_v0 }
  0xcc   : > { %620 = vst.msk [vmem:[#allocation4 + $0xc8] sm:$0xf] %vm568_vm2, %v14469_v0  ;;  %621 = vst.msk [vmem:[#allocation4 + $0xcc] sm:$0xf] %vm568_vm2, %v14469_v0 }
  0xcd   : > { %622 = vst.msk [vmem:[#allocation4 + $0xd0] sm:$0xf] %vm568_vm2, %v14469_v0  ;;  %623 = vst.msk [vmem:[#allocation4 + $0xd4] sm:$0xf] %vm568_vm2, %v14469_v0 }
  0xce   : > { %625 = vst.msk [vmem:[#allocation4 + $0xdc] sm:$0xf] %vm568_vm2, %v14469_v0  ;;  %626 = vst.msk [vmem:[#allocation4 + $0xe0] sm:$0xf] %vm568_vm2, %v14469_v0 }
  0xcf   : > { %627 = vst.msk [vmem:[#allocation4 + $0xe4] sm:$0xf] %vm568_vm2, %v14469_v0  ;;  %628 = vst.msk [vmem:[#allocation4 + $0xe8] sm:$0xf] %vm568_vm2, %v14469_v0 }
  0xd0   : > { %630 = vst.msk [vmem:[#allocation4 + $0xf0] sm:$0xf] %vm568_vm2, %v14469_v0  ;;  %631 = vst.msk [vmem:[#allocation4 + $0xf4] sm:$0xf] %vm568_vm2, %v14469_v0 }
  0xd1   : > { %632 = vst.msk [vmem:[#allocation4 + $0xf8] sm:$0xf] %vm568_vm2, %v14469_v0  ;;  %633 = vst.msk [vmem:[#allocation4 + $0xfc] sm:$0xf] %vm568_vm2, %v14469_v0 }
  0xd2   : > { %635 = vst.msk [vmem:[#allocation4 + $0x104] sm:$0xf] %vm568_vm2, %v14469_v0  ;;  %636 = vst.msk [vmem:[#allocation4 + $0x108] sm:$0xf] %vm568_vm2, %v14469_v0 }
  0xd3   : > { %637 = vst.msk [vmem:[#allocation4 + $0x10c] sm:$0xf] %vm568_vm2, %v14469_v0  ;;  %638 = vst.msk [vmem:[#allocation4 + $0x110] sm:$0xf] %vm568_vm2, %v14469_v0 }
  0xd4   : > { %640 = vst.msk [vmem:[#allocation4 + $0x118] sm:$0xf] %vm568_vm2, %v14469_v0  ;;  %641 = vst.msk [vmem:[#allocation4 + $0x11c] sm:$0xf] %vm568_vm2, %v14469_v0 }
  0xd5   : > { %642 = vst.msk [vmem:[#allocation4 + $0x120] sm:$0xf] %vm568_vm2, %v14469_v0  ;;  %643 = vst.msk [vmem:[#allocation4 + $0x124] sm:$0xf] %vm568_vm2, %v14469_v0 }
  0xd6   : > { %645 = vst.msk [vmem:[#allocation4 + $0x12c] sm:$0xf] %vm568_vm2, %v14469_v0  ;;  %646 = vst.msk [vmem:[#allocation4 + $0x130] sm:$0xf] %vm568_vm2, %v14469_v0 }
  0xd7   : > { %647 = vst.msk [vmem:[#allocation4 + $0x134] sm:$0xf] %vm568_vm2, %v14469_v0  ;;  %648 = vst.msk [vmem:[#allocation4 + $0x138] sm:$0xf] %vm568_vm2, %v14469_v0 }
  0xd8   : > { %650 = vst.msk [vmem:[#allocation4 + $0x140] sm:$0xf] %vm568_vm2, %v14469_v0  ;;  %651 = vst.msk [vmem:[#allocation4 + $0x144] sm:$0xf] %vm568_vm2, %v14469_v0 }
  0xd9   : > { %652 = vst.msk [vmem:[#allocation4 + $0x148] sm:$0xf] %vm568_vm2, %v14469_v0  ;;  %653 = vst.msk [vmem:[#allocation4 + $0x14c] sm:$0xf] %vm568_vm2, %v14469_v0 }
  0xda   : > { %655 = vst.msk [vmem:[#allocation4 + $0x154] sm:$0xf] %vm568_vm2, %v14469_v0  ;;  %656 = vst.msk [vmem:[#allocation4 + $0x158] sm:$0xf] %vm568_vm2, %v14469_v0 }
  0xdb   : > { %657 = vst.msk [vmem:[#allocation4 + $0x15c] sm:$0xf] %vm568_vm2, %v14469_v0  ;;  %658 = vst.msk [vmem:[#allocation4 + $0x160] sm:$0xf] %vm568_vm2, %v14469_v0 }
  0xdc   : > { %660 = vst.msk [vmem:[#allocation4 + $0x168] sm:$0xf] %vm568_vm2, %v14469_v0  ;;  %661 = vst.msk [vmem:[#allocation4 + $0x16c] sm:$0xf] %vm568_vm2, %v14469_v0 }
  0xdd   : > { %662 = vst.msk [vmem:[#allocation4 + $0x170] sm:$0xf] %vm568_vm2, %v14469_v0  ;;  %663 = vst.msk [vmem:[#allocation4 + $0x174] sm:$0xf] %vm568_vm2, %v14469_v0 }
  0xde   : > { %665 = vst.msk [vmem:[#allocation4 + $0x17c] sm:$0xf] %vm568_vm2, %v14469_v0  ;;  %666 = vst.msk [vmem:[#allocation4 + $0x180] sm:$0xf] %vm568_vm2, %v14469_v0 }
  0xdf   : > { %667 = vst.msk [vmem:[#allocation4 + $0x184] sm:$0xf] %vm568_vm2, %v14469_v0  ;;  %668 = vst.msk [vmem:[#allocation4 + $0x188] sm:$0xf] %vm568_vm2, %v14469_v0 }
  0xe0   : > { %670 = vst.msk [vmem:[#allocation4 + $0x190] sm:$0xf] %vm568_vm2, %v14469_v0  ;;  %671 = vst.msk [vmem:[#allocation4 + $0x194] sm:$0xf] %vm568_vm2, %v14469_v0 }
  0xe1   : > { %672 = vst.msk [vmem:[#allocation4 + $0x198] sm:$0xf] %vm568_vm2, %v14469_v0  ;;  %673 = vst.msk [vmem:[#allocation4 + $0x19c] sm:$0xf] %vm568_vm2, %v14469_v0 }
  0xe2   : > { %675 = vst.msk [vmem:[#allocation4 + $0x1a4] sm:$0xf] %vm568_vm2, %v14469_v0  ;;  %676 = vst.msk [vmem:[#allocation4 + $0x1a8] sm:$0xf] %vm568_vm2, %v14469_v0 }
  0xe3   : > { %677 = vst.msk [vmem:[#allocation4 + $0x1ac] sm:$0xf] %vm568_vm2, %v14469_v0  ;;  %678 = vst.msk [vmem:[#allocation4 + $0x1b0] sm:$0xf] %vm568_vm2, %v14469_v0 }
  0xe4   : > { %680 = vst.msk [vmem:[#allocation4 + $0x1b8] sm:$0xf] %vm568_vm2, %v14469_v0  ;;  %681 = vst.msk [vmem:[#allocation4 + $0x1bc] sm:$0xf] %vm568_vm2, %v14469_v0 }
  0xe5   : > { %682 = vst.msk [vmem:[#allocation4 + $0x1c0] sm:$0xf] %vm568_vm2, %v14469_v0  ;;  %683 = vst.msk [vmem:[#allocation4 + $0x1c4] sm:$0xf] %vm568_vm2, %v14469_v0 }
  0xe6   : > { %685 = vst.msk [vmem:[#allocation4 + $0x1cc] sm:$0xf] %vm568_vm2, %v14469_v0  ;;  %686 = vst.msk [vmem:[#allocation4 + $0x1d0] sm:$0xf] %vm568_vm2, %v14469_v0 }
  0xe7   : > { %687 = vst.msk [vmem:[#allocation4 + $0x1d4] sm:$0xf] %vm568_vm2, %v14469_v0  ;;  %688 = vst.msk [vmem:[#allocation4 + $0x1d8] sm:$0xf] %vm568_vm2, %v14469_v0 }
  0xe8   : > { %690 = vst.msk [vmem:[#allocation4 + $0x1e0] sm:$0xf] %vm568_vm2, %v14469_v0  ;;  %691 = vst.msk [vmem:[#allocation4 + $0x1e4] sm:$0xf] %vm568_vm2, %v14469_v0 }
  0xe9   : > { %692 = vst.msk [vmem:[#allocation4 + $0x1e8] sm:$0xf] %vm568_vm2, %v14469_v0  ;;  %693 = vst.msk [vmem:[#allocation4 + $0x1ec] sm:$0xf] %vm568_vm2, %v14469_v0 }
  0xea   : > { %695 = vst.msk [vmem:[#allocation4 + $0x1f4] sm:$0xf] %vm568_vm2, %v14469_v0  ;;  %696 = vst.msk [vmem:[#allocation4 + $0x1f8] sm:$0xf] %vm568_vm2, %v14469_v0 }
  0xeb   : > { %697 = vst.msk [vmem:[#allocation4 + $0x1fc] sm:$0xf] %vm568_vm2, %v14469_v0  ;;  %698 = vst.msk [vmem:[#allocation4 + $0x200] sm:$0xf] %vm568_vm2, %v14469_v0 }
  0xec   : > { %700 = vst.msk [vmem:[#allocation4 + $0x208] sm:$0xf] %vm568_vm2, %v14469_v0  ;;  %701 = vst.msk [vmem:[#allocation4 + $0x20c] sm:$0xf] %vm568_vm2, %v14469_v0 }
  0xed   : > { %702 = vst.msk [vmem:[#allocation4 + $0x210] sm:$0xf] %vm568_vm2, %v14469_v0  ;;  %703 = vst.msk [vmem:[#allocation4 + $0x214] sm:$0xf] %vm568_vm2, %v14469_v0 }
  0xee   : > { %705 = vst.msk [vmem:[#allocation4 + $0x21c] sm:$0xf] %vm568_vm2, %v14469_v0  ;;  %706 = vst.msk [vmem:[#allocation4 + $0x220] sm:$0xf] %vm568_vm2, %v14469_v0 }
  0xef   : > { %707 = vst.msk [vmem:[#allocation4 + $0x224] sm:$0xf] %vm568_vm2, %v14469_v0  ;;  %708 = vst.msk [vmem:[#allocation4 + $0x228] sm:$0xf] %vm568_vm2, %v14469_v0 }
  0xf0   : > { %710 = vst.msk [vmem:[#allocation4 + $0x230] sm:$0xf] %vm568_vm2, %v14469_v0  ;;  %711 = vst.msk [vmem:[#allocation4 + $0x234] sm:$0xf] %vm568_vm2, %v14469_v0 }
  0xf1   : > { %712 = vst.msk [vmem:[#allocation4 + $0x238] sm:$0xf] %vm568_vm2, %v14469_v0  ;;  %713 = vst.msk [vmem:[#allocation4 + $0x23c] sm:$0xf] %vm568_vm2, %v14469_v0 }
  0xf2   : > { %715 = vst.msk [vmem:[#allocation4 + $0x244] sm:$0xf] %vm568_vm2, %v14469_v0  ;;  %716 = vst.msk [vmem:[#allocation4 + $0x248] sm:$0xf] %vm568_vm2, %v14469_v0 }
  0xf3   : > { %717 = vst.msk [vmem:[#allocation4 + $0x24c] sm:$0xf] %vm568_vm2, %v14469_v0  ;;  %718 = vst.msk [vmem:[#allocation4 + $0x250] sm:$0xf] %vm568_vm2, %v14469_v0 }
  0xf4   : > { %720 = vst.msk [vmem:[#allocation4 + $0x258] sm:$0xf] %vm568_vm2, %v14469_v0  ;;  %721 = vst.msk [vmem:[#allocation4 + $0x25c] sm:$0xf] %vm568_vm2, %v14469_v0 }
  0xf5   : > { %722 = vst.msk [vmem:[#allocation4 + $0x260] sm:$0xf] %vm568_vm2, %v14469_v0  ;;  %723 = vst.msk [vmem:[#allocation4 + $0x264] sm:$0xf] %vm568_vm2, %v14469_v0 }
  0xf6   : > { %725 = vst.msk [vmem:[#allocation4 + $0x26c] sm:$0xf] %vm568_vm2, %v14469_v0  ;;  %726 = vst.msk [vmem:[#allocation4 + $0x270] sm:$0xf] %vm568_vm2, %v14469_v0 }
  0xf7   : > { %727 = vst.msk [vmem:[#allocation4 + $0x274] sm:$0xf] %vm568_vm2, %v14469_v0  ;;  %728 = vst.msk [vmem:[#allocation4 + $0x278] sm:$0xf] %vm568_vm2, %v14469_v0 }
  0xf8   : > { %730 = vst.msk [vmem:[#allocation4 + $0x280] sm:$0xf] %vm568_vm2, %v14469_v0  ;;  %731 = vst.msk [vmem:[#allocation4 + $0x284] sm:$0xf] %vm568_vm2, %v14469_v0 }
  0xf9   : > { %732 = vst.msk [vmem:[#allocation4 + $0x288] sm:$0xf] %vm568_vm2, %v14469_v0  ;;  %733 = vst.msk [vmem:[#allocation4 + $0x28c] sm:$0xf] %vm568_vm2, %v14469_v0 }
  0xfa   : > { %735 = vst.msk [vmem:[#allocation4 + $0x294] sm:$0xf] %vm568_vm2, %v14469_v0  ;;  %736 = vst.msk [vmem:[#allocation4 + $0x298] sm:$0xf] %vm568_vm2, %v14469_v0 }
  0xfb   : > { %737 = vst.msk [vmem:[#allocation4 + $0x29c] sm:$0xf] %vm568_vm2, %v14469_v0  ;;  %738 = vst.msk [vmem:[#allocation4 + $0x2a0] sm:$0xf] %vm568_vm2, %v14469_v0 }
  0xfc   : > { %574 = vst.msk [vmem:[#allocation4 + $0x10] sm:$0x1] %vm573_vm3, %v14469_v0  ;;  %579 = vst.msk [vmem:[#allocation4 + $0x24] sm:$0x1] %vm573_vm3, %v14469_v0 }
  0xfd   : > { %584 = vst.msk [vmem:[#allocation4 + $0x38] sm:$0x1] %vm573_vm3, %v14469_v0  ;;  %589 = vst.msk [vmem:[#allocation4 + $0x4c] sm:$0x1] %vm573_vm3, %v14469_v0 }
  0xfe   : > { %594 = vst.msk [vmem:[#allocation4 + $0x60] sm:$0x1] %vm573_vm3, %v14469_v0  ;;  %599 = vst.msk [vmem:[#allocation4 + $0x74] sm:$0x1] %vm573_vm3, %v14469_v0 }
  0xff   : > { %604 = vst.msk [vmem:[#allocation4 + $0x88] sm:$0x1] %vm573_vm3, %v14469_v0  ;;  %609 = vst.msk [vmem:[#allocation4 + $0x9c] sm:$0x1] %vm573_vm3, %v14469_v0 }
 0x100   : > { %614 = vst.msk [vmem:[#allocation4 + $0xb0] sm:$0x1] %vm573_vm3, %v14469_v0  ;;  %619 = vst.msk [vmem:[#allocation4 + $0xc4] sm:$0x1] %vm573_vm3, %v14469_v0 }
 0x101   : > { %624 = vst.msk [vmem:[#allocation4 + $0xd8] sm:$0x1] %vm573_vm3, %v14469_v0  ;;  %629 = vst.msk [vmem:[#allocation4 + $0xec] sm:$0x1] %vm573_vm3, %v14469_v0 }
 0x102   : > { %634 = vst.msk [vmem:[#allocation4 + $0x100] sm:$0x1] %vm573_vm3, %v14469_v0  ;;  %639 = vst.msk [vmem:[#allocation4 + $0x114] sm:$0x1] %vm573_vm3, %v14469_v0 }
 0x103   : > { %644 = vst.msk [vmem:[#allocation4 + $0x128] sm:$0x1] %vm573_vm3, %v14469_v0  ;;  %649 = vst.msk [vmem:[#allocation4 + $0x13c] sm:$0x1] %vm573_vm3, %v14469_v0 }
 0x104   : > { %654 = vst.msk [vmem:[#allocation4 + $0x150] sm:$0x1] %vm573_vm3, %v14469_v0  ;;  %659 = vst.msk [vmem:[#allocation4 + $0x164] sm:$0x1] %vm573_vm3, %v14469_v0 }
 0x105   : > { %664 = vst.msk [vmem:[#allocation4 + $0x178] sm:$0x1] %vm573_vm3, %v14469_v0  ;;  %669 = vst.msk [vmem:[#allocation4 + $0x18c] sm:$0x1] %vm573_vm3, %v14469_v0 }
 0x106   : > { %674 = vst.msk [vmem:[#allocation4 + $0x1a0] sm:$0x1] %vm573_vm3, %v14469_v0  ;;  %679 = vst.msk [vmem:[#allocation4 + $0x1b4] sm:$0x1] %vm573_vm3, %v14469_v0 }
 0x107   : > { %684 = vst.msk [vmem:[#allocation4 + $0x1c8] sm:$0x1] %vm573_vm3, %v14469_v0  ;;  %689 = vst.msk [vmem:[#allocation4 + $0x1dc] sm:$0x1] %vm573_vm3, %v14469_v0 }
 0x108   : > { %694 = vst.msk [vmem:[#allocation4 + $0x1f0] sm:$0x1] %vm573_vm3, %v14469_v0  ;;  %699 = vst.msk [vmem:[#allocation4 + $0x204] sm:$0x1] %vm573_vm3, %v14469_v0 }
 0x109   : > { %704 = vst.msk [vmem:[#allocation4 + $0x218] sm:$0x1] %vm573_vm3, %v14469_v0  ;;  %709 = vst.msk [vmem:[#allocation4 + $0x22c] sm:$0x1] %vm573_vm3, %v14469_v0 }
 0x10a   : > { %714 = vst.msk [vmem:[#allocation4 + $0x240] sm:$0x1] %vm573_vm3, %v14469_v0  ;;  %719 = vst.msk [vmem:[#allocation4 + $0x254] sm:$0x1] %vm573_vm3, %v14469_v0 }
 0x10b   : > { %724 = vst.msk [vmem:[#allocation4 + $0x268] sm:$0x1] %vm573_vm3, %v14469_v0  ;;  %729 = vst.msk [vmem:[#allocation4 + $0x27c] sm:$0x1] %vm573_vm3, %v14469_v0 }
 0x10c   : > { %734 = vst.msk [vmem:[#allocation4 + $0x290] sm:$0x1] %vm573_vm3, %v14469_v0  ;;  %739 = vst.msk [vmem:[#allocation4 + $0x2a4] sm:$0x1] %vm573_vm3, %v14469_v0 }
 0x10d LB: >> { %v11384_v1 = vld [vmem:[%s18718_s1 + $0x2] sm:$0x3]  ;;  %vm853_vm4 = vcmask 1040384   ;;  %vm854_vm5 = vcmask 1041408   ;;  %v14470_v2 = vmov 65535   ;;  %s12635_s11 = smul.u32 80, %s14455_s29  ;;  %s14455_s29 = sphi %s15553_s29, %s745_s29  }
 0x10e   : >> { %v855_v3 = vsel %vm853_vm4, 4294967295, %v14470_v2  ;;  %v11485_v4 = vld [vmem:[%s18718_s1 + $0x8] sm:$0x3]  ;;  %v766_v5 = vld [vmem:[%s18718_s1] sm:$0x3]  ;;  %vm828_vm6 = vcmask 23552  }
 0x10f   : >> { %v15567_v6 = vsel %vm854_vm5, %v855_v3, 0  ;;  %v11522_v7 = vld [vmem:[%s18718_s1 + $0xa] sm:$0x3]  ;;  %s15581_s14 = scalar_lea.vmem %s15551_s28, %s12635_s11  ;;  %v11557_v12 = vld [vmem:[%s18718_s1 + $0xc] sm:$0x3]  ;;  %s15942_s27 = scalar_lea.vmem [#allocation2], %s12635_s11 }
 0x110   : >> { %v858_v8 = vand.u32 %v11384_v1, %v15567_v6  ;;  %v15575_v9 = vand.u32 %v11485_v4, %v15567_v6  ;;  %v1022_v10 = vand.u32 %v15567_v6, %v766_v5  ;;  %v2135_v11 = vand.u32 %v11522_v7, %v15567_v6  ;;  %v11417_v13 = vld [vmem:[%s18718_s1 + $0x4] sm:$0x3]  ;;  %v14269_v14 = vld [vmem:[%s15581_s14 + $0x294] sm:$0xff]   ;;  %v14270_v15 = vld [vmem:[%s15581_s14 + $0x7bc] sm:$0xff]   ;;  %s745_s29 = sadd.s32 1, %s14455_s29  }
 0x111   : >> { %13040 = vmatprep.mubr.msk.bf16.mxu1 %vm828_vm6, %v14269_v14  ;;  %v14271_v16 = vld [vmem:[%s15581_s14 + $0x29c] sm:$0xff]   ;;  %13112 = vmatprep.mubr.msk.bf16.mxu0 %vm828_vm6, %v14270_v15  ;;  %v14272_v17 = vld [vmem:[%s15581_s14 + $0x7c4] sm:$0xff]   ;;  %vm1141_vm7 = vsmask.f32 3328  ;;  %v15599_v18 = vand.u32 %v11557_v12, %v15567_v6  ;;  %v15604_v20 = vand.u32 %v11417_v13, %v15567_v6  ;;  %v14274_v21 = vld [vmem:[%s15581_s14 + $0x7d0] sm:$0xff]   ;;  %p742_p4 = scmp.ge.s32.totalorder %s745_s29, 8  }
 0x112   : >> { %13038 = vmatprep.subr.bf16.mxu1 %v858_v8  ;;  %13110 = vmatprep.subr.bf16.mxu0 %v15575_v9  ;;  %v14273_v19 = vld [vmem:[%s15581_s14 + $0x2a8] sm:$0xff]   ;;  %vm1142_vm8 = vsmask.f32 7440  ;;  %v14275_v22 = vld [vmem:[%s15581_s14 + $0x2b0] sm:$0xff]   ;;  %v14276_v23 = vld [vmem:[%s15581_s14 + $0x7d8] sm:$0xff]   ;;  %s16046_s30 = smov (%p742_p4), 0  }
 0x113   : >> { %13039 = vmatpush3.bf16.msra.mxu1 %v858_v8  ;;  %13111 = vmatpush3.bf16.msra.mxu0 %v15575_v9  ;;  %v14277_v24 = vld [vmem:[%s15581_s14 + $0x2bc] sm:$0xff]   ;;  %v11502_v25 = vld [vmem:[%s15581_s14 + $0x528] sm:$0xf]  ;;  %v11503_v26 = vld [vmem:[%s15581_s14 + $0x52c] sm:$0xf] }
 0x114   : >> { %13056 = vmatprep.subr.bf16.mxu1 %v1022_v10  ;;  %13128 = vmatprep.subr.bf16.mxu0 %v2135_v11  ;;  %v11504_v27 = vld [vmem:[%s15581_s14 + $0x530] sm:$0xf]  ;;  %v1909_v28 = vshrl.u32 %v11502_v25, 16  ;;  %v1912_v29 = vshll.u32 %v11502_v25, 16  ;;  %v1918_v30 = vshll.u32 %v11503_v26, 16  ;;  %v1922_v31 = vshrl.u32 %v11503_v26, 16  ;;  %vm15631_vm9 = vmor %vm1141_vm7, %vm1142_vm8 }
 0x115   : >> { %v11593_v32 = vld [vmem:[%s18718_s1 + $0xe] sm:$0x3]  ;;  %v1928_v33 = vshll.u32 %v11504_v27, 16  ;;  %v1932_v34 = vshrl.u32 %v11504_v27, 16  ;;  %v11451_v39 = vld [vmem:[%s18718_s1 + $0x6] sm:$0x3] }
 0x116   : >> { %13041 = vmatmul.mubr.msk.bf16.vlgmr.msra.gmra.mrb[0].mxu1 %vm828_vm6, %v14271_v16  ;;  %13113 = vmatmul.mubr.msk.bf16.vlgmr.msra.gmra.mrb[0].mxu0 %vm828_vm6, %v14272_v17  ;;  %v1911_v35 = vrot.slane %v1909_v28, 4  ;;  %v1914_v36 = vrot.slane %v1912_v29, 5  ;;  %v1920_v37 = vrot.slane %v1918_v30, 5  ;;  %v1924_v38 = vrot.slane %v1922_v31, 4  ;;  %v11505_v42 = vld [vmem:[%s15581_s14 + $0x534] sm:$0xf] }
 0x117   : >> { %13057 = vmatpush3.bf16.msra.mxu1 %v1022_v10  ;;  %13129 = vmatpush3.bf16.msra.mxu0 %v2135_v11  ;;  %v1930_v40 = vrot.slane %v1928_v33, 5  ;;  %v1934_v41 = vrot.slane %v1932_v34, 4  ;;  %v11506_v43 = vld [vmem:[%s15581_s14 + $0x538] sm:$0x1]  ;;  %v14278_v47 = vld [vmem:[%s15581_s14 + $0x2c4] sm:$0xff]   ;;  %v1938_v48 = vshll.u32 %v11505_v42, 16  ;;  %v15640_v55 = vand.u32 %v11593_v32, %v15567_v6 }
 0x118   : >> { %13044 = vmatprep.mubr.msk.bf16.mxu1 %vm828_vm6, %v14273_v19  ;;  %13116 = vmatprep.mubr.msk.bf16.mxu0 %vm828_vm6, %v14274_v21  ;;  %v1915_v45 = vor.u32 %v1914_v36, %v1911_v35  ;;  %v1925_v46 = vor.u32 %v1924_v38, %v1920_v37  ;;  %v1942_v49 = vshrl.u32 %v11505_v42, 16  ;;  %v1948_v51 = vshll.u32 %v11506_v43, 16  ;;  %v14279_v52 = vld [vmem:[%s15581_s14 + $0x2d0] sm:$0xff]   ;;  %v11507_v53 = vld [vmem:[%s15581_s14 + $0x53c] sm:$0xf] }
 0x119   : >> { %13146 = vmatprep.subr.bf16.mxu0 %v15599_v18  ;;  %13074 = vmatprep.subr.bf16.mxu1 %v15604_v20  ;;  %v1935_v50 = vor.u32 %v1934_v41, %v1930_v40  ;;  %v11508_v54 = vld [vmem:[%s15581_s14 + $0x540] sm:$0xf]  ;;  %v15643_v56 = vand.u32 %v11451_v39, %v15567_v6  ;;  %v1940_v59 = vrot.slane %v1938_v48, 5  ;;  %v11509_v61 = vld [vmem:[%s15581_s14 + $0x544] sm:$0xf]  ;;  %v1953_v0 = vshrl.u32 %v11507_v53, 16 }
 0x11a   : >> { %v1916_v57 = vrot.slane %v1915_v45, 4  ;;  %v1926_v58 = vrot.slane %v1925_v46, 4  ;;  %v1944_v60 = vrot.slane %v1942_v49, 4  ;;  %v1950_v63 = vrot.slane %v1948_v51, 5  ;;  %v11510_v7 = vld [vmem:[%s15581_s14 + $0x548] sm:$0xf] }
 0x11b   : >> { %v1936_v62 = vrot.slane %v1935_v50, 4  ;;  %v1956_v1 = vshll.u32 %v11507_v53, 16  ;;  %v1962_v5 = vshll.u32 %v11508_v54, 16  ;;  %v1955_v11 = vrot.slane %v1953_v0, 4  ;;  %v11511_v13 = vld [vmem:[%s15581_s14 + $0x54c] sm:$0x1] }
 0x11c   : >> { %v1921_v2 = vsel %vm15631_vm9, %v1916_v57, %v1920_v37  ;;  %v1931_v3 = vsel %vm15631_vm9, %v1926_v58, %v1930_v40  ;;  %v1945_v4 = vor.u32 %v1944_v60, %v1940_v59  ;;  %v1966_v16 = vshrl.u32 %v11508_v54, 16  ;;  %v11513_v29 = vld [vmem:[%s15581_s14 + $0x554] sm:$0xf]  ;;  %v14280_v32 = vld [vmem:[%s15581_s14 + $0x2d8] sm:$0xff]   ;;  %v14281_v39 = vld [vmem:[%s15581_s14] sm:$0xff]  }
 0x11d   : >> { %v11523_v8 = vcombine.low %v1921_v2, %v1931_v3  ;;  %v1941_v10 = vsel %vm15631_vm9, %v1936_v62, %v1940_v59  ;;  %v1958_v12 = vrot.slane %v1956_v1, 5  ;;  %v1964_v15 = vrot.slane %v1962_v5, 5  ;;  %v11514_v35 = vld [vmem:[%s15581_s14 + $0x558] sm:$0xf]  ;;  %v11515_v46 = vld [vmem:[%s15581_s14 + $0x55c] sm:$0xf] }
 0x11e   : >> { %13045 = vmatmul.mubr.msk.bf16.gmra.mrb[4].mxu1 %vm828_vm6, %v14275_v22  ;;  %13117 = vmatmul.mubr.msk.bf16.gmra.mrb[4].mxu0 %vm828_vm6, %v14276_v23  ;;  %v1946_v14 = vrot.slane %v1945_v4, 4  ;;  %v1972_v17 = vshll.u32 %v11509_v61, 16  ;;  %v1976_v21 = vshrl.u32 %v11509_v61, 16  ;;  %v1982_v22 = vshll.u32 %v11510_v7, 16  ;;  %v11516_v51 = vld [vmem:[%s15581_s14 + $0x560] sm:$0x1] }
 0x11f   : >> { %13048 = vmatprep.mubr.msk.bf16.mxu1 %vm828_vm6, %v14277_v24  ;;  %13130 = vmatprep.mubr.msk.bf16.mxu0 %vm828_vm6, %v11523_v8  ;;  %v1959_v19 = vor.u32 %v1958_v12, %v1955_v11  ;;  %v1986_v23 = vshrl.u32 %v11510_v7, 16  ;;  %v11512_v24 = vld [vmem:[%s15581_s14 + $0x550] sm:$0xf]  ;;  %v1968_v26 = vrot.slane %v1966_v16, 4  ;;  %v1992_v28 = vshll.u32 %v11511_v13, 16 }
 0x120   : >> { %v1951_v25 = vsel %vm15631_vm9, %v1946_v14, %v1950_v63  ;;  %v1974_v27 = vrot.slane %v1972_v17, 5  ;;  %v1978_v33 = vrot.slane %v1976_v21, 4  ;;  %v1984_v34 = vrot.slane %v1982_v22, 5  ;;  %v11517_v1 = vld [vmem:[%s15581_s14 + $0x564] sm:$0xf] }
 0x121   : >> { %v11524_v30 = vcombine.low %v1941_v10, %v1951_v25  ;;  %v1960_v31 = vrot.slane %v1959_v19, 4  ;;  %v1969_v36 = vor.u32 %v1968_v26, %v1964_v15  ;;  %v1988_v37 = vrot.slane %v1986_v23, 4  ;;  %v11518_v7 = vld [vmem:[%s15581_s14 + $0x568] sm:$0xf]  ;;  %v11519_v13 = vld [vmem:[%s15581_s14 + $0x56c] sm:$0xf] }
 0x122   : >> { %v1994_v38 = vrot.slane %v1992_v28, 5  ;;  %v1997_v40 = vshrl.u32 %v11512_v24, 16  ;;  %v1979_v42 = vor.u32 %v1978_v33, %v1974_v27  ;;  %v2000_v43 = vshll.u32 %v11512_v24, 16  ;;  %v11520_v21 = vld [vmem:[%s15581_s14 + $0x570] sm:$0xf] }
 0x123   : >> { %v1965_v41 = vsel %vm15631_vm9, %v1960_v31, %v1964_v15  ;;  %v2006_v45 = vshll.u32 %v11513_v29, 16  ;;  %v1989_v48 = vor.u32 %v1988_v37, %v1984_v34  ;;  %v2010_v50 = vshrl.u32 %v11513_v29, 16  ;;  %v14282_v15 = vld [vmem:[%s15581_s14 + $0x8] sm:$0xff]   ;;  %v11521_v26 = vld [vmem:[%s15581_s14 + $0x574] sm:$0x1] }
 0x124   : >> { %v1999_v49 = vrot.slane %v1997_v40, 4  ;;  %v2002_v53 = vrot.slane %v2000_v43, 5  ;;  %v2016_v57 = vshll.u32 %v11514_v35, 16  ;;  %v2020_v60 = vshrl.u32 %v11514_v35, 16  ;;  %v14283_v29 = vld [vmem:[%s15581_s14 + $0x14] sm:$0xff]  }
 0x125   : >> { %v2008_v54 = vrot.slane %v2006_v45, 5  ;;  %v1990_v59 = vrot.slane %v1989_v48, 4  ;;  %v2026_v5 = vshll.u32 %v11515_v46, 16  ;;  %v2030_v11 = vshrl.u32 %v11515_v46, 16 }
 0x126   : >> { %13049 = vmatmul.mubr.msk.bf16.gmra.mrb[8].mxu1 %vm828_vm6, %v14278_v47  ;;  %13131 = vmatmul.mubr.msk.bf16.vlgmr.msra.gmra.mrb[0].mxu0 %vm828_vm6, %v11524_v30  ;;  %v1970_v47 = vrot.slane %v1969_v36, 4  ;;  %v2003_v63 = vor.u32 %v2002_v53, %v1999_v49  ;;  %v2018_v0 = vrot.slane %v2016_v57, 5  ;;  %v2022_v4 = vrot.slane %v2020_v60, 4  ;;  %v14284_v53 = vld [vmem:[%s15581_s14 + $0x1c] sm:$0xff]  }
 0x127   : >> { %13052 = vmatprep.mubr.msk.bf16.mxu1 %vm828_vm6, %v14279_v52  ;;  %13147 = vmatpush3.bf16.msra.mxu0 %v15599_v18  ;;  %v1980_v52 = vrot.slane %v1979_v42, 4  ;;  %v2012_v18 = vrot.slane %v2010_v50, 4  ;;  %v1995_v2 = vsel %vm15631_vm9, %v1990_v59, %v1994_v38  ;;  %v2036_v12 = vshll.u32 %v11516_v51, 16 }
 0x128   : >> { %13164 = vmatprep.subr.bf16.mxu0 %v15640_v55  ;;  %v1975_v58 = vsel %vm15631_vm9, %v1970_v47, %v1974_v27  ;;  %v2004_v10 = vrot.slane %v2003_v63, 4  ;;  %v2023_v16 = vor.u32 %v2022_v4, %v2018_v0  ;;  %v2028_v17 = vrot.slane %v2026_v5, 5  ;;  %v1122_v4 = vld [vmem:[%s15581_s14 + $0x4] sm:$0xf]  ;;  %v1123_v5 = vld [vmem:[%s15581_s14 + $0x8] sm:$0xf] }
 0x129   : >> { %v11525_v61 = vcombine.low %v1965_v41, %v1975_v58  ;;  %v1985_v62 = vsel %vm15631_vm9, %v1980_v52, %v1984_v34  ;;  %v2013_v3 = vor.u32 %v2012_v18, %v2008_v54  ;;  %v2041_v19 = vshrl.u32 %v11517_v1, 16  ;;  %v14285_v18 = vld [vmem:[%s15581_s14 + $0x28] sm:$0xff]  }
 0x12a   : >> { %v11526_v8 = vcombine.low %v1985_v62, %v1995_v2  ;;  %v2009_v22 = vsel %vm15631_vm9, %v2004_v10, %v2008_v54  ;;  %v2032_v23 = vrot.slane %v2030_v11, 4  ;;  %v2038_v24 = vrot.slane %v2036_v12, 5 }
 0x12b   : >> { %13134 = vmatprep.mubr.msk.bf16.mxu0 %vm828_vm6, %v11525_v61  ;;  %v2014_v14 = vrot.slane %v2013_v3, 4  ;;  %v2044_v25 = vshll.u32 %v11517_v1, 16  ;;  %v2024_v28 = vrot.slane %v2023_v16, 4  ;;  %v2043_v30 = vrot.slane %v2041_v19, 4 }
 0x12c   : >> { %v2050_v31 = vshll.u32 %v11518_v7, 16  ;;  %v2033_v33 = vor.u32 %v2032_v23, %v2028_v17  ;;  %v2054_v35 = vshrl.u32 %v11518_v7, 16  ;;  %v2060_v38 = vshll.u32 %v11519_v13, 16 }
 0x12d   : >> { %v2019_v27 = vsel %vm15631_vm9, %v2014_v14, %v2018_v0  ;;  %v2046_v34 = vrot.slane %v2044_v25, 5  ;;  %v2029_v36 = vsel %vm15631_vm9, %v2024_v28, %v2028_v17  ;;  %v2070_v43 = vshll.u32 %v11520_v21, 16  ;;  %v1121_v0 = vld [vmem:[%s15581_s14] sm:$0xf]  ;;  %v1124_v17 = vld [vmem:[%s15581_s14 + $0xc] sm:$0xf] }
 0x12e   : >> { %13053 = vmatmul.mubr.msk.bf16.gmra.mrb[12].mxu1 %vm828_vm6, %v14280_v32  ;;  %13135 = vmatmul.mubr.msk.bf16.gmra.mrb[4].mxu0 %vm828_vm6, %v11526_v8  ;;  %v11527_v32 = vcombine.low %v2009_v22, %v2019_v27  ;;  %v2052_v37 = vrot.slane %v2050_v31, 5  ;;  %v2034_v40 = vrot.slane %v2033_v33, 4  ;;  %v2056_v42 = vrot.slane %v2054_v35, 4  ;;  %v14286_v8 = vld [vmem:[%s15581_s14 + $0x14] sm:$0xff]   ;;  %v1125_v25 = vld [vmem:[%s15581_s14 + $0x10] sm:$0x1] }
 0x12f   : >> { %13058 = vmatprep.mubr.msk.bf16.mxu1 %vm828_vm6, %v14281_v39  ;;  %v2064_v39 = vshrl.u32 %v11519_v13, 16  ;;  %v2047_v41 = vor.u32 %v2046_v34, %v2043_v30  ;;  %v2062_v45 = vrot.slane %v2060_v38, 5  ;;  %v2074_v47 = vshrl.u32 %v11520_v21, 16  ;;  %v14287_v21 = vld [vmem:[%s15581_s14 + $0x30] sm:$0xff]   ;;  %v14289_v30 = vld [vmem:[%s15581_s14 + $0x3c] sm:$0xff]  }
 0x130   : >> { %13138 = vmatprep.mubr.msk.bf16.mxu0 %vm828_vm6, %v11527_v32  ;;  %v2080_v48 = vshll.u32 %v11521_v26, 16  ;;  %v2039_v49 = vsel %vm15631_vm9, %v2034_v40, %v2038_v24  ;;  %v2057_v51 = vor.u32 %v2056_v42, %v2052_v37  ;;  %v2072_v52 = vrot.slane %v2070_v43, 5  ;;  %v1126_v34 = vld [vmem:[%s15581_s14 + $0x14] sm:$0xf]  ;;  %v1127_v38 = vld [vmem:[%s15581_s14 + $0x18] sm:$0xf] }
 0x131   : >> { %v2066_v46 = vrot.slane %v2064_v39, 4  ;;  %v2048_v50 = vrot.slane %v2047_v41, 4  ;;  %v2076_v57 = vrot.slane %v2074_v47, 4  ;;  %v1145_v7 = vshrl.u32 %v1121_v0, 16  ;;  %v11630_v42 = vld [vmem:[%s18718_s1 + $0x10] sm:$0x3] }
 0x132   : >> { %v2058_v59 = vrot.slane %v2057_v51, 4  ;;  %v2082_v62 = vrot.slane %v2080_v48, 5  ;;  %v1148_v10 = vshll.u32 %v1121_v0, 16  ;;  %v1154_v11 = vshll.u32 %v1122_v4, 16  ;;  %v14288_v43 = vld [vmem:[%s15581_s14 + $0x1c] sm:$0xff]  }
 0x133   : >> { %v2067_v54 = vor.u32 %v2066_v46, %v2062_v45  ;;  %v2053_v58 = vsel %vm15631_vm9, %v2048_v50, %v2052_v37  ;;  %v2077_v61 = vor.u32 %v2076_v57, %v2072_v52  ;;  %v1158_v12 = vshrl.u32 %v1122_v4, 16  ;;  %v1128_v46 = vld [vmem:[%s15581_s14 + $0x1c] sm:$0xf]  ;;  %v1130_v0 = vld [vmem:[%s15581_s14 + $0x24] sm:$0x1] }
 0x134   : >> { %v2063_v63 = vsel %vm15631_vm9, %v2058_v59, %v2062_v45  ;;  %v1164_v13 = vshll.u32 %v1123_v5, 16  ;;  %v1168_v16 = vshrl.u32 %v1123_v5, 16  ;;  %v1150_v22 = vrot.slane %v1148_v10, 5  ;;  %v1131_v4 = vld [vmem:[%s15581_s14 + $0x28] sm:$0xf] }
 0x135   : >> { %v2068_v60 = vrot.slane %v2067_v54, 4  ;;  %v11529_v1 = vcombine.low %v2053_v58, %v2063_v63  ;;  %v2078_v3 = vrot.slane %v2077_v61, 4  ;;  %v1156_v23 = vrot.slane %v1154_v11, 5  ;;  %v14291_v54 = vld [vmem:[%s15581_s14 + $0x44] sm:$0xff]   ;;  %v1132_v5 = vld [vmem:[%s15581_s14 + $0x2c] sm:$0xf] }
 0x136   : >> { %13059 = vmatmul.mubr.msk.bf16.vlgmr.msra.gmra.mrb[0].mxu1 %vm828_vm6, %v14282_v15  ;;  %v1147_v15 = vrot.slane %v1145_v7, 4  ;;  %v1160_v24 = vrot.slane %v1158_v12, 4  ;;  %v1166_v26 = vrot.slane %v1164_v13, 5  ;;  %v1170_v27 = vrot.slane %v1168_v16, 4 }
 0x137   : >> { %13075 = vmatpush3.bf16.msra.mxu1 %v15604_v20  ;;  %13062 = vmatprep.mubr.msk.bf16.mxu1 %vm828_vm6, %v14283_v29  ;;  %v11528_v20 = vcombine.low %v2029_v36, %v2039_v49  ;;  %v2073_v2 = vsel %vm15631_vm9, %v2068_v60, %v2072_v52  ;;  %v2083_v14 = vsel %vm15631_vm9, %v2078_v3, %v2082_v62  ;;  %v1174_v28 = vshll.u32 %v1124_v17, 16  ;;  %v14290_v49 = vld [vmem:[%s15581_s14 + $0x28] sm:$0xff]  }
 0x138   : >> { %13092 = vmatprep.subr.bf16.mxu1 %v15643_v56  ;;  %v11530_v19 = vcombine.low %v2073_v2, %v2083_v14  ;;  %v1178_v29 = vshrl.u32 %v1124_v17, 16  ;;  %v1151_v31 = vor.u32 %v1150_v22, %v1147_v15  ;;  %v1161_v32 = vor.u32 %v1160_v24, %v1156_v23  ;;  %v1133_v17 = vld [vmem:[%s15581_s14 + $0x30] sm:$0xf] }
 0x139   : >> { %13139 = vmatmul.mubr.msk.bf16.gmra.mrb[8].mxu0 %vm828_vm6, %v11528_v20  ;;  %v1184_v33 = vshll.u32 %v1125_v25, 16  ;;  %v1171_v35 = vor.u32 %v1170_v27, %v1166_v26  ;;  %v15725_v36 = vrot.slane %v1174_v28, 5  ;;  %v1189_v41 = vshrl.u32 %v1126_v34, 16 }
 0x13a   : >> { %13142 = vmatprep.mubr.msk.bf16.mxu0 %vm828_vm6, %v11529_v1  ;;  %v1180_v37 = vrot.slane %v1178_v29, 4  ;;  %v1152_v39 = vrot.slane %v1151_v31, 4  ;;  %v1162_v40 = vrot.slane %v1161_v32, 4  ;;  %v1192_v47 = vshll.u32 %v1126_v34, 16  ;;  %v1135_v31 = vld [vmem:[%s15581_s14 + $0x38] sm:$0x1] }
 0x13b   : >> { %v1198_v48 = vshll.u32 %v1127_v38, 16  ;;  %v1172_v50 = vrot.slane %v1171_v35, 4  ;;  %v1186_v51 = vrot.slane %v1184_v33, 5  ;;  %v1191_v52 = vrot.slane %v1189_v41, 4  ;;  %v14292_v32 = vld [vmem:[%s15581_s14 + $0x30] sm:$0xff]  }
 0x13c   : >> { %v1181_v45 = vor.u32 %v1180_v37, %v15725_v36  ;;  %v1202_v20 = vshrl.u32 %v1127_v38, 16  ;;  %v1157_v57 = vsel %vm15631_vm9, %v1152_v39, %v1156_v23  ;;  %v1167_v58 = vsel %vm15631_vm9, %v1162_v40, %v1166_v26  ;;  %v1134_v23 = vld [vmem:[%s15581_s14 + $0x34] sm:$0xf]  ;;  %v1136_v37 = vld [vmem:[%s15581_s14 + $0x3c] sm:$0xf] }
 0x13d   : >> { %v1200_v60 = vrot.slane %v1198_v48, 5  ;;  %v1208_v62 = vshll.u32 %v1128_v46, 16  ;;  %v1212_v63 = vshrl.u32 %v1128_v46, 16  ;;  %v15748_v7 = vand.u32 %v11630_v42, %v15567_v6  ;;  %v14293_v38 = vld [vmem:[%s15581_s14 + $0x3c] sm:$0xff]  }
 0x13e   : >> { %13063 = vmatmul.mubr.msk.bf16.gmra.mrb[4].mxu1 %vm828_vm6, %v14284_v53  ;;  %v1129_v53 = vld [vmem:[%s15581_s14 + $0x20] sm:$0xf]  ;;  %v1182_v59 = vrot.slane %v1181_v45, 4  ;;  %v1204_v61 = vrot.slane %v1202_v20, 4  ;;  %v1228_v16 = vshll.u32 %v1130_v0, 16  ;;  %v1236_v22 = vshll.u32 %v1131_v4, 16 }
 0x13f   : >> { %13066 = vmatprep.mubr.msk.bf16.mxu1 %vm828_vm6, %v14285_v18  ;;  %v1194_v18 = vrot.slane %v1192_v47, 5  ;;  %v1218_v2 = vshll.u32 %v1129_v53, 16  ;;  %v1222_v3 = vshrl.u32 %v1129_v53, 16  ;;  %v1210_v11 = vrot.slane %v1208_v62, 5 }
 0x140   : >> { %v1205_v10 = vor.u32 %v1204_v61, %v1200_v60  ;;  %v1214_v12 = vrot.slane %v1212_v63, 4  ;;  %v1177_v24 = vsel %vm15631_vm9, %v1172_v50, %v15725_v36  ;;  %v1187_v25 = vsel %vm15631_vm9, %v1182_v59, %v1186_v51 }
 0x141   : >> { %13143 = vmatmul.mubr.msk.bf16.gmra.mrb[12].mxu0 %vm828_vm6, %v11530_v19  ;;  %v1195_v1 = vor.u32 %v1194_v18, %v1191_v52  ;;  %v15751_v14 = vrot.slane %v1218_v2, 5  ;;  %v1224_v15 = vrot.slane %v1222_v3, 4  ;;  %v1242_v26 = vshll.u32 %v1132_v5, 16  ;;  %v1137_v52 = vld [vmem:[%s15581_s14 + $0x40] sm:$0xf] }
 0x142   : >> { %13148 = vmatprep.mubr.msk.bf16.mxu0 %vm828_vm6, %v14286_v8  ;;  %v11418_v8 = vcombine.low %v1157_v57, %v1167_v58  ;;  %v1206_v19 = vrot.slane %v1205_v10, 4  ;;  %v1215_v6 = vor.u32 %v1214_v12, %v1210_v11  ;;  %v1230_v28 = vrot.slane %v1228_v16, 5  ;;  %v1138_v58 = vld [vmem:[%s15581_s14 + $0x44] sm:$0xf]  ;;  %v1139_v2 = vld [vmem:[%s15581_s14 + $0x48] sm:$0xf] }
 0x143   : >> { %v1196_v13 = vrot.slane %v1195_v1, 4  ;;  %v1244_v35 = vrot.slane %v1242_v26, 5  ;;  %v1246_v36 = vshrl.u32 %v1132_v5, 16  ;;  %v1252_v41 = vshll.u32 %v1133_v17, 16  ;;  %v14295_v10 = vld [vmem:[%s15581_s14 + $0x50] sm:$0xff]  }
 0x144   : >> { %v1211_v33 = vsel %vm15631_vm9, %v1206_v19, %v1210_v11  ;;  %v1216_v34 = vrot.slane %v1215_v6, 4  ;;  %v1256_v42 = vshrl.u32 %v1133_v17, 16  ;;  %v1262_v46 = vshll.u32 %v1134_v23, 16  ;;  %v1140_v19 = vld [vmem:[%s15581_s14 + $0x4c] sm:$0x1] }
 0x145   : >> { %v1201_v27 = vsel %vm15631_vm9, %v1196_v13, %v1200_v60  ;;  %v1248_v45 = vrot.slane %v1246_v36, 4  ;;  %v1266_v47 = vshrl.u32 %v1134_v23, 16  ;;  %v1254_v50 = vrot.slane %v1252_v41, 5 }
 0x146   : >> { %13067 = vmatmul.mubr.msk.bf16.gmra.mrb[8].mxu1 %vm828_vm6, %v14287_v21  ;;  %v1233_v21 = vshrl.u32 %v1131_v4, 16  ;;  %v11420_v48 = vcombine.low %v1201_v27, %v1211_v33  ;;  %v1258_v51 = vrot.slane %v1256_v42, 4  ;;  %v1264_v53 = vrot.slane %v1262_v46, 5 }
 0x147   : >> { %13070 = vmatprep.mubr.msk.bf16.mxu1 %vm828_vm6, %v14289_v30  ;;  %v1238_v30 = vrot.slane %v1236_v22, 5  ;;  %v1249_v20 = vor.u32 %v1248_v45, %v1244_v35  ;;  %v1272_v57 = vshll.u32 %v1135_v31, 16  ;;  %v1221_v59 = vsel %vm15631_vm9, %v1216_v34, %v15751_v14 }
 0x148   : >> { %v1235_v29 = vrot.slane %v1233_v21, 4  ;;  %v1277_v60 = vshrl.u32 %v1136_v37, 16  ;;  %v1280_v61 = vshll.u32 %v1136_v37, 16  ;;  %v1259_v63 = vor.u32 %v1258_v51, %v1254_v50  ;;  %v14296_v37 = vld [vmem:[%s15581_s14 + $0x58] sm:$0xff]   ;;  %v11610_v51 = vld [vmem:[%s15581_s14 + $0x14] sm:$0xf] }
 0x149   : >> { %13149 = vmatmul.mubr.msk.bf16.vlgmr.msra.gmra.mrb[0].mxu0 %vm828_vm6, %v14288_v43  ;;  %v11419_v43 = vcombine.low %v1177_v24, %v1187_v25  ;;  %v1250_v62 = vrot.slane %v1249_v20, 4  ;;  %v1286_v1 = vshll.u32 %v1137_v52, 16  ;;  %v1290_v5 = vshrl.u32 %v1137_v52, 16  ;;  %v11611_v20 = vld [vmem:[%s15581_s14 + $0x18] sm:$0xf] }
 0x14a   : >> { %13165 = vmatpush3.bf16.msra.mxu0 %v15640_v55  ;;  %13152 = vmatprep.mubr.msk.bf16.mxu0 %vm828_vm6, %v14290_v49  ;;  %v1225_v55 = vor.u32 %v1224_v15, %v15751_v14  ;;  %v1239_v40 = vor.u32 %v1238_v30, %v1235_v29  ;;  %v1279_v3 = vrot.slane %v1277_v60, 4  ;;  %v1282_v4 = vrot.slane %v1280_v61, 5  ;;  %v14300_v60 = vld [vmem:[%s15581_s14 + $0x2c4] sm:$0xff]   ;;  %v11613_v61 = vld [vmem:[%s15581_s14 + $0x20] sm:$0xf] }
 0x14b   : >> { %13182 = vmatprep.subr.bf16.mxu0 %v15748_v7  ;;  %v1255_v12 = vsel %vm15631_vm9, %v1250_v62, %v1254_v50  ;;  %v1288_v13 = vrot.slane %v1286_v1, 5  ;;  %v1296_v14 = vshll.u32 %v1138_v58, 16  ;;  %v1292_v17 = vrot.slane %v1290_v5, 4  ;;  %v14299_v50 = vld [vmem:[%s15581_s14 + $0x2bc] sm:$0xff]  }
 0x14c   : >> { %v1226_v39 = vrot.slane %v1225_v55, 4  ;;  %v1240_v49 = vrot.slane %v1239_v40, 4  ;;  %v1283_v16 = vor.u32 %v1282_v4, %v1279_v3  ;;  %v1260_v6 = vrot.slane %v1259_v63, 4  ;;  %v14297_v40 = vld [vmem:[%s15581_s14 + $0x2a8] sm:$0xff]  }
 0x14d   : >> { %v1300_v22 = vshrl.u32 %v1138_v58, 16  ;;  %v1306_v23 = vshll.u32 %v1139_v2, 16  ;;  %v1293_v25 = vor.u32 %v1292_v17, %v1288_v13  ;;  %v1298_v55 = vrot.slane %v1296_v14, 5  ;;  %v11612_v58 = vld [vmem:[%s15581_s14 + $0x1c] sm:$0xf] }
 0x14e   : >> { %13071 = vmatmul.mubr.msk.bf16.gmra.mrb[12].mxu1 %vm828_vm6, %v14291_v54  ;;  %v1268_v54 = vrot.slane %v1266_v47, 4  ;;  %v1231_v18 = vsel %vm15631_vm9, %v1226_v39, %v1230_v28  ;;  %v1245_v11 = vsel %vm15631_vm9, %v1240_v49, %v1244_v35  ;;  %v1310_v26 = vshrl.u32 %v1139_v2, 16  ;;  %v14298_v49 = vld [vmem:[%s15581_s14 + $0x2b0] sm:$0xff]  }
 0x14f   : >> { %13076 = vmatprep.mubr.msk.bf16.mxu1 %vm828_vm6, %v11418_v8  ;;  %v14294_v8 = vld [vmem:[%s15581_s14 + $0x44] sm:$0xff]   ;;  %v11421_v15 = vcombine.low %v1221_v59, %v1231_v18  ;;  %v11422_v24 = vcombine.low %v1245_v11, %v1255_v12  ;;  %v1284_v27 = vrot.slane %v1283_v16, 4  ;;  %v1302_v28 = vrot.slane %v1300_v22, 4  ;;  %v14303_v2 = vld [vmem:[%s15581_s14 + $0x530] sm:$0xff]   ;;  %v11616_v11 = vld [vmem:[%s15581_s14 + $0x2c] sm:$0xf] }
 0x150   : >> { %v1269_v0 = vor.u32 %v1268_v54, %v1264_v53  ;;  %v1308_v29 = vrot.slane %v1306_v23, 5  ;;  %v1294_v30 = vrot.slane %v1293_v25, 4  ;;  %v1312_v31 = vrot.slane %v1310_v26, 4  ;;  %v14305_v12 = vld [vmem:[%s15581_s14 + $0x53c] sm:$0xff]   ;;  %v14306_v25 = vld [vmem:[%s15581_s14 + $0x2e4] sm:$0xff]  }
 0x151   : >> { %13153 = vmatmul.mubr.msk.bf16.gmra.mrb[4].mxu0 %vm828_vm6, %v14292_v32  ;;  %v1316_v32 = vshll.u32 %v1140_v19, 16  ;;  %v1265_v33 = vsel %vm15631_vm9, %v1260_v6, %v1264_v53  ;;  %v1303_v35 = vor.u32 %v1302_v28, %v1298_v55  ;;  %v14301_v53 = vld [vmem:[%s15581_s14 + $0x528] sm:$0xff]   ;;  %v2674_v54 = vshrl.u32 %v11610_v51, 16 }
 0x152   : >> { %13156 = vmatprep.mubr.msk.bf16.mxu0 %vm828_vm6, %v14293_v38  ;;  %v1270_v21 = vrot.slane %v1269_v0, 4  ;;  %v1313_v36 = vor.u32 %v1312_v31, %v1308_v29  ;;  %v1289_v38 = vsel %vm15631_vm9, %v1284_v27, %v1288_v13  ;;  %v1299_v39 = vsel %vm15631_vm9, %v1294_v30, %v1298_v55  ;;  %v11617_v55 = vld [vmem:[%s15581_s14 + $0x30] sm:$0xf]  ;;  %v11620_v30 = vld [vmem:[%s15581_s14 + $0x3c] sm:$0xf] }
 0x153   : >> { %v11424_v42 = vcombine.low %v1289_v38, %v1299_v39  ;;  %v1318_v46 = vrot.slane %v1316_v32, 5  ;;  %v2683_v59 = vshll.u32 %v11611_v20, 16  ;;  %v2687_v18 = vshrl.u32 %v11611_v20, 16 }
 0x154   : >> { %v1314_v45 = vrot.slane %v1313_v36, 4  ;;  %v2676_v62 = vrot.slane %v2674_v54, 4  ;;  %v2693_v0 = vshll.u32 %v11612_v58, 16  ;;  %v2697_v1 = vshrl.u32 %v11612_v58, 16  ;;  %v14307_v36 = vld [vmem:[%s15581_s14 + $0x544] sm:$0xff]  }
 0x155   : >> { %v15832_v3 = vrot.slane %v2683_v59, 5  ;;  %v2689_v4 = vrot.slane %v2687_v18, 4  ;;  %v2703_v5 = vshll.u32 %v11613_v61, 16  ;;  %v2727_v19 = vshll.u32 %v11616_v11, 16 }
 0x156   : >> { %13077 = vmatmul.mubr.msk.bf16.vlgmr.msra.gmra.mrb[0].mxu1 %vm828_vm6, %v11419_v43  ;;  %v1304_v43 = vrot.slane %v1303_v35, 4  ;;  %v2695_v14 = vrot.slane %v2693_v0, 5  ;;  %v2731_v6 = vshrl.u32 %v11616_v11, 16  ;;  %v11621_v35 = vld [vmem:[%s15581_s14 + $0x40] sm:$0xf]  ;;  %v2737_v38 = vshll.u32 %v11617_v55, 16 }
 0x157   : >> { %13093 = vmatpush3.bf16.msra.mxu1 %v15643_v56  ;;  %13080 = vmatprep.mubr.msk.bf16.mxu1 %vm828_vm6, %v11420_v48  ;;  %v1274_v56 = vrot.slane %v1272_v57, 5  ;;  %v1319_v48 = vsel %vm15631_vm9, %v1314_v45, %v1318_v46  ;;  %v2677_v57 = vshll.u32 %v11610_v51, 16  ;;  %v2690_v22 = vor.u32 %v2689_v4, %v15832_v3 }
 0x158   : >> { %13704 = vmatprep.subr.bf16.mxu1 %v15575_v9  ;;  %v1309_v47 = vsel %vm15631_vm9, %v1304_v43, %v1308_v29  ;;  %v15843_v23 = vrot.slane %v2703_v5, 5  ;;  %v11618_v29 = vld [vmem:[%s15581_s14 + $0x34] sm:$0xf]  ;;  %v2741_v39 = vshrl.u32 %v11617_v55, 16  ;;  %v2762_v43 = vshrl.u32 %v11620_v30, 16 }
 0x159   : >> { %13157 = vmatmul.mubr.msk.bf16.gmra.mrb[8].mxu0 %vm828_vm6, %v14294_v8  ;;  %v1275_v34 = vsel %vm15631_vm9, %v1270_v21, %v1274_v56  ;;  %v11425_v52 = vcombine.low %v1309_v47, %v1319_v48  ;;  %v2679_v63 = vrot.slane %v2677_v57, 5  ;;  %v2707_v8 = vshrl.u32 %v11613_v61, 16  ;;  %v11614_v56 = vld [vmem:[%s15581_s14 + $0x24] sm:$0x1]  ;;  %v14304_v21 = vld [vmem:[%s15581_s14 + $0x2d8] sm:$0xff]  }
 0x15a   : >> { %13160 = vmatprep.mubr.msk.bf16.mxu0 %vm828_vm6, %v14295_v10  ;;  %v11423_v41 = vcombine.low %v1265_v33, %v1275_v34  ;;  %v11615_v10 = vld [vmem:[%s15581_s14 + $0x28] sm:$0xf]  ;;  %v2713_v28 = vshll.u32 %v11614_v56, 16  ;;  %v15851_v33 = vrot.slane %v2727_v19, 5  ;;  %v2733_v34 = vrot.slane %v2731_v6, 4 }
 0x15b   : >> { %v2680_v13 = vor.u32 %v2679_v63, %v2676_v62  ;;  %v2718_v16 = vshrl.u32 %v11615_v10, 16  ;;  %v2721_v17 = vshll.u32 %v11615_v10, 16  ;;  %v2765_v45 = vshll.u32 %v11620_v30, 16  ;;  %v11619_v57 = vld [vmem:[%s15581_s14 + $0x38] sm:$0x1]  ;;  %v14308_v62 = vld [vmem:[%s15581_s14 + $0x2ec] sm:$0xff]  }
 0x15c   : >> { %v2771_v47 = vshll.u32 %v11621_v35, 16  ;;  %v2775_v48 = vshrl.u32 %v11621_v35, 16  ;;  %v2739_v54 = vrot.slane %v2737_v38, 5  ;;  %v2743_v58 = vrot.slane %v2741_v39, 4  ;;  %v11622_v63 = vld [vmem:[%s15581_s14 + $0x44] sm:$0xf] }
 0x15d   : >> { %v2681_v26 = vrot.slane %v2680_v13, 4  ;;  %v2720_v31 = vrot.slane %v2718_v16, 4  ;;  %v2723_v32 = vrot.slane %v2721_v17, 5  ;;  %v2767_v61 = vrot.slane %v2765_v45, 5  ;;  %v11623_v5 = vld [vmem:[%s15581_s14 + $0x48] sm:$0xf] }
 0x15e   : >> { %13081 = vmatmul.mubr.msk.bf16.gmra.mrb[4].mxu1 %vm828_vm6, %v11421_v15  ;;  %v2699_v15 = vrot.slane %v2697_v1, 4  ;;  %v15872_v0 = vrot.slane %v2771_v47, 5  ;;  %v2777_v1 = vrot.slane %v2775_v48, 4  ;;  %v2757_v4 = vshll.u32 %v11619_v57, 16  ;;  %v11625_v16 = vld [vmem:[%s15581_s14 + $0x50] sm:$0xf] }
 0x15f   : >> { %13084 = vmatprep.mubr.msk.bf16.mxu1 %vm828_vm6, %v11422_v24  ;;  %v2709_v24 = vrot.slane %v2707_v8, 4  ;;  %v2724_v51 = vor.u32 %v2723_v32, %v2720_v31  ;;  %v14310_v8 = vld [vmem:[%s15581_s14 + $0x558] sm:$0xff]   ;;  %v2744_v13 = vor.u32 %v2743_v58, %v2739_v54  ;;  %v2781_v56 = vshll.u32 %v11622_v63, 16  ;;  %v11626_v17 = vld [vmem:[%s15581_s14 + $0x54] sm:$0xf]  ;;  %v14312_v39 = vld [vmem:[%s15581_s14 + $0x56c] sm:$0xff]  }
 0x160   : >> { %v2700_v27 = vor.u32 %v2699_v15, %v2695_v14  ;;  %v2778_v19 = vor.u32 %v2777_v1, %v15872_v0  ;;  %v2785_v6 = vshrl.u32 %v11622_v63, 16  ;;  %v2759_v55 = vrot.slane %v2757_v4, 5  ;;  %v11624_v35 = vld [vmem:[%s15581_s14 + $0x4c] sm:$0x1] }
 0x161   : >> { %13161 = vmatmul.mubr.msk.bf16.gmra.mrb[12].mxu0 %vm828_vm6, %v14296_v37  ;;  %v2691_v37 = vrot.slane %v2690_v22, 4  ;;  %v2795_v22 = vshrl.u32 %v11623_v5, 16  ;;  %v2745_v30 = vrot.slane %v2744_v13, 4  ;;  %vm3245_vm10 = vsmask.f32 7938 }
 0x162   : >> { %13166 = vmatprep.mubr.msk.bf16.mxu0 %vm828_vm6, %v14297_v40  ;;  %v14309_v40 = vld [vmem:[%s15581_s14 + $0x550] sm:$0xff]   ;;  %v2701_v46 = vrot.slane %v2700_v27, 4  ;;  %v2809_v27 = vshll.u32 %v11625_v16, 16  ;;  %vm3079_vm11 = vsmask.f32 256  ;;  %vm15947_vm13 = vmand %vm226_vm0, %vm3245_vm10 }
 0x163   : >> { %v2696_v20 = vsel %vm15631_vm9, %v2691_v37, %v2695_v14  ;;  %vm3080_vm12 = vsmask.f32 4368  ;;  %vm15959_vm15 = vmand %vm231_vm1, %vm3079_vm11 }
 0x164   : >> { %v2706_v10 = vsel %vm15631_vm9, %v2701_v46, %v15843_v23  ;;  %v11628_v46 = vld [vmem:[%s15581_s14 + $0x5c] sm:$0xf]  ;;  %vm15953_vm14 = vmor %vm3079_vm11, %vm3080_vm12 }
 0x165   : >> { %v2835_v58 = vshll.u32 %v11628_v46, 16 }
 0x166   : >> { %13085 = vmatmul.mubr.msk.bf16.gmra.mrb[8].mxu1 %vm828_vm6, %v11423_v41  ;;  %v2747_v41 = vshll.u32 %v11618_v29, 16 }
 0x167   : >> { %13088 = vmatprep.mubr.msk.bf16.mxu1 %vm828_vm6, %v11424_v42  ;;  %v2751_v42 = vshrl.u32 %v11618_v29, 16  ;;  %v2819_v29 = vshrl.u32 %v11626_v17, 16 }
 0x168   : >> { %v15868_v59 = vrot.slane %v2747_v41, 5 }
 0x169   : >> { %13167 = vmatmul.mubr.msk.bf16.vlgmr.msra.gmra.mrb[0].mxu0 %vm828_vm6, %v14298_v49  ;;  %v2686_v49 = vsel %vm15631_vm9, %v2681_v26, %v15832_v3  ;;  %v2753_v18 = vrot.slane %v2751_v42, 4  ;;  %v2806_v26 = vshrl.u32 %v11625_v16, 16  ;;  %v2811_v42 = vrot.slane %v2809_v27, 5 }
 0x16a   : >> { %13183 = vmatpush3.bf16.msra.mxu0 %v15748_v7  ;;  %13170 = vmatprep.mubr.msk.bf16.mxu0 %vm828_vm6, %v14299_v50  ;;  %v14302_v7 = vld [vmem:[%s15581_s14 + $0x2d0] sm:$0xff]   ;;  %v2715_v50 = vrot.slane %v2713_v28, 5  ;;  %v2815_v28 = vshll.u32 %v11626_v17, 16  ;;  %v2821_v45 = vrot.slane %v2819_v29, 4  ;;  %v2750_v47 = vsel %vm15631_vm9, %v2745_v30, %v15868_v59 }
 0x16b   : >> { %v2754_v14 = vor.u32 %v2753_v18, %v15868_v59  ;;  %v2808_v41 = vrot.slane %v2806_v26, 4  ;;  %v2839_v59 = vshrl.u32 %v11628_v46, 16 }
 0x16d   : >> { %v2755_v31 = vrot.slane %v2754_v14, 4  ;;  %v2812_v18 = vor.u32 %v2811_v42, %v2808_v41  ;;  %v2841_v4 = vrot.slane %v2839_v59, 4  ;;  %v11665_v59 = vld [vmem:[%s15942_s27 + $0x14] sm:$0xf] }
 0x16e   : >> { %13089 = vmatmul.mubr.msk.bf16.gmra.mrb[12].mxu1 %vm828_vm6, %v11425_v52  ;;  %v2734_v52 = vor.u32 %v2733_v34, %v15851_v33  ;;  %v2783_v34 = vrot.slane %v2781_v56, 5 }
 0x16f   : >> { %13094 = vmatprep.mubr.msk.bf16.mxu1 %vm828_vm6, %v14301_v53  ;;  %v2760_v48 = vsel %vm15631_vm9, %v2755_v31, %v2759_v55 }
 0x170   : >> { %v2735_v3 = vrot.slane %v2734_v52, 4 }
 0x171   : >> { %13171 = vmatmul.mubr.msk.bf16.gmra.mrb[4].mxu0 %vm828_vm6, %v14300_v60  ;;  %v2764_v60 = vrot.slane %v2762_v43, 4  ;;  %v2817_v43 = vrot.slane %v2815_v28, 5 }
 0x172   : >> { %13174 = vmatprep.mubr.msk.bf16.mxu0 %vm828_vm6, %v14302_v7  ;;  %v11631_v7 = vcombine.low %v2686_v49, %v2696_v20  ;;  %v14313_v49 = vld [vmem:[%s15581_s14 + $0x7e4] sm:$0xff]  }
 0x173   : >> { %v2768_v15 = vor.u32 %v2767_v61, %v2764_v60  ;;  %v2822_v60 = vor.u32 %v2821_v45, %v2817_v43  ;;  %v11634_v61 = vcombine.low %v2750_v47, %v2760_v48 }
 0x175   : >> { %v2769_v32 = vrot.slane %v2768_v15, 4 }
 0x176   : >> { %13095 = vmatmul.mubr.msk.bf16.vlgmr.msra.gmra.mrb[0].mxu1 %vm828_vm6, %v14303_v2  ;;  %v2725_v2 = vrot.slane %v2724_v51, 4 }
 0x177   : >> { %13705 = vmatpush3.bf16.msra.mxu1 %v15575_v9  ;;  %13098 = vmatprep.mubr.msk.bf16.mxu1 %vm828_vm6, %v14305_v12  ;;  %v2710_v9 = vor.u32 %v2709_v24, %v15843_v23  ;;  %v14311_v12 = vld [vmem:[%s15581_s14 + $0x564] sm:$0xff]   ;;  %v2774_v51 = vsel %vm15631_vm9, %v2769_v32, %v15872_v0 }
 0x178   : >> { %v2730_v24 = vsel %vm15631_vm9, %v2725_v2, %v15851_v33  ;;  %v2779_v33 = vrot.slane %v2778_v19, 4 }
 0x179   : >> { %13175 = vmatmul.mubr.msk.bf16.gmra.mrb[8].mxu0 %vm828_vm6, %v14304_v21  ;;  %v2711_v53 = vrot.slane %v2710_v9, 4  ;;  %v2791_v21 = vshll.u32 %v11623_v5, 16  ;;  %v2797_v9 = vrot.slane %v2795_v22, 4  ;;  %v14314_v5 = vld [vmem:[%s15581_s14 + $0x7ec] sm:$0xff]  }
 0x17a   : >> { %13178 = vmatprep.mubr.msk.bf16.mxu0 %vm828_vm6, %v14306_v25  ;;  %v2740_v25 = vsel %vm15631_vm9, %v2735_v3, %v2739_v54  ;;  %v2784_v52 = vsel %vm15631_vm9, %v2779_v33, %v2783_v34  ;;  %v2837_v3 = vrot.slane %v2835_v58, 5 }
 0x17b   : >> { %v2716_v11 = vsel %vm15631_vm9, %v2711_v53, %v2715_v50  ;;  %v2793_v37 = vrot.slane %v2791_v21, 5  ;;  %v11633_v38 = vcombine.low %v2730_v24, %v2740_v25  ;;  %v2801_v50 = vshll.u32 %v11624_v35, 16  ;;  %v14316_v25 = vld [vmem:[%s15581_s14 + $0x800] sm:$0xff]  }
 0x17c   : >> { %v11632_v23 = vcombine.low %v2706_v10, %v2716_v11  ;;  %v2823_v10 = vrot.slane %v2822_v60, 4  ;;  %v11629_v11 = vld [vmem:[%s15581_s14 + $0x60] sm:$0x1]  ;;  %v2842_v56 = vor.u32 %v2841_v4, %v2837_v3 }
 0x17d   : >> { %v2798_v53 = vor.u32 %v2797_v9, %v2793_v37  ;;  %v2803_v1 = vrot.slane %v2801_v50, 5  ;;  %v2845_v16 = vshll.u32 %v11629_v11, 16 }
 0x17e   : >> { %13099 = vmatmul.mubr.msk.bf16.gmra.mrb[4].mxu1 %vm828_vm6, %v14307_v36  ;;  %v2787_v36 = vrot.slane %v2785_v6, 4 }
 0x17f   : >> { %13102 = vmatprep.mubr.msk.bf16.mxu1 %vm828_vm6, %v14309_v40  ;;  %v11627_v40 = vld [vmem:[%s15581_s14 + $0x58] sm:$0xf]  ;;  %v2799_v0 = vrot.slane %v2798_v53, 4  ;;  %v2847_v24 = vrot.slane %v2845_v16, 5  ;;  %v18738_v16 = vmov 0 }
 0x180   : >> { %v2788_v20 = vor.u32 %v2787_v36, %v2783_v34  ;;  %v2825_v54 = vshll.u32 %v11627_v40, 16  ;;  %v2829_v57 = vshrl.u32 %v11627_v40, 16  ;;  %v18739_v16 = vsel %vm15959_vm15, 4294967295, %v18738_v16 }
 0x181   : >> { %13179 = vmatmul.mubr.msk.bf16.gmra.mrb[12].mxu0 %vm828_vm6, %v14308_v62  ;;  %v11635_v62 = vcombine.low %v2774_v51, %v2784_v52  ;;  %v2804_v14 = vsel %vm15631_vm9, %v2799_v0, %v2803_v1  ;;  %18740 = vst [vmem:[#allocation6_spill] sm:$0xff] %v18739_v16 }
 0x182   : >> { %13184 = vmatprep.mubr.msk.bf16.mxu0 %vm828_vm6, %v11631_v7  ;;  %v2789_v63 = vrot.slane %v2788_v20, 4  ;;  %v2827_v7 = vrot.slane %v2825_v54, 5  ;;  %v2831_v2 = vrot.slane %v2829_v57, 4 }
 0x184   : >> { %v2794_v13 = vsel %vm15631_vm9, %v2789_v63, %v2793_v37  ;;  %v2832_v15 = vor.u32 %v2831_v2, %v2827_v7  ;;  %v2828_v19 = vsel %vm15631_vm9, %v2823_v10, %v2827_v7  ;;  %v18735_v10 = vmov 0 }
 0x185   : >> { %v11636_v6 = vcombine.low %v2794_v13, %v2804_v14  ;;  %v18736_v10 = vsel %vm15953_vm14, 4294967295, %v18735_v10 }
 0x186   : >> { %13103 = vmatmul.mubr.msk.bf16.gmra.mrb[8].mxu1 %vm828_vm6, %v14310_v8  ;;  %v2813_v8 = vrot.slane %v2812_v18, 4  ;;  %v2833_v22 = vrot.slane %v2832_v15, 4  ;;  %18737 = vst [vmem:[#allocation5_spill] sm:$0xff] %v18736_v10 }
 0x187   : >> { %13106 = vmatprep.mubr.msk.bf16.mxu1 %vm828_vm6, %v14311_v12  ;;  %v14315_v12 = vld [vmem:[%s15581_s14 + $0x7f8] sm:$0xff]  }
 0x188   : >> { %v2818_v17 = vsel %vm15631_vm9, %v2813_v8, %v2817_v43  ;;  %v2838_v55 = vsel %vm15631_vm9, %v2833_v22, %v2837_v3 }
 0x189   : >> { %13185 = vmatmul.mubr.msk.bf16.vlgmr.msra.gmra.mrb[0].mxu0 %vm828_vm6, %v11632_v23  ;;  %v11637_v21 = vcombine.low %v2818_v17, %v2828_v19  ;;  %v2843_v23 = vrot.slane %v2842_v56, 4  ;;  %v11670_v17 = vld [vmem:[%s15942_s27 + $0x24] sm:$0x1] }
 0x18a   : >> { %13188 = vmatprep.mubr.msk.bf16.mxu0 %vm828_vm6, %v11633_v38 }
 0x18b   : >> { %v2848_v26 = vsel %vm15631_vm9, %v2843_v23, %v2847_v24 }
 0x18c   : >> { %v11638_v27 = vcombine.low %v2838_v55, %v2848_v26 }
 0x18e   : >> { %13107 = vmatmul.mubr.msk.bf16.gmra.mrb[12].mxu1 %vm828_vm6, %v14312_v39 }
 0x18f   : >> { %13120 = vmatprep.mubr.msk.bf16.mxu1 %vm828_vm6, %v14313_v49 }
 0x191   : >> { %13189 = vmatmul.mubr.msk.bf16.gmra.mrb[4].mxu0 %vm828_vm6, %v11634_v61 }
 0x192   : >> { %13192 = vmatprep.mubr.msk.bf16.mxu0 %vm828_vm6, %v11635_v62 }
 0x196   : >> { %13121 = vmatmul.mubr.msk.bf16.vlgmr.msra.gmra.mrb[8].mxu1 %vm828_vm6, %v14314_v5 }
 0x197   : >> { %13124 = vmatprep.mubr.msk.bf16.mxu1 %vm828_vm6, %v14315_v12 }
 0x199   : >> { %13193 = vmatmul.mubr.msk.bf16.gmra.mrb[8].mxu0 %vm828_vm6, %v11636_v6 }
 0x19a   : >> { %13196 = vmatprep.mubr.msk.bf16.mxu0 %vm828_vm6, %v11637_v21 }
 0x19e   : >> { %13125 = vmatmul.mubr.msk.bf16.gmra.mrb[12].mxu1 %vm828_vm6, %v14316_v25 }
 0x1a1   : >> { %13197 = vmatmul.mubr.msk.bf16.gmra.mrb[12].mxu0 %vm828_vm6, %v11638_v27 }
 0x249   : >> { %v13096_v28 = vpop.f32.mrb[0].mxu1 }
 0x24a   : >> { %v1608_v29 = vpop.f32.mrb[1].mxu1 }
 0x24b   : >> { %v13097_v30 = vpop.f32.mrb[2].mxu1 }
 0x24c   : >> { %v1611_v31 = vpop.f32.mrb[3].mxu1 }
 0x251   : >> { %v13100_v32 = vpop.f32.mrb[4].mxu1 }
 0x252   : >> { %v1624_v34 = vpop.f32.mrb[5].mxu1 }
 0x253   : >> { %v13101_v33 = vpop.f32.mrb[6].mxu1 }
 0x254   : >> { %v15938_v35 = vpop.f32.mrb[7].mxu1 }
 0x25c   : >> { %v13186_v36 = vpop.f32.mrb[0].mxu0 }
 0x25d   : >> { %v13706_v37 = vadd.f32 %v13186_v36, %v13096_v28  ;;  %v2936_v9 = vpop.f32.mrb[1].mxu0 }
 0x25e   : >> { %v13707_v38 = vadd.f32 %v2936_v9, %v1608_v29  ;;  %v13187_v39 = vpop.f32.mrb[2].mxu0 }
 0x25f   : >> { %v3017_v40 = vmax.f32 %v13706_v37, 0.0  ;;  %v13708_v41 = vadd.f32 %v13187_v39, %v13097_v30  ;;  %v2939_v42 = vpop.f32.mrb[3].mxu0 }
 0x260   : >> { %v3015_v43 = vmax.f32 %v13707_v38, 0.0  ;;  %v13709_v45 = vadd.f32 %v2939_v42, %v1611_v31 }
 0x261   : >> { %v12638_v46 = vpack.c.bf16 %v3017_v40, %v3017_v40  ;;  %v3018_v47 = vmax.f32 %v13708_v41, 0.0 }
 0x262   : >> { %v12636_v48 = vpack.c.bf16 %v3015_v43, %v3015_v43  ;;  %v3016_v49 = vmax.f32 %v13709_v45, 0.0 }
 0x263   : >> { %v3100_v50 = vshrl.u32 %v12638_v46, 16  ;;  %v12639_v51 = vpack.c.bf16 %v3018_v47, %v3018_v47  ;;  %v3103_v52 = vshll.u32 %v12638_v46, 16 }
 0x264   : >> { %v3083_v20 = vshrl.u32 %v12636_v48, 16  ;;  %v3086_v53 = vshll.u32 %v12636_v48, 16  ;;  %v12637_v54 = vpack.c.bf16 %v3016_v49, %v3016_v49  ;;  %v13190_v57 = vpop.f32.mrb[4].mxu0 }
 0x265   : >> { %v3102_v58 = vrot.slane %v3100_v50, 7  ;;  %v3109_v18 = vshrl.u32 %v12639_v51, 16  ;;  %v3112_v60 = vshll.u32 %v12639_v51, 16  ;;  %v13710_v61 = vadd.f32 %v13190_v57, %v13100_v32  ;;  %v2952_v62 = vpop.f32.mrb[5].mxu0  ;;  %v11672_v51 = vld [vmem:[%s15942_s27 + $0x28] sm:$0xf] }
 0x266   : >> { %v3085_v63 = vrot.slane %v3083_v20, 7  ;;  %v3091_v1 = vshrl.u32 %v12637_v54, 16  ;;  %v3094_v7 = vshll.u32 %v12637_v54, 16  ;;  %v13711_v2 = vadd.f32 %v2952_v62, %v1624_v34  ;;  %v13191_v3 = vpop.f32.mrb[6].mxu0 }
 0x267   : >> { %v3105_v5 = vor.u32 %v3103_v52, %v3102_v58  ;;  %v3107_v8 = vrot.slane %v3102_v58, 4  ;;  %v3111_v11 = vrot.slane %v3109_v18, 7  ;;  %v3021_v12 = vmax.f32 %v13710_v61, 0.0  ;;  %v2955_v13 = vpop.f32.mrb[7].mxu0 }
 0x268   : >> { %v3088_v15 = vor.u32 %v3086_v53, %v3085_v63  ;;  %v3089_v56 = vrot.slane %v3085_v63, 4  ;;  %v3093_v19 = vrot.slane %v3091_v1, 7  ;;  %v3019_v6 = vmax.f32 %v13711_v2, 0.0 }
 0x269   : >> { %v13122_v4 = vpop.f32.mrb[8].mxu1  ;;  %v3114_v22 = vor.u32 %v3112_v60, %v3111_v11  ;;  %v3116_v23 = vrot.slane %v3111_v11, 4  ;;  %v12642_v24 = vpack.c.bf16 %v3021_v12, %v3021_v12  ;;  %v13712_v25 = vadd.f32 %v13191_v3, %v13101_v33 }
 0x26a   : >> { %v1841_v14 = vpop.f32.mrb[9].mxu1  ;;  %v3248_v26 = vsel %vm15947_vm13, %v3088_v15, %v11665_v59  ;;  %v3096_v27 = vor.u32 %v3094_v7, %v3093_v19  ;;  %v3098_v28 = vrot.slane %v3093_v19, 4  ;;  %v12640_v29 = vpack.c.bf16 %v3019_v6, %v3019_v6 }
 0x26b   : >> { %v13123_v21 = vpop.f32.mrb[10].mxu1  ;;  %11666 = vst [vmem:[%s15942_s27 + $0x14] sm:$0xf] %v3248_v26  ;;  %v3115_v30 = vsel %vm15953_vm14, %v3107_v8, %v3114_v22  ;;  %v3256_v31 = vsel %vm15959_vm15, %v3116_v23, %v11670_v17  ;;  %v3135_v32 = vshrl.u32 %v12642_v24, 16  ;;  %v3138_v36 = vshll.u32 %v12642_v24, 16 }
 0x26c   : >> { %v1844_v55 = vpop.f32.mrb[11].mxu1  ;;  %11669 = vst.msk [vmem:[%s15942_s27 + $0x20] sm:$0xf] %vm226_vm0, %v3115_v30  ;;  %11671 = vst [vmem:[%s15942_s27 + $0x24] sm:$0x1] %v3256_v31  ;;  %v3097_v34 = vsel %vm15953_vm14, %v3089_v56, %v3096_v27  ;;  %v3106_v33 = vsel %vm15953_vm14, %v3098_v28, %v3105_v5  ;;  %v3118_v37 = vshrl.u32 %v12640_v29, 16  ;;  %v13713_v40 = vadd.f32 %v2955_v13, %v15938_v35 }
 0x26d   : >> { %v13194_v9 = vpop.f32.mrb[8].mxu0  ;;  %11667 = vst.msk [vmem:[%s15942_s27 + $0x18] sm:$0xf] %vm226_vm0, %v3097_v34  ;;  %11668 = vst.msk [vmem:[%s15942_s27 + $0x1c] sm:$0xf] %vm226_vm0, %v3106_v33  ;;  %v3137_v38 = vrot.slane %v3135_v32, 7 }
 0x26e   : >> { %v3022_v39 = vmax.f32 %v13712_v25, 0.0  ;;  %v13714_v41 = vadd.f32 %v13194_v9, %v13122_v4  ;;  %v2968_v42 = vpop.f32.mrb[9].mxu0  ;;  %v3120_v43 = vrot.slane %v3118_v37, 7  ;;  %v3121_v45 = vshll.u32 %v12640_v29, 16  ;;  %v11677_v8 = vld [vmem:[%s15942_s27 + $0x38] sm:$0x1] }
 0x26f   : >> { %v13715_v46 = vadd.f32 %v2968_v42, %v1841_v14  ;;  %v13195_v47 = vpop.f32.mrb[10].mxu0  ;;  %v3140_v49 = vor.u32 %v3138_v36, %v3137_v38  ;;  %v3142_v50 = vrot.slane %v3137_v38, 4  ;;  %v3020_v20 = vmax.f32 %v13713_v40, 0.0  ;;  %v11679_v34 = vld [vmem:[%s15942_s27 + $0x3c] sm:$0xf] }
 0x270   : >> { %v12643_v52 = vpack.c.bf16 %v3022_v39, %v3022_v39  ;;  %v2971_v53 = vpop.f32.mrb[11].mxu0  ;;  %v3123_v57 = vor.u32 %v3121_v45, %v3120_v43  ;;  %v3124_v58 = vrot.slane %v3120_v43, 4  ;;  %v3025_v59 = vmax.f32 %v13714_v41, 0.0 }
 0x271   : >> { %v13126_v48 = vpop.f32.mrb[12].mxu1  ;;  %v3023_v35 = vmax.f32 %v13715_v46, 0.0  ;;  %v12641_v62 = vpack.c.bf16 %v3020_v20, %v3020_v20  ;;  %v13716_v63 = vadd.f32 %v13195_v47, %v13123_v21  ;;  %v13717_v4 = vadd.f32 %v2971_v53, %v1844_v55 }
 0x272   : >> { %v1857_v54 = vpop.f32.mrb[13].mxu1  ;;  %v3144_v60 = vshrl.u32 %v12643_v52, 16  ;;  %v3147_v61 = vshll.u32 %v12643_v52, 16  ;;  %v3259_v7 = vsel %vm15947_vm13, %v3123_v57, %v11672_v51  ;;  %v12646_v2 = vpack.c.bf16 %v3025_v59, %v3025_v59  ;;  %v11684_v51 = vld [vmem:[%s15942_s27 + $0x4c] sm:$0x1] }
 0x273   : >> { %v13127_v18 = vpop.f32.mrb[14].mxu1  ;;  %v12644_v3 = vpack.c.bf16 %v3023_v35, %v3023_v35  ;;  %11673 = vst [vmem:[%s15942_s27 + $0x28] sm:$0xf] %v3259_v7  ;;  %v3126_v11 = vshrl.u32 %v12641_v62, 16  ;;  %v3129_v12 = vshll.u32 %v12641_v62, 16  ;;  %v3026_v13 = vmax.f32 %v13716_v63, 0.0 }
 0x274   : >> { %v1860_v1 = vpop.f32.mrb[15].mxu1  ;;  %v3146_v5 = vrot.slane %v3144_v60, 7  ;;  %v3170_v14 = vshrl.u32 %v12646_v2, 16  ;;  %v3173_v15 = vshll.u32 %v12646_v2, 16  ;;  %v13198_v19 = vpop.f32.mrb[12].mxu0  ;;  %v3024_v26 = vmax.f32 %v13717_v4, 0.0 }
 0x275   : >> { %v3153_v56 = vshrl.u32 %v12644_v3, 16  ;;  %v3156_v17 = vshll.u32 %v12644_v3, 16  ;;  %v3128_v22 = vrot.slane %v3126_v11, 7  ;;  %v12647_v23 = vpack.c.bf16 %v3026_v13, %v3026_v13  ;;  %v2984_v24 = vpop.f32.mrb[13].mxu0 }
 0x276   : >> { %v3149_v6 = vor.u32 %v3147_v61, %v3146_v5  ;;  %v3151_v21 = vrot.slane %v3146_v5, 4  ;;  %v3172_v25 = vrot.slane %v3170_v14, 7  ;;  %v13718_v27 = vadd.f32 %v13198_v19, %v13126_v48  ;;  %v13199_v28 = vpop.f32.mrb[14].mxu0 }
 0x277   : >> { %v3155_v55 = vrot.slane %v3153_v56, 7  ;;  %v3131_v31 = vor.u32 %v3129_v12, %v3128_v22  ;;  %v3133_v32 = vrot.slane %v3128_v22, 4  ;;  %v2987_v33 = vpop.f32.mrb[15].mxu0  ;;  %v3179_v39 = vshrl.u32 %v12647_v23, 16  ;;  %v11691_v22 = vld [vmem:[%s15942_s27 + $0x60] sm:$0x1] }
 0x278   : >> { %v3150_v29 = vsel %vm15953_vm14, %v3142_v50, %v3149_v6  ;;  %v3265_v30 = vsel %vm15959_vm15, %v3151_v21, %v11677_v8  ;;  %v3175_v38 = vor.u32 %v3173_v15, %v3172_v25  ;;  %v12645_v41 = vpack.c.bf16 %v3024_v26, %v3024_v26  ;;  %v11686_v21 = vld [vmem:[%s15942_s27 + $0x50] sm:$0xf] }
 0x279   : >> { %11676 = vst.msk [vmem:[%s15942_s27 + $0x34] sm:$0xf] %vm226_vm0, %v3150_v29  ;;  %11678 = vst [vmem:[%s15942_s27 + $0x38] sm:$0x1] %v3265_v30  ;;  %v3158_v36 = vor.u32 %v3156_v17, %v3155_v55  ;;  %v3132_v37 = vsel %vm15953_vm14, %v3124_v58, %v3131_v31  ;;  %v3141_v9 = vsel %vm15953_vm14, %v3133_v32, %v3140_v49  ;;  %v3029_v42 = vmax.f32 %v13718_v27, 0.0 }
 0x27a   : >> { %11674 = vst.msk [vmem:[%s15942_s27 + $0x2c] sm:$0xf] %vm226_vm0, %v3132_v37  ;;  %11675 = vst.msk [vmem:[%s15942_s27 + $0x30] sm:$0xf] %vm226_vm0, %v3141_v9  ;;  %v13719_v43 = vadd.f32 %v2984_v24, %v1857_v54  ;;  %v3181_v45 = vrot.slane %v3179_v39, 7  ;;  %v3182_v46 = vshll.u32 %v12647_v23, 16  ;;  %v13720_v47 = vadd.f32 %v13199_v28, %v13127_v18 }
 0x27b   : >> { %v3268_v40 = vsel %vm15947_vm13, %v3158_v36, %v11679_v34  ;;  %v13721_v48 = vadd.f32 %v2987_v33, %v1860_v1  ;;  %v3177_v50 = vrot.slane %v3172_v25, 4  ;;  %v3161_v49 = vshrl.u32 %v12645_v41, 16 }
 0x27c   : >> { %11680 = vst [vmem:[%s15942_s27 + $0x3c] sm:$0xf] %v3268_v40  ;;  %v12650_v52 = vpack.c.bf16 %v3029_v42, %v3029_v42  ;;  %v3027_v20 = vmax.f32 %v13719_v43, 0.0  ;;  %v3184_v53 = vor.u32 %v3182_v46, %v3181_v45  ;;  %v3186_v57 = vrot.slane %v3181_v45, 4 }
 0x27d   : >> { %v3030_v58 = vmax.f32 %v13720_v47, 0.0  ;;  %v3028_v59 = vmax.f32 %v13721_v48, 0.0  ;;  %v3163_v35 = vrot.slane %v3161_v49, 7  ;;  %v3164_v60 = vshll.u32 %v12645_v41, 16 }
 0x27e   : >> { %v3205_v61 = vshrl.u32 %v12650_v52, 16  ;;  %v12648_v54 = vpack.c.bf16 %v3027_v20, %v3027_v20  ;;  %v3185_v62 = vsel %vm15953_vm14, %v3177_v50, %v3184_v53  ;;  %v3274_v18 = vsel %vm15959_vm15, %v3186_v57, %v11684_v51 }
 0x27f   : >> { %v12651_v63 = vpack.c.bf16 %v3030_v58, %v3030_v58  ;;  %v12649_v1 = vpack.c.bf16 %v3028_v59, %v3028_v59  ;;  %v3159_v7 = vrot.slane %v3155_v55, 4  ;;  %11683 = vst.msk [vmem:[%s15942_s27 + $0x48] sm:$0xf] %vm226_vm0, %v3185_v62  ;;  %11685 = vst [vmem:[%s15942_s27 + $0x4c] sm:$0x1] %v3274_v18  ;;  %v3166_v2 = vor.u32 %v3164_v60, %v3163_v35 }
 0x280   : >> { %v3168_v3 = vrot.slane %v3163_v35, 4  ;;  %v3188_v4 = vshrl.u32 %v12648_v54, 16  ;;  %v3207_v5 = vrot.slane %v3205_v61, 7  ;;  %v3191_v14 = vshll.u32 %v12648_v54, 16 }
 0x281   : >> { %v3214_v8 = vshrl.u32 %v12651_v63, 16  ;;  %v3196_v11 = vshrl.u32 %v12649_v1, 16  ;;  %v3167_v12 = vsel %vm15953_vm14, %v3159_v7, %v3166_v2  ;;  %v3217_v17 = vshll.u32 %v12651_v63, 16 }
 0x282   : >> { %v3176_v13 = vsel %vm15953_vm14, %v3168_v3, %v3175_v38  ;;  %11681 = vst.msk [vmem:[%s15942_s27 + $0x40] sm:$0xf] %vm226_vm0, %v3167_v12  ;;  %v3190_v15 = vrot.slane %v3188_v4, 7  ;;  %v3208_v6 = vshll.u32 %v12650_v52, 16  ;;  %v3199_v23 = vshll.u32 %v12649_v1, 16 }
 0x283   : >> { %11682 = vst.msk [vmem:[%s15942_s27 + $0x44] sm:$0xf] %vm226_vm0, %v3176_v13  ;;  %v3216_v56 = vrot.slane %v3214_v8, 7  ;;  %v3198_v19 = vrot.slane %v3196_v11, 7  ;;  %v3212_v24 = vrot.slane %v3207_v5, 4  ;;  %744 = sbr.rel (!%p742_p4) target bundleno = 269 (0x10d), region = 149 }
 0x284   : >> { %v3193_v25 = vor.u32 %v3191_v14, %v3190_v15  ;;  %v3210_v27 = vor.u32 %v3208_v6, %v3207_v5  ;;  %v3194_v28 = vrot.slane %v3190_v15, 4 }
 0x285   : >> { %v3219_v55 = vor.u32 %v3217_v17, %v3216_v56  ;;  %v3221_v26 = vrot.slane %v3216_v56, 4  ;;  %v3201_v29 = vor.u32 %v3199_v23, %v3198_v19  ;;  %v3203_v30 = vrot.slane %v3198_v19, 4 }
 0x286   : >> { %v3277_v31 = vsel %vm15947_vm13, %v3193_v25, %v11686_v21 }
 0x287   : >> { %v3220_v32 = vsel %vm15953_vm14, %v3212_v24, %v3219_v55  ;;  %v3283_v34 = vsel %vm15959_vm15, %v3221_v26, %v11691_v22  ;;  %11687 = vst [vmem:[%s15942_s27 + $0x50] sm:$0xf] %v3277_v31  ;;  %v3202_v33 = vsel %vm15953_vm14, %v3194_v28, %v3201_v29  ;;  %v3211_v36 = vsel %vm15953_vm14, %v3203_v30, %v3210_v27 }
 0x288   : >> { %11690 = vst.msk [vmem:[%s15942_s27 + $0x5c] sm:$0xf] %vm226_vm0, %v3220_v32  ;;  %11692 = vst [vmem:[%s15942_s27 + $0x60] sm:$0x1] %v3283_v34 }
 0x289   : >> { %11688 = vst.msk [vmem:[%s15942_s27 + $0x54] sm:$0xf] %vm226_vm0, %v3202_v33  ;;  %11689 = vst.msk [vmem:[%s15942_s27 + $0x58] sm:$0xf] %vm226_vm0, %v3211_v36 }
 0x28a LB: >> { %v14317_v37 = vld [vmem:[%s18719_s2 + $0x8] sm:$0xff]   ;;  %v14318_v9 = vld [vmem:[%s18719_s2 + $0x20] sm:$0xff]   ;;  %s12652_s29 = smul.u32 80, %s14459_s30  ;;  %vm3529_vm1 = vcmask 130048   ;;  %vm3830_vm4 = vcmask 1042432   ;;  %vm3831_vm5 = vcmask 1046532   ;;  %s14459_s30 = sphi %s16046_s30, %s3290_s30  }
 0x28b   : >> { %13200 = vmatprep.subr.bf16.mxu1 %v14317_v37  ;;  %v16061_v38 = vld [vmem:[%s18719_s2] sm:$0xff]   ;;  %13272 = vmatprep.subr.bf16.mxu0 %v14318_v9  ;;  %v16066_v39 = vld [vmem:[%s18719_s2 + $0x28] sm:$0xff]   ;;  %vm16139_vm6 = vmor %vm3830_vm4, %vm3831_vm5  ;;  %s3290_s30 = sadd.s32 1, %s14459_s30  }
 0x28c   : >> { %13201 = vmatpush3.bf16.msra.mxu1 %v14317_v37  ;;  %13273 = vmatpush3.bf16.msra.mxu0 %v14318_v9  ;;  %s16071_s13 = scalar_lea.vmem [#allocation2], %s12652_s29  ;;  %s16856_s6 = scalar_lea.vmem [#allocation3], %s12652_s29 }
 0x28d   : >> { %13218 = vmatprep.subr.bf16.mxu1 %v16061_v38  ;;  %13290 = vmatprep.subr.bf16.mxu0 %v16066_v39  ;;  %p3287_p5 = scmp.ge.s32.totalorder %s3290_s30, 8  }
 0x28e   : > { %s16946_s7 = smov (%p3287_p5), 0  }
 0x290   : >> { %v16074_v40 = vld [vmem:[%s16071_s13] sm:$0xf]  ;;  %v16077_v41 = vld [vmem:[%s16071_s13 + $0x4] sm:$0xf]  ;;  %v16080_v42 = vld [vmem:[%s16071_s13 + $0x8] sm:$0xf] }
 0x291   : >> { %v16084_v43 = vld [vmem:[%s16071_s13 + $0xc] sm:$0xf]  ;;  %v3321_v45 = vshrl.u32 %v16074_v40, 16  ;;  %v3324_v46 = vshll.u32 %v16074_v40, 16  ;;  %v3330_v47 = vshll.u32 %v16077_v41, 16  ;;  %v3334_v48 = vshrl.u32 %v16077_v41, 16 }
 0x292   : >> { %v3340_v50 = vshll.u32 %v16080_v42, 16  ;;  %v3344_v51 = vshrl.u32 %v16080_v42, 16  ;;  %v3841_v49 = vrot.slane %v16084_v43, 5  ;;  %v11792_v52 = vld [vmem:[%s16071_s13 + $0x14] sm:$0xf]  ;;  %v3350_v29 = vshll.u32 %v16084_v43, 16 }
 0x293   : >> { %v3323_v20 = vrot.slane %v3321_v45, 4  ;;  %v3326_v53 = vrot.slane %v3324_v46, 5  ;;  %v3332_v57 = vrot.slane %v3330_v47, 5  ;;  %v3336_v58 = vrot.slane %v3334_v48, 4  ;;  %v16095_v59 = vld [vmem:[%s16071_s13 + $0x18] sm:$0xf] }
 0x294   : >> { %v3342_v35 = vrot.slane %v3340_v50, 5  ;;  %v3346_v60 = vrot.slane %v3344_v51, 4  ;;  %v16098_v61 = vld [vmem:[%s16071_s13 + $0x1c] sm:$0xf]  ;;  %v4282_v54 = vshrl.u32 %v11792_v52, 16  ;;  %v4285_v62 = vshll.u32 %v11792_v52, 16 }
 0x295   : >> { %v3327_v18 = vor.u32 %v3326_v53, %v3323_v20  ;;  %v3337_v63 = vor.u32 %v3336_v58, %v3332_v57  ;;  %v4291_v1 = vshll.u32 %v16095_v59, 16  ;;  %v4295_v7 = vshrl.u32 %v16095_v59, 16  ;;  %v3313_v23 = vld [vmem:[%s16071_s13 + $0x10] sm:$0x1]  ;;  %v16125_v36 = vld [vmem:[%s16071_s13 + $0x20] sm:$0xf] }
 0x296   : >> { %v3347_v2 = vor.u32 %v3346_v60, %v3342_v35  ;;  %v4284_v3 = vrot.slane %v4282_v54, 4  ;;  %v4287_v4 = vrot.slane %v4285_v62, 5  ;;  %v4301_v5 = vshll.u32 %v16098_v61, 16  ;;  %v11796_v47 = vld [vmem:[%s16071_s13 + $0x24] sm:$0x1] }
 0x297   : >> { %v3328_v8 = vrot.slane %v3327_v18, 4  ;;  %v3338_v11 = vrot.slane %v3337_v63, 4  ;;  %v4293_v12 = vrot.slane %v4291_v1, 5  ;;  %v4297_v13 = vrot.slane %v4295_v7, 4  ;;  %v16133_v20 = vld [vmem:[%s16071_s13 + $0x14] sm:$0xf] }
 0x298   : >> { %v3348_v14 = vrot.slane %v3347_v2, 4  ;;  %v4288_v15 = vor.u32 %v4287_v4, %v4284_v3  ;;  %v4303_v56 = vrot.slane %v4301_v5, 5  ;;  %v4305_v17 = vshrl.u32 %v16098_v61, 16  ;;  %v16146_v54 = vld [vmem:[%s16071_s13 + $0x18] sm:$0xf] }
 0x299   : >> { %v3333_v19 = vsel %vm15631_vm9, %v3328_v8, %v3332_v57  ;;  %v3343_v6 = vsel %vm15631_vm9, %v3338_v11, %v3342_v35  ;;  %v4298_v21 = vor.u32 %v4297_v13, %v4293_v12  ;;  %v4653_v22 = vrot.slane %v16095_v59, 5  ;;  %v16155_v4 = vld [vmem:[%s16071_s13 + $0x1c] sm:$0xf] }
 0x29a   : >> { %v11698_v24 = vcombine.low %v3333_v19, %v3343_v6  ;;  %v4289_v25 = vrot.slane %v4288_v15, 4  ;;  %v4307_v55 = vrot.slane %v4305_v17, 4  ;;  %v4656_v26 = vrot.slane %v16098_v61, 5  ;;  %v16168_v6 = vld [vmem:[%s16071_s13 + $0x2c] sm:$0xf] }
 0x29b   : >> { %v4299_v27 = vrot.slane %v4298_v21, 4  ;;  %v16113_v28 = vrot.slane %v4653_v22, 4  ;;  %v3354_v30 = vshrl.u32 %v16084_v43, 16  ;;  %v3360_v33 = vshll.u32 %v3313_v23, 16 }
 0x29c   : >> { %13202 = vmatprep.mubr.msk.bf16.mxu1 %vm3529_vm1, %v11698_v24  ;;  %v4294_v31 = vsel %vm15631_vm9, %v4289_v25, %v4293_v12  ;;  %v4308_v32 = vor.u32 %v4307_v55, %v4303_v56  ;;  %v16122_v34 = vrot.slane %v4656_v26, 4  ;;  %v3352_v9 = vrot.slane %v3350_v29, 5  ;;  %v16177_v55 = vld [vmem:[%s18719_s2 + $0x10] sm:$0xff]  }
 0x29d   : >> { %v4304_v37 = vsel %vm15631_vm9, %v4299_v27, %v4303_v56  ;;  %v3356_v45 = vrot.slane %v3354_v30, 4  ;;  %v3843_v46 = vrot.slane %v3841_v49, 4  ;;  %v3362_v51 = vrot.slane %v3360_v33, 5 }
 0x29e   : >> { %v4309_v48 = vrot.slane %v4308_v32, 4  ;;  %v11814_v50 = vcombine.low %v4294_v31, %v4304_v37  ;;  %v3844_v52 = vrot.slane %v3313_v23, 5  ;;  %v3353_v53 = vsel %vm15631_vm9, %v3348_v14, %v3352_v9  ;;  %v11797_v14 = vld [vmem:[%s16071_s13 + $0x28] sm:$0xf]  ;;  %v16182_v31 = vld [vmem:[%s16071_s13 + $0x30] sm:$0xf] }
 0x29f   : >> { %v3357_v57 = vor.u32 %v3356_v45, %v3352_v9  ;;  %v4311_v35 = vshll.u32 %v16125_v36, 16  ;;  %v4315_v60 = vshrl.u32 %v16125_v36, 16  ;;  %v4321_v18 = vshll.u32 %v11796_v47, 16 }
 0x2a0   : >> { %13274 = vmatprep.mubr.msk.bf16.mxu0 %vm3529_vm1, %v11814_v50  ;;  %v16151_v62 = vsel %vm16139_vm6, %v3843_v46, %v3844_v52  ;;  %v4659_v63 = vrot.slane %v16125_v36, 5  ;;  %v4662_v1 = vrot.slane %v11796_v47, 5  ;;  %v3365_v5 = vshrl.u32 %v16133_v20, 16  ;;  %v16188_v46 = vld [vmem:[%s16071_s13 + $0x20] sm:$0xf] }
 0x2a1   : >> { %v3358_v7 = vrot.slane %v3357_v57, 4  ;;  %v4313_v2 = vrot.slane %v4311_v35, 5  ;;  %v4317_v3 = vrot.slane %v4315_v60, 4  ;;  %v4323_v8 = vrot.slane %v4321_v18, 5  ;;  %v16194_v52 = vld [vmem:[%s16071_s13 + $0x24] sm:$0x1] }
 0x2a2   : >> { %v4661_v11 = vrot.slane %v4659_v63, 4  ;;  %v3368_v12 = vshll.u32 %v16133_v20, 16  ;;  %v3374_v13 = vshll.u32 %v16146_v54, 16  ;;  %v3367_v19 = vrot.slane %v3365_v5, 4  ;;  %v16199_v18 = vld [vmem:[%s18719_s2 + $0x30] sm:$0xff]  }
 0x2a3   : >> { %v3363_v15 = vsel %vm15631_vm9, %v3358_v7, %v3362_v51  ;;  %v4314_v56 = vsel %vm15631_vm9, %v4309_v48, %v4313_v2  ;;  %v4318_v17 = vor.u32 %v4317_v3, %v4313_v2  ;;  %v3378_v29 = vshrl.u32 %v16146_v54, 16 }
 0x2a4   : >> { %v11699_v21 = vcombine.low %v3353_v53, %v3363_v15  ;;  %v16172_v23 = vsel %vm16139_vm6, %v4661_v11, %v4662_v1  ;;  %v3370_v24 = vrot.slane %v3368_v12, 5  ;;  %v3376_v25 = vrot.slane %v3374_v13, 5 }
 0x2a5   : >> { %v4319_v27 = vrot.slane %v4318_v17, 4  ;;  %v3384_v30 = vshll.u32 %v16155_v4, 16  ;;  %v4326_v32 = vshrl.u32 %v11797_v14, 16  ;;  %v4329_v37 = vshll.u32 %v11797_v14, 16 }
 0x2a6   : >> { %13203 = vmatmul.mubr.msk.bf16.vlgmr.msra.gmra.mrb[0].mxu1 %vm3529_vm1, %v11699_v21  ;;  %v3371_v33 = vor.u32 %v3370_v24, %v3367_v19  ;;  %v4335_v9 = vshll.u32 %v16168_v6, 16  ;;  %v4339_v45 = vshrl.u32 %v16168_v6, 16  ;;  %v3380_v48 = vrot.slane %v3378_v29, 4  ;;  %v16212_v24 = vld [vmem:[%s16071_s13 + $0x34] sm:$0xf] }
 0x2a7   : >> { %13219 = vmatpush3.bf16.msra.mxu1 %v16061_v38  ;;  %v4324_v47 = vsel %vm15631_vm9, %v4319_v27, %v4323_v8  ;;  %v3386_v50 = vrot.slane %v3384_v30, 5  ;;  %v4328_v51 = vrot.slane %v4326_v32, 4  ;;  %v4331_v35 = vrot.slane %v4329_v37, 5  ;;  %v16218_v29 = vld [vmem:[%s16071_s13 + $0x38] sm:$0x1] }
 0x2a8   : >> { %v11815_v53 = vcombine.low %v4314_v56, %v4324_v47  ;;  %v3372_v57 = vrot.slane %v3371_v33, 4  ;;  %v4337_v60 = vrot.slane %v4335_v9, 5  ;;  %13236 = vmatprep.subr.bf16.mxu1 %v16177_v55  ;;  %v3381_v38 = vor.u32 %v3380_v48, %v3376_v25  ;;  %v16227_v47 = vld [vmem:[%s16071_s13 + $0x2c] sm:$0xf] }
 0x2a9   : >> { %v4341_v1 = vrot.slane %v4339_v45, 4  ;;  %v4345_v7 = vshll.u32 %v16182_v31, 16  ;;  %v3388_v2 = vshrl.u32 %v16155_v4, 16  ;;  %v4332_v5 = vor.u32 %v4331_v35, %v4328_v51  ;;  %v16224_v45 = vld [vmem:[%s16071_s13 + $0x28] sm:$0xf] }
 0x2aa   : >> { %13275 = vmatmul.mubr.msk.bf16.vlgmr.msra.gmra.mrb[0].mxu0 %vm3529_vm1, %v11815_v53  ;;  %v3377_v3 = vsel %vm15631_vm9, %v3372_v57, %v3376_v25  ;;  %v3394_v8 = vshll.u32 %v16188_v46, 16  ;;  %v3398_v11 = vshrl.u32 %v16188_v46, 16  ;;  %v3382_v12 = vrot.slane %v3381_v38, 4  ;;  %v16233_v57 = vld [vmem:[%s16071_s13 + $0x30] sm:$0xf] }
 0x2ab   : >> { %13291 = vmatpush3.bf16.msra.mxu0 %v16066_v39  ;;  %v4342_v13 = vor.u32 %v4341_v1, %v4337_v60  ;;  %v4347_v14 = vrot.slane %v4345_v7, 5  ;;  %v3390_v15 = vrot.slane %v3388_v2, 4  ;;  %v4333_v56 = vrot.slane %v4332_v5, 4  ;;  %v11831_v7 = vld [vmem:[%s16071_s13 + $0x14] sm:$0xe] }
 0x2ac   : >> { %v3396_v17 = vrot.slane %v3394_v8, 5  ;;  %v3400_v19 = vrot.slane %v3398_v11, 4  ;;  %v3404_v21 = vshll.u32 %v16194_v52, 16  ;;  %13308 = vmatprep.subr.bf16.mxu0 %v16199_v18  ;;  %v3387_v25 = vsel %vm15631_vm9, %v3382_v12, %v3386_v50 }
 0x2ad   : >> { %v4343_v39 = vrot.slane %v4342_v13, 4  ;;  %v3391_v27 = vor.u32 %v3390_v15, %v3386_v50  ;;  %v4349_v30 = vshrl.u32 %v16182_v31, 16  ;;  %v11700_v32 = vcombine.low %v3377_v3, %v3387_v25 }
 0x2ae   : >> { %v4338_v33 = vsel %vm15631_vm9, %v4333_v56, %v4337_v60  ;;  %v3401_v37 = vor.u32 %v3400_v19, %v3396_v17  ;;  %v3406_v9 = vrot.slane %v3404_v21, 5  ;;  %v4355_v53 = vshll.u32 %v16212_v24, 16  ;;  %v16247_v56 = vld [vmem:[%s16071_s13 + $0x34] sm:$0xf] }
 0x2af   : >> { %v4348_v48 = vsel %vm15631_vm9, %v4343_v39, %v4347_v14  ;;  %v3392_v51 = vrot.slane %v3391_v27, 4  ;;  %v4351_v50 = vrot.slane %v4349_v30, 4  ;;  %13206 = vmatprep.mubr.msk.bf16.mxu1 %vm3529_vm1, %v11700_v32  ;;  %v4359_v38 = vshrl.u32 %v16212_v24, 16 }
 0x2b0   : >> { %v11816_v35 = vcombine.low %v4338_v33, %v4348_v48  ;;  %v3402_v60 = vrot.slane %v3401_v37, 4  ;;  %v4365_v1 = vshll.u32 %v16218_v29, 16  ;;  %v4357_v5 = vrot.slane %v4355_v53, 5  ;;  %v16261_v48 = vld [vmem:[%s16071_s13 + $0x38] sm:$0x1] }
 0x2b1   : >> { %v3397_v2 = vsel %vm15631_vm9, %v3392_v51, %v3396_v17  ;;  %v4352_v3 = vor.u32 %v4351_v50, %v4347_v14  ;;  %v3409_v8 = vshrl.u32 %v16224_v45, 16  ;;  %v4361_v12 = vrot.slane %v4359_v38, 4 }
 0x2b2   : >> { %13278 = vmatprep.mubr.msk.bf16.mxu0 %vm3529_vm1, %v11816_v35  ;;  %v3407_v11 = vsel %vm15631_vm9, %v3402_v60, %v3406_v9  ;;  %v4367_v13 = vrot.slane %v4365_v1, 5  ;;  %v3412_v15 = vshll.u32 %v16224_v45, 16  ;;  %v3418_v14 = vshll.u32 %v16227_v47, 16  ;;  %v16264_v60 = vld [vmem:[%s16071_s13 + $0x3c] sm:$0xf] }
 0x2b3   : >> { %v11701_v19 = vcombine.low %v3397_v2, %v3407_v11  ;;  %v4353_v21 = vrot.slane %v4352_v3, 4  ;;  %v3411_v25 = vrot.slane %v3409_v8, 4  ;;  %v4362_v17 = vor.u32 %v4361_v12, %v4357_v5 }
 0x2b4   : >> { %v3414_v39 = vrot.slane %v3412_v15, 5  ;;  %v3422_v27 = vshrl.u32 %v16227_v47, 16  ;;  %v3428_v30 = vshll.u32 %v16233_v57, 16  ;;  %v3420_v33 = vrot.slane %v3418_v14, 5 }
 0x2b5   : >> { %13207 = vmatmul.mubr.msk.bf16.gmra.mrb[4].mxu1 %vm3529_vm1, %v11701_v19  ;;  %v4358_v32 = vsel %vm15631_vm9, %v4353_v21, %v4357_v5  ;;  %v11835_v37 = vrot.slane %v11831_v7, 9  ;;  %v4657_v9 = vsel %vm16139_vm6, %v16113_v28, %v4656_v26  ;;  %v4363_v51 = vrot.slane %v4362_v17, 4  ;;  %v16276_v5 = vld [vmem:[%s16071_s13 + $0x40] sm:$0xf] }
 0x2b6   : >> { %v3415_v50 = vor.u32 %v3414_v39, %v3411_v25  ;;  %v3424_v53 = vrot.slane %v3422_v27, 4  ;;  %v3430_v35 = vrot.slane %v3428_v30, 5  ;;  %v3432_v61 = vshrl.u32 %v16233_v57, 16  ;;  %v11832_v25 = vld [vmem:[%s16071_s13 + $0x28] sm:$0xe] }
 0x2b7   : >> { %v4654_v38 = vsel %vm16139_vm6, %v11835_v37, %v4653_v22  ;;  %v3438_v1 = vshll.u32 %v16247_v56, 16  ;;  %v3442_v26 = vshrl.u32 %v16247_v56, 16  ;;  %v4368_v28 = vsel %vm15631_vm9, %v4363_v51, %v4367_v13  ;;  %v16279_v22 = vld [vmem:[%s16071_s13 + $0x44] sm:$0xf]  ;;  %v16299_v51 = vld [vmem:[%s16071_s13 + $0x48] sm:$0xf] }
 0x2b8   : >> { %v3416_v7 = vrot.slane %v3415_v50, 4  ;;  %v3425_v2 = vor.u32 %v3424_v53, %v3420_v33  ;;  %v11841_v3 = vcombine.low %v4654_v38, %v4657_v9  ;;  %v11817_v8 = vcombine.low %v4358_v32, %v4368_v28 }
 0x2b9   : >> { %v3434_v59 = vrot.slane %v3432_v61, 4  ;;  %v3440_v11 = vrot.slane %v3438_v1, 5  ;;  %v3444_v12 = vrot.slane %v3442_v26, 4  ;;  %v3448_v21 = vshll.u32 %v16261_v48, 16 }
 0x2ba   : >> { %v3421_v15 = vsel %vm15631_vm9, %v3416_v7, %v3420_v33  ;;  %v3426_v19 = vrot.slane %v3425_v2, 4  ;;  %v4660_v13 = vsel %vm16139_vm6, %v16122_v34, %v4659_v63  ;;  %13279 = vmatmul.mubr.msk.bf16.gmra.mrb[4].mxu0 %vm3529_vm1, %v11817_v8  ;;  %v3453_v27 = vshrl.u32 %v16264_v60, 16  ;;  %v16310_v8 = vld [vmem:[%s16071_s13 + $0x4c] sm:$0x1] }
 0x2bb   : >> { %v3435_v14 = vor.u32 %v3434_v59, %v3430_v35  ;;  %v3445_v17 = vor.u32 %v3444_v12, %v3440_v11  ;;  %v11842_v39 = vcombine.low %v4660_v13, %v16172_v23  ;;  %13292 = vmatprep.mubr.msk.bf16.mxu0 %vm3529_vm1, %v11841_v3  ;;  %v3450_v36 = vrot.slane %v3448_v21, 5 }
 0x2bc   : >> { %v3431_v30 = vsel %vm15631_vm9, %v3426_v19, %v3430_v35  ;;  %v3456_v32 = vshll.u32 %v16264_v60, 16  ;;  %v3462_v34 = vshll.u32 %v16276_v5, 16  ;;  %v3455_v9 = vrot.slane %v3453_v27, 4  ;;  %v16319_v19 = vld [vmem:[%s18719_s2 + $0x38] sm:$0xff]  }
 0x2bd   : >> { %v11702_v63 = vcombine.low %v3421_v15, %v3431_v30  ;;  %v3436_v33 = vrot.slane %v3435_v14, 4  ;;  %v3446_v37 = vrot.slane %v3445_v17, 4  ;;  %v3466_v53 = vshrl.u32 %v16276_v5, 16  ;;  %v11833_v30 = vld [vmem:[%s16071_s13 + $0x3c] sm:$0xe] }
 0x2be   : >> { %v3458_v23 = vrot.slane %v3456_v32, 5  ;;  %v3464_v50 = vrot.slane %v3462_v34, 5  ;;  %v3472_v35 = vshll.u32 %v16279_v22, 16  ;;  %v11836_v1 = vrot.slane %v11832_v25, 9 }
 0x2bf   : >> { %13210 = vmatprep.mubr.msk.bf16.mxu1 %vm3529_vm1, %v11702_v63  ;;  %v3441_v38 = vsel %vm15631_vm9, %v3436_v33, %v3440_v11  ;;  %v3451_v61 = vsel %vm15631_vm9, %v3446_v37, %v3450_v36  ;;  %v4666_v26 = vrot.slane %v16168_v6, 5  ;;  %v3468_v2 = vrot.slane %v3466_v53, 4  ;;  %v16333_v33 = vld [vmem:[%s16071_s13 + $0x40] sm:$0xf] }
 0x2c0   : >> { %v11703_v28 = vcombine.low %v3441_v38, %v3451_v61  ;;  %v3459_v7 = vor.u32 %v3458_v23, %v3455_v9  ;;  %v3474_v3 = vrot.slane %v3472_v35, 5  ;;  %v4669_v15 = vrot.slane %v16182_v31, 5  ;;  %v16337_v23 = vld [vmem:[%s16071_s13 + $0x44] sm:$0xf]  ;;  %v16345_v35 = vld [vmem:[%s16071_s13 + $0x48] sm:$0xf] }
 0x2c1   : >> { %v4667_v59 = vsel %vm16139_vm6, %v11836_v1, %v4666_v26  ;;  %v4668_v12 = vrot.slane %v4666_v26, 4  ;;  %v3476_v11 = vshrl.u32 %v16279_v22, 16  ;;  %v3469_v21 = vor.u32 %v3468_v2, %v3464_v50 }
 0x2c2   : >> { %13211 = vmatmul.mubr.msk.bf16.gmra.mrb[8].mxu1 %vm3529_vm1, %v11703_v28  ;;  %v3460_v6 = vrot.slane %v3459_v7, 4  ;;  %v3482_v13 = vshll.u32 %v16299_v51, 16  ;;  %v3486_v25 = vshrl.u32 %v16299_v51, 16  ;;  %13293 = vmatmul.mubr.msk.bf16.vlgmr.msra.gmra.mrb[0].mxu0 %vm3529_vm1, %v11842_v39  ;;  %v3492_v17 = vshll.u32 %v16310_v8, 16 }
 0x2c3   : >> { %v4670_v31 = vsel %vm16139_vm6, %v4668_v12, %v4669_v15  ;;  %v3478_v14 = vrot.slane %v3476_v11, 4  ;;  %v4671_v27 = vrot.slane %v4669_v15, 4  ;;  %13309 = vmatpush3.bf16.msra.mxu0 %v16199_v18  ;;  %v3470_v32 = vrot.slane %v3469_v21, 4  ;;  %v16359_v15 = vld [vmem:[%s16071_s13 + $0x54] sm:$0xf] }
 0x2c4   : >> { %v3465_v36 = vsel %vm15631_vm9, %v3460_v6, %v3464_v50  ;;  %v11843_v34 = vcombine.low %v4667_v59, %v4670_v31  ;;  %v3484_v63 = vrot.slane %v3482_v13, 5  ;;  %v3488_v37 = vrot.slane %v3486_v25, 4  ;;  %13326 = vmatprep.subr.bf16.mxu0 %v16319_v19  ;;  %v16355_v59 = vld [vmem:[%s16071_s13 + $0x4c] sm:$0x1]  ;;  %v11834_v13 = vld [vmem:[%s16071_s13 + $0x50] sm:$0xe] }
 0x2c5   : >> { %v3479_v39 = vor.u32 %v3478_v14, %v3474_v3  ;;  %v4672_v9 = vrot.slane %v16212_v24, 5  ;;  %v3475_v53 = vsel %vm15631_vm9, %v3470_v32, %v3474_v3  ;;  %v4675_v18 = vrot.slane %v16218_v29, 5 }
 0x2c6   : >> { %13296 = vmatprep.mubr.msk.bf16.mxu0 %vm3529_vm1, %v11843_v34  ;;  %v11837_v50 = vrot.slane %v11833_v30, 9  ;;  %v11704_v38 = vcombine.low %v3465_v36, %v3475_v53  ;;  %v3489_v24 = vor.u32 %v3488_v37, %v3484_v63  ;;  %v3494_v1 = vrot.slane %v3492_v17, 5 }
 0x2c7   : >> { %v3480_v61 = vrot.slane %v3479_v39, 4  ;;  %v4673_v26 = vsel %vm16139_vm6, %v4671_v27, %v4672_v9  ;;  %v4674_v28 = vrot.slane %v4672_v9, 4  ;;  %v4679_v7 = vrot.slane %v16333_v33, 5  ;;  %v16371_v27 = vld [vmem:[%s16071_s13 + $0x58] sm:$0xf] }
 0x2c8   : >> { %v4682_v2 = vrot.slane %v16337_v23, 5  ;;  %13214 = vmatprep.mubr.msk.bf16.mxu1 %vm3529_vm1, %v11704_v38  ;;  %v3490_v3 = vrot.slane %v3489_v24, 4  ;;  %v4685_v12 = vrot.slane %v16345_v35, 5  ;;  %v11715_v14 = vcombine.low %v16074_v40, %v16077_v41 }
 0x2c9   : >> { %v3485_v29 = vsel %vm15631_vm9, %v3480_v61, %v3484_v63  ;;  %v4676_v11 = vsel %vm16139_vm6, %v4674_v28, %v4675_v18  ;;  %v4680_v6 = vsel %vm16139_vm6, %v11837_v50, %v4679_v7  ;;  %v4681_v21 = vrot.slane %v4679_v7, 4  ;;  %v16377_v63 = vld [vmem:[%s16071_s13 + $0x5c] sm:$0xf]  ;;  %v16388_v50 = vld [vmem:[%s16071_s13 + $0x60] sm:$0x1] }
 0x2ca   : >> { %v3495_v25 = vsel %vm15631_vm9, %v3490_v3, %v3494_v1  ;;  %v11844_v31 = vcombine.low %v4673_v26, %v4676_v11  ;;  %v4684_v17 = vrot.slane %v4682_v2, 4  ;;  %v4687_v32 = vrot.slane %v4685_v12, 4  ;;  %v3819_v26 = vld [vmem:[%s16071_s13 + $0x14] sm:$0xe] }
 0x2cb   : >> { %v11705_v30 = vcombine.low %v3485_v29, %v3495_v25  ;;  %v4683_v36 = vsel %vm16139_vm6, %v4681_v21, %v4682_v2  ;;  %v4688_v34 = vrot.slane %v16355_v59, 5  ;;  %v11838_v37 = vrot.slane %v11834_v13, 9  ;;  %v3820_v25 = vld [vmem:[%s16071_s13 + $0x28] sm:$0xe] }
 0x2cc   : >> { %13297 = vmatmul.mubr.msk.bf16.gmra.mrb[4].mxu0 %vm3529_vm1, %v11844_v31  ;;  %v11845_v39 = vcombine.low %v4680_v6, %v4683_v36  ;;  %v4686_v40 = vsel %vm16139_vm6, %v4684_v17, %v4685_v12  ;;  %v4692_v53 = vrot.slane %v16359_v15, 5  ;;  %v4695_v18 = vrot.slane %v16371_v27, 5  ;;  %v16413_v17 = vld [vmem:[%s18719_s2 + $0x18] sm:$0xff]  }
 0x2cd   : >> { %13215 = vmatmul.mubr.msk.bf16.gmra.mrb[12].mxu1 %vm3529_vm1, %v11705_v30  ;;  %v4689_v9 = vsel %vm16139_vm6, %v4687_v32, %v4688_v34  ;;  %v4698_v38 = vrot.slane %v16377_v63, 5  ;;  %v11716_v28 = vcombine.low %v16080_v42, %v16084_v43  ;;  %v4701_v3 = vrot.slane %v16388_v50, 5 }
 0x2ce   : >> { %13220 = vmatprep.mubr.msk.bf16.mxu1 %vm3529_vm1, %v11715_v14  ;;  %13300 = vmatprep.mubr.msk.bf16.mxu0 %vm3529_vm1, %v11845_v39  ;;  %v4693_v61 = vsel %vm16139_vm6, %v11838_v37, %v4692_v53  ;;  %v4694_v24 = vrot.slane %v4692_v53, 4  ;;  %v4697_v1 = vrot.slane %v4695_v18, 4  ;;  %v11846_v7 = vcombine.low %v4686_v40, %v4689_v9 }
 0x2cf   : >> { %v4700_v29 = vrot.slane %v4698_v38, 4  ;;  %v3838_v12 = vrot.slane %v16080_v42, 5  ;;  %v11717_v11 = vcombine.low %v16133_v20, %v16146_v54  ;;  %v11733_v21 = vrot.slane %v3819_v26, 9 }
 0x2d0   : >> { %v4696_v2 = vsel %vm16139_vm6, %v4694_v24, %v4695_v18  ;;  %v3848_v13 = vrot.slane %v16146_v54, 5  ;;  %v4699_v31 = vsel %vm16139_vm6, %v4697_v1, %v4698_v38  ;;  %v3851_v54 = vrot.slane %v16155_v4, 5  ;;  %v14328_v24 = vld [vmem:[%s16071_s13 + $0x28] sm:$0xff]  }
 0x2d1   : >> { %v11847_v6 = vcombine.low %v4693_v61, %v4696_v2  ;;  %v3840_v14 = vrot.slane %v3838_v12, 4  ;;  %v3854_v36 = vrot.slane %v16188_v46, 5  ;;  %v4702_v32 = vsel %vm16139_vm6, %v4700_v29, %v4701_v3  ;;  %v3818_v29 = vld [vmem:[%s16071_s13] sm:$0xe]  ;;  %v3821_v3 = vld [vmem:[%s16071_s13 + $0x3c] sm:$0xe] }
 0x2d2   : >> { %v16418_v20 = vsel %vm16139_vm6, %v11733_v21, %v3848_v13  ;;  %v3850_v30 = vrot.slane %v3848_v13, 4  ;;  %v3857_v39 = vrot.slane %v16194_v52, 5  ;;  %v11734_v37 = vrot.slane %v3820_v25, 9  ;;  %v14331_v21 = vld [vmem:[%s16071_s13 + $0x30] sm:$0xff]  }
 0x2d3   : >> { %v16430_v34 = vsel %vm16139_vm6, %v3840_v14, %v3841_v49  ;;  %v3853_v43 = vrot.slane %v3851_v54, 4  ;;  %v3856_v53 = vrot.slane %v3854_v36, 4  ;;  %v3861_v52 = vrot.slane %v16227_v47, 5 }
 0x2d4   : >> { %13301 = vmatmul.mubr.msk.bf16.gmra.mrb[8].mxu0 %vm3529_vm1, %v11846_v7  ;;  %v16439_v9 = vsel %vm16139_vm6, %v3850_v30, %v3851_v54  ;;  %v11848_v18 = vcombine.low %v4699_v31, %v4702_v32  ;;  %v11718_v61 = vcombine.low %v16155_v4, %v16188_v46  ;;  %v11719_v7 = vcombine.low %v16224_v45, %v16227_v47  ;;  %v11895_v47 = vld [vmem:[%s16071_s13 + $0x28] sm:$0xf]  ;;  %v14333_v32 = vld [vmem:[%s16071_s13 + $0x3c] sm:$0xff]  }
 0x2d5   : >> { %13221 = vmatmul.mubr.msk.bf16.vlgmr.msra.gmra.mrb[0].mxu1 %vm3529_vm1, %v11716_v28  ;;  %13304 = vmatprep.mubr.msk.bf16.mxu0 %vm3529_vm1, %v11847_v6  ;;  %v16448_v38 = vsel %vm16139_vm6, %v3853_v43, %v3854_v36  ;;  %v16455_v1 = vsel %vm16139_vm6, %v3856_v53, %v3857_v39  ;;  %v16459_v26 = vsel %vm16139_vm6, %v11734_v37, %v3861_v52  ;;  %v3863_v28 = vrot.slane %v3861_v52, 4  ;;  %v16482_v6 = vld [vmem:[%s16071_s13 + $0x2c] sm:$0xf] }
 0x2d6   : >> { %13237 = vmatpush3.bf16.msra.mxu1 %v16177_v55  ;;  %13224 = vmatprep.mubr.msk.bf16.mxu1 %vm3529_vm1, %v11717_v11  ;;  %v3864_v55 = vrot.slane %v16233_v57, 5  ;;  %v3835_v45 = vrot.slane %v16077_v41, 5  ;;  %v11720_v11 = vcombine.low %v16233_v57, %v16247_v56  ;;  %v11721_v13 = vcombine.low %v16264_v60, %v16276_v5 }
 0x2d7   : >> { %13254 = vmatprep.subr.bf16.mxu1 %v16413_v17  ;;  %v11732_v25 = vrot.slane %v3818_v29, 9  ;;  %v3867_v14 = vrot.slane %v16247_v56, 5  ;;  %v5100_v54 = vshrl.u32 %v11895_v47, 16  ;;  %v3870_v41 = vrot.slane %v16261_v48, 5  ;;  %v16499_v56 = vld [vmem:[%s18719_s2 + $0x40] sm:$0xff]  }
 0x2d8   : >> { %v16467_v4 = vsel %vm16139_vm6, %v3863_v28, %v3864_v55  ;;  %v3866_v31 = vrot.slane %v3864_v55, 4  ;;  %v3837_v30 = vrot.slane %v3835_v45, 4  ;;  %v11735_v36 = vrot.slane %v3821_v3, 9 }
 0x2d9   : >> { %v5103_v39 = vshll.u32 %v11895_v47, 16  ;;  %v5109_v37 = vshll.u32 %v16482_v6, 16  ;;  %v3869_v43 = vrot.slane %v3867_v14, 4  ;;  %v5113_v60 = vshrl.u32 %v16482_v6, 16 }
 0x2da   : >> { %v16493_v57 = vsel %vm16139_vm6, %v3866_v31, %v3867_v14  ;;  %v3874_v48 = vrot.slane %v16276_v5, 5  ;;  %v3877_v53 = vrot.slane %v16279_v22, 5  ;;  %v3836_v55 = vsel %vm16139_vm6, %v11732_v25, %v3835_v45  ;;  %v16530_v45 = vld [vmem:[%s16071_s13 + $0x34] sm:$0xf]  ;;  %v11900_v25 = vld [vmem:[%s16071_s13 + $0x3c] sm:$0xf] }
 0x2db   : >> { %v16506_v52 = vsel %vm16139_vm6, %v3869_v43, %v3870_v41  ;;  %v5102_v28 = vrot.slane %v5100_v54, 4  ;;  %v16527_v29 = vrot.slane %v5109_v37, 5  ;;  %v5115_v47 = vrot.slane %v5113_v60, 4  ;;  %v16548_v41 = vld [vmem:[%s16071_s13 + $0x40] sm:$0xf] }
 0x2dc   : >> { %13305 = vmatmul.mubr.msk.bf16.gmra.mrb[12].mxu0 %vm3529_vm1, %v11848_v18  ;;  %v16516_v5 = vsel %vm16139_vm6, %v11735_v36, %v3874_v48  ;;  %v3879_v42 = vrot.slane %v3877_v53, 4  ;;  %v3883_v31 = vrot.slane %v16310_v8, 5  ;;  %v5133_v8 = vshrl.u32 %v16530_v45, 16  ;;  %v16595_v18 = vld [vmem:[%s16071_s13 + $0x54] sm:$0xf] }
 0x2dd   : >> { %13225 = vmatmul.mubr.msk.bf16.gmra.mrb[4].mxu1 %vm3529_vm1, %v11718_v61  ;;  %13310 = vmatprep.mubr.msk.bf16.mxu0 %vm3529_vm1, %v14328_v24  ;;  %v3876_v61 = vrot.slane %v3874_v48, 4  ;;  %v16525_v24 = vld [vmem:[%s16071_s13 + $0x30] sm:$0xf]  ;;  %v5116_v37 = vor.u32 %v5115_v47, %v16527_v29  ;;  %v5144_v43 = vshrl.u32 %v11900_v25, 16  ;;  %v5147_v60 = vshll.u32 %v11900_v25, 16 }
 0x2de   : >> { %13228 = vmatprep.mubr.msk.bf16.mxu1 %vm3529_vm1, %v11719_v7  ;;  %v5105_v7 = vrot.slane %v5103_v39, 5  ;;  %v5119_v54 = vshll.u32 %v16525_v24, 16  ;;  %v5129_v39 = vshll.u32 %v16530_v45, 16  ;;  %v16579_v25 = vld [vmem:[%s16071_s13 + $0x38] sm:$0x1] }
 0x2df   : >> { %v16535_v3 = vsel %vm16139_vm6, %v3876_v61, %v3877_v53  ;;  %v16564_v53 = vld [vmem:[%s16071_s13 + $0x44] sm:$0xf]  ;;  %v5157_v61 = vshrl.u32 %v16548_v41, 16 }
 0x2e4   : >> { %13311 = vmatmul.mubr.msk.bf16.vlgmr.msra.gmra.mrb[0].mxu0 %vm3529_vm1, %v14331_v21  ;;  %v14335_v21 = vld [vmem:[%s16071_s13 + $0x44] sm:$0xff]  }
 0x2e5   : >> { %13229 = vmatmul.mubr.msk.bf16.gmra.mrb[8].mxu1 %vm3529_vm1, %v11720_v11  ;;  %13327 = vmatpush3.bf16.msra.mxu0 %v16319_v19  ;;  %v3839_v19 = vsel %vm16139_vm6, %v3837_v30, %v3838_v12  ;;  %v3880_v12 = vrot.slane %v16299_v51, 5  ;;  %v11722_v11 = vcombine.low %v16279_v22, %v16299_v51  ;;  %v14337_v30 = vld [vmem:[%s16071_s13 + $0x50] sm:$0xff]   ;;  %v5106_v22 = vor.u32 %v5105_v7, %v5102_v28  ;;  %v16573_v7 = vld [vmem:[%s16071_s13 + $0x48] sm:$0xf] }
 0x2e6   : >> { %13232 = vmatprep.mubr.msk.bf16.mxu1 %vm3529_vm1, %v11721_v13  ;;  %13314 = vmatprep.mubr.msk.bf16.mxu0 %vm3529_vm1, %v14333_v32  ;;  %v11738_v14 = vcombine.low %v3836_v55, %v3839_v19  ;;  %v5123_v51 = vshrl.u32 %v16525_v24, 16  ;;  %v5153_v55 = vshll.u32 %v16548_v41, 16  ;;  %v5121_v28 = vrot.slane %v5119_v54, 5  ;;  %v14338_v54 = vld [vmem:[%s16071_s13 + $0x58] sm:$0xff]  }
 0x2e7   : >> { %13344 = vmatprep.subr.bf16.mxu0 %v16499_v56  ;;  %v16552_v36 = vsel %vm16139_vm6, %v3879_v42, %v3880_v12  ;;  %v3882_v32 = vrot.slane %v3880_v12, 4  ;;  %v5107_v47 = vrot.slane %v5106_v22, 4  ;;  %v16576_v12 = vrot.slane %v5129_v39, 5 }
 0x2e8   : >> { %v5125_v42 = vrot.slane %v5123_v51, 4  ;;  %v16583_v19 = vrot.slane %v5153_v55, 5  ;;  %v5159_v13 = vrot.slane %v5157_v61, 4  ;;  %v5173_v22 = vshll.u32 %v16573_v7, 16  ;;  %v14339_v51 = vld [vmem:[%s16071_s13 + $0x64] sm:$0xff]  }
 0x2e9   : >> { %v16560_v48 = vsel %vm16139_vm6, %v3882_v32, %v3883_v31  ;;  %v5117_v31 = vrot.slane %v5116_v37, 4  ;;  %v5146_v32 = vrot.slane %v5144_v43, 4  ;;  %v5177_v39 = vshrl.u32 %v16573_v7, 16 }
 0x2ea   : >> { %v5112_v37 = vsel %vm15631_vm9, %v5107_v47, %v16527_v29  ;;  %v5126_v43 = vor.u32 %v5125_v42, %v5121_v28  ;;  %v5160_v49 = vor.u32 %v5159_v13, %v16583_v19  ;;  %v16604_v16 = vrot.slane %v5173_v22, 5  ;;  %v16628_v22 = vld [vmem:[%s16071_s13 + $0x58] sm:$0xf] }
 0x2eb   : >> { %v5122_v55 = vsel %vm15631_vm9, %v5117_v31, %v5121_v28  ;;  %v18743_v47 = vcombine.low %v16430_v34, %v16151_v62  ;;  %v16612_v28 = vld [vmem:[%s16071_s13 + $0x4c] sm:$0x1]  ;;  %v5179_v42 = vrot.slane %v5177_v39, 4  ;;  %v5197_v31 = vshll.u32 %v16595_v18, 16 }
 0x2ec   : >> { %13315 = vmatmul.mubr.msk.bf16.gmra.mrb[4].mxu0 %vm3529_vm1, %v14335_v21  ;;  %v5135_v21 = vrot.slane %v5133_v8, 4  ;;  %v11905_v8 = vld [vmem:[%s16071_s13 + $0x50] sm:$0xf]  ;;  %v5201_v13 = vshrl.u32 %v16595_v18, 16  ;;  %v18744_v62 = vcombine.low %v16418_v20, %v16439_v9  ;;  %v5127_v34 = vrot.slane %v5126_v43, 4 }
 0x2ed   : >> { %13233 = vmatmul.mubr.msk.bf16.gmra.mrb[12].mxu1 %vm3529_vm1, %v11722_v11  ;;  %13318 = vmatprep.mubr.msk.bf16.mxu0 %vm3529_vm1, %v14337_v30  ;;  %v5149_v11 = vrot.slane %v5147_v60, 5  ;;  %v5163_v30 = vshll.u32 %v16564_v53, 16  ;;  %v5139_v60 = vshll.u32 %v16579_v25, 16  ;;  %v5188_v29 = vshrl.u32 %v11905_v8, 16 }
 0x2ee   : >> { %13238 = vmatprep.mubr.msk.bf16.mxu1 %vm3529_vm1, %v11738_v14  ;;  %v5167_v14 = vshrl.u32 %v16564_v53, 16  ;;  %v5136_v61 = vor.u32 %v5135_v21, %v16576_v12  ;;  %v5191_v21 = vshll.u32 %v11905_v8, 16  ;;  %v5161_v20 = vrot.slane %v5160_v49, 4  ;;  %v16634_v8 = vld [vmem:[%s16071_s13 + $0x5c] sm:$0xf] }
 0x2ef   : >> { %v5150_v46 = vor.u32 %v5149_v11, %v5146_v32  ;;  %v16600_v2 = vrot.slane %v5163_v30, 5  ;;  %v5141_v11 = vrot.slane %v5139_v60, 5  ;;  %v11917_v30 = vcombine.low %v5112_v37, %v5122_v55 }
 0x2f0   : >> { %v5169_v40 = vrot.slane %v5167_v14, 4  ;;  %v5137_v32 = vrot.slane %v5136_v61, 4  ;;  %v16624_v14 = vld [vmem:[%s18719_s2 + $0x20] sm:$0xff]   ;;  %v5190_v39 = vrot.slane %v5188_v29, 4  ;;  %v5193_v37 = vrot.slane %v5191_v21, 5 }
 0x2f1   : >> { %v16637_v43 = vrot.slane %v5197_v31, 5  ;;  %v5203_v60 = vrot.slane %v5201_v13, 4  ;;  %v5132_v55 = vsel %vm15631_vm9, %v5127_v34, %v16576_v12  ;;  %v11910_v61 = vld [vmem:[%s16071_s13 + $0x64] sm:$0xf]  ;;  %v5207_v49 = vshll.u32 %v16628_v22, 16 }
 0x2f2   : >> { %v5170_v9 = vor.u32 %v5169_v40, %v16600_v2  ;;  %v5211_v40 = vshrl.u32 %v16628_v22, 16  ;;  %v5221_v29 = vshrl.u32 %v16634_v8, 16  ;;  %v5166_v21 = vsel %vm15631_vm9, %v5161_v20, %v16600_v2 }
 0x2f3   : >> { %v18745_v13 = vcombine.low %v16448_v38, %v16455_v1  ;;  %v5232_v2 = vshrl.u32 %v11910_v61, 16  ;;  %v5209_v20 = vrot.slane %v5207_v49, 5 }
 0x2f4   : >> { %13319 = vmatmul.mubr.msk.bf16.gmra.mrb[8].mxu0 %vm3529_vm1, %v14338_v54  ;;  %v5151_v54 = vrot.slane %v5150_v46, 4  ;;  %v5180_v46 = vor.u32 %v5179_v42, %v16604_v16  ;;  %v5142_v42 = vsel %vm15631_vm9, %v5137_v32, %v5141_v11  ;;  %v5171_v34 = vrot.slane %v5170_v9, 4 }
 0x2f5   : >> { %13239 = vmatmul.mubr.msk.bf16.vlgmr.msra.gmra.mrb[0].mxu1 %vm3529_vm1, %v18743_v47  ;;  %13322 = vmatprep.mubr.msk.bf16.mxu0 %vm3529_vm1, %v14339_v51  ;;  %v5183_v51 = vshll.u32 %v16612_v28, 16  ;;  %v5217_v47 = vshll.u32 %v16634_v8, 16  ;;  %v5194_v32 = vor.u32 %v5193_v37, %v5190_v39  ;;  %v5204_v11 = vor.u32 %v5203_v60, %v16637_v43 }
 0x2f6   : >> { %13255 = vmatpush3.bf16.msra.mxu1 %v16413_v17  ;;  %13242 = vmatprep.mubr.msk.bf16.mxu1 %vm3529_vm1, %v18744_v62  ;;  %v14340_v17 = vld [vmem:[%s16071_s13 + $0x6c] sm:$0xff]   ;;  %v16648_v62 = vld [vmem:[%s16071_s13 + $0x68] sm:$0xf]  ;;  %v5156_v12 = vsel %vm15631_vm9, %v5151_v54, %v16583_v19  ;;  %v18746_v19 = vcombine.low %v16459_v26, %v16467_v4  ;;  %v5235_v54 = vshll.u32 %v11910_v61, 16  ;;  %v11918_v39 = vcombine.low %v5132_v55, %v5142_v42 }
 0x2f7   : >> { %13834 = vmatprep.subr.bf16.mxu1 %v16624_v14  ;;  %v5185_v31 = vrot.slane %v5183_v51, 5  ;;  %v5241_v38 = vshll.u32 %v16648_v62, 16  ;;  %v5245_v1 = vshrl.u32 %v16648_v62, 16  ;;  %v5219_v9 = vrot.slane %v5217_v47, 5  ;;  %v16681_v61 = vld [vmem:[%s16071_s13 + $0x70] sm:$0xf] }
 0x2f8   : >> { %v5223_v51 = vrot.slane %v5221_v29, 4  ;;  %v11919_v37 = vcombine.low %v5156_v12, %v5166_v21  ;;  %v5176_v26 = vsel %vm15631_vm9, %v5171_v34, %v16604_v16  ;;  %v5195_v4 = vrot.slane %v5194_v32, 4 }
 0x2f9   : >> { %v5205_v60 = vrot.slane %v5204_v11, 4  ;;  %v5237_v10 = vrot.slane %v5235_v54, 5  ;;  %v5243_v49 = vrot.slane %v5241_v38, 5  ;;  %v5261_v21 = vshll.u32 %v16681_v61, 16 }
 0x2fa   : >> { %v5224_v29 = vor.u32 %v5223_v51, %v5219_v9  ;;  %v5265_v34 = vshrl.u32 %v16681_v61, 16  ;;  %v18747_v32 = vcombine.low %v16493_v57, %v16506_v52 }
 0x2fb   : >> { %v5210_v11 = vsel %vm15631_vm9, %v5205_v60, %v5209_v20 }
 0x2fc   : >> { %13323 = vmatmul.mubr.msk.bf16.gmra.mrb[12].mxu0 %vm3529_vm1, %v14340_v17  ;;  %v5181_v17 = vrot.slane %v5180_v46, 4  ;;  %v16672_v46 = vld [vmem:[%s16071_s13 + $0x60] sm:$0x1] }
 0x2fd   : >> { %13243 = vmatmul.mubr.msk.bf16.gmra.mrb[4].mxu1 %vm3529_vm1, %v18745_v13  ;;  %13328 = vmatprep.mubr.msk.bf16.mxu0 %vm3529_vm1, %v11917_v30  ;;  %v5213_v30 = vrot.slane %v5211_v40, 4  ;;  %v16678_v13 = vld [vmem:[%s16071_s13 + $0x6c] sm:$0xf]  ;;  %v5247_v40 = vrot.slane %v5245_v1, 4  ;;  %v5227_v42 = vshll.u32 %v16672_v46, 16 }
 0x2fe   : >> { %13246 = vmatprep.mubr.msk.bf16.mxu1 %vm3529_vm1, %v18746_v19  ;;  %v5234_v19 = vrot.slane %v5232_v2, 4  ;;  %v5186_v55 = vsel %vm15631_vm9, %v5181_v17, %v5185_v31  ;;  %v5251_v16 = vshll.u32 %v16678_v13, 16  ;;  %v5255_v12 = vshrl.u32 %v16678_v13, 16 }
 0x2ff   : >> { %v5214_v47 = vor.u32 %v5213_v30, %v5209_v20  ;;  %v5200_v31 = vsel %vm15631_vm9, %v5195_v4, %v16637_v43  ;;  %v18748_v17 = vcombine.low %v16516_v5, %v16535_v3  ;;  %v5248_v52 = vor.u32 %v5247_v40, %v5243_v49  ;;  %v16707_v43 = vld [vmem:[%s16071_s13 + $0x74] sm:$0x1]  ;;  %v11934_v40 = vld [vmem:[%s16071_s13 + $0x28] sm:$0xe] }
 0x300   : >> { %v5238_v57 = vor.u32 %v5237_v10, %v5234_v19  ;;  %v11920_v2 = vcombine.low %v5176_v26, %v5186_v55  ;;  %v5229_v38 = vrot.slane %v5227_v42, 5  ;;  %v5253_v1 = vrot.slane %v5251_v16, 5 }
 0x301   : >> { %v5215_v54 = vrot.slane %v5214_v47, 4  ;;  %v5257_v30 = vrot.slane %v5255_v12, 4  ;;  %v5263_v5 = vrot.slane %v5261_v21, 5  ;;  %v5267_v3 = vrot.slane %v5265_v34, 4  ;;  %v14343_v34 = vld [vmem:[%s16071_s13 + $0x1c] sm:$0xff]  }
 0x302   : >> { %v11921_v51 = vcombine.low %v5200_v31, %v5210_v11  ;;  %v5239_v4 = vrot.slane %v5238_v57, 4  ;;  %v5271_v10 = vshll.u32 %v16707_v43, 16  ;;  %v5471_v55 = vrot.slane %v16482_v6, 5  ;;  %v14344_v31 = vld [vmem:[%s16071_s13 + $0x28] sm:$0xff]  }
 0x303   : >> { %v5220_v20 = vsel %vm15631_vm9, %v5215_v54, %v5219_v9  ;;  %v5258_v60 = vor.u32 %v5257_v30, %v5253_v1  ;;  %v5268_v19 = vor.u32 %v5267_v3, %v5263_v5  ;;  %v18749_v47 = vcombine.low %v16552_v36, %v16560_v48  ;;  %v11935_v54 = vld [vmem:[%s16071_s13 + $0x3c] sm:$0xe] }
 0x304   : >> { %13329 = vmatmul.mubr.msk.bf16.vlgmr.msra.gmra.mrb[0].mxu0 %vm3529_vm1, %v11918_v39  ;;  %v14342_v39 = vld [vmem:[%s16071_s13 + $0x14] sm:$0xff]   ;;  %v5244_v9 = vsel %vm15631_vm9, %v5239_v4, %v5243_v49  ;;  %v5273_v16 = vrot.slane %v5271_v10, 5  ;;  %v11938_v12 = vrot.slane %v11934_v40, 9  ;;  %v5473_v36 = vrot.slane %v5471_v55, 4 }
 0x305   : >> { %13247 = vmatmul.mubr.msk.bf16.gmra.mrb[8].mxu1 %vm3529_vm1, %v18747_v32  ;;  %13345 = vmatpush3.bf16.msra.mxu0 %v16499_v56  ;;  %v5225_v56 = vrot.slane %v5224_v29, 4  ;;  %v5259_v6 = vrot.slane %v5258_v60, 4  ;;  %v5269_v21 = vrot.slane %v5268_v19, 4  ;;  %v5474_v48 = vrot.slane %v16525_v24, 5  ;;  %v14346_v19 = vld [vmem:[%s16071_s13 + $0x3c] sm:$0xff]  }
 0x306   : >> { %13250 = vmatprep.mubr.msk.bf16.mxu1 %vm3529_vm1, %v18748_v17  ;;  %13332 = vmatprep.mubr.msk.bf16.mxu0 %vm3529_vm1, %v11919_v37  ;;  %v5249_v37 = vrot.slane %v5248_v52, 4  ;;  %v11802_v17 = vld [vmem:[%s16071_s13 + $0x3c] sm:$0xf]  ;;  %v5477_v11 = vrot.slane %v16530_v45, 5  ;;  %v5484_v49 = vrot.slane %v16548_v41, 5  ;;  %v5487_v30 = vrot.slane %v16564_v53, 5 }
 0x307   : >> { %v5230_v26 = vsel %vm15631_vm9, %v5225_v56, %v5229_v38  ;;  %v5264_v57 = vsel %vm15631_vm9, %v5259_v6, %v5263_v5  ;;  %v5274_v52 = vsel %vm15631_vm9, %v5269_v21, %v5273_v16  ;;  %v5475_v24 = vsel %vm16139_vm6, %v5473_v36, %v5474_v48  ;;  %v11807_v6 = vld [vmem:[%s16071_s13 + $0x50] sm:$0xf] }
 0x308   : >> { %v5254_v29 = vsel %vm15631_vm9, %v5249_v37, %v5253_v1  ;;  %v11922_v42 = vcombine.low %v5220_v20, %v5230_v26  ;;  %v4370_v45 = vshrl.u32 %v11802_v17, 16  ;;  %v4373_v41 = vshll.u32 %v11802_v17, 16 }
 0x309   : >> { %v11923_v32 = vcombine.low %v5244_v9, %v5254_v29  ;;  %v4379_v56 = vshll.u32 %v16333_v33, 16  ;;  %v4383_v38 = vshrl.u32 %v16333_v33, 16  ;;  %v5480_v1 = vrot.slane %v16579_v25, 5  ;;  %v14345_v33 = vld [vmem:[%s16071_s13 + $0x30] sm:$0xff]  }
 0x30a   : >> { %v5490_v5 = vrot.slane %v16573_v7, 5  ;;  %v5476_v3 = vrot.slane %v5474_v48, 4  ;;  %v5486_v4 = vrot.slane %v5484_v49, 4  ;;  %v4403_v37 = vshrl.u32 %v16345_v35, 16 }
 0x30b   : >> { %v11924_v20 = vcombine.low %v5264_v57, %v5274_v52  ;;  %v4372_v26 = vrot.slane %v4370_v45, 4  ;;  %v4375_v25 = vrot.slane %v4373_v41, 5  ;;  %v4385_v60 = vrot.slane %v4383_v38, 4 }
 0x30c   : >> { %13333 = vmatmul.mubr.msk.bf16.gmra.mrb[4].mxu0 %vm3529_vm1, %v11920_v2  ;;  %v5472_v2 = vsel %vm16139_vm6, %v11938_v12, %v5471_v55  ;;  %v5489_v40 = vrot.slane %v5487_v30, 4  ;;  %v5492_v53 = vrot.slane %v5490_v5, 4  ;;  %v5493_v7 = vrot.slane %v16612_v28, 5 }
 0x30d   : >> { %13251 = vmatmul.mubr.msk.bf16.gmra.mrb[12].mxu1 %vm3529_vm1, %v18749_v47  ;;  %13336 = vmatprep.mubr.msk.bf16.mxu0 %vm3529_vm1, %v11921_v51  ;;  %v5479_v51 = vrot.slane %v5477_v11, 4  ;;  %v11944_v10 = vcombine.low %v5472_v2, %v5475_v24  ;;  %v5478_v55 = vsel %vm16139_vm6, %v5476_v3, %v5477_v11  ;;  %v5488_v29 = vsel %vm16139_vm6, %v5486_v4, %v5487_v30  ;;  %v14348_v30 = vld [vmem:[%s16071_s13 + $0x50] sm:$0xff]  }
 0x30e   : >> { %13256 = vmatprep.mubr.msk.bf16.mxu1 %vm3529_vm1, %v14342_v39  ;;  %v11939_v39 = vrot.slane %v11935_v54, 9  ;;  %v4389_v16 = vshll.u32 %v16337_v23, 16  ;;  %v4393_v28 = vshrl.u32 %v16337_v23, 16  ;;  %v4399_v12 = vshll.u32 %v16345_v35, 16  ;;  %v14347_v54 = vld [vmem:[%s16071_s13 + $0x44] sm:$0xff]  }
 0x30f   : >> { %v5481_v47 = vsel %vm16139_vm6, %v5479_v51, %v5480_v1  ;;  %v4405_v21 = vrot.slane %v4403_v37, 4  ;;  %v4376_v36 = vor.u32 %v4375_v25, %v4372_v26  ;;  %v5491_v23 = vsel %vm16139_vm6, %v5489_v40, %v5490_v5  ;;  %v11937_v25 = vld [vmem:[%s16071_s13 + $0x64] sm:$0xe] }
 0x310   : >> { %v5485_v9 = vsel %vm16139_vm6, %v11939_v39, %v5484_v49  ;;  %v5494_v35 = vsel %vm16139_vm6, %v5492_v53, %v5493_v7  ;;  %v4414_v17 = vshrl.u32 %v11807_v6, 16  ;;  %v4417_v11 = vshll.u32 %v11807_v6, 16 }
 0x311   : >> { %v4423_v49 = vshll.u32 %v16359_v15, 16  ;;  %v4427_v57 = vshrl.u32 %v16359_v15, 16  ;;  %v4391_v52 = vrot.slane %v4389_v16, 5  ;;  %v4395_v2 = vrot.slane %v4393_v28, 4  ;;  %v14349_v28 = vld [vmem:[%s16071_s13 + $0x58] sm:$0xff]  }
 0x312   : >> { %v4377_v45 = vrot.slane %v4376_v36, 4  ;;  %v5500_v38 = vrot.slane %v16628_v22, 5  ;;  %v5503_v5 = vrot.slane %v16634_v8, 5  ;;  %v4416_v3 = vrot.slane %v4414_v17, 4 }
 0x313   : >> { %v4419_v51 = vrot.slane %v4417_v11, 5  ;;  %v4425_v39 = vrot.slane %v4423_v49, 5  ;;  %v4429_v15 = vrot.slane %v4427_v57, 4  ;;  %v11947_v4 = vcombine.low %v5491_v23, %v5494_v35 }
 0x314   : >> { %13337 = vmatmul.mubr.msk.bf16.gmra.mrb[8].mxu0 %vm3529_vm1, %v11922_v42  ;;  %v4409_v42 = vshll.u32 %v16355_v59, 16  ;;  %v5497_v59 = vrot.slane %v16595_v18, 5  ;;  %v16785_v18 = vrot.slane %v4399_v12, 5  ;;  %v4396_v37 = vor.u32 %v4395_v2, %v4391_v52 }
 0x315   : >> { %13257 = vmatmul.mubr.msk.bf16.vlgmr.msra.gmra.mrb[0].mxu1 %vm3529_vm1, %v14343_v34  ;;  %13340 = vmatprep.mubr.msk.bf16.mxu0 %vm3529_vm1, %v11923_v32  ;;  %v11936_v34 = vld [vmem:[%s16071_s13 + $0x50] sm:$0xe]  ;;  %v11945_v32 = vcombine.low %v5478_v55, %v5481_v47  ;;  %v4433_v26 = vshll.u32 %v16371_v27, 16  ;;  %v4443_v40 = vshll.u32 %v16377_v63, 16  ;;  %v5502_v53 = vrot.slane %v5500_v38, 4 }
 0x316   : >> { %13835 = vmatpush3.bf16.msra.mxu1 %v16624_v14  ;;  %13260 = vmatprep.mubr.msk.bf16.mxu1 %vm3529_vm1, %v14344_v31  ;;  %v16755_v14 = vrot.slane %v4379_v56, 5  ;;  %v11946_v31 = vcombine.low %v5485_v9, %v5488_v29  ;;  %v11940_v24 = vrot.slane %v11936_v34, 9  ;;  %v5499_v56 = vrot.slane %v5497_v59, 4 }
 0x317   : >> { %v4411_v1 = vrot.slane %v4409_v42, 5  ;;  %v5505_v7 = vrot.slane %v5503_v5, 4  ;;  %v4420_v55 = vor.u32 %v4419_v51, %v4416_v3  ;;  %v4430_v47 = vor.u32 %v4429_v15, %v4425_v39 }
 0x318   : >> { %v4386_v48 = vor.u32 %v4385_v60, %v16755_v14  ;;  %v4382_v22 = vsel %vm15631_vm9, %v4377_v45, %v16755_v14  ;;  %v5510_v60 = vrot.slane %v16648_v62, 5  ;;  %v4447_v14 = vshrl.u32 %v16377_v63, 16 }
 0x319   : >> { %v4397_v9 = vrot.slane %v4396_v37, 4  ;;  %v5506_v16 = vrot.slane %v16672_v46, 5  ;;  %v4435_v6 = vrot.slane %v4433_v26, 5  ;;  %v5513_v62 = vrot.slane %v16678_v13, 5 }
 0x31a   : >> { %v4387_v41 = vrot.slane %v4386_v48, 4  ;;  %v4445_v48 = vrot.slane %v4443_v40, 5  ;;  %v4449_v34 = vrot.slane %v4447_v14, 4  ;;  %v4421_v63 = vrot.slane %v4420_v55, 4 }
 0x31b   : >> { %v5507_v46 = vsel %vm16139_vm6, %v5505_v7, %v5506_v16  ;;  %v4402_v13 = vsel %vm15631_vm9, %v4397_v9, %v16785_v18  ;;  %v5516_v35 = vrot.slane %v16681_v61, 5  ;;  %v4453_v57 = vshll.u32 %v16388_v50, 16 }
 0x31c   : >> { %13341 = vmatmul.mubr.msk.bf16.gmra.mrb[12].mxu0 %vm3529_vm1, %v11924_v20  ;;  %v4406_v20 = vor.u32 %v4405_v21, %v16785_v18  ;;  %v4392_v8 = vsel %vm15631_vm9, %v4387_v41, %v4391_v52  ;;  %v11941_v21 = vrot.slane %v11937_v25, 9  ;;  %v4450_v49 = vor.u32 %v4449_v34, %v4445_v48 }
 0x31d   : >> { %13261 = vmatmul.mubr.msk.bf16.gmra.mrb[4].mxu1 %vm3529_vm1, %v14345_v33  ;;  %13346 = vmatprep.mubr.msk.bf16.mxu0 %vm3529_vm1, %v11944_v10  ;;  %v5498_v10 = vsel %vm16139_vm6, %v11940_v24, %v5497_v59  ;;  %v5501_v33 = vsel %vm16139_vm6, %v5499_v56, %v5500_v38  ;;  %v11818_v42 = vcombine.low %v4382_v22, %v4392_v8  ;;  %v4431_v59 = vrot.slane %v4430_v47, 4 }
 0x31e   : >> { %13264 = vmatprep.mubr.msk.bf16.mxu1 %vm3529_vm1, %v14346_v19  ;;  %v4437_v19 = vshrl.u32 %v16371_v27, 16  ;;  %v4407_v29 = vrot.slane %v4406_v20, 4  ;;  %v11948_v12 = vcombine.low %v5498_v10, %v5501_v33  ;;  %v5512_v27 = vrot.slane %v5510_v60, 4 }
 0x31f   : >> { %v5511_v23 = vsel %vm16139_vm6, %v11941_v21, %v5510_v60  ;;  %v4426_v52 = vsel %vm15631_vm9, %v4421_v63, %v4425_v39  ;;  %v4436_v2 = vsel %vm15631_vm9, %v4431_v59, %v4435_v6  ;;  %v5515_v45 = vrot.slane %v5513_v62, 4 }
 0x320   : >> { %v4439_v36 = vrot.slane %v4437_v19, 4  ;;  %v5514_v17 = vsel %vm16139_vm6, %v5512_v27, %v5513_v62  ;;  %v5518_v61 = vrot.slane %v5516_v35, 4  ;;  %v5519_v41 = vrot.slane %v16707_v43, 5 }
 0x321   : >> { %v11820_v56 = vcombine.low %v4426_v52, %v4436_v2  ;;  %v5517_v50 = vsel %vm16139_vm6, %v5515_v45, %v5516_v35 }
 0x322   : >> { %v4440_v11 = vor.u32 %v4439_v36, %v4435_v6 }
 0x324   : >> { %13347 = vmatmul.mubr.msk.bf16.vlgmr.msra.gmra.mrb[0].mxu0 %vm3529_vm1, %v11945_v32  ;;  %v5504_v32 = vsel %vm16139_vm6, %v5502_v53, %v5503_v5  ;;  %v4441_v38 = vrot.slane %v4440_v11, 4  ;;  %v5520_v5 = vsel %vm16139_vm6, %v5518_v61, %v5519_v41 }
 0x325   : >> { %13265 = vmatmul.mubr.msk.bf16.gmra.mrb[8].mxu1 %vm3529_vm1, %v14347_v54  ;;  %13350 = vmatprep.mubr.msk.bf16.mxu0 %vm3529_vm1, %v11946_v31  ;;  %v4412_v31 = vsel %vm15631_vm9, %v4407_v29, %v4411_v1  ;;  %v11949_v24 = vcombine.low %v5504_v32, %v5507_v46  ;;  %v11950_v54 = vcombine.low %v5511_v23, %v5514_v17  ;;  %v4451_v1 = vrot.slane %v4450_v49, 4  ;;  %v11979_v49 = vld [vmem:[%s16856_s6 + $0x14] sm:$0xf] }
 0x326   : >> { %13268 = vmatprep.mubr.msk.bf16.mxu1 %vm3529_vm1, %v14348_v30  ;;  %v11819_v18 = vcombine.low %v4402_v13, %v4412_v31  ;;  %v4455_v30 = vrot.slane %v4453_v57, 5  ;;  %v4446_v43 = vsel %vm15631_vm9, %v4441_v38, %v4445_v48  ;;  %v11951_v51 = vcombine.low %v5517_v50, %v5520_v5 }
 0x328   : >> { %v4456_v3 = vsel %vm15631_vm9, %v4451_v1, %v4455_v30 }
 0x329   : >> { %v11821_v39 = vcombine.low %v4446_v43, %v4456_v3 }
 0x32c   : >> { %13351 = vmatmul.mubr.msk.bf16.gmra.mrb[4].mxu0 %vm3529_vm1, %v11947_v4 }
 0x32d   : >> { %13269 = vmatmul.mubr.msk.bf16.gmra.mrb[12].mxu1 %vm3529_vm1, %v14349_v28  ;;  %13354 = vmatprep.mubr.msk.bf16.mxu0 %vm3529_vm1, %v11948_v12 }
 0x32e   : >> { %13282 = vmatprep.mubr.msk.bf16.mxu1 %vm3529_vm1, %v11818_v42 }
 0x334   : >> { %13355 = vmatmul.mubr.msk.bf16.gmra.mrb[8].mxu0 %vm3529_vm1, %v11949_v24 }
 0x335   : >> { %13283 = vmatmul.mubr.msk.bf16.vlgmr.msra.gmra.mrb[8].mxu1 %vm3529_vm1, %v11819_v18  ;;  %13358 = vmatprep.mubr.msk.bf16.mxu0 %vm3529_vm1, %v11950_v54  ;;  %v11984_v54 = vld [vmem:[%s16856_s6 + $0x24] sm:$0x1] }
 0x336   : >> { %13286 = vmatprep.mubr.msk.bf16.mxu1 %vm3529_vm1, %v11820_v56 }
 0x33c   : >> { %13359 = vmatmul.mubr.msk.bf16.gmra.mrb[12].mxu0 %vm3529_vm1, %v11951_v51 }
 0x33d   : >> { %13287 = vmatmul.mubr.msk.bf16.gmra.mrb[12].mxu1 %vm3529_vm1, %v11821_v39 }
 0x3e8   : >> { %v13258_v15 = vpop.f32.mrb[0].mxu1 }
 0x3e9   : >> { %v4182_v4 = vpop.f32.mrb[1].mxu1 }
 0x3ea   : >> { %v13259_v37 = vpop.f32.mrb[2].mxu1 }
 0x3eb   : >> { %v4185_v20 = vpop.f32.mrb[3].mxu1 }
 0x3f0   : >> { %v13262_v10 = vpop.f32.mrb[4].mxu1 }
 0x3f1   : >> { %v4198_v22 = vpop.f32.mrb[5].mxu1 }
 0x3f2   : >> { %v13263_v8 = vpop.f32.mrb[6].mxu1 }
 0x3f3   : >> { %v16852_v33 = vpop.f32.mrb[7].mxu1 }
 0x3f7   : >> { %v13348_v26 = vpop.f32.mrb[0].mxu0 }
 0x3f8   : >> { %v13836_v25 = vadd.f32 %v13348_v26, %v13258_v15  ;;  %v5612_v60 = vpop.f32.mrb[1].mxu0 }
 0x3f9   : >> { %v13837_v19 = vadd.f32 %v5612_v60, %v4182_v4  ;;  %v13349_v40 = vpop.f32.mrb[2].mxu0 }
 0x3fa   : >> { %v5693_v14 = vmax.f32 %v13836_v25, 0.0  ;;  %v13838_v53 = vadd.f32 %v13349_v40, %v13259_v37  ;;  %v5615_v7 = vpop.f32.mrb[3].mxu0 }
 0x3fb   : >> { %v5691_v55 = vmax.f32 %v13837_v19, 0.0  ;;  %v13839_v47 = vadd.f32 %v5615_v7, %v4185_v20 }
 0x3fc   : >> { %v12655_v9 = vpack.c.bf16 %v5693_v14, %v5693_v14  ;;  %v5694_v29 = vmax.f32 %v13838_v53, 0.0 }
 0x3fd   : >> { %v12653_v42 = vpack.c.bf16 %v5691_v55, %v5691_v55  ;;  %v5692_v16 = vmax.f32 %v13839_v47, 0.0 }
 0x3fe   : >> { %v5776_v28 = vshrl.u32 %v12655_v9, 16  ;;  %v12656_v12 = vpack.c.bf16 %v5694_v29, %v5694_v29  ;;  %v5779_v6 = vshll.u32 %v12655_v9, 16 }
 0x3ff   : >> { %v5759_v21 = vshrl.u32 %v12653_v42, 16  ;;  %v5762_v62 = vshll.u32 %v12653_v42, 16  ;;  %v12654_v27 = vpack.c.bf16 %v5692_v16, %v5692_v16  ;;  %v13352_v36 = vpop.f32.mrb[4].mxu0  ;;  %v11986_v42 = vld [vmem:[%s16856_s6 + $0x28] sm:$0xf] }
 0x400   : >> { %v5778_v48 = vrot.slane %v5776_v28, 7  ;;  %v5785_v34 = vshrl.u32 %v12656_v12, 16  ;;  %v5788_v63 = vshll.u32 %v12656_v12, 16  ;;  %v13840_v59 = vadd.f32 %v13352_v36, %v13262_v10  ;;  %v5628_v32 = vpop.f32.mrb[5].mxu0 }
 0x401   : >> { %v5761_v46 = vrot.slane %v5759_v21, 7  ;;  %v5767_v13 = vshrl.u32 %v12654_v27, 16  ;;  %v5770_v31 = vshll.u32 %v12654_v27, 16  ;;  %v13841_v23 = vadd.f32 %v5628_v32, %v4198_v22  ;;  %v13353_v35 = vpop.f32.mrb[6].mxu0 }
 0x402   : >> { %v5781_v17 = vor.u32 %v5779_v6, %v5778_v48  ;;  %v5783_v11 = vrot.slane %v5778_v48, 4  ;;  %v5787_v57 = vrot.slane %v5785_v34, 7  ;;  %v5697_v52 = vmax.f32 %v13840_v59, 0.0  ;;  %v5631_v2 = vpop.f32.mrb[7].mxu0 }
 0x403   : >> { %v5764_v18 = vor.u32 %v5762_v62, %v5761_v46  ;;  %v5765_v24 = vrot.slane %v5761_v46, 4  ;;  %v5769_v45 = vrot.slane %v5767_v13, 7  ;;  %v5695_v61 = vmax.f32 %v13841_v23, 0.0 }
 0x404   : >> { %v5790_v41 = vor.u32 %v5788_v63, %v5787_v57  ;;  %v5792_v56 = vrot.slane %v5787_v57, 4  ;;  %v12659_v38 = vpack.c.bf16 %v5697_v52, %v5697_v52  ;;  %v13842_v1 = vadd.f32 %v13353_v35, %v13263_v8 }
 0x405   : >> { %v5924_v30 = vsel %vm15947_vm13, %v5764_v18, %v11979_v49  ;;  %v5772_v50 = vor.u32 %v5770_v31, %v5769_v45  ;;  %v5774_v5 = vrot.slane %v5769_v45, 4  ;;  %v12657_v43 = vpack.c.bf16 %v5695_v61, %v5695_v61  ;;  %v11991_v49 = vld [vmem:[%s16856_s6 + $0x38] sm:$0x1] }
 0x406   : >> { %11980 = vst [vmem:[%s16856_s6 + $0x14] sm:$0xf] %v5924_v30  ;;  %v5791_v51 = vsel %vm15953_vm14, %v5783_v11, %v5790_v41  ;;  %v5932_v15 = vsel %vm15959_vm15, %v5792_v56, %v11984_v54  ;;  %v5811_v4 = vshrl.u32 %v12659_v38, 16  ;;  %v5814_v26 = vshll.u32 %v12659_v38, 16 }
 0x407   : >> { %11983 = vst.msk [vmem:[%s16856_s6 + $0x20] sm:$0xf] %vm226_vm0, %v5791_v51  ;;  %11985 = vst [vmem:[%s16856_s6 + $0x24] sm:$0x1] %v5932_v15  ;;  %v5773_v37 = vsel %vm15953_vm14, %v5765_v24, %v5772_v50  ;;  %v5782_v20 = vsel %vm15953_vm14, %v5774_v5, %v5781_v17  ;;  %v5794_v10 = vshrl.u32 %v12657_v43, 16  ;;  %v13356_v22 = vpop.f32.mrb[8].mxu0  ;;  %v13843_v60 = vadd.f32 %v5631_v2, %v16852_v33 }
 0x408   : >> { %11981 = vst.msk [vmem:[%s16856_s6 + $0x18] sm:$0xf] %vm226_vm0, %v5773_v37  ;;  %11982 = vst.msk [vmem:[%s16856_s6 + $0x1c] sm:$0xf] %vm226_vm0, %v5782_v20  ;;  %v5813_v8 = vrot.slane %v5811_v4, 7  ;;  %v5698_v25 = vmax.f32 %v13842_v1, 0.0 }
 0x409   : >> { %v13284_v19 = vpop.f32.mrb[8].mxu1  ;;  %v5644_v40 = vpop.f32.mrb[9].mxu0  ;;  %v16879_v14 = vrot.slane %v5794_v10, 7  ;;  %v5797_v53 = vshll.u32 %v12657_v43, 16  ;;  %v5696_v28 = vmax.f32 %v13843_v60, 0.0 }
 0x40a   : >> { %v13844_v7 = vadd.f32 %v13356_v22, %v13284_v19  ;;  %v4580_v55 = vpop.f32.mrb[9].mxu1  ;;  %v13357_v47 = vpop.f32.mrb[10].mxu0  ;;  %v5816_v9 = vor.u32 %v5814_v26, %v5813_v8  ;;  %v5818_v29 = vrot.slane %v5813_v8, 4  ;;  %v12660_v16 = vpack.c.bf16 %v5698_v25, %v5698_v25 }
 0x40b   : >> { %v13285_v12 = vpop.f32.mrb[10].mxu1  ;;  %v5647_v6 = vpop.f32.mrb[11].mxu0  ;;  %v5799_v21 = vor.u32 %v5797_v53, %v16879_v14  ;;  %v5800_v33 = vrot.slane %v16879_v14, 4  ;;  %v13845_v27 = vadd.f32 %v5644_v40, %v4580_v55  ;;  %v12658_v63 = vpack.c.bf16 %v5696_v28, %v5696_v28  ;;  %v11993_v53 = vld [vmem:[%s16856_s6 + $0x3c] sm:$0xf] }
 0x40c   : >> { %v5701_v62 = vmax.f32 %v13844_v7, 0.0  ;;  %v4583_v36 = vpop.f32.mrb[11].mxu1  ;;  %v5820_v48 = vshrl.u32 %v12660_v16, 16  ;;  %v5823_v34 = vshll.u32 %v12660_v16, 16  ;;  %v13846_v59 = vadd.f32 %v13357_v47, %v13285_v12  ;;  %v11998_v28 = vld [vmem:[%s16856_s6 + $0x4c] sm:$0x1] }
 0x40d   : >> { %v5935_v32 = vsel %vm15947_vm13, %v5799_v21, %v11986_v42  ;;  %v5699_v13 = vmax.f32 %v13845_v27, 0.0  ;;  %v13847_v31 = vadd.f32 %v5647_v6, %v4583_v36  ;;  %v5802_v35 = vshrl.u32 %v12658_v63, 16 }
 0x40e   : >> { %v12663_v46 = vpack.c.bf16 %v5701_v62, %v5701_v62  ;;  %11987 = vst [vmem:[%s16856_s6 + $0x28] sm:$0xf] %v5935_v32  ;;  %v5822_v23 = vrot.slane %v5820_v48, 7  ;;  %v5805_v17 = vshll.u32 %v12658_v63, 16  ;;  %v5702_v11 = vmax.f32 %v13846_v59, 0.0 }
 0x40f   : >> { %v12661_v2 = vpack.c.bf16 %v5699_v13, %v5699_v13  ;;  %v5700_v18 = vmax.f32 %v13847_v31, 0.0  ;;  %v13360_v24 = vpop.f32.mrb[12].mxu0  ;;  %v5804_v61 = vrot.slane %v5802_v35, 7 }
 0x410   : >> { %v5846_v57 = vshrl.u32 %v12663_v46, 16  ;;  %v5849_v52 = vshll.u32 %v12663_v46, 16  ;;  %v5825_v54 = vor.u32 %v5823_v34, %v5822_v23  ;;  %v5827_v45 = vrot.slane %v5822_v23, 4  ;;  %v13288_v56 = vpop.f32.mrb[12].mxu1  ;;  %v5660_v38 = vpop.f32.mrb[13].mxu0 }
 0x411   : >> { %v12664_v41 = vpack.c.bf16 %v5702_v11, %v5702_v11  ;;  %v5829_v30 = vshrl.u32 %v12661_v2, 16  ;;  %v5832_v50 = vshll.u32 %v12661_v2, 16  ;;  %v12662_v5 = vpack.c.bf16 %v5700_v18, %v5700_v18  ;;  %v4596_v43 = vpop.f32.mrb[13].mxu1  ;;  %v13361_v51 = vpop.f32.mrb[14].mxu0 }
 0x412   : >> { %v5848_v1 = vrot.slane %v5846_v57, 7  ;;  %v5826_v15 = vsel %vm15953_vm14, %v5818_v29, %v5825_v54  ;;  %v5941_v4 = vsel %vm15959_vm15, %v5827_v45, %v11991_v49  ;;  %v5807_v37 = vor.u32 %v5805_v17, %v5804_v61  ;;  %v13289_v10 = vpop.f32.mrb[14].mxu1  ;;  %v5663_v22 = vpop.f32.mrb[15].mxu0 }
 0x413   : >> { %v5809_v20 = vrot.slane %v5804_v61, 4  ;;  %11990 = vst.msk [vmem:[%s16856_s6 + $0x34] sm:$0xf] %vm226_vm0, %v5826_v15  ;;  %11992 = vst [vmem:[%s16856_s6 + $0x38] sm:$0x1] %v5941_v4  ;;  %v5831_v25 = vrot.slane %v5829_v30, 7  ;;  %v13848_v6 = vadd.f32 %v13360_v24, %v13288_v56  ;;  %v13849_v21 = vadd.f32 %v5660_v38, %v4596_v43 }
 0x414   : >> { %v5851_v8 = vor.u32 %v5849_v52, %v5848_v1  ;;  %v5853_v26 = vrot.slane %v5848_v1, 4  ;;  %v5855_v60 = vshrl.u32 %v12664_v41, 16  ;;  %v4599_v19 = vpop.f32.mrb[15].mxu1  ;;  %v5808_v40 = vsel %vm15953_vm14, %v5800_v33, %v5807_v37  ;;  %v12000_v56 = vld [vmem:[%s16856_s6 + $0x50] sm:$0xf] }
 0x415   : >> { %v5817_v14 = vsel %vm15953_vm14, %v5809_v20, %v5816_v9  ;;  %v5858_v7 = vshll.u32 %v12664_v41, 16  ;;  %v5837_v55 = vshrl.u32 %v12662_v5, 16  ;;  %11988 = vst.msk [vmem:[%s16856_s6 + $0x2c] sm:$0xf] %vm226_vm0, %v5808_v40  ;;  %v5834_v47 = vor.u32 %v5832_v50, %v5831_v25  ;;  %v12005_v4 = vld [vmem:[%s16856_s6 + $0x60] sm:$0x1] }
 0x416   : >> { %11989 = vst.msk [vmem:[%s16856_s6 + $0x30] sm:$0xf] %vm226_vm0, %v5817_v14  ;;  %v5835_v29 = vrot.slane %v5831_v25, 4  ;;  %v5857_v42 = vrot.slane %v5855_v60, 7  ;;  %v5840_v16 = vshll.u32 %v12662_v5, 16  ;;  %v13850_v33 = vadd.f32 %v13361_v51, %v13289_v10 }
 0x417   : >> { %v5839_v12 = vrot.slane %v5837_v55, 7  ;;  %v5944_v9 = vsel %vm15947_vm13, %v5834_v47, %v11993_v53  ;;  %v13851_v36 = vadd.f32 %v5663_v22, %v4599_v19  ;;  %v5705_v63 = vmax.f32 %v13848_v6, 0.0 }
 0x418   : >> { %v5860_v62 = vor.u32 %v5858_v7, %v5857_v42  ;;  %v5862_v27 = vrot.slane %v5857_v42, 4  ;;  %11994 = vst [vmem:[%s16856_s6 + $0x3c] sm:$0xf] %v5944_v9  ;;  %v5703_v59 = vmax.f32 %v13849_v21, 0.0  ;;  %v5706_v13 = vmax.f32 %v13850_v33, 0.0 }
 0x419   : >> { %v5842_v48 = vor.u32 %v5840_v16, %v5839_v12  ;;  %v5844_v34 = vrot.slane %v5839_v12, 4  ;;  %v5704_v31 = vmax.f32 %v13851_v36, 0.0  ;;  %v12667_v17 = vpack.c.bf16 %v5705_v63, %v5705_v63 }
 0x41a   : >> { %v5861_v32 = vsel %vm15953_vm14, %v5853_v26, %v5860_v62  ;;  %v5950_v46 = vsel %vm15959_vm15, %v5862_v27, %v11998_v28  ;;  %v12665_v11 = vpack.c.bf16 %v5703_v59, %v5703_v59  ;;  %v12668_v49 = vpack.c.bf16 %v5706_v13, %v5706_v13 }
 0x41b   : >> { %11997 = vst.msk [vmem:[%s16856_s6 + $0x48] sm:$0xf] %vm226_vm0, %v5861_v32  ;;  %11999 = vst [vmem:[%s16856_s6 + $0x4c] sm:$0x1] %v5950_v46  ;;  %v5843_v23 = vsel %vm15953_vm14, %v5835_v29, %v5842_v48  ;;  %v5852_v35 = vsel %vm15953_vm14, %v5844_v34, %v5851_v8  ;;  %v12666_v57 = vpack.c.bf16 %v5704_v31, %v5704_v31  ;;  %v5881_v52 = vshrl.u32 %v12667_v17, 16 }
 0x41c   : >> { %11995 = vst.msk [vmem:[%s16856_s6 + $0x40] sm:$0xf] %vm226_vm0, %v5843_v23  ;;  %11996 = vst.msk [vmem:[%s16856_s6 + $0x44] sm:$0xf] %vm226_vm0, %v5852_v35  ;;  %v5864_v2 = vshrl.u32 %v12665_v11, 16  ;;  %v5890_v18 = vshrl.u32 %v12668_v49, 16 }
 0x41d   : >> { %v5872_v24 = vshrl.u32 %v12666_v57, 16  ;;  %v5883_v54 = vrot.slane %v5881_v52, 7  ;;  %v5884_v45 = vshll.u32 %v12667_v17, 16  ;;  %v5867_v41 = vshll.u32 %v12665_v11, 16 }
 0x41e   : >> { %v5866_v61 = vrot.slane %v5864_v2, 7  ;;  %v5892_v38 = vrot.slane %v5890_v18, 7  ;;  %v5893_v1 = vshll.u32 %v12668_v49, 16  ;;  %v5875_v50 = vshll.u32 %v12666_v57, 16 }
 0x41f   : >> { %v5874_v30 = vrot.slane %v5872_v24, 7  ;;  %v5886_v5 = vor.u32 %v5884_v45, %v5883_v54  ;;  %v5888_v43 = vrot.slane %v5883_v54, 4  ;;  %3289 = sbr.rel (!%p3287_p5) target bundleno = 650 (0x28a), region = 160 }
 0x420   : >> { %v5869_v51 = vor.u32 %v5867_v41, %v5866_v61  ;;  %v5870_v15 = vrot.slane %v5866_v61, 4  ;;  %v5895_v37 = vor.u32 %v5893_v1, %v5892_v38  ;;  %v5897_v20 = vrot.slane %v5892_v38, 4 }
 0x421   : >> { %v5877_v10 = vor.u32 %v5875_v50, %v5874_v30  ;;  %v5879_v22 = vrot.slane %v5874_v30, 4 }
 0x422   : >> { %v5953_v8 = vsel %vm15947_vm13, %v5869_v51, %v12000_v56  ;;  %v5896_v26 = vsel %vm15953_vm14, %v5888_v43, %v5895_v37  ;;  %v5959_v25 = vsel %vm15959_vm15, %v5897_v20, %v12005_v4 }
 0x423   : >> { %12001 = vst [vmem:[%s16856_s6 + $0x50] sm:$0xf] %v5953_v8  ;;  %v5878_v60 = vsel %vm15953_vm14, %v5870_v15, %v5877_v10  ;;  %v5887_v19 = vsel %vm15953_vm14, %v5879_v22, %v5886_v5  ;;  %12004 = vst.msk [vmem:[%s16856_s6 + $0x5c] sm:$0xf] %vm226_vm0, %v5896_v26 }
 0x424   : >> { %12006 = vst [vmem:[%s16856_s6 + $0x60] sm:$0x1] %v5959_v25  ;;  %12002 = vst.msk [vmem:[%s16856_s6 + $0x54] sm:$0xf] %vm226_vm0, %v5878_v60 }
 0x425   : >> { %12003 = vst.msk [vmem:[%s16856_s6 + $0x58] sm:$0xf] %vm226_vm0, %v5887_v19 }
 0x426 LB: >> { %v14351_v3 = vld [vmem:[%s18720_s3 + $0x8] sm:$0xff]   ;;  %v14352_v40 = vld [vmem:[%s18720_s3 + $0x20] sm:$0xff]   ;;  %s12669_s30 = smul.u32 80, %s14463_s7  ;;  %vm17748_vm0 = vmand %vm568_vm2, %vm3245_vm10  ;;  %s5966_s7 = sadd.s32 1, %s14463_s7   ;;  %s14463_s7 = sphi %s16946_s7, %s5966_s7  }
 0x427   : >> { %13362 = vmatprep.subr.bf16.mxu1 %v14351_v3  ;;  %v16961_v0 = vld [vmem:[%s18720_s3] sm:$0xff]   ;;  %13434 = vmatprep.subr.bf16.mxu0 %v14352_v40  ;;  %v16966_v39 = vld [vmem:[%s18720_s3 + $0x28] sm:$0xff]   ;;  %vm17759_vm7 = vmand %vm573_vm3, %vm3079_vm11  ;;  %p5963_p6 = scmp.ge.s32.totalorder %s5966_s7, 8  }
 0x428   : >> { %13363 = vmatpush3.bf16.msra.mxu1 %v14351_v3  ;;  %13435 = vmatpush3.bf16.msra.mxu0 %v14352_v40  ;;  %s16971_s14 = scalar_lea.vmem [#allocation3], %s12669_s30  ;;  %s17754_s8 = scalar_lea.vmem [#allocation4], %s12669_s30 }
 0x429   : >> { %13380 = vmatprep.subr.bf16.mxu1 %v16961_v0  ;;  %13452 = vmatprep.subr.bf16.mxu0 %v16966_v39  ;;  %s17850_s9 = smov (%p5963_p6), 0  }
 0x42c   : >> { %v16974_v14 = vld [vmem:[%s16971_s14] sm:$0xf]  ;;  %v16977_v53 = vld [vmem:[%s16971_s14 + $0x4] sm:$0xf]  ;;  %v16980_v7 = vld [vmem:[%s16971_s14 + $0x8] sm:$0xf] }
 0x42d   : >> { %v5997_v55 = vshrl.u32 %v16974_v14, 16  ;;  %v6000_v47 = vshll.u32 %v16974_v14, 16  ;;  %v6006_v29 = vshll.u32 %v16977_v53, 16  ;;  %v6010_v42 = vshrl.u32 %v16977_v53, 16  ;;  %v12106_v12 = vld [vmem:[%s16971_s14 + $0x14] sm:$0xf] }
 0x42e   : >> { %v6016_v16 = vshll.u32 %v16980_v7, 16  ;;  %v6020_v28 = vshrl.u32 %v16980_v7, 16  ;;  %v16991_v6 = vld [vmem:[%s16971_s14 + $0x18] sm:$0xf]  ;;  %v12029_v21 = vcombine.low %v16974_v14, %v16977_v53  ;;  %v16996_v36 = vld [vmem:[%s16971_s14 + $0x1c] sm:$0xf] }
 0x42f   : >> { %v5999_v33 = vrot.slane %v5997_v55, 4  ;;  %v6002_v9 = vrot.slane %v6000_v47, 5  ;;  %v6008_v62 = vrot.slane %v6006_v29, 5  ;;  %v6012_v27 = vrot.slane %v6010_v42, 4  ;;  %v17001_v23 = vld [vmem:[%s16971_s14 + $0xc] sm:$0xf] }
 0x430   : >> { %v6018_v48 = vrot.slane %v6016_v16, 5  ;;  %v6022_v34 = vrot.slane %v6020_v28, 4  ;;  %v6958_v63 = vshrl.u32 %v12106_v12, 16  ;;  %v6961_v59 = vshll.u32 %v12106_v12, 16  ;;  %v5989_v41 = vld [vmem:[%s16971_s14 + $0x10] sm:$0x1] }
 0x431   : >> { %v6003_v32 = vor.u32 %v6002_v9, %v5999_v33  ;;  %v6013_v46 = vor.u32 %v6012_v27, %v6008_v62  ;;  %v6967_v13 = vshll.u32 %v16991_v6, 16  ;;  %v6971_v31 = vshrl.u32 %v16991_v6, 16  ;;  %v17014_v10 = vld [vmem:[%s16971_s14 + $0x20] sm:$0xf]  ;;  %v12110_v60 = vld [vmem:[%s16971_s14 + $0x24] sm:$0x1] }
 0x432   : >> { %v6023_v35 = vor.u32 %v6022_v34, %v6018_v48  ;;  %v6960_v17 = vrot.slane %v6958_v63, 4  ;;  %v6963_v11 = vrot.slane %v6961_v59, 5  ;;  %v6977_v49 = vshll.u32 %v16996_v36, 16  ;;  %v17027_v47 = vld [vmem:[%s16971_s14 + $0x14] sm:$0xf] }
 0x433   : >> { %v6004_v57 = vrot.slane %v6003_v32, 4  ;;  %v6014_v52 = vrot.slane %v6013_v46, 4  ;;  %v6969_v2 = vrot.slane %v6967_v13, 5  ;;  %v6973_v18 = vrot.slane %v6971_v31, 4  ;;  %v17037_v27 = vld [vmem:[%s16971_s14 + $0x18] sm:$0xf] }
 0x434   : >> { %v6024_v24 = vrot.slane %v6023_v35, 4  ;;  %v6964_v54 = vor.u32 %v6963_v11, %v6960_v17  ;;  %v6979_v45 = vrot.slane %v6977_v49, 5  ;;  %v6981_v61 = vshrl.u32 %v16996_v36, 16  ;;  %v17041_v59 = vld [vmem:[%s16971_s14 + $0x1c] sm:$0xf] }
 0x435   : >> { %v6009_v56 = vsel %vm15631_vm9, %v6004_v57, %v6008_v62  ;;  %v6019_v38 = vsel %vm15631_vm9, %v6014_v52, %v6018_v48  ;;  %v6974_v1 = vor.u32 %v6973_v18, %v6969_v2  ;;  %v6026_v30 = vshll.u32 %v17001_v23, 16  ;;  %v12111_v17 = vld [vmem:[%s16971_s14 + $0x28] sm:$0xf] }
 0x436   : >> { %v12012_v50 = vcombine.low %v6009_v56, %v6019_v38  ;;  %v6965_v5 = vrot.slane %v6964_v54, 4  ;;  %v6983_v43 = vrot.slane %v6981_v61, 4  ;;  %v6030_v51 = vshrl.u32 %v17001_v23, 16  ;;  %v17063_v61 = vld [vmem:[%s18720_s3 + $0x10] sm:$0xff]  }
 0x437   : >> { %v6975_v15 = vrot.slane %v6974_v1, 4  ;;  %v6028_v4 = vrot.slane %v6026_v30, 5  ;;  %v6036_v37 = vshll.u32 %v5989_v41, 16  ;;  %v6517_v20 = vrot.slane %v17001_v23, 5  ;;  %v17068_v1 = vld [vmem:[%s16971_s14 + $0x30] sm:$0xf] }
 0x438   : >> { %13364 = vmatprep.mubr.msk.bf16.mxu1 %vm3529_vm1, %v12012_v50  ;;  %v6970_v22 = vsel %vm15631_vm9, %v6965_v5, %v6969_v2  ;;  %v6984_v8 = vor.u32 %v6983_v43, %v6979_v45  ;;  %v6032_v26 = vrot.slane %v6030_v51, 4  ;;  %v6520_v25 = vrot.slane %v5989_v41, 5  ;;  %v17054_v2 = vld [vmem:[%s16971_s14 + $0x2c] sm:$0xf] }
 0x439   : >> { %v6980_v19 = vsel %vm15631_vm9, %v6975_v15, %v6979_v45  ;;  %v6029_v3 = vsel %vm15631_vm9, %v6024_v24, %v6028_v4  ;;  %v6038_v40 = vrot.slane %v6036_v37, 5  ;;  %v6519_v55 = vrot.slane %v6517_v20, 4  ;;  %v17073_v15 = vld [vmem:[%s16971_s14 + $0x20] sm:$0xf] }
 0x43a   : >> { %v6985_v29 = vrot.slane %v6984_v8, 4  ;;  %v12128_v42 = vcombine.low %v6970_v22, %v6980_v19  ;;  %v6033_v16 = vor.u32 %v6032_v26, %v6028_v4  ;;  %v6987_v28 = vshll.u32 %v17014_v10, 16 }
 0x43b   : >> { %v17032_v12 = vsel %vm16139_vm6, %v6519_v55, %v6520_v25  ;;  %v6991_v33 = vshrl.u32 %v17014_v10, 16  ;;  %v6997_v9 = vshll.u32 %v12110_v60, 16  ;;  %v7335_v62 = vrot.slane %v17014_v10, 5  ;;  %v17178_v10 = vld [vmem:[%s16971_s14 + $0x48] sm:$0xf] }
 0x43c   : >> { %13436 = vmatprep.mubr.msk.bf16.mxu0 %vm3529_vm1, %v12128_v42  ;;  %v6034_v48 = vrot.slane %v6033_v16, 4  ;;  %v6989_v34 = vrot.slane %v6987_v28, 5  ;;  %v7338_v63 = vrot.slane %v12110_v60, 5  ;;  %v6041_v32 = vshrl.u32 %v17027_v47, 16  ;;  %v17082_v42 = vld [vmem:[%s16971_s14 + $0x24] sm:$0x1] }
 0x43d   : >> { %v6993_v46 = vrot.slane %v6991_v33, 4  ;;  %v6999_v13 = vrot.slane %v6997_v9, 5  ;;  %v7337_v31 = vrot.slane %v7335_v62, 4  ;;  %v6044_v35 = vshll.u32 %v17027_v47, 16 }
 0x43e   : >> { %v6039_v11 = vsel %vm15631_vm9, %v6034_v48, %v6038_v40  ;;  %v6990_v49 = vsel %vm15631_vm9, %v6985_v29, %v6989_v34  ;;  %v6043_v57 = vrot.slane %v6041_v32, 4  ;;  %v6050_v52 = vshll.u32 %v17037_v27, 16 }
 0x43f   : >> { %v12013_v18 = vcombine.low %v6029_v3, %v6039_v11  ;;  %v6994_v24 = vor.u32 %v6993_v46, %v6989_v34  ;;  %v17058_v54 = vsel %vm16139_vm6, %v7337_v31, %v7338_v63  ;;  %v6046_v45 = vrot.slane %v6044_v35, 5 }
 0x440   : >> { %v6052_v41 = vrot.slane %v6050_v52, 5  ;;  %v6054_v56 = vshrl.u32 %v17037_v27, 16  ;;  %v6060_v38 = vshll.u32 %v17041_v59, 16  ;;  %v7002_v30 = vshrl.u32 %v12111_v17, 16  ;;  %v17103_v52 = vld [vmem:[%s16971_s14 + $0x38] sm:$0x1] }
 0x441   : >> { %13365 = vmatmul.mubr.msk.bf16.vlgmr.msra.gmra.mrb[0].mxu1 %vm3529_vm1, %v12013_v18  ;;  %v6995_v50 = vrot.slane %v6994_v24, 4  ;;  %v6047_v5 = vor.u32 %v6046_v45, %v6043_v57  ;;  %v7005_v43 = vshll.u32 %v12111_v17, 16  ;;  %v7011_v51 = vshll.u32 %v17054_v2, 16  ;;  %v17098_v17 = vld [vmem:[%s16971_s14 + $0x34] sm:$0xf] }
 0x442   : >> { %13381 = vmatpush3.bf16.msra.mxu1 %v16961_v0  ;;  %v6056_v4 = vrot.slane %v6054_v56, 4  ;;  %v6062_v37 = vrot.slane %v6060_v38, 5  ;;  %v7004_v22 = vrot.slane %v7002_v30, 4  ;;  %v7015_v8 = vshrl.u32 %v17054_v2, 16  ;;  %v17087_v0 = vld [vmem:[%s18720_s3 + $0x30] sm:$0xff]  }
 0x443   : >> { %v7000_v26 = vsel %vm15631_vm9, %v6995_v50, %v6999_v13  ;;  %v6048_v25 = vrot.slane %v6047_v5, 4  ;;  %v7007_v60 = vrot.slane %v7005_v43, 5  ;;  %v7013_v19 = vrot.slane %v7011_v51, 5  ;;  %13398 = vmatprep.subr.bf16.mxu1 %v17063_v61  ;;  %v17110_v56 = vld [vmem:[%s16971_s14 + $0x28] sm:$0xf] }
 0x444   : >> { %v12129_v3 = vcombine.low %v6990_v49, %v7000_v26  ;;  %v6057_v40 = vor.u32 %v6056_v4, %v6052_v41  ;;  %v7017_v55 = vrot.slane %v7015_v8, 4  ;;  %v7021_v29 = vshll.u32 %v17068_v1, 16  ;;  %v17116_v43 = vld [vmem:[%s16971_s14 + $0x2c] sm:$0xf]  ;;  %v17122_v8 = vld [vmem:[%s16971_s14 + $0x30] sm:$0xf] }
 0x445   : >> { %v6053_v16 = vsel %vm15631_vm9, %v6048_v25, %v6052_v41  ;;  %v7008_v28 = vor.u32 %v7007_v60, %v7004_v22  ;;  %v6064_v33 = vshrl.u32 %v17041_v59, 16  ;;  %v6070_v9 = vshll.u32 %v17073_v15, 16  ;;  %v12145_v26 = vld [vmem:[%s16971_s14 + $0x14] sm:$0xe] }
 0x446   : >> { %13437 = vmatmul.mubr.msk.bf16.vlgmr.msra.gmra.mrb[0].mxu0 %vm3529_vm1, %v12129_v3  ;;  %v6058_v48 = vrot.slane %v6057_v40, 4  ;;  %v7018_v34 = vor.u32 %v7017_v55, %v7013_v19  ;;  %v7023_v63 = vrot.slane %v7021_v29, 5  ;;  %v6074_v32 = vshrl.u32 %v17073_v15, 16 }
 0x447   : >> { %13453 = vmatpush3.bf16.msra.mxu0 %v16966_v39  ;;  %v7009_v46 = vrot.slane %v7008_v28, 4  ;;  %v6066_v13 = vrot.slane %v6064_v33, 4  ;;  %v6072_v31 = vrot.slane %v6070_v9, 5  ;;  %v6080_v35 = vshll.u32 %v17082_v42, 16  ;;  %v17131_v28 = vld [vmem:[%s16971_s14 + $0x34] sm:$0xf] }
 0x448   : >> { %v6063_v11 = vsel %vm15631_vm9, %v6058_v48, %v6062_v37  ;;  %v7019_v49 = vrot.slane %v7018_v34, 4  ;;  %v6076_v57 = vrot.slane %v6074_v32, 4  ;;  %v7025_v18 = vshrl.u32 %v17068_v1, 16  ;;  %13470 = vmatprep.subr.bf16.mxu0 %v17087_v0 }
 0x449   : >> { %v12014_v39 = vcombine.low %v6053_v16, %v6063_v11  ;;  %v7014_v24 = vsel %vm15631_vm9, %v7009_v46, %v7013_v19  ;;  %v6067_v45 = vor.u32 %v6066_v13, %v6062_v37  ;;  %v6082_v41 = vrot.slane %v6080_v35, 5 }
 0x44a   : >> { %v7024_v38 = vsel %vm15631_vm9, %v7019_v49, %v7023_v63  ;;  %v6077_v30 = vor.u32 %v6076_v57, %v6072_v31  ;;  %v7027_v50 = vrot.slane %v7025_v18, 4  ;;  %v7031_v5 = vshll.u32 %v17098_v17, 16 }
 0x44b   : >> { %13368 = vmatprep.mubr.msk.bf16.mxu1 %vm3529_vm1, %v12014_v39  ;;  %v12130_v51 = vcombine.low %v7014_v24, %v7024_v38  ;;  %v6068_v4 = vrot.slane %v6067_v45, 4  ;;  %v7035_v22 = vshrl.u32 %v17098_v17, 16  ;;  %v7041_v37 = vshll.u32 %v17103_v52, 16  ;;  %v17143_v45 = vld [vmem:[%s16971_s14 + $0x38] sm:$0x1] }
 0x44c   : >> { %v6078_v25 = vrot.slane %v6077_v30, 4  ;;  %v7028_v60 = vor.u32 %v7027_v50, %v7023_v63  ;;  %v7033_v19 = vrot.slane %v7031_v5, 5  ;;  %v6085_v3 = vshrl.u32 %v17110_v56, 16 }
 0x44d   : >> { %13440 = vmatprep.mubr.msk.bf16.mxu0 %vm3529_vm1, %v12130_v51  ;;  %v6073_v40 = vsel %vm15631_vm9, %v6068_v4, %v6072_v31  ;;  %v7037_v55 = vrot.slane %v7035_v22, 4  ;;  %v7043_v29 = vrot.slane %v7041_v37, 5  ;;  %v6088_v16 = vshll.u32 %v17110_v56, 16  ;;  %v17153_v37 = vld [vmem:[%s16971_s14 + $0x3c] sm:$0xf] }
 0x44e   : >> { %v6083_v33 = vsel %vm15631_vm9, %v6078_v25, %v6082_v41  ;;  %v7029_v9 = vrot.slane %v7028_v60, 4  ;;  %v6087_v48 = vrot.slane %v6085_v3, 4  ;;  %v6094_v34 = vshll.u32 %v17116_v43, 16 }
 0x44f   : >> { %v12015_v63 = vcombine.low %v6073_v40, %v6083_v33  ;;  %v7038_v32 = vor.u32 %v7037_v55, %v7033_v19  ;;  %v6090_v46 = vrot.slane %v6088_v16, 5  ;;  %v6098_v13 = vshrl.u32 %v17116_v43, 16 }
 0x450   : >> { %v7034_v31 = vsel %vm15631_vm9, %v7029_v9, %v7033_v19  ;;  %v6096_v35 = vrot.slane %v6094_v34, 5  ;;  %v6104_v11 = vshll.u32 %v17122_v8, 16  ;;  %v12149_v49 = vrot.slane %v12145_v26, 9 }
 0x451   : >> { %13369 = vmatmul.mubr.msk.bf16.gmra.mrb[4].mxu1 %vm3529_vm1, %v12015_v63  ;;  %v7039_v57 = vrot.slane %v7038_v32, 4  ;;  %v6091_v18 = vor.u32 %v6090_v46, %v6087_v48  ;;  %v6100_v39 = vrot.slane %v6098_v13, 4  ;;  %v7329_v24 = vrot.slane %v16991_v6, 5  ;;  %v12146_v13 = vld [vmem:[%s16971_s14 + $0x28] sm:$0xe] }
 0x452   : >> { %v6106_v41 = vrot.slane %v6104_v11, 5  ;;  %v7332_v38 = vrot.slane %v16996_v36, 5  ;;  %v6108_v30 = vshrl.u32 %v17122_v8, 16  ;;  %v6114_v50 = vshll.u32 %v17131_v28, 16  ;;  %v17156_v36 = vld [vmem:[%s16971_s14 + $0x40] sm:$0xf] }
 0x453   : >> { %v7044_v5 = vsel %vm15631_vm9, %v7039_v57, %v7043_v29  ;;  %v6092_v51 = vrot.slane %v6091_v18, 4  ;;  %v6101_v4 = vor.u32 %v6100_v39, %v6096_v35  ;;  %v7330_v22 = vsel %vm16139_vm6, %v12149_v49, %v7329_v24  ;;  %v17162_v29 = vld [vmem:[%s16971_s14 + $0x44] sm:$0xf] }
 0x454   : >> { %v12131_v6 = vcombine.low %v7034_v31, %v7044_v5  ;;  %v7331_v26 = vrot.slane %v7329_v24, 4  ;;  %v7334_v25 = vrot.slane %v7332_v38, 4  ;;  %v6110_v60 = vrot.slane %v6108_v30, 4 }
 0x455   : >> { %v6097_v19 = vsel %vm15631_vm9, %v6092_v51, %v6096_v35  ;;  %v6102_v3 = vrot.slane %v6101_v4, 4  ;;  %v6116_v40 = vrot.slane %v6114_v50, 5  ;;  %v6118_v55 = vshrl.u32 %v17131_v28, 16 }
 0x456   : >> { %13441 = vmatmul.mubr.msk.bf16.gmra.mrb[4].mxu0 %vm3529_vm1, %v12131_v6  ;;  %v7333_v16 = vsel %vm16139_vm6, %v7331_v26, %v7332_v38  ;;  %v7336_v33 = vsel %vm16139_vm6, %v7334_v25, %v7335_v62  ;;  %v6111_v9 = vor.u32 %v6110_v60, %v6106_v41  ;;  %v6124_v48 = vshll.u32 %v17143_v45, 16  ;;  %v17194_v25 = vld [vmem:[%s18720_s3 + $0x38] sm:$0xff]  }
 0x457   : >> { %v6107_v34 = vsel %vm15631_vm9, %v6102_v3, %v6106_v41  ;;  %v12155_v63 = vcombine.low %v7330_v22, %v7333_v16  ;;  %v6120_v32 = vrot.slane %v6118_v55, 4  ;;  %v12156_v46 = vcombine.low %v7336_v33, %v17058_v54 }
 0x458   : >> { %v12016_v31 = vcombine.low %v6097_v19, %v6107_v34  ;;  %v6112_v35 = vrot.slane %v6111_v9, 4  ;;  %v6126_v11 = vrot.slane %v6124_v48, 5  ;;  %v6129_v49 = vshrl.u32 %v17153_v37, 16  ;;  %v17206_v9 = vld [vmem:[%s16971_s14 + $0x40] sm:$0xf] }
 0x459   : >> { %13454 = vmatprep.mubr.msk.bf16.mxu0 %vm3529_vm1, %v12155_v63  ;;  %v6121_v62 = vor.u32 %v6120_v32, %v6116_v40  ;;  %v6132_v57 = vshll.u32 %v17153_v37, 16  ;;  %v6138_v18 = vshll.u32 %v17156_v36, 16  ;;  %v6142_v39 = vshrl.u32 %v17156_v36, 16 }
 0x45a   : >> { %13372 = vmatprep.mubr.msk.bf16.mxu1 %vm3529_vm1, %v12016_v31  ;;  %v6117_v54 = vsel %vm15631_vm9, %v6112_v35, %v6116_v40  ;;  %v6131_v24 = vrot.slane %v6129_v49, 4  ;;  %v6148_v41 = vshll.u32 %v17162_v29, 16  ;;  %v12150_v38 = vrot.slane %v12146_v13, 9  ;;  %v17199_v40 = vld [vmem:[%s16971_s14 + $0x4c] sm:$0x1] }
 0x45b   : >> { %v6122_v30 = vrot.slane %v6121_v62, 4  ;;  %v6134_v50 = vrot.slane %v6132_v57, 5  ;;  %v6140_v5 = vrot.slane %v6138_v18, 5  ;;  %v6144_v51 = vrot.slane %v6142_v39, 4  ;;  %v17221_v18 = vld [vmem:[%s16971_s14 + $0x44] sm:$0xf] }
 0x45c   : >> { %v6150_v4 = vrot.slane %v6148_v41, 5  ;;  %v7342_v22 = vrot.slane %v17054_v2, 5  ;;  %v7345_v6 = vrot.slane %v17068_v1, 5  ;;  %v6152_v26 = vshrl.u32 %v17162_v29, 16 }
 0x45d   : >> { %v6127_v60 = vsel %vm15631_vm9, %v6122_v30, %v6126_v11  ;;  %v6135_v19 = vor.u32 %v6134_v50, %v6131_v24  ;;  %v6145_v3 = vor.u32 %v6144_v51, %v6140_v5  ;;  %v6158_v55 = vshll.u32 %v17178_v10, 16  ;;  %v12147_v11 = vld [vmem:[%s16971_s14 + $0x3c] sm:$0xe]  ;;  %v12119_v51 = vld [vmem:[%s16971_s14 + $0x48] sm:$0xf] }
 0x45e   : >> { %v12017_v16 = vcombine.low %v6117_v54, %v6127_v60  ;;  %13455 = vmatmul.mubr.msk.bf16.vlgmr.msra.gmra.mrb[0].mxu0 %vm3529_vm1, %v12156_v46  ;;  %v7343_v2 = vsel %vm16139_vm6, %v12150_v38, %v7342_v22  ;;  %v7344_v1 = vrot.slane %v7342_v22, 4  ;;  %v6154_v33 = vrot.slane %v6152_v26, 4  ;;  %v12120_v26 = vld [vmem:[%s16971_s14 + $0x4c] sm:$0x1]  ;;  %v12148_v60 = vld [vmem:[%s16971_s14 + $0x50] sm:$0xe] }
 0x45f   : >> { %13471 = vmatpush3.bf16.msra.mxu0 %v17087_v0  ;;  %v6136_v48 = vrot.slane %v6135_v19, 4  ;;  %v6146_v34 = vrot.slane %v6145_v3, 4  ;;  %v6160_v63 = vrot.slane %v6158_v55, 5  ;;  %v6162_v32 = vshrl.u32 %v17178_v10, 16 }
 0x460   : >> { %13373 = vmatmul.mubr.msk.bf16.gmra.mrb[8].mxu1 %vm3529_vm1, %v12017_v16  ;;  %v7346_v46 = vsel %vm16139_vm6, %v7344_v1, %v7345_v6  ;;  %v6155_v13 = vor.u32 %v6154_v33, %v6150_v4  ;;  %v6168_v31 = vshll.u32 %v17199_v40, 16  ;;  %v7347_v35 = vrot.slane %v7345_v6, 4  ;;  %13488 = vmatprep.subr.bf16.mxu0 %v17194_v25 }
 0x461   : >> { %v6141_v0 = vsel %vm15631_vm9, %v6136_v48, %v6140_v5  ;;  %v6151_v49 = vsel %vm15631_vm9, %v6146_v34, %v6150_v4  ;;  %v12157_v62 = vcombine.low %v7343_v2, %v7346_v46  ;;  %v6164_v57 = vrot.slane %v6162_v32, 4  ;;  %v17247_v46 = vld [vmem:[%s16971_s14 + $0x54] sm:$0xf] }
 0x462   : >> { %v12018_v39 = vcombine.low %v6141_v0, %v6151_v49  ;;  %v6156_v54 = vrot.slane %v6155_v13, 4  ;;  %v6170_v24 = vrot.slane %v6168_v31, 5  ;;  %v7348_v41 = vrot.slane %v17098_v17, 5  ;;  %v17250_v13 = vld [vmem:[%s16971_s14 + $0x58] sm:$0xf] }
 0x463   : >> { %13458 = vmatprep.mubr.msk.bf16.mxu0 %vm3529_vm1, %v12157_v62  ;;  %v6165_v38 = vor.u32 %v6164_v57, %v6160_v63  ;;  %v7351_v30 = vrot.slane %v17103_v52, 5  ;;  %v12151_v50 = vrot.slane %v12147_v11, 9  ;;  %v7355_v5 = vrot.slane %v17206_v9, 5  ;;  %v17253_v0 = vld [vmem:[%s16971_s14 + $0x5c] sm:$0xf] }
 0x464   : >> { %13376 = vmatprep.mubr.msk.bf16.mxu1 %vm3529_vm1, %v12018_v39  ;;  %v6161_v4 = vsel %vm15631_vm9, %v6156_v54, %v6160_v63  ;;  %v7349_v22 = vsel %vm16139_vm6, %v7347_v35, %v7348_v41  ;;  %v7350_v6 = vrot.slane %v7348_v41, 4  ;;  %v7358_v17 = vrot.slane %v17221_v18, 5 }
 0x465   : >> { %v6166_v52 = vrot.slane %v6165_v38, 4  ;;  %v7356_v19 = vsel %vm16139_vm6, %v12151_v50, %v7355_v5  ;;  %v7357_v3 = vrot.slane %v7355_v5, 4  ;;  %v7075_v55 = vshll.u32 %v12119_v51, 16  ;;  %v17264_v38 = vld [vmem:[%s16971_s14 + $0x60] sm:$0x1] }
 0x466   : >> { %v7352_v16 = vsel %vm16139_vm6, %v7350_v6, %v7351_v30  ;;  %v7079_v2 = vshrl.u32 %v12119_v51, 16  ;;  %v7085_v1 = vshll.u32 %v12120_v26, 16  ;;  %v7360_v33 = vrot.slane %v7358_v17, 4 }
 0x467   : >> { %v6171_v48 = vsel %vm15631_vm9, %v6166_v52, %v6170_v24  ;;  %v12158_v34 = vcombine.low %v7349_v22, %v7352_v16  ;;  %v7359_v63 = vsel %vm16139_vm6, %v7357_v3, %v7358_v17  ;;  %v17244_v32 = vrot.slane %v7075_v55, 5 }
 0x468   : >> { %v12019_v31 = vcombine.low %v6161_v4, %v6171_v48  ;;  %v12159_v35 = vcombine.low %v7356_v19, %v7359_v63  ;;  %v7081_v11 = vrot.slane %v7079_v2, 4  ;;  %v7361_v49 = vrot.slane %v12119_v51, 5 }
 0x469   : >> { %13459 = vmatmul.mubr.msk.bf16.gmra.mrb[4].mxu0 %vm3529_vm1, %v12158_v34  ;;  %v7364_v62 = vrot.slane %v12120_v26, 5  ;;  %v12152_v57 = vrot.slane %v12148_v60, 9  ;;  %v17259_v54 = vrot.slane %v7085_v1, 5  ;;  %v7368_v24 = vrot.slane %v17247_v46, 5  ;;  %v6495_v26 = vld [vmem:[%s16971_s14 + $0x14] sm:$0xe] }
 0x46a   : >> { %13377 = vmatmul.mubr.msk.bf16.gmra.mrb[12].mxu1 %vm3529_vm1, %v12019_v31  ;;  %13462 = vmatprep.mubr.msk.bf16.mxu0 %vm3529_vm1, %v12159_v35  ;;  %v7082_v39 = vor.u32 %v7081_v11, %v17244_v32  ;;  %v7371_v41 = vrot.slane %v17250_v13, 5  ;;  %v7362_v30 = vsel %vm16139_vm6, %v7360_v33, %v7361_v49  ;;  %v7363_v50 = vrot.slane %v7361_v49, 4  ;;  %v17295_v1 = vld [vmem:[%s18720_s3 + $0x18] sm:$0xff]   ;;  %v6496_v31 = vld [vmem:[%s16971_s14 + $0x28] sm:$0xe] }
 0x46b   : >> { %13382 = vmatprep.mubr.msk.bf16.mxu1 %vm3529_vm1, %v12029_v21  ;;  %v7374_v5 = vrot.slane %v17253_v0, 5  ;;  %v7369_v4 = vsel %vm16139_vm6, %v12152_v57, %v7368_v24  ;;  %v7370_v22 = vrot.slane %v7368_v24, 4  ;;  %v12030_v6 = vcombine.low %v16980_v7, %v17001_v23  ;;  %v17483_v60 = vld [vmem:[%s16971_s14 + $0x54] sm:$0xf] }
 0x46c   : >> { %v17273_v51 = vrot.slane %v7082_v39, 4  ;;  %v7365_v14 = vsel %vm16139_vm6, %v7363_v50, %v7364_v62  ;;  %v7373_v17 = vrot.slane %v7371_v41, 4  ;;  %v7377_v21 = vrot.slane %v17264_v38, 5 }
 0x46d   : >> { %v12160_v52 = vcombine.low %v7362_v30, %v7365_v14  ;;  %v7372_v19 = vsel %vm16139_vm6, %v7370_v22, %v7371_v41  ;;  %v7376_v3 = vrot.slane %v7374_v5, 4  ;;  %v12031_v55 = vcombine.low %v17027_v47, %v17037_v27 }
 0x46e   : >> { %v12161_v16 = vcombine.low %v7369_v4, %v7372_v19  ;;  %v6514_v2 = vrot.slane %v16980_v7, 5  ;;  %v12047_v33 = vrot.slane %v6495_v26, 9  ;;  %v6524_v48 = vrot.slane %v17037_v27, 5 }
 0x46f   : >> { %v6527_v34 = vrot.slane %v17041_v59, 5  ;;  %v6530_v63 = vrot.slane %v17073_v15, 5  ;;  %v7375_v47 = vsel %vm16139_vm6, %v7373_v17, %v7374_v5  ;;  %v7378_v35 = vsel %vm16139_vm6, %v7376_v3, %v7377_v21  ;;  %v14362_v5 = vld [vmem:[%s16971_s14 + $0x28] sm:$0xff]   ;;  %v6497_v3 = vld [vmem:[%s16971_s14 + $0x3c] sm:$0xe] }
 0x470   : >> { %v6516_v11 = vrot.slane %v6514_v2, 4  ;;  %v6533_v27 = vrot.slane %v17082_v42, 5  ;;  %v17315_v49 = vsel %vm16139_vm6, %v12047_v33, %v6524_v48  ;;  %v6526_v62 = vrot.slane %v6524_v48, 4  ;;  %v14365_v48 = vld [vmem:[%s16971_s14 + $0x30] sm:$0xff]  }
 0x471   : >> { %13463 = vmatmul.mubr.msk.bf16.gmra.mrb[8].mxu0 %vm3529_vm1, %v12160_v52  ;;  %v6529_v57 = vrot.slane %v6527_v34, 4  ;;  %v6532_v39 = vrot.slane %v6530_v63, 4  ;;  %v12048_v42 = vrot.slane %v6496_v31, 9  ;;  %v12162_v41 = vcombine.low %v7375_v47, %v7378_v35  ;;  %v12209_v52 = vld [vmem:[%s16971_s14 + $0x28] sm:$0xf] }
 0x472   : >> { %13383 = vmatmul.mubr.msk.bf16.vlgmr.msra.gmra.mrb[0].mxu1 %vm3529_vm1, %v12030_v6  ;;  %13466 = vmatprep.mubr.msk.bf16.mxu0 %vm3529_vm1, %v12161_v16  ;;  %v17321_v24 = vsel %vm16139_vm6, %v6516_v11, %v6517_v20  ;;  %v17329_v50 = vsel %vm16139_vm6, %v6526_v62, %v6527_v34  ;;  %v12032_v20 = vcombine.low %v17041_v59, %v17073_v15  ;;  %v6540_v15 = vrot.slane %v17122_v8, 5  ;;  %v14367_v62 = vld [vmem:[%s16971_s14 + $0x3c] sm:$0xff]  }
 0x473   : >> { %13399 = vmatpush3.bf16.msra.mxu1 %v17063_v61  ;;  %13386 = vmatprep.mubr.msk.bf16.mxu1 %vm3529_vm1, %v12031_v55  ;;  %v6537_v61 = vrot.slane %v17116_v43, 5  ;;  %v12053_v30 = vcombine.low %v17321_v24, %v17032_v12  ;;  %v17333_v23 = vsel %vm16139_vm6, %v6529_v57, %v6530_v63  ;;  %v12054_v4 = vcombine.low %v17315_v49, %v17329_v50  ;;  %v17368_v55 = vld [vmem:[%s16971_s14 + $0x2c] sm:$0xf] }
 0x474   : >> { %13416 = vmatprep.subr.bf16.mxu1 %v17295_v1  ;;  %v17342_v22 = vsel %vm16139_vm6, %v6532_v39, %v6533_v27  ;;  %v12033_v14 = vcombine.low %v17110_v56, %v17116_v43  ;;  %v6511_v21 = vrot.slane %v16977_v53, 5  ;;  %v6494_v56 = vld [vmem:[%s16971_s14] sm:$0xe]  ;;  %v6542_v19 = vrot.slane %v6540_v15, 4  ;;  %v14374_v24 = vld [vmem:[%s16971_s14 + $0x6c] sm:$0xff]  }
 0x475   : >> { %v6539_v6 = vrot.slane %v6537_v61, 4  ;;  %v12055_v17 = vcombine.low %v17333_v23, %v17342_v22  ;;  %v17350_v59 = vsel %vm16139_vm6, %v12048_v42, %v6537_v61  ;;  %v6543_v53 = vrot.slane %v17131_v28, 5 }
 0x476   : >> { %v6546_v16 = vrot.slane %v17143_v45, 5  ;;  %v12034_v33 = vcombine.low %v17122_v8, %v17131_v28  ;;  %v12035_v34 = vcombine.low %v17153_v37, %v17156_v36  ;;  %v12046_v63 = vrot.slane %v6494_v56, 9  ;;  %v17388_v37 = vld [vmem:[%s18720_s3 + $0x40] sm:$0xff]   ;;  %v12214_v56 = vld [vmem:[%s16971_s14 + $0x3c] sm:$0xf] }
 0x477   : >> { %v17357_v26 = vsel %vm16139_vm6, %v6539_v6, %v6540_v15  ;;  %v6513_v31 = vrot.slane %v6511_v21, 4  ;;  %v7776_v47 = vshrl.u32 %v12209_v52, 16  ;;  %v17379_v35 = vsel %vm16139_vm6, %v6542_v19, %v6543_v53 }
 0x478   : >> { %v6545_v11 = vrot.slane %v6543_v53, 4  ;;  %v12049_v27 = vrot.slane %v6497_v3, 9  ;;  %v7779_v57 = vshll.u32 %v12209_v52, 16  ;;  %v7785_v45 = vshll.u32 %v17368_v55, 16  ;;  %v14369_v3 = vld [vmem:[%s16971_s14 + $0x44] sm:$0xff]  }
 0x479   : >> { %13467 = vmatmul.mubr.msk.bf16.gmra.mrb[12].mxu0 %vm3529_vm1, %v12162_v41  ;;  %v7789_v8 = vshrl.u32 %v17368_v55, 16  ;;  %v6550_v28 = vrot.slane %v17156_v36, 5  ;;  %v6553_v42 = vrot.slane %v17162_v29, 5  ;;  %v6512_v36 = vsel %vm16139_vm6, %v12046_v63, %v6511_v21 }
 0x47a   : >> { %13387 = vmatmul.mubr.msk.bf16.gmra.mrb[4].mxu1 %vm3529_vm1, %v12032_v20  ;;  %13472 = vmatprep.mubr.msk.bf16.mxu0 %vm3529_vm1, %v14362_v5  ;;  %v17392_v39 = vsel %vm16139_vm6, %v6545_v11, %v6546_v16  ;;  %v6515_v41 = vsel %vm16139_vm6, %v6513_v31, %v6514_v2  ;;  %v17407_v20 = vld [vmem:[%s16971_s14 + $0x30] sm:$0xf]  ;;  %v7778_v7 = vrot.slane %v7776_v47, 4  ;;  %v17418_v15 = vrot.slane %v7785_v45, 5 }
 0x47b   : >> { %13390 = vmatprep.mubr.msk.bf16.mxu1 %vm3529_vm1, %v12033_v14  ;;  %v17411_v5 = vsel %vm16139_vm6, %v12049_v27, %v6550_v28  ;;  %v6552_v6 = vrot.slane %v6550_v28, 4  ;;  %v7781_v14 = vrot.slane %v7779_v57, 5  ;;  %v7791_v2 = vrot.slane %v7789_v8, 4 }
 0x47c   : >> { %v6555_v52 = vrot.slane %v6553_v42, 4  ;;  %v12036_v19 = vcombine.low %v17162_v29, %v17178_v10  ;;  %v12052_v53 = vcombine.low %v6512_v36, %v6515_v41  ;;  %v7795_v16 = vshll.u32 %v17407_v20, 16 }
 0x47d   : >> { %v17423_v21 = vsel %vm16139_vm6, %v6552_v6, %v6553_v42  ;;  %v7799_v63 = vshrl.u32 %v17407_v20, 16  ;;  %v6556_v47 = vrot.slane %v17178_v10, 5  ;;  %v6559_v11 = vrot.slane %v17199_v40, 5  ;;  %v17449_v10 = vld [vmem:[%s16971_s14 + $0x44] sm:$0xf] }
 0x47e   : >> { %v7782_v29 = vor.u32 %v7781_v14, %v7778_v7  ;;  %v7792_v27 = vor.u32 %v7791_v2, %v17418_v15  ;;  %v7820_v57 = vshrl.u32 %v12214_v56, 16  ;;  %v7823_v45 = vshll.u32 %v12214_v56, 16  ;;  %v17461_v14 = vld [vmem:[%s16971_s14 + $0x48] sm:$0xf] }
 0x47f   : >> { %v17445_v28 = vsel %vm16139_vm6, %v6555_v52, %v6556_v47  ;;  %v6558_v42 = vrot.slane %v6556_v47, 4  ;;  %v7797_v36 = vrot.slane %v7795_v16, 5  ;;  %v7801_v41 = vrot.slane %v7799_v63, 4  ;;  %v14372_v47 = vld [vmem:[%s16971_s14 + $0x58] sm:$0xff]  }
 0x480   : >> { %v7783_v2 = vrot.slane %v7782_v29, 4  ;;  %v7793_v56 = vrot.slane %v7792_v27, 4  ;;  %v7822_v16 = vrot.slane %v7820_v57, 4  ;;  %v7849_v29 = vshll.u32 %v17461_v14, 16 }
 0x481   : >> { %13473 = vmatmul.mubr.msk.bf16.vlgmr.msra.gmra.mrb[0].mxu0 %vm3529_vm1, %v14365_v48  ;;  %v17433_v48 = vld [vmem:[%s16971_s14 + $0x40] sm:$0xf]  ;;  %v17458_v7 = vsel %vm16139_vm6, %v6558_v42, %v6559_v11  ;;  %v7853_v27 = vshrl.u32 %v17461_v14, 16  ;;  %v7802_v57 = vor.u32 %v7801_v41, %v7797_v36 }
 0x482   : >> { %13391 = vmatmul.mubr.msk.bf16.gmra.mrb[8].mxu1 %vm3529_vm1, %v12034_v33  ;;  %13489 = vmatpush3.bf16.msra.mxu0 %v17194_v25  ;;  %v17416_v25 = vld [vmem:[%s16971_s14 + $0x34] sm:$0xf]  ;;  %v7829_v8 = vshll.u32 %v17433_v48, 16  ;;  %v7833_v40 = vshrl.u32 %v17433_v48, 16  ;;  %v7788_v42 = vsel %vm15631_vm9, %v7783_v2, %v17418_v15  ;;  %v17490_v2 = vrot.slane %v7849_v29, 5 }
 0x483   : >> { %13394 = vmatprep.mubr.msk.bf16.mxu1 %vm3529_vm1, %v12035_v34  ;;  %13476 = vmatprep.mubr.msk.bf16.mxu0 %vm3529_vm1, %v14367_v62  ;;  %v14371_v34 = vld [vmem:[%s16971_s14 + $0x50] sm:$0xff]   ;;  %v7805_v31 = vshll.u32 %v17416_v25, 16  ;;  %v7809_v62 = vshrl.u32 %v17416_v25, 16  ;;  %v7855_v41 = vrot.slane %v7853_v27, 4  ;;  %v7803_v12 = vrot.slane %v7802_v57, 4 }
 0x484   : >> { %13506 = vmatprep.subr.bf16.mxu0 %v17388_v37  ;;  %v17469_v63 = vrot.slane %v7829_v8, 5  ;;  %v7835_v11 = vrot.slane %v7833_v40, 4  ;;  %v12219_v8 = vld [vmem:[%s16971_s14 + $0x50] sm:$0xf]  ;;  %v7798_v40 = vsel %vm15631_vm9, %v7793_v56, %v7797_v36  ;;  %v17498_v36 = vld [vmem:[%s16971_s14 + $0x4c] sm:$0x1] }
 0x485   : >> { %v17454_v6 = vrot.slane %v7805_v31, 5  ;;  %v7811_v52 = vrot.slane %v7809_v62, 4  ;;  %v7839_v31 = vshll.u32 %v17449_v10, 16  ;;  %v14373_v62 = vld [vmem:[%s16971_s14 + $0x64] sm:$0xff]   ;;  %v7864_v56 = vshrl.u32 %v12219_v8, 16 }
 0x486   : >> { %v7836_v43 = vor.u32 %v7835_v11, %v17469_v63  ;;  %v7856_v49 = vor.u32 %v7855_v41, %v17490_v2  ;;  %v7859_v50 = vshll.u32 %v17498_v36, 16  ;;  %v17533_v41 = vld [vmem:[%s16971_s14 + $0x68] sm:$0xf] }
 0x487   : >> { %v7841_v61 = vrot.slane %v7839_v31, 5  ;;  %v7866_v27 = vrot.slane %v7864_v56, 4  ;;  %v7808_v57 = vsel %vm15631_vm9, %v7803_v12, %v17454_v6  ;;  %v7917_v23 = vshll.u32 %v17533_v41, 16 }
 0x488   : >> { %v7857_v12 = vrot.slane %v7856_v49, 4  ;;  %v7921_v22 = vshrl.u32 %v17533_v41, 16 }
 0x489   : >> { %13477 = vmatmul.mubr.msk.bf16.gmra.mrb[4].mxu0 %vm3529_vm1, %v14369_v3  ;;  %v17467_v3 = vld [vmem:[%s16971_s14 + $0x38] sm:$0x1] }
 0x48a   : >> { %13395 = vmatmul.mubr.msk.bf16.gmra.mrb[12].mxu1 %vm3529_vm1, %v12036_v19  ;;  %13480 = vmatprep.mubr.msk.bf16.mxu0 %vm3529_vm1, %v14371_v34  ;;  %v7825_v34 = vrot.slane %v7823_v45, 5  ;;  %v7815_v45 = vshll.u32 %v17467_v3, 16  ;;  %v7812_v19 = vor.u32 %v7811_v52, %v17454_v6  ;;  %v7867_v52 = vshll.u32 %v12219_v8, 16 }
 0x48b   : >> { %13400 = vmatprep.mubr.msk.bf16.mxu1 %vm3529_vm1, %v12052_v53  ;;  %v7843_v53 = vshrl.u32 %v17449_v10, 16 }
 0x48c   : >> { %v7826_v33 = vor.u32 %v7825_v34, %v7822_v16  ;;  %v7873_v16 = vshll.u32 %v17483_v60, 16  ;;  %v7877_v34 = vshrl.u32 %v17483_v60, 16  ;;  %v7813_v31 = vrot.slane %v7812_v19, 4  ;;  %v17520_v19 = vld [vmem:[%s16971_s14 + $0x5c] sm:$0xf] }
 0x48d   : >> { %v7845_v15 = vrot.slane %v7843_v53, 4  ;;  %v17511_v53 = vld [vmem:[%s18720_s3 + $0x20] sm:$0xff]  }
 0x48e   : >> { %v7827_v11 = vrot.slane %v7826_v33, 4  ;;  %v7869_v33 = vrot.slane %v7867_v52, 5 }
 0x48f   : >> { %v7846_v29 = vor.u32 %v7845_v15, %v7841_v61  ;;  %v7897_v15 = vshrl.u32 %v17520_v19, 16 }
 0x490   : >> { %v7832_v6 = vsel %vm15631_vm9, %v7827_v11, %v17469_v63  ;;  %v18752_v63 = vcombine.low %v17350_v59, %v17357_v26 }
 0x491   : >> { %13481 = vmatmul.mubr.msk.bf16.gmra.mrb[8].mxu0 %vm3529_vm1, %v14372_v47  ;;  %v7817_v47 = vrot.slane %v7815_v45, 5 }
 0x492   : >> { %13401 = vmatmul.mubr.msk.bf16.vlgmr.msra.gmra.mrb[0].mxu1 %vm3529_vm1, %v12053_v30  ;;  %13484 = vmatprep.mubr.msk.bf16.mxu0 %vm3529_vm1, %v14373_v62  ;;  %v12231_v30 = vcombine.low %v7788_v42, %v7798_v40  ;;  %v17522_v62 = vrot.slane %v7873_v16, 5  ;;  %v7879_v42 = vrot.slane %v7877_v34, 4  ;;  %v7893_v40 = vshll.u32 %v17520_v19, 16 }
 0x493   : >> { %13417 = vmatpush3.bf16.msra.mxu1 %v17295_v1  ;;  %13404 = vmatprep.mubr.msk.bf16.mxu1 %vm3529_vm1, %v12054_v4  ;;  %v7837_v1 = vrot.slane %v7836_v43, 4  ;;  %v17517_v4 = vld [vmem:[%s16971_s14 + $0x58] sm:$0xf]  ;;  %v12224_v43 = vld [vmem:[%s16971_s14 + $0x64] sm:$0xf]  ;;  %v7818_v56 = vsel %vm15631_vm9, %v7813_v31, %v7817_v47  ;;  %v7861_v16 = vrot.slane %v7859_v50, 5 }
 0x494   : >> { %13964 = vmatprep.subr.bf16.mxu1 %v17511_v53  ;;  %v7883_v45 = vshll.u32 %v17517_v4, 16  ;;  %v7887_v8 = vshrl.u32 %v17517_v4, 16  ;;  %v7847_v34 = vrot.slane %v7846_v29, 4  ;;  %v7880_v31 = vor.u32 %v7879_v42, %v17522_v62  ;;  %v17558_v50 = vld [vmem:[%s16971_s14 + $0x60] sm:$0x1] }
 0x495   : >> { %v7842_v52 = vsel %vm15631_vm9, %v7837_v1, %v7841_v61  ;;  %v7908_v61 = vshrl.u32 %v12224_v43, 16  ;;  %v7911_v47 = vshll.u32 %v12224_v43, 16  ;;  %v17555_v11 = vrot.slane %v7893_v40, 5  ;;  %v17569_v43 = vld [vmem:[%s16971_s14 + $0x70] sm:$0xf] }
 0x496   : >> { %v7899_v1 = vrot.slane %v7897_v15, 4  ;;  %v12232_v29 = vcombine.low %v7808_v57, %v7818_v56  ;;  %v12233_v49 = vcombine.low %v7832_v6, %v7842_v52  ;;  %v7852_v59 = vsel %vm15631_vm9, %v7847_v34, %v17490_v2 }
 0x497   : >> { %v7862_v26 = vsel %vm15631_vm9, %v7857_v12, %v7861_v16  ;;  %v7881_v42 = vrot.slane %v7880_v31, 4  ;;  %v7919_v40 = vrot.slane %v7917_v23, 5  ;;  %v7923_v57 = vrot.slane %v7921_v22, 4 }
 0x498   : >> { %v7900_v56 = vor.u32 %v7899_v1, %v17555_v11  ;;  %v7903_v6 = vshll.u32 %v17558_v50, 16  ;;  %v7937_v16 = vshll.u32 %v17569_v43, 16  ;;  %v7941_v34 = vshrl.u32 %v17569_v43, 16 }
 0x499   : >> { %13485 = vmatmul.mubr.msk.bf16.gmra.mrb[12].mxu0 %vm3529_vm1, %v14374_v24  ;;  %v7870_v24 = vor.u32 %v7869_v33, %v7866_v27  ;;  %v17561_v27 = vld [vmem:[%s16971_s14 + $0x6c] sm:$0xf]  ;;  %v18753_v12 = vcombine.low %v17379_v35, %v17392_v39 }
 0x49a   : >> { %13405 = vmatmul.mubr.msk.bf16.gmra.mrb[4].mxu1 %vm3529_vm1, %v12055_v17  ;;  %13490 = vmatprep.mubr.msk.bf16.mxu0 %vm3529_vm1, %v12231_v30  ;;  %v7885_v17 = vrot.slane %v7883_v45, 5  ;;  %v7889_v30 = vrot.slane %v7887_v8, 4  ;;  %v7910_v45 = vrot.slane %v7908_v61, 4  ;;  %v7913_v8 = vrot.slane %v7911_v47, 5 }
 0x49b   : >> { %13408 = vmatprep.mubr.msk.bf16.mxu1 %vm3529_vm1, %v18752_v63  ;;  %v7871_v33 = vrot.slane %v7870_v24, 4  ;;  %v7927_v52 = vshll.u32 %v17561_v27, 16  ;;  %v7931_v2 = vshrl.u32 %v17561_v27, 16  ;;  %v12234_v24 = vcombine.low %v7852_v59, %v7862_v26  ;;  %v14376_v59 = vld [vmem:[%s16971_s14 + $0x14] sm:$0xff]  }
 0x49c   : >> { %v7890_v15 = vor.u32 %v7889_v30, %v7885_v17  ;;  %v18754_v63 = vcombine.low %v17411_v5, %v17423_v21  ;;  %v7886_v35 = vsel %vm15631_vm9, %v7881_v42, %v7885_v17  ;;  %v7914_v39 = vor.u32 %v7913_v8, %v7910_v45  ;;  %v17594_v30 = vld [vmem:[%s16971_s14 + $0x74] sm:$0x1] }
 0x49d   : >> { %v7876_v31 = vsel %vm15631_vm9, %v7871_v33, %v17522_v62  ;;  %v7924_v61 = vor.u32 %v7923_v57, %v7919_v40  ;;  %v7905_v23 = vrot.slane %v7903_v6, 5  ;;  %v7929_v22 = vrot.slane %v7927_v52, 5 }
 0x49e   : >> { %v7891_v47 = vrot.slane %v7890_v15, 4  ;;  %v7933_v62 = vrot.slane %v7931_v2, 4  ;;  %v7939_v1 = vrot.slane %v7937_v16, 5  ;;  %v7943_v5 = vrot.slane %v7941_v34, 4 }
 0x49f   : >> { %v7065_v21 = vshll.u32 %v17221_v18, 16  ;;  %v7915_v26 = vrot.slane %v7914_v39, 4  ;;  %v7925_v17 = vrot.slane %v7924_v61, 4  ;;  %v7947_v45 = vshll.u32 %v17594_v30, 16 }
 0x4a0   : >> { %v7896_v42 = vsel %vm15631_vm9, %v7891_v47, %v17555_v11  ;;  %v7934_v15 = vor.u32 %v7933_v62, %v7929_v22  ;;  %v8147_v6 = vrot.slane %v17368_v55, 5  ;;  %v18755_v52 = vcombine.low %v17445_v28, %v17458_v7  ;;  %v12116_v47 = vld [vmem:[%s16971_s14 + $0x3c] sm:$0xf] }
 0x4a1   : >> { %13491 = vmatmul.mubr.msk.bf16.vlgmr.msra.gmra.mrb[0].mxu0 %vm3529_vm1, %v12232_v29  ;;  %v12235_v29 = vcombine.low %v7876_v31, %v7886_v35  ;;  %v17599_v33 = vrot.slane %v7065_v21, 5  ;;  %v7920_v2 = vsel %vm15631_vm9, %v7915_v26, %v7919_v40  ;;  %v7930_v16 = vsel %vm15631_vm9, %v7925_v17, %v7929_v22  ;;  %v14377_v35 = vld [vmem:[%s16971_s14 + $0x1c] sm:$0xff]   ;;  %v14378_v40 = vld [vmem:[%s16971_s14 + $0x28] sm:$0xff]  }
 0x4a2   : >> { %13409 = vmatmul.mubr.msk.bf16.gmra.mrb[8].mxu1 %vm3529_vm1, %v18753_v12  ;;  %13507 = vmatpush3.bf16.msra.mxu0 %v17388_v37  ;;  %v7901_v37 = vrot.slane %v7900_v56, 4  ;;  %v7944_v56 = vor.u32 %v7943_v5, %v7939_v1  ;;  %v7949_v34 = vrot.slane %v7947_v45, 5  ;;  %v7935_v7 = vrot.slane %v7934_v15, 4  ;;  %v12249_v21 = vld [vmem:[%s16971_s14 + $0x3c] sm:$0xe] }
 0x4a3   : >> { %13412 = vmatprep.mubr.msk.bf16.mxu1 %vm3529_vm1, %v18754_v63  ;;  %13494 = vmatprep.mubr.msk.bf16.mxu0 %vm3529_vm1, %v12233_v49  ;;  %v7069_v49 = vshrl.u32 %v17221_v18, 16  ;;  %v12248_v18 = vld [vmem:[%s16971_s14 + $0x28] sm:$0xe]  ;;  %v8149_v31 = vrot.slane %v8147_v6, 4  ;;  %v8150_v63 = vrot.slane %v17407_v20, 5  ;;  %v12237_v39 = vcombine.low %v7920_v2, %v7930_v16 }
 0x4a4   : >> { %v7906_v57 = vsel %vm15631_vm9, %v7901_v37, %v7905_v23  ;;  %v12252_v12 = vrot.slane %v12248_v18, 9  ;;  %v18756_v37 = vsel %vm15631_vm9, %v17273_v51, %v17259_v54  ;;  %v8153_v20 = vrot.slane %v17416_v25, 5  ;;  %v14380_v18 = vld [vmem:[%s16971_s14 + $0x3c] sm:$0xff]  }
 0x4a5   : >> { %v7071_v8 = vrot.slane %v7069_v49, 4  ;;  %v12236_v55 = vcombine.low %v7896_v42, %v7906_v57  ;;  %v7940_v62 = vsel %vm15631_vm9, %v7935_v7, %v7939_v1  ;;  %v8151_v5 = vsel %vm16139_vm6, %v8149_v31, %v8150_v63  ;;  %v14379_v57 = vld [vmem:[%s16971_s14 + $0x30] sm:$0xff]  }
 0x4a6   : >> { %v8148_v22 = vsel %vm16139_vm6, %v12252_v12, %v8147_v6  ;;  %v8160_v54 = vrot.slane %v17433_v48, 5  ;;  %v7046_v51 = vshrl.u32 %v12116_v47, 16  ;;  %v7049_v25 = vshll.u32 %v12116_v47, 16  ;;  %v14381_v47 = vld [vmem:[%s16971_s14 + $0x44] sm:$0xff]  }
 0x4a7   : >> { %v7072_v11 = vor.u32 %v7071_v8, %v17599_v33  ;;  %v7059_v1 = vshrl.u32 %v17206_v9, 16  ;;  %v8152_v49 = vrot.slane %v8150_v63, 4  ;;  %v8156_v48 = vrot.slane %v17467_v3, 5 }
 0x4a8   : >> { %v12253_v26 = vrot.slane %v12249_v21, 9  ;;  %v12258_v42 = vcombine.low %v8148_v22, %v8151_v5  ;;  %v8162_v45 = vrot.slane %v8160_v54, 4  ;;  %v8163_v8 = vrot.slane %v17449_v10, 5 }
 0x4a9   : >> { %13495 = vmatmul.mubr.msk.bf16.gmra.mrb[4].mxu0 %vm3529_vm1, %v12234_v24  ;;  %v7073_v28 = vrot.slane %v7072_v11, 4  ;;  %v7945_v24 = vrot.slane %v7944_v56, 4  ;;  %v7048_v15 = vrot.slane %v7046_v51, 4  ;;  %v8154_v6 = vsel %vm16139_vm6, %v8152_v49, %v8153_v20  ;;  %v12121_v11 = vld [vmem:[%s16971_s14 + $0x50] sm:$0xf] }
 0x4aa   : >> { %13413 = vmatmul.mubr.msk.bf16.gmra.mrb[12].mxu1 %vm3529_vm1, %v18755_v52  ;;  %13498 = vmatprep.mubr.msk.bf16.mxu0 %vm3529_vm1, %v12235_v29  ;;  %v7055_v29 = vshll.u32 %v17206_v9, 16  ;;  %v7051_v9 = vrot.slane %v7049_v25, 5  ;;  %v8161_v52 = vsel %vm16139_vm6, %v12253_v26, %v8160_v54  ;;  %v8166_v10 = vrot.slane %v17461_v14, 5 }
 0x4ab   : >> { %13418 = vmatprep.mubr.msk.bf16.mxu1 %vm3529_vm1, %v14376_v59  ;;  %v7078_v61 = vsel %vm15631_vm9, %v7073_v28, %v17244_v32  ;;  %v7950_v32 = vsel %vm15631_vm9, %v7945_v24, %v7949_v34  ;;  %v8155_v59 = vrot.slane %v8153_v20, 4  ;;  %v8164_v2 = vsel %vm16139_vm6, %v8162_v45, %v8163_v8  ;;  %v12250_v34 = vld [vmem:[%s16971_s14 + $0x50] sm:$0xe] }
 0x4ac   : >> { %v17633_v23 = vcombine.low %v7078_v61, %v18756_v37  ;;  %v12238_v17 = vcombine.low %v7940_v62, %v7950_v32  ;;  %v17656_v56 = vrot.slane %v7055_v29, 5  ;;  %v7052_v16 = vor.u32 %v7051_v9, %v7048_v15  ;;  %v14382_v62 = vld [vmem:[%s16971_s14 + $0x50] sm:$0xff]  }
 0x4ad   : >> { %v8157_v3 = vsel %vm16139_vm6, %v8155_v59, %v8156_v48  ;;  %v8173_v12 = vrot.slane %v17483_v60, 5  ;;  %v8165_v14 = vrot.slane %v8163_v8, 4  ;;  %v7090_v7 = vshrl.u32 %v12121_v11, 16 }
 0x4ae   : >> { %v12259_v28 = vcombine.low %v8154_v6, %v8157_v3  ;;  %v7093_v24 = vshll.u32 %v12121_v11, 16  ;;  %v7099_v31 = vshll.u32 %v17247_v46, 16  ;;  %v7103_v63 = vshrl.u32 %v17247_v46, 16 }
 0x4af   : >> { %v8169_v61 = vrot.slane %v17498_v36, 5  ;;  %v7053_v37 = vrot.slane %v7052_v16, 4  ;;  %v8175_v60 = vrot.slane %v8173_v12, 4  ;;  %v8176_v20 = vrot.slane %v17517_v4, 5 }
 0x4b0   : >> { %v7092_v32 = vrot.slane %v7090_v7, 4  ;;  %v7095_v5 = vrot.slane %v7093_v24, 5  ;;  %v7101_v21 = vrot.slane %v7099_v31, 5  ;;  %v7105_v54 = vrot.slane %v7103_v63, 4 }
 0x4b1   : >> { %13499 = vmatmul.mubr.msk.bf16.gmra.mrb[8].mxu0 %vm3529_vm1, %v12236_v55  ;;  %v8167_v46 = vsel %vm16139_vm6, %v8165_v14, %v8166_v10  ;;  %v8179_v25 = vrot.slane %v17520_v19, 5  ;;  %v7058_v4 = vsel %vm15631_vm9, %v7053_v37, %v17656_v56  ;;  %v7109_v49 = vshll.u32 %v17250_v13, 16  ;;  %v12251_v19 = vld [vmem:[%s16971_s14 + $0x64] sm:$0xe] }
 0x4b2   : >> { %13419 = vmatmul.mubr.msk.bf16.vlgmr.msra.gmra.mrb[0].mxu1 %vm3529_vm1, %v14377_v35  ;;  %13502 = vmatprep.mubr.msk.bf16.mxu0 %vm3529_vm1, %v12237_v39  ;;  %v12260_v35 = vcombine.low %v8161_v52, %v8164_v2  ;;  %v8168_v39 = vrot.slane %v8166_v10, 4  ;;  %v8186_v59 = vrot.slane %v17533_v41, 5  ;;  %v7113_v48 = vshrl.u32 %v17250_v13, 16 }
 0x4b3   : >> { %13965 = vmatpush3.bf16.msra.mxu1 %v17511_v53  ;;  %13422 = vmatprep.mubr.msk.bf16.mxu1 %vm3529_vm1, %v14378_v40  ;;  %v7061_v53 = vrot.slane %v7059_v1, 4  ;;  %v12254_v40 = vrot.slane %v12250_v34, 9  ;;  %v8177_v1 = vsel %vm16139_vm6, %v8175_v60, %v8176_v20  ;;  %v7119_v26 = vshll.u32 %v17253_v0, 16 }
 0x4b4   : >> { %v8170_v36 = vsel %vm16139_vm6, %v8168_v39, %v8169_v61  ;;  %v7096_v45 = vor.u32 %v7095_v5, %v7092_v32  ;;  %v8181_v15 = vrot.slane %v8179_v25, 4  ;;  %v8182_v9 = vrot.slane %v17558_v50, 5 }
 0x4b5   : >> { %v7062_v55 = vor.u32 %v7061_v53, %v17656_v56  ;;  %v8174_v51 = vsel %vm16139_vm6, %v12254_v40, %v8173_v12  ;;  %v14383_v56 = vld [vmem:[%s16971_s14 + $0x58] sm:$0xff]   ;;  %v12255_v6 = vrot.slane %v12251_v19, 9  ;;  %v8189_v41 = vrot.slane %v17561_v27, 5 }
 0x4b6   : >> { %v12262_v8 = vcombine.low %v8174_v51, %v8177_v1  ;;  %v8188_v3 = vrot.slane %v8186_v59, 4  ;;  %v7115_v13 = vrot.slane %v7113_v48, 4  ;;  %v7121_v52 = vrot.slane %v7119_v26, 5 }
 0x4b7   : >> { %v7063_v22 = vrot.slane %v7062_v55, 4  ;;  %v7097_v11 = vrot.slane %v7096_v45, 4  ;;  %v8183_v2 = vsel %vm16139_vm6, %v8181_v15, %v8182_v9  ;;  %v8187_v27 = vsel %vm16139_vm6, %v12255_v6, %v8186_v59 }
 0x4b8   : >> { %v8192_v16 = vrot.slane %v17569_v43, 5  ;;  %v8190_v55 = vsel %vm16139_vm6, %v8188_v3, %v8189_v41  ;;  %v8191_v63 = vrot.slane %v8189_v41, 4  ;;  %v8195_v43 = vrot.slane %v17594_v30, 5 }
 0x4b9   : >> { %13503 = vmatmul.mubr.msk.bf16.gmra.mrb[12].mxu0 %vm3529_vm1, %v12238_v17  ;;  %v7068_v29 = vsel %vm15631_vm9, %v7063_v22, %v17599_v33  ;;  %v7123_v17 = vshrl.u32 %v17253_v0, 16  ;;  %v7106_v33 = vor.u32 %v7105_v54, %v7101_v21  ;;  %v7102_v14 = vsel %vm15631_vm9, %v7097_v11, %v7101_v21 }
 0x4ba   : >> { %13423 = vmatmul.mubr.msk.bf16.gmra.mrb[4].mxu1 %vm3529_vm1, %v14379_v57  ;;  %13508 = vmatprep.mubr.msk.bf16.mxu0 %vm3529_vm1, %v12258_v42  ;;  %v12261_v42 = vcombine.low %v8167_v46, %v8170_v36  ;;  %v8178_v57 = vrot.slane %v8176_v20, 4  ;;  %v12132_v53 = vcombine.low %v7058_v4, %v7068_v29  ;;  %v12264_v31 = vcombine.low %v8187_v27, %v8190_v55 }
 0x4bb   : >> { %13426 = vmatprep.mubr.msk.bf16.mxu1 %vm3529_vm1, %v14380_v18  ;;  %v7111_v18 = vrot.slane %v7109_v49, 5  ;;  %v7125_v10 = vrot.slane %v7123_v17, 4  ;;  %v7107_v0 = vrot.slane %v7106_v33, 4 }
 0x4bc   : >> { %v8180_v50 = vsel %vm16139_vm6, %v8178_v57, %v8179_v25 }
 0x4bd   : >> { %v7116_v34 = vor.u32 %v7115_v13, %v7111_v18  ;;  %v7126_v12 = vor.u32 %v7125_v10, %v7121_v52  ;;  %v7112_v7 = vsel %vm15631_vm9, %v7107_v0, %v7111_v18  ;;  %v12263_v24 = vcombine.low %v8180_v50, %v8183_v2 }
 0x4be   : >> { %v12134_v39 = vcombine.low %v7102_v14, %v7112_v7 }
 0x4bf   : >> { %v7117_v61 = vrot.slane %v7116_v34, 4  ;;  %v7127_v40 = vrot.slane %v7126_v12, 4  ;;  %v12293_v34 = vld [vmem:[%s17754_s8 + $0x14] sm:$0xf] }
 0x4c1   : >> { %13509 = vmatmul.mubr.msk.bf16.vlgmr.msra.gmra.mrb[0].mxu0 %vm3529_vm1, %v12259_v28  ;;  %v7129_v28 = vshll.u32 %v17264_v38, 16  ;;  %v8193_v38 = vsel %vm16139_vm6, %v8191_v63, %v8192_v16  ;;  %v7122_v30 = vsel %vm15631_vm9, %v7117_v61, %v7121_v52  ;;  %v12298_v63 = vld [vmem:[%s17754_s8 + $0x24] sm:$0x1] }
 0x4c2   : >> { %13427 = vmatmul.mubr.msk.bf16.gmra.mrb[8].mxu1 %vm3529_vm1, %v14381_v47  ;;  %13512 = vmatprep.mubr.msk.bf16.mxu0 %vm3529_vm1, %v12260_v35  ;;  %v8194_v35 = vrot.slane %v8192_v16, 4 }
 0x4c3   : >> { %13430 = vmatprep.mubr.msk.bf16.mxu1 %vm3529_vm1, %v14382_v62  ;;  %v7131_v47 = vrot.slane %v7129_v28, 5 }
 0x4c4   : >> { %v8196_v37 = vsel %vm16139_vm6, %v8194_v35, %v8195_v43 }
 0x4c5   : >> { %v7132_v22 = vsel %vm15631_vm9, %v7127_v40, %v7131_v47  ;;  %v12265_v60 = vcombine.low %v8193_v38, %v8196_v37 }
 0x4c6   : >> { %v12135_v20 = vcombine.low %v7122_v30, %v7132_v22 }
 0x4c9   : >> { %13513 = vmatmul.mubr.msk.bf16.gmra.mrb[4].mxu0 %vm3529_vm1, %v12261_v42 }
 0x4ca   : >> { %13431 = vmatmul.mubr.msk.bf16.gmra.mrb[12].mxu1 %vm3529_vm1, %v14383_v56  ;;  %13516 = vmatprep.mubr.msk.bf16.mxu0 %vm3529_vm1, %v12262_v8 }
 0x4cb   : >> { %13444 = vmatprep.mubr.msk.bf16.mxu1 %vm3529_vm1, %v12132_v53 }
 0x4d1   : >> { %13517 = vmatmul.mubr.msk.bf16.gmra.mrb[8].mxu0 %vm3529_vm1, %v12263_v24 }
 0x4d2   : >> { %13445 = vmatmul.mubr.msk.bf16.vlgmr.msra.gmra.mrb[8].mxu1 %vm3529_vm1, %v17633_v23  ;;  %13520 = vmatprep.mubr.msk.bf16.mxu0 %vm3529_vm1, %v12264_v31 }
 0x4d3   : >> { %13448 = vmatprep.mubr.msk.bf16.mxu1 %vm3529_vm1, %v12134_v39 }
 0x4d9   : >> { %13521 = vmatmul.mubr.msk.bf16.gmra.mrb[12].mxu0 %vm3529_vm1, %v12265_v60 }
 0x4da   : >> { %13449 = vmatmul.mubr.msk.bf16.gmra.mrb[12].mxu1 %vm3529_vm1, %v12135_v20 }
 0x585   : >> { %v13420_v23 = vpop.f32.mrb[0].mxu1 }
 0x586   : >> { %v6858_v62 = vpop.f32.mrb[1].mxu1 }
 0x587   : >> { %v13421_v32 = vpop.f32.mrb[2].mxu1 }
 0x588   : >> { %v6861_v5 = vpop.f32.mrb[3].mxu1 }
 0x58d   : >> { %v13424_v21 = vpop.f32.mrb[4].mxu1 }
 0x58e   : >> { %v6874_v54 = vpop.f32.mrb[5].mxu1 }
 0x58f   : >> { %v13425_v46 = vpop.f32.mrb[6].mxu1 }
 0x590   : >> { %v17744_v36 = vpop.f32.mrb[7].mxu1 }
 0x594   : >> { %v13510_v51 = vpop.f32.mrb[0].mxu0 }
 0x595   : >> { %v13966_v25 = vadd.f32 %v13510_v51, %v13420_v23  ;;  %v8288_v4 = vpop.f32.mrb[1].mxu0 }
 0x596   : >> { %v13967_v29 = vadd.f32 %v8288_v4, %v6858_v62  ;;  %v13511_v1 = vpop.f32.mrb[2].mxu0 }
 0x597   : >> { %v8369_v49 = vmax.f32 %v13966_v25, 0.0  ;;  %v13968_v19 = vadd.f32 %v13511_v1, %v13421_v32  ;;  %v8291_v59 = vpop.f32.mrb[3].mxu0 }
 0x598   : >> { %v8367_v48 = vmax.f32 %v13967_v29, 0.0  ;;  %v13969_v26 = vadd.f32 %v8291_v59, %v6861_v5 }
 0x599   : >> { %v12672_v17 = vpack.c.bf16 %v8369_v49, %v8369_v49  ;;  %v8370_v42 = vmax.f32 %v13968_v19, 0.0 }
 0x59a   : >> { %v12670_v45 = vpack.c.bf16 %v8367_v48, %v8367_v48  ;;  %v8368_v33 = vmax.f32 %v13969_v26, 0.0 }
 0x59b   : >> { %v8452_v8 = vshrl.u32 %v12672_v17, 16  ;;  %v12673_v57 = vpack.c.bf16 %v8370_v42, %v8370_v42  ;;  %v8455_v15 = vshll.u32 %v12672_v17, 16 }
 0x59c   : >> { %v8435_v9 = vshrl.u32 %v12670_v45, 16  ;;  %v8438_v56 = vshll.u32 %v12670_v45, 16  ;;  %v12671_v53 = vpack.c.bf16 %v8368_v33, %v8368_v33  ;;  %v13514_v18 = vpop.f32.mrb[4].mxu0  ;;  %v12300_v45 = vld [vmem:[%s17754_s8 + $0x28] sm:$0xf] }
 0x59d   : >> { %v8454_v6 = vrot.slane %v8452_v8, 7  ;;  %v8461_v41 = vshrl.u32 %v12673_v57, 16  ;;  %v8464_v3 = vshll.u32 %v12673_v57, 16  ;;  %v13970_v13 = vadd.f32 %v13514_v18, %v13424_v21  ;;  %v8304_v52 = vpop.f32.mrb[5].mxu0 }
 0x59e   : >> { %v8437_v10 = vrot.slane %v8435_v9, 7  ;;  %v8443_v11 = vshrl.u32 %v12671_v53, 16  ;;  %v8446_v0 = vshll.u32 %v12671_v53, 16  ;;  %v13971_v50 = vadd.f32 %v8304_v52, %v6874_v54  ;;  %v13515_v2 = vpop.f32.mrb[6].mxu0 }
 0x59f   : >> { %v8457_v27 = vor.u32 %v8455_v15, %v8454_v6  ;;  %v8459_v16 = vrot.slane %v8454_v6, 4  ;;  %v8463_v12 = vrot.slane %v8461_v41, 7  ;;  %v8373_v28 = vmax.f32 %v13970_v13, 0.0  ;;  %v8307_v14 = vpop.f32.mrb[7].mxu0 }
 0x5a0   : >> { %v8440_v7 = vor.u32 %v8438_v56, %v8437_v10  ;;  %v8441_v24 = vrot.slane %v8437_v10, 4  ;;  %v8445_v35 = vrot.slane %v8443_v11, 7  ;;  %v8371_v43 = vmax.f32 %v13971_v50, 0.0 }
 0x5a1   : >> { %v8466_v39 = vor.u32 %v8464_v3, %v8463_v12  ;;  %v8468_v61 = vrot.slane %v8463_v12, 4  ;;  %v12676_v40 = vpack.c.bf16 %v8373_v28, %v8373_v28  ;;  %v13972_v47 = vadd.f32 %v13515_v2, %v13425_v46 }
 0x5a2   : >> { %v8600_v38 = vsel %vm17748_vm0, %v8440_v7, %v12293_v34  ;;  %v8448_v37 = vor.u32 %v8446_v0, %v8445_v35  ;;  %v8450_v30 = vrot.slane %v8445_v35, 4  ;;  %v12674_v22 = vpack.c.bf16 %v8371_v43, %v8371_v43  ;;  %v12305_v34 = vld [vmem:[%s17754_s8 + $0x38] sm:$0x1] }
 0x5a3   : >> { %12294 = vst [vmem:[%s17754_s8 + $0x14] sm:$0xf] %v8600_v38  ;;  %v8467_v20 = vsel %vm15953_vm14, %v8459_v16, %v8466_v39  ;;  %v8608_v23 = vsel %vm17759_vm7, %v8468_v61, %v12298_v63  ;;  %v8487_v62 = vshrl.u32 %v12676_v40, 16  ;;  %v8490_v51 = vshll.u32 %v12676_v40, 16 }
 0x5a4   : >> { %12297 = vst.msk [vmem:[%s17754_s8 + $0x20] sm:$0xf] %vm568_vm2, %v8467_v20  ;;  %12299 = vst [vmem:[%s17754_s8 + $0x24] sm:$0x1] %v8608_v23  ;;  %v8449_v32 = vsel %vm15953_vm14, %v8441_v24, %v8448_v37  ;;  %v8458_v5 = vsel %vm15953_vm14, %v8450_v30, %v8457_v27  ;;  %v8470_v21 = vshrl.u32 %v12674_v22, 16  ;;  %v13518_v54 = vpop.f32.mrb[8].mxu0  ;;  %v13973_v4 = vadd.f32 %v8307_v14, %v17744_v36 }
 0x5a5   : >> { %12295 = vst.msk [vmem:[%s17754_s8 + $0x18] sm:$0xf] %vm568_vm2, %v8449_v32  ;;  %12296 = vst.msk [vmem:[%s17754_s8 + $0x1c] sm:$0xf] %vm568_vm2, %v8458_v5  ;;  %v8489_v46 = vrot.slane %v8487_v62, 7  ;;  %v8374_v25 = vmax.f32 %v13972_v47, 0.0 }
 0x5a6   : >> { %v13446_v29 = vpop.f32.mrb[8].mxu1  ;;  %v8320_v1 = vpop.f32.mrb[9].mxu0  ;;  %v17783_v49 = vrot.slane %v8470_v21, 7  ;;  %v8473_v19 = vshll.u32 %v12674_v22, 16  ;;  %v8372_v8 = vmax.f32 %v13973_v4, 0.0 }
 0x5a7   : >> { %v13974_v59 = vadd.f32 %v13518_v54, %v13446_v29  ;;  %v7256_v48 = vpop.f32.mrb[9].mxu1  ;;  %v13519_v26 = vpop.f32.mrb[10].mxu0  ;;  %v8492_v17 = vor.u32 %v8490_v51, %v8489_v46  ;;  %v8494_v42 = vrot.slane %v8489_v46, 4  ;;  %v12677_v33 = vpack.c.bf16 %v8374_v25, %v8374_v25 }
 0x5a8   : >> { %v13447_v57 = vpop.f32.mrb[10].mxu1  ;;  %v8323_v15 = vpop.f32.mrb[11].mxu0  ;;  %v8475_v9 = vor.u32 %v8473_v19, %v17783_v49  ;;  %v8476_v36 = vrot.slane %v17783_v49, 4  ;;  %v13975_v53 = vadd.f32 %v8320_v1, %v7256_v48  ;;  %v12675_v3 = vpack.c.bf16 %v8372_v8, %v8372_v8  ;;  %v12307_v19 = vld [vmem:[%s17754_s8 + $0x3c] sm:$0xf] }
 0x5a9   : >> { %v8377_v56 = vmax.f32 %v13974_v59, 0.0  ;;  %v7259_v18 = vpop.f32.mrb[11].mxu1  ;;  %v8496_v6 = vshrl.u32 %v12677_v33, 16  ;;  %v8499_v41 = vshll.u32 %v12677_v33, 16  ;;  %v13976_v13 = vadd.f32 %v13519_v26, %v13447_v57  ;;  %v12312_v8 = vld [vmem:[%s17754_s8 + $0x4c] sm:$0x1] }
 0x5aa   : >> { %v8611_v52 = vsel %vm17748_vm0, %v8475_v9, %v12300_v45  ;;  %v8375_v11 = vmax.f32 %v13975_v53, 0.0  ;;  %v13977_v0 = vadd.f32 %v8323_v15, %v7259_v18  ;;  %v8478_v2 = vshrl.u32 %v12675_v3, 16 }
 0x5ab   : >> { %v12680_v10 = vpack.c.bf16 %v8377_v56, %v8377_v56  ;;  %12301 = vst [vmem:[%s17754_s8 + $0x28] sm:$0xf] %v8611_v52  ;;  %v8498_v50 = vrot.slane %v8496_v6, 7  ;;  %v8481_v27 = vshll.u32 %v12675_v3, 16  ;;  %v8378_v16 = vmax.f32 %v13976_v13, 0.0 }
 0x5ac   : >> { %v12678_v14 = vpack.c.bf16 %v8375_v11, %v8375_v11  ;;  %v8376_v7 = vmax.f32 %v13977_v0, 0.0  ;;  %v13522_v24 = vpop.f32.mrb[12].mxu0  ;;  %v8480_v43 = vrot.slane %v8478_v2, 7 }
 0x5ad   : >> { %v8522_v12 = vshrl.u32 %v12680_v10, 16  ;;  %v8525_v28 = vshll.u32 %v12680_v10, 16  ;;  %v8501_v63 = vor.u32 %v8499_v41, %v8498_v50  ;;  %v8503_v35 = vrot.slane %v8498_v50, 4  ;;  %v13450_v61 = vpop.f32.mrb[12].mxu1  ;;  %v8336_v40 = vpop.f32.mrb[13].mxu0 }
 0x5ae   : >> { %v12681_v39 = vpack.c.bf16 %v8378_v16, %v8378_v16  ;;  %v8505_v38 = vshrl.u32 %v12678_v14, 16  ;;  %v8508_v37 = vshll.u32 %v12678_v14, 16  ;;  %v12679_v30 = vpack.c.bf16 %v8376_v7, %v8376_v7  ;;  %v7272_v22 = vpop.f32.mrb[13].mxu1  ;;  %v13523_v20 = vpop.f32.mrb[14].mxu0 }
 0x5af   : >> { %v8524_v47 = vrot.slane %v8522_v12, 7  ;;  %v8502_v23 = vsel %vm15953_vm14, %v8494_v42, %v8501_v63  ;;  %v8617_v62 = vsel %vm17759_vm7, %v8503_v35, %v12305_v34  ;;  %v8483_v32 = vor.u32 %v8481_v27, %v8480_v43  ;;  %v13451_v21 = vpop.f32.mrb[14].mxu1  ;;  %v8339_v54 = vpop.f32.mrb[15].mxu0 }
 0x5b0   : >> { %v8485_v5 = vrot.slane %v8480_v43, 4  ;;  %12304 = vst.msk [vmem:[%s17754_s8 + $0x34] sm:$0xf] %vm568_vm2, %v8502_v23  ;;  %12306 = vst [vmem:[%s17754_s8 + $0x38] sm:$0x1] %v8617_v62  ;;  %v8507_v25 = vrot.slane %v8505_v38, 7  ;;  %v13978_v15 = vadd.f32 %v13522_v24, %v13450_v61  ;;  %v13979_v9 = vadd.f32 %v8336_v40, %v7272_v22 }
 0x5b1   : >> { %v8527_v46 = vor.u32 %v8525_v28, %v8524_v47  ;;  %v8529_v51 = vrot.slane %v8524_v47, 4  ;;  %v8531_v4 = vshrl.u32 %v12681_v39, 16  ;;  %v7275_v29 = vpop.f32.mrb[15].mxu1  ;;  %v8484_v1 = vsel %vm15953_vm14, %v8476_v36, %v8483_v32  ;;  %v12314_v61 = vld [vmem:[%s17754_s8 + $0x50] sm:$0xf] }
 0x5b2   : >> { %v8493_v49 = vsel %vm15953_vm14, %v8485_v5, %v8492_v17  ;;  %v8534_v59 = vshll.u32 %v12681_v39, 16  ;;  %v8513_v48 = vshrl.u32 %v12679_v30, 16  ;;  %12302 = vst.msk [vmem:[%s17754_s8 + $0x2c] sm:$0xf] %vm568_vm2, %v8484_v1  ;;  %v8510_v26 = vor.u32 %v8508_v37, %v8507_v25  ;;  %v12319_v62 = vld [vmem:[%s17754_s8 + $0x60] sm:$0x1] }
 0x5b3   : >> { %12303 = vst.msk [vmem:[%s17754_s8 + $0x30] sm:$0xf] %vm568_vm2, %v8493_v49  ;;  %v8511_v42 = vrot.slane %v8507_v25, 4  ;;  %v8533_v45 = vrot.slane %v8531_v4, 7  ;;  %v8516_v33 = vshll.u32 %v12679_v30, 16  ;;  %v13980_v36 = vadd.f32 %v13523_v20, %v13451_v21 }
 0x5b4   : >> { %v8515_v57 = vrot.slane %v8513_v48, 7  ;;  %v8620_v17 = vsel %vm17748_vm0, %v8510_v26, %v12307_v19  ;;  %v13981_v18 = vadd.f32 %v8339_v54, %v7275_v29  ;;  %v8381_v3 = vmax.f32 %v13978_v15, 0.0 }
 0x5b5   : >> { %v8536_v56 = vor.u32 %v8534_v59, %v8533_v45  ;;  %v8538_v53 = vrot.slane %v8533_v45, 4  ;;  %12308 = vst [vmem:[%s17754_s8 + $0x3c] sm:$0xf] %v8620_v17  ;;  %v8379_v13 = vmax.f32 %v13979_v9, 0.0  ;;  %v8382_v11 = vmax.f32 %v13980_v36, 0.0 }
 0x5b6   : >> { %v8518_v6 = vor.u32 %v8516_v33, %v8515_v57  ;;  %v8520_v41 = vrot.slane %v8515_v57, 4  ;;  %v8380_v0 = vmax.f32 %v13981_v18, 0.0  ;;  %v12684_v27 = vpack.c.bf16 %v8381_v3, %v8381_v3 }
 0x5b7   : >> { %v8537_v52 = vsel %vm15953_vm14, %v8529_v51, %v8536_v56  ;;  %v8626_v10 = vsel %vm17759_vm7, %v8538_v53, %v12312_v8  ;;  %v12682_v16 = vpack.c.bf16 %v8379_v13, %v8379_v13  ;;  %v12685_v34 = vpack.c.bf16 %v8382_v11, %v8382_v11 }
 0x5b8   : >> { %12311 = vst.msk [vmem:[%s17754_s8 + $0x48] sm:$0xf] %vm568_vm2, %v8537_v52  ;;  %12313 = vst [vmem:[%s17754_s8 + $0x4c] sm:$0x1] %v8626_v10  ;;  %v8519_v50 = vsel %vm15953_vm14, %v8511_v42, %v8518_v6  ;;  %v8528_v2 = vsel %vm15953_vm14, %v8520_v41, %v8527_v46  ;;  %v12683_v12 = vpack.c.bf16 %v8380_v0, %v8380_v0  ;;  %v8557_v28 = vshrl.u32 %v12684_v27, 16 }
 0x5b9   : >> { %12309 = vst.msk [vmem:[%s17754_s8 + $0x40] sm:$0xf] %vm568_vm2, %v8519_v50  ;;  %12310 = vst.msk [vmem:[%s17754_s8 + $0x44] sm:$0xf] %vm568_vm2, %v8528_v2  ;;  %v8540_v14 = vshrl.u32 %v12682_v16, 16  ;;  %v8566_v7 = vshrl.u32 %v12685_v34, 16 }
 0x5ba   : >> { %v8548_v24 = vshrl.u32 %v12683_v12, 16  ;;  %v8559_v63 = vrot.slane %v8557_v28, 7  ;;  %v8560_v35 = vshll.u32 %v12684_v27, 16  ;;  %v8543_v39 = vshll.u32 %v12682_v16, 16 }
 0x5bb   : >> { %v8542_v43 = vrot.slane %v8540_v14, 7  ;;  %v8568_v40 = vrot.slane %v8566_v7, 7  ;;  %v8569_v47 = vshll.u32 %v12685_v34, 16  ;;  %v8551_v37 = vshll.u32 %v12683_v12, 16 }
 0x5bc   : >> { %v8550_v38 = vrot.slane %v8548_v24, 7  ;;  %v8562_v30 = vor.u32 %v8560_v35, %v8559_v63  ;;  %v8564_v22 = vrot.slane %v8559_v63, 4  ;;  %5965 = sbr.rel (!%p5963_p6) target bundleno = 1062 (0x426), region = 171 }
 0x5bd   : >> { %v8545_v20 = vor.u32 %v8543_v39, %v8542_v43  ;;  %v8546_v23 = vrot.slane %v8542_v43, 4  ;;  %v8571_v32 = vor.u32 %v8569_v47, %v8568_v40  ;;  %v8573_v5 = vrot.slane %v8568_v40, 4 }
 0x5be   : >> { %v8553_v21 = vor.u32 %v8551_v37, %v8550_v38  ;;  %v8555_v54 = vrot.slane %v8550_v38, 4 }
 0x5bf   : >> { %v8629_v46 = vsel %vm17748_vm0, %v8545_v20, %v12314_v61  ;;  %v8572_v51 = vsel %vm15953_vm14, %v8564_v22, %v8571_v32  ;;  %v8635_v25 = vsel %vm17759_vm7, %v8573_v5, %v12319_v62 }
 0x5c0   : >> { %12315 = vst [vmem:[%s17754_s8 + $0x50] sm:$0xf] %v8629_v46  ;;  %v8554_v4 = vsel %vm15953_vm14, %v8546_v23, %v8553_v21  ;;  %v8563_v29 = vsel %vm15953_vm14, %v8555_v54, %v8562_v30  ;;  %12318 = vst.msk [vmem:[%s17754_s8 + $0x5c] sm:$0xf] %vm568_vm2, %v8572_v51 }
 0x5c1   : >> { %12320 = vst [vmem:[%s17754_s8 + $0x60] sm:$0x1] %v8635_v25  ;;  %12316 = vst.msk [vmem:[%s17754_s8 + $0x54] sm:$0xf] %vm568_vm2, %v8554_v4 }
 0x5c2   : >> { %12317 = vst.msk [vmem:[%s17754_s8 + $0x58] sm:$0xf] %vm568_vm2, %v8563_v29 }
 0x5c3 LB: >> { %v14385_v55 = vld [vmem:[%s18721_s4 + $0x10] sm:$0xff]   ;;  %v14386_v31 = vld [vmem:[%s18721_s4 + $0x40] sm:$0xff]   ;;  %v14387_v60 = vld [vmem:[%s18721_s4 + $0x18] sm:$0xff]   ;;  %s12686_s12 = smul.u32 80, %s14467_s9  ;;  %vm8891_vm3 = vcmask 261120   ;;  %s14467_s9 = sphi %s17850_s9, %s8642_s9  }
 0x5c4   : >> { %13524 = vmatprep.subr.bf16.mxu1 %v14385_v55  ;;  %13604 = vmatprep.subr.bf16.mxu0 %v14386_v31  ;;  %v14388_v1 = vld [vmem:[%s18721_s4 + $0x48] sm:$0xff]   ;;  %v17871_v49 = vld [vmem:[%s18721_s4] sm:$0xff]   ;;  %v17905_v2 = vld [vmem:[%s18721_s4 + $0x50] sm:$0xff]  }
 0x5c5   : >> { %13525 = vmatpush3.bf16.msra.mxu1 %v14385_v55  ;;  %13605 = vmatpush3.bf16.msra.mxu0 %v14386_v31  ;;  %s17873_s17 = scalar_lea.vmem [#allocation4], %s12686_s12 }
 0x5c6   : >> { %13526 = vmatprep.subr.bf16.mxu1 %v14387_v60  ;;  %13606 = vmatprep.subr.bf16.mxu0 %v14388_v1 }
 0x5c9   : >> { %v17876_v19 = vld [vmem:[%s17873_s17] sm:$0xf]  ;;  %v17879_v59 = vld [vmem:[%s17873_s17 + $0x4] sm:$0xf]  ;;  %v17882_v48 = vld [vmem:[%s17873_s17 + $0x8] sm:$0xf]  ;;  %13527 = vmatpush3.bf16.msra.mxu1 %v14387_v60  ;;  %13607 = vmatpush3.bf16.msra.mxu0 %v14388_v1 }
 0x5ca   : >> { %v8675_v26 = vshrl.u32 %v17876_v19, 16  ;;  %v8678_v42 = vshll.u32 %v17876_v19, 16  ;;  %v8684_v45 = vshll.u32 %v17879_v59, 16  ;;  %v8688_v33 = vshrl.u32 %v17879_v59, 16  ;;  %v12430_v15 = vld [vmem:[%s17873_s17 + $0x14] sm:$0xf]  ;;  %13544 = vmatprep.subr.bf16.mxu1 %v17871_v49  ;;  %13624 = vmatprep.subr.bf16.mxu0 %v17905_v2 }
 0x5cb   : >> { %v8694_v8 = vshll.u32 %v17882_v48, 16  ;;  %v8698_v57 = vshrl.u32 %v17882_v48, 16  ;;  %v17892_v9 = vld [vmem:[%s17873_s17 + $0x18] sm:$0xf]  ;;  %v12346_v36 = vcombine.low %v17876_v19, %v17879_v59  ;;  %v17898_v6 = vld [vmem:[%s17873_s17 + $0x1c] sm:$0xf] }
 0x5cc   : >> { %v8677_v17 = vrot.slane %v8675_v26, 4  ;;  %v8680_v56 = vrot.slane %v8678_v42, 5  ;;  %v8686_v53 = vrot.slane %v8684_v45, 5  ;;  %v8690_v18 = vrot.slane %v8688_v33, 4  ;;  %v17909_v28 = vld [vmem:[%s17873_s17 + $0xc] sm:$0xf] }
 0x5cd   : >> { %v8696_v41 = vrot.slane %v8694_v8, 5  ;;  %v8700_v3 = vrot.slane %v8698_v57, 4  ;;  %v9666_v13 = vshrl.u32 %v12430_v15, 16  ;;  %v9669_v52 = vshll.u32 %v12430_v15, 16  ;;  %v8667_v40 = vld [vmem:[%s17873_s17 + $0x10] sm:$0x1] }
 0x5ce   : >> { %v8681_v10 = vor.u32 %v8680_v56, %v8677_v17  ;;  %v8691_v11 = vor.u32 %v8690_v18, %v8686_v53  ;;  %v9675_v0 = vshll.u32 %v17892_v9, 16  ;;  %v9679_v50 = vshrl.u32 %v17892_v9, 16  ;;  %v12433_v46 = vld [vmem:[%s17873_s17 + $0x20] sm:$0xf]  ;;  %v12434_v55 = vld [vmem:[%s17873_s17 + $0x24] sm:$0x1] }
 0x5cf   : >> { %v8701_v27 = vor.u32 %v8700_v3, %v8696_v41  ;;  %v9668_v16 = vrot.slane %v9666_v13, 4  ;;  %v9671_v34 = vrot.slane %v9669_v52, 5  ;;  %v9685_v12 = vshll.u32 %v17898_v6, 16  ;;  %v17931_v31 = vld [vmem:[%s17873_s17 + $0x14] sm:$0xf] }
 0x5d0   : >> { %v8682_v14 = vrot.slane %v8681_v10, 4  ;;  %v8692_v7 = vrot.slane %v8691_v11, 4  ;;  %v9677_v24 = vrot.slane %v9675_v0, 5  ;;  %v9681_v63 = vrot.slane %v9679_v50, 4  ;;  %v17945_v0 = vld [vmem:[%s17873_s17 + $0x18] sm:$0xf] }
 0x5d1   : >> { %v8702_v35 = vrot.slane %v8701_v27, 4  ;;  %v9672_v43 = vor.u32 %v9671_v34, %v9668_v16  ;;  %v9687_v39 = vrot.slane %v9685_v12, 5  ;;  %v9689_v61 = vshrl.u32 %v17898_v6, 16  ;;  %v17953_v12 = vld [vmem:[%s17873_s17 + $0x1c] sm:$0xf] }
 0x5d2   : >> { %v8687_v47 = vsel %vm15631_vm9, %v8682_v14, %v8686_v53  ;;  %v8697_v38 = vsel %vm15631_vm9, %v8692_v7, %v8696_v41  ;;  %v9682_v37 = vor.u32 %v9681_v63, %v9677_v24  ;;  %v10045_v30 = vrot.slane %v17892_v9, 5 }
 0x5d3   : >> { %v12328_v22 = vcombine.low %v8687_v47, %v8697_v38  ;;  %v9673_v20 = vrot.slane %v9672_v43, 4  ;;  %v9691_v23 = vrot.slane %v9689_v61, 4  ;;  %v10048_v62 = vrot.slane %v17898_v6, 5  ;;  %v12435_v43 = vld [vmem:[%s17873_s17 + $0x28] sm:$0xf] }
 0x5d4   : >> { %v9683_v32 = vrot.slane %v9682_v37, 4  ;;  %v8704_v5 = vshll.u32 %v17909_v28, 16  ;;  %v8708_v21 = vshrl.u32 %v17909_v28, 16  ;;  %v8714_v54 = vshll.u32 %v8667_v40, 16  ;;  %v14393_v61 = vld [vmem:[%s18721_s4 + $0x8] sm:$0xff]  }
 0x5d5   : >> { %13528 = vmatprep.mubr.msk.bf16.mxu1 %vm8891_vm3, %v12328_v22  ;;  %v9678_v51 = vsel %vm15631_vm9, %v9673_v20, %v9677_v24  ;;  %v9692_v25 = vor.u32 %v9691_v23, %v9687_v39  ;;  %v10050_v4 = vrot.slane %v10048_v62, 4  ;;  %v9209_v29 = vrot.slane %v17909_v28, 5  ;;  %v17973_v22 = vld [vmem:[%s17873_s17 + $0x30] sm:$0xf] }
 0x5d6   : >> { %v9688_v60 = vsel %vm15631_vm9, %v9683_v32, %v9687_v39  ;;  %v8706_v1 = vrot.slane %v8704_v5, 5  ;;  %v8710_v26 = vrot.slane %v8708_v21, 4  ;;  %v8716_v42 = vrot.slane %v8714_v54, 5  ;;  %v17962_v39 = vld [vmem:[%s17873_s17 + $0x2c] sm:$0xf] }
 0x5d7   : >> { %v9693_v45 = vrot.slane %v9692_v25, 4  ;;  %v12454_v33 = vcombine.low %v9678_v51, %v9688_v60  ;;  %v9211_v8 = vrot.slane %v9209_v29, 4  ;;  %v9212_v57 = vrot.slane %v8667_v40, 5  ;;  %v17980_v21 = vld [vmem:[%s17873_s17 + $0x20] sm:$0xf] }
 0x5d8   : >> { %v8707_v15 = vsel %vm15631_vm9, %v8702_v35, %v8706_v1  ;;  %v8711_v17 = vor.u32 %v8710_v26, %v8706_v1  ;;  %v9695_v56 = vshll.u32 %v12433_v46, 16  ;;  %v9699_v53 = vshrl.u32 %v12433_v46, 16 }
 0x5d9   : >> { %13608 = vmatprep.mubr.msk.bf16.mxu0 %vm8891_vm3, %v12454_v33  ;;  %v17942_v18 = vsel %vm16139_vm6, %v9211_v8, %v9212_v57  ;;  %v9705_v41 = vshll.u32 %v12434_v55, 16  ;;  %v10051_v3 = vrot.slane %v12433_v46, 5  ;;  %v10054_v13 = vrot.slane %v12434_v55, 5  ;;  %v14392_v8 = vld [vmem:[%s18721_s4 + $0x58] sm:$0xff]  }
 0x5da   : >> { %v8712_v52 = vrot.slane %v8711_v17, 4  ;;  %v9697_v10 = vrot.slane %v9695_v56, 5  ;;  %v9701_v11 = vrot.slane %v9699_v53, 4  ;;  %v8719_v50 = vshrl.u32 %v17931_v31, 16  ;;  %v17998_v53 = vld [vmem:[%s17873_s17 + $0x24] sm:$0x1] }
 0x5db   : >> { %v9707_v27 = vrot.slane %v9705_v41, 5  ;;  %v17950_v16 = vsel %vm16139_vm6, %v10050_v4, %v10051_v3  ;;  %v10053_v34 = vrot.slane %v10051_v3, 4  ;;  %v8722_v14 = vshll.u32 %v17931_v31, 16 }
 0x5dc   : >> { %v8717_v7 = vsel %vm15631_vm9, %v8712_v52, %v8716_v42  ;;  %v9698_v24 = vsel %vm15631_vm9, %v9693_v45, %v9697_v10  ;;  %v9702_v63 = vor.u32 %v9701_v11, %v9697_v10  ;;  %v8721_v35 = vrot.slane %v8719_v50, 4 }
 0x5dd   : >> { %v12329_v40 = vcombine.low %v8707_v15, %v8717_v7  ;;  %v17969_v47 = vsel %vm16139_vm6, %v10053_v34, %v10054_v13  ;;  %v8724_v38 = vrot.slane %v8722_v14, 5  ;;  %v8728_v37 = vshll.u32 %v17945_v0, 16  ;;  %v18010_v34 = vld [vmem:[%s18721_s4 + $0x60] sm:$0xff]  }
 0x5de   : >> { %v9703_v20 = vrot.slane %v9702_v63, 4  ;;  %v12485_v23 = vcombine.low %v17950_v16, %v17969_v47  ;;  %v8732_v32 = vshrl.u32 %v17945_v0, 16  ;;  %v8738_v5 = vshll.u32 %v17953_v12, 16 }
 0x5df   : >> { %13529 = vmatmul.mubr.msk.bf16.vlgmr.msra.gmra.mrb[0].mxu1 %vm8891_vm3, %v12329_v40  ;;  %v8725_v54 = vor.u32 %v8724_v38, %v8721_v35  ;;  %v8730_v46 = vrot.slane %v8728_v37, 5  ;;  %v9710_v51 = vshrl.u32 %v12435_v43, 16  ;;  %v9713_v25 = vshll.u32 %v12435_v43, 16  ;;  %v18020_v38 = vld [vmem:[%s17873_s17 + $0x38] sm:$0x1] }
 0x5e0   : >> { %13545 = vmatpush3.bf16.msra.mxu1 %v17871_v49  ;;  %v9708_v4 = vsel %vm15631_vm9, %v9703_v20, %v9707_v27  ;;  %v8734_v55 = vrot.slane %v8732_v32, 4  ;;  %v8740_v60 = vrot.slane %v8738_v5, 5  ;;  %v9719_v1 = vshll.u32 %v17962_v39, 16  ;;  %v17993_v49 = vld [vmem:[%s18721_s4 + $0x20] sm:$0xff]   ;;  %v18024_v37 = vld [vmem:[%s17873_s17 + $0x28] sm:$0xf] }
 0x5e1   : >> { %v12455_v26 = vcombine.low %v9698_v24, %v9708_v4  ;;  %v8726_v42 = vrot.slane %v8725_v54, 4  ;;  %v9712_v45 = vrot.slane %v9710_v51, 4  ;;  %v9715_v33 = vrot.slane %v9713_v25, 5  ;;  %13546 = vmatprep.subr.bf16.mxu1 %v14393_v61 }
 0x5e2   : >> { %v8735_v57 = vor.u32 %v8734_v55, %v8730_v46  ;;  %v9721_v15 = vrot.slane %v9719_v1, 5  ;;  %v9723_v17 = vshrl.u32 %v17962_v39, 16  ;;  %v9729_v56 = vshll.u32 %v17973_v22, 16 }
 0x5e3   : >> { %13609 = vmatmul.mubr.msk.bf16.vlgmr.msra.gmra.mrb[0].mxu0 %vm8891_vm3, %v12455_v26  ;;  %v8731_v41 = vsel %vm15631_vm9, %v8726_v42, %v8730_v46  ;;  %v9716_v3 = vor.u32 %v9715_v33, %v9712_v45  ;;  %v8742_v13 = vshrl.u32 %v17953_v12, 16  ;;  %v8748_v52 = vshll.u32 %v17980_v21, 16  ;;  %v18033_v42 = vld [vmem:[%s17873_s17 + $0x2c] sm:$0xf] }
 0x5e4   : >> { %13625 = vmatpush3.bf16.msra.mxu0 %v17905_v2  ;;  %v8736_v10 = vrot.slane %v8735_v57, 4  ;;  %v9725_v11 = vrot.slane %v9723_v17, 4  ;;  %v9731_v50 = vrot.slane %v9729_v56, 5  ;;  %v8752_v27 = vshrl.u32 %v17980_v21, 16  ;;  %13547 = vmatpush3.bf16.msra.mxu1 %v14393_v61  ;;  %v18014_v2 = vld [vmem:[%s17873_s17 + $0x34] sm:$0xf] }
 0x5e5   : >> { %v9717_v14 = vrot.slane %v9716_v3, 4  ;;  %13626 = vmatprep.subr.bf16.mxu0 %v14392_v8  ;;  %v8744_v7 = vrot.slane %v8742_v13, 4  ;;  %v8750_v24 = vrot.slane %v8748_v52, 5  ;;  %v8758_v63 = vshll.u32 %v17998_v53, 16  ;;  %13564 = vmatprep.subr.bf16.mxu1 %v17993_v49  ;;  %v12472_v13 = vld [vmem:[%s17873_s17 + $0x14] sm:$0xe] }
 0x5e6   : >> { %v8741_v35 = vsel %vm15631_vm9, %v8736_v10, %v8740_v60  ;;  %v9726_v43 = vor.u32 %v9725_v11, %v9721_v15  ;;  %v8754_v40 = vrot.slane %v8752_v27, 4  ;;  %v9733_v61 = vshrl.u32 %v17973_v22, 16 }
 0x5e7   : >> { %v12330_v20 = vcombine.low %v8731_v41, %v8741_v35  ;;  %v9722_v32 = vsel %vm15631_vm9, %v9717_v14, %v9721_v15  ;;  %v8745_v5 = vor.u32 %v8744_v7, %v8740_v60  ;;  %v8760_v54 = vrot.slane %v8758_v63, 5  ;;  %v18040_v15 = vld [vmem:[%s17873_s17 + $0x30] sm:$0xf]  ;;  %v18052_v63 = vld [vmem:[%s17873_s17 + $0x34] sm:$0xf] }
 0x5e8   : >> { %v9727_v46 = vrot.slane %v9726_v43, 4  ;;  %v8755_v51 = vor.u32 %v8754_v40, %v8750_v24  ;;  %v9735_v25 = vrot.slane %v9733_v61, 4  ;;  %v9739_v4 = vshll.u32 %v18014_v2, 16  ;;  %13627 = vmatpush3.bf16.msra.mxu0 %v14392_v8 }
 0x5e9   : >> { %13532 = vmatprep.mubr.msk.bf16.mxu1 %vm8891_vm3, %v12330_v20  ;;  %v8746_v55 = vrot.slane %v8745_v5, 4  ;;  %v9743_v1 = vshrl.u32 %v18014_v2, 16  ;;  %v9749_v26 = vshll.u32 %v18020_v38, 16  ;;  %v8763_v60 = vshrl.u32 %v18024_v37, 16  ;;  %13644 = vmatprep.subr.bf16.mxu0 %v18010_v34  ;;  %v18058_v20 = vld [vmem:[%s17873_s17 + $0x38] sm:$0x1] }
 0x5ea   : >> { %v9732_v45 = vsel %vm15631_vm9, %v9727_v46, %v9731_v50  ;;  %v8756_v33 = vrot.slane %v8755_v51, 4  ;;  %v9736_v57 = vor.u32 %v9735_v25, %v9731_v50  ;;  %v9741_v8 = vrot.slane %v9739_v4, 5  ;;  %v18064_v51 = vld [vmem:[%s17873_s17 + $0x3c] sm:$0xf] }
 0x5eb   : >> { %v12456_v17 = vcombine.low %v9722_v32, %v9732_v45  ;;  %v8751_v56 = vsel %vm15631_vm9, %v8746_v55, %v8750_v24  ;;  %v9745_v41 = vrot.slane %v9743_v1, 4  ;;  %v9751_v3 = vrot.slane %v9749_v26, 5  ;;  %v18072_v26 = vld [vmem:[%s17873_s17 + $0x40] sm:$0xf] }
 0x5ec   : >> { %v8761_v52 = vsel %vm15631_vm9, %v8756_v33, %v8760_v54  ;;  %v9737_v10 = vrot.slane %v9736_v57, 4  ;;  %v8765_v11 = vrot.slane %v8763_v60, 4  ;;  %v8766_v27 = vshll.u32 %v18024_v37, 16 }
 0x5ed   : >> { %13612 = vmatprep.mubr.msk.bf16.mxu0 %vm8891_vm3, %v12456_v17  ;;  %v12331_v50 = vcombine.low %v8751_v56, %v8761_v52  ;;  %v9746_v14 = vor.u32 %v9745_v41, %v9741_v8  ;;  %v8772_v7 = vshll.u32 %v18033_v42, 16  ;;  %v8776_v24 = vshrl.u32 %v18033_v42, 16  ;;  %v18082_v56 = vld [vmem:[%s17873_s17 + $0x44] sm:$0xf] }
 0x5ee   : >> { %v9742_v35 = vsel %vm15631_vm9, %v9737_v10, %v9741_v8  ;;  %v8768_v43 = vrot.slane %v8766_v27, 5  ;;  %v8782_v40 = vshll.u32 %v18040_v15, 16  ;;  %v12476_v61 = vrot.slane %v12472_v13, 9  ;;  %v12473_v10 = vld [vmem:[%s17873_s17 + $0x28] sm:$0xe] }
 0x5ef   : >> { %13533 = vmatmul.mubr.msk.bf16.gmra.mrb[4].mxu1 %vm8891_vm3, %v12331_v50  ;;  %v9747_v32 = vrot.slane %v9746_v14, 4  ;;  %v8774_v5 = vrot.slane %v8772_v7, 5  ;;  %v8778_v54 = vrot.slane %v8776_v24, 4  ;;  %v10047_v46 = vrot.slane %v10045_v30, 4 }
 0x5f0   : >> { %v8769_v25 = vor.u32 %v8768_v43, %v8765_v11  ;;  %v8784_v4 = vrot.slane %v8782_v40, 5  ;;  %v10046_v55 = vsel %vm16139_vm6, %v12476_v61, %v10045_v30  ;;  %v8786_v1 = vshrl.u32 %v18040_v15, 16 }
 0x5f1   : >> { %v9752_v60 = vsel %vm15631_vm9, %v9747_v32, %v9751_v3  ;;  %v8779_v45 = vor.u32 %v8778_v54, %v8774_v5  ;;  %v10049_v33 = vsel %vm16139_vm6, %v10047_v46, %v10048_v62  ;;  %v8792_v57 = vshll.u32 %v18052_v63, 16 }
 0x5f2   : >> { %v12457_v9 = vcombine.low %v9742_v35, %v9752_v60  ;;  %v8770_v8 = vrot.slane %v8769_v25, 4  ;;  %v12484_v17 = vcombine.low %v10046_v55, %v10049_v33  ;;  %v8788_v30 = vrot.slane %v8786_v1, 4  ;;  %v18103_v60 = vld [vmem:[%s17873_s17 + $0x48] sm:$0xf] }
 0x5f3   : >> { %v8780_v41 = vrot.slane %v8779_v45, 4  ;;  %v8794_v13 = vrot.slane %v8792_v57, 5  ;;  %v8796_v52 = vshrl.u32 %v18052_v63, 16  ;;  %v8802_v3 = vshll.u32 %v18058_v20, 16 }
 0x5f4   : >> { %13613 = vmatmul.mubr.msk.bf16.gmra.mrb[4].mxu0 %vm8891_vm3, %v12457_v9  ;;  %v8775_v6 = vsel %vm15631_vm9, %v8770_v8, %v8774_v5  ;;  %v8789_v62 = vor.u32 %v8788_v30, %v8784_v4  ;;  %v8807_v11 = vshrl.u32 %v18064_v51, 16  ;;  %v8810_v27 = vshll.u32 %v18064_v51, 16  ;;  %v18107_v8 = vld [vmem:[%s17873_s17 + $0x4c] sm:$0x1] }
 0x5f5   : >> { %v8785_v50 = vsel %vm15631_vm9, %v8780_v41, %v8784_v4  ;;  %13628 = vmatprep.mubr.msk.bf16.mxu0 %vm8891_vm3, %v12484_v17  ;;  %v8798_v14 = vrot.slane %v8796_v52, 4  ;;  %v8804_v7 = vrot.slane %v8802_v3, 5  ;;  %v8816_v24 = vshll.u32 %v18072_v26, 16  ;;  %v12474_v52 = vld [vmem:[%s17873_s17 + $0x3c] sm:$0xe] }
 0x5f6   : >> { %v12332_v35 = vcombine.low %v8775_v6, %v8785_v50  ;;  %v8790_v43 = vrot.slane %v8789_v62, 4  ;;  %v8809_v40 = vrot.slane %v8807_v11, 4  ;;  %v8812_v61 = vrot.slane %v8810_v27, 5 }
 0x5f7   : >> { %v8799_v32 = vor.u32 %v8798_v14, %v8794_v13  ;;  %v8818_v5 = vrot.slane %v8816_v24, 5  ;;  %v8820_v54 = vshrl.u32 %v18072_v26, 16  ;;  %v8826_v46 = vshll.u32 %v18082_v56, 16  ;;  %v18129_v14 = vld [vmem:[%s17873_s17 + $0x40] sm:$0xf] }
 0x5f8   : >> { %13536 = vmatprep.mubr.msk.bf16.mxu1 %vm8891_vm3, %v12332_v35  ;;  %v8795_v25 = vsel %vm15631_vm9, %v8790_v43, %v8794_v13  ;;  %v8813_v4 = vor.u32 %v8812_v61, %v8809_v40  ;;  %v12477_v55 = vrot.slane %v12473_v10, 9  ;;  %v10058_v1 = vrot.slane %v17962_v39, 5  ;;  %v14397_v39 = vld [vmem:[%s18721_s4 + $0x68] sm:$0xff]  }
 0x5f9   : >> { %v8800_v45 = vrot.slane %v8799_v32, 4  ;;  %v8822_v33 = vrot.slane %v8820_v54, 4  ;;  %v8828_v57 = vrot.slane %v8826_v46, 5  ;;  %v10061_v9 = vrot.slane %v17973_v22, 5  ;;  %v18141_v32 = vld [vmem:[%s18721_s4 + $0x70] sm:$0xff]  }
 0x5fa   : >> { %v8814_v17 = vrot.slane %v8813_v4, 4  ;;  %v10059_v30 = vsel %vm16139_vm6, %v12477_v55, %v10058_v1  ;;  %v10060_v41 = vrot.slane %v10058_v1, 4  ;;  %v8830_v13 = vshrl.u32 %v18082_v56, 16  ;;  %v12444_v4 = vld [vmem:[%s17873_s17 + $0x4c] sm:$0x1] }
 0x5fb   : >> { %v8805_v3 = vsel %vm15631_vm9, %v8800_v45, %v8804_v7  ;;  %v8823_v22 = vor.u32 %v8822_v33, %v8818_v5  ;;  %v8836_v10 = vshll.u32 %v18103_v60, 16  ;;  %v8840_v6 = vshrl.u32 %v18103_v60, 16  ;;  %v18132_v7 = vld [vmem:[%s17873_s17 + $0x44] sm:$0xf] }
 0x5fc   : >> { %v12333_v62 = vcombine.low %v8795_v25, %v8805_v3  ;;  %13629 = vmatmul.mubr.msk.bf16.vlgmr.msra.gmra.mrb[0].mxu0 %vm8891_vm3, %v12485_v23  ;;  %v8819_v11 = vsel %vm15631_vm9, %v8814_v17, %v8818_v5  ;;  %v10062_v27 = vsel %vm16139_vm6, %v10060_v41, %v10061_v9  ;;  %v8832_v50 = vrot.slane %v8830_v13, 4  ;;  %v12443_v25 = vld [vmem:[%s17873_s17 + $0x48] sm:$0xf] }
 0x5fd   : >> { %13645 = vmatpush3.bf16.msra.mxu0 %v18010_v34  ;;  %v8824_v24 = vrot.slane %v8823_v22, 4  ;;  %v12486_v35 = vcombine.low %v10059_v30, %v10062_v27  ;;  %v8838_v16 = vrot.slane %v8836_v10, 5  ;;  %v8842_v47 = vrot.slane %v8840_v6, 4  ;;  %v18166_v27 = vld [vmem:[%s17873_s17 + $0x54] sm:$0xf] }
 0x5fe   : >> { %13537 = vmatmul.mubr.msk.bf16.gmra.mrb[8].mxu1 %vm8891_vm3, %v12333_v62  ;;  %v8833_v23 = vor.u32 %v8832_v50, %v8828_v57  ;;  %v8846_v43 = vshll.u32 %v18107_v8, 16  ;;  %v10063_v40 = vrot.slane %v10061_v9, 4  ;;  %v10064_v61 = vrot.slane %v18014_v2, 5  ;;  %13646 = vmatprep.subr.bf16.mxu0 %v14397_v39  ;;  %v12475_v50 = vld [vmem:[%s17873_s17 + $0x50] sm:$0xe] }
 0x5ff   : >> { %v8829_v34 = vsel %vm15631_vm9, %v8824_v24, %v8828_v57  ;;  %13632 = vmatprep.mubr.msk.bf16.mxu0 %vm8891_vm3, %v12486_v35  ;;  %v8843_v5 = vor.u32 %v8842_v47, %v8838_v16  ;;  %v10067_v54 = vrot.slane %v18020_v38, 5  ;;  %v12478_v46 = vrot.slane %v12474_v52, 9  ;;  %v18172_v47 = vld [vmem:[%s17873_s17 + $0x58] sm:$0xf] }
 0x600   : >> { %v12334_v55 = vcombine.low %v8819_v11, %v8829_v34  ;;  %v8834_v1 = vrot.slane %v8833_v23, 4  ;;  %v8848_v2 = vrot.slane %v8846_v43, 5  ;;  %v10065_v45 = vsel %vm16139_vm6, %v10063_v40, %v10064_v61  ;;  %v18175_v23 = vld [vmem:[%s17873_s17 + $0x5c] sm:$0xf] }
 0x601   : >> { %v8844_v33 = vrot.slane %v8843_v5, 4  ;;  %v10066_v9 = vrot.slane %v10064_v61, 4  ;;  %v10071_v17 = vrot.slane %v18129_v14, 5  ;;  %v10074_v57 = vrot.slane %v18132_v7, 5  ;;  %13647 = vmatpush3.bf16.msra.mxu0 %v14397_v39  ;;  %v18183_v5 = vld [vmem:[%s17873_s17 + $0x60] sm:$0x1] }
 0x602   : >> { %13540 = vmatprep.mubr.msk.bf16.mxu1 %vm8891_vm3, %v12334_v55  ;;  %v8839_v38 = vsel %vm15631_vm9, %v8834_v1, %v8838_v16  ;;  %v9783_v30 = vshll.u32 %v12443_v25, 16  ;;  %v9787_v41 = vshrl.u32 %v12443_v25, 16  ;;  %v9793_v13 = vshll.u32 %v12444_v4, 16  ;;  %13664 = vmatprep.subr.bf16.mxu0 %v18141_v32  ;;  %18762 = vst [vmem:[#allocation7_spill] sm:$0xff] %v18183_v5 }
 0x603   : >> { %v8849_v52 = vsel %vm15631_vm9, %v8844_v33, %v8848_v2  ;;  %v10068_v3 = vsel %vm16139_vm6, %v10066_v9, %v10067_v54  ;;  %v10072_v39 = vsel %vm16139_vm6, %v12478_v46, %v10071_v17  ;;  %v10073_v22 = vrot.slane %v10071_v17, 4 }
 0x604   : >> { %v12335_v10 = vcombine.low %v8839_v38, %v8849_v52  ;;  %v12487_v6 = vcombine.low %v10065_v45, %v10068_v3  ;;  %v18163_v62 = vrot.slane %v9783_v30, 5  ;;  %v9789_v11 = vrot.slane %v9787_v41, 4  ;;  %v9187_v38 = vld [vmem:[%s17873_s17 + $0x14] sm:$0xe] }
 0x605   : >> { %v10075_v24 = vsel %vm16139_vm6, %v10073_v22, %v10074_v57  ;;  %v10076_v35 = vrot.slane %v10074_v57, 4  ;;  %v10077_v16 = vrot.slane %v12443_v25, 5  ;;  %v18180_v61 = vrot.slane %v9793_v13, 5 }
 0x606   : >> { %13541 = vmatmul.mubr.msk.bf16.gmra.mrb[12].mxu1 %vm8891_vm3, %v12335_v10  ;;  %13633 = vmatmul.mubr.msk.bf16.gmra.mrb[4].mxu0 %vm8891_vm3, %v12487_v6  ;;  %v12488_v43 = vcombine.low %v10072_v39, %v10075_v24  ;;  %v9790_v40 = vor.u32 %v9789_v11, %v18163_v62  ;;  %v10080_v34 = vrot.slane %v12444_v4, 5  ;;  %v12479_v25 = vrot.slane %v12475_v50, 9  ;;  %v14401_v39 = vld [vmem:[%s18721_s4 + $0x28] sm:$0xff]  }
 0x607   : >> { %13548 = vmatprep.mubr.msk.bf16.mxu1 %vm8891_vm3, %v12346_v36  ;;  %v10078_v54 = vsel %vm16139_vm6, %v10076_v35, %v10077_v16  ;;  %v10079_v46 = vrot.slane %v10077_v16, 4  ;;  %v10084_v55 = vrot.slane %v18166_v27, 5  ;;  %v10087_v4 = vrot.slane %v18172_v47, 5  ;;  %v9188_v10 = vld [vmem:[%s17873_s17 + $0x28] sm:$0xe] }
 0x608   : >> { %13636 = vmatprep.mubr.msk.bf16.mxu0 %vm8891_vm3, %v12488_v43  ;;  %v18193_v1 = vrot.slane %v9790_v40, 4  ;;  %v10090_v2 = vrot.slane %v18175_v23, 5  ;;  %v12347_v33 = vcombine.low %v17882_v48, %v17909_v28  ;;  %v12348_v57 = vcombine.low %v17931_v31, %v17945_v0 }
 0x609   : >> { %v10081_v19 = vsel %vm16139_vm6, %v10079_v46, %v10080_v34  ;;  %v10085_v36 = vsel %vm16139_vm6, %v12479_v25, %v10084_v55  ;;  %v10086_v45 = vrot.slane %v10084_v55, 4  ;;  %v10089_v41 = vrot.slane %v10087_v4, 4 }
 0x60a   : >> { %v12489_v17 = vcombine.low %v10078_v54, %v10081_v19  ;;  %v10092_v13 = vrot.slane %v10090_v2, 4  ;;  %v10093_v52 = vrot.slane %v18183_v5, 5  ;;  %v9206_v22 = vrot.slane %v17882_v48, 5  ;;  %v14409_v48 = vld [vmem:[%s17873_s17 + $0x44] sm:$0xff]  }
 0x60b   : >> { %v10088_v30 = vsel %vm16139_vm6, %v10086_v45, %v10087_v4  ;;  %v12365_v31 = vrot.slane %v9187_v38, 9  ;;  %v9216_v6 = vrot.slane %v17945_v0, 5  ;;  %v9219_v11 = vrot.slane %v17953_v12, 5  ;;  %v18236_v0 = vld [vmem:[%s18721_s4 + $0x30] sm:$0xff]  }
 0x60c   : >> { %v12490_v3 = vcombine.low %v10085_v36, %v10088_v30  ;;  %v9222_v50 = vrot.slane %v17980_v21, 5  ;;  %v10091_v24 = vsel %vm16139_vm6, %v10089_v41, %v10090_v2  ;;  %v10094_v35 = vsel %vm16139_vm6, %v10092_v13, %v10093_v52  ;;  %v9186_v30 = vld [vmem:[%s17873_s17] sm:$0xe] }
 0x60d   : >> { %v9208_v16 = vrot.slane %v9206_v22, 4  ;;  %v9225_v43 = vrot.slane %v17998_v53, 5  ;;  %v9218_v40 = vrot.slane %v9216_v6, 4  ;;  %v9221_v34 = vrot.slane %v9219_v11, 4 }
 0x60e   : >> { %13549 = vmatmul.mubr.msk.bf16.vlgmr.msra.gmra.mrb[0].mxu1 %vm8891_vm3, %v12347_v33  ;;  %13637 = vmatmul.mubr.msk.bf16.gmra.mrb[8].mxu0 %vm8891_vm3, %v12489_v17  ;;  %v9224_v54 = vrot.slane %v9222_v50, 4  ;;  %v12349_v46 = vcombine.low %v17953_v12, %v17980_v21  ;;  %v12366_v25 = vrot.slane %v9188_v10, 9  ;;  %v9229_v55 = vrot.slane %v18033_v42, 5  ;;  %v12542_v10 = vld [vmem:[%s17873_s17 + $0x28] sm:$0xf] }
 0x60f   : >> { %13565 = vmatpush3.bf16.msra.mxu1 %v17993_v49  ;;  %13552 = vmatprep.mubr.msk.bf16.mxu1 %vm8891_vm3, %v12348_v57  ;;  %v18240_v49 = vsel %vm16139_vm6, %v12365_v31, %v9216_v6  ;;  %v18248_v53 = vsel %vm16139_vm6, %v9208_v16, %v9209_v29  ;;  %v12491_v4 = vcombine.low %v10091_v24, %v10094_v35  ;;  %v14402_v29 = vld [vmem:[%s17873_s17 + $0x28] sm:$0xff]   ;;  %v9203_v57 = vrot.slane %v17879_v59, 5  ;;  %v14407_v6 = vld [vmem:[%s17873_s17 + $0x3c] sm:$0xff]  }
 0x610   : >> { %13640 = vmatprep.mubr.msk.bf16.mxu0 %vm8891_vm3, %v12490_v3  ;;  %13566 = vmatprep.subr.bf16.mxu1 %v14401_v39  ;;  %v12373_v2 = vcombine.low %v18248_v53, %v17942_v18  ;;  %v18255_v19 = vsel %vm16139_vm6, %v9218_v40, %v9219_v11  ;;  %v18259_v12 = vsel %vm16139_vm6, %v9221_v34, %v9222_v50  ;;  %v9231_v45 = vrot.slane %v9229_v55, 4  ;;  %v14405_v3 = vld [vmem:[%s17873_s17 + $0x30] sm:$0xff]   ;;  %v18300_v50 = vld [vmem:[%s17873_s17 + $0x2c] sm:$0xf] }
 0x611   : >> { %v12350_v28 = vcombine.low %v18024_v37, %v18033_v42  ;;  %v18268_v36 = vsel %vm16139_vm6, %v9224_v54, %v9225_v43  ;;  %v18275_v37 = vsel %vm16139_vm6, %v12366_v25, %v9229_v55  ;;  %v9232_v42 = vrot.slane %v18040_v15, 5  ;;  %v18338_v55 = vld [vmem:[%s17873_s17 + $0x30] sm:$0xf] }
 0x612   : >> { %v9235_v13 = vrot.slane %v18052_v63, 5  ;;  %v12351_v52 = vcombine.low %v18040_v15, %v18052_v63  ;;  %v9238_v31 = vrot.slane %v18058_v20, 5  ;;  %v12364_v11 = vrot.slane %v9186_v30, 9  ;;  %v14412_v15 = vld [vmem:[%s18721_s4 + $0x78] sm:$0xff]  }
 0x613   : >> { %13567 = vmatpush3.bf16.msra.mxu1 %v14401_v39  ;;  %v18282_v17 = vsel %vm16139_vm6, %v9231_v45, %v9232_v42  ;;  %v9234_v41 = vrot.slane %v9232_v42, 4  ;;  %v12352_v39 = vcombine.low %v18064_v51, %v18072_v26  ;;  %v9205_v59 = vrot.slane %v9203_v57, 4  ;;  %v12547_v30 = vld [vmem:[%s17873_s17 + $0x3c] sm:$0xf] }
 0x614   : >> { %13584 = vmatprep.subr.bf16.mxu1 %v18236_v0  ;;  %v9237_v35 = vrot.slane %v9235_v13, 4  ;;  %v10508_v20 = vshrl.u32 %v12542_v10, 16  ;;  %v10511_v51 = vshll.u32 %v12542_v10, 16  ;;  %v10517_v16 = vshll.u32 %v18300_v50, 16  ;;  %v18355_v10 = vld [vmem:[%s17873_s17 + $0x40] sm:$0xf] }
 0x615   : >> { %v18304_v24 = vsel %vm16139_vm6, %v9234_v41, %v9235_v13  ;;  %v9204_v40 = vsel %vm16139_vm6, %v12364_v11, %v9203_v57  ;;  %v9207_v34 = vsel %vm16139_vm6, %v9205_v59, %v9206_v22  ;;  %v10521_v54 = vshrl.u32 %v18300_v50, 16 }
 0x616   : >> { %13553 = vmatmul.mubr.msk.bf16.gmra.mrb[4].mxu1 %vm8891_vm3, %v12349_v46  ;;  %13641 = vmatmul.mubr.msk.bf16.gmra.mrb[12].mxu0 %vm8891_vm3, %v12491_v4  ;;  %v18311_v63 = vsel %vm16139_vm6, %v9237_v35, %v9238_v31  ;;  %v18728_v46 = vrot.slane %v18082_v56, 5  ;;  %v12353_v25 = vcombine.low %v18082_v56, %v18103_v60  ;;  %v12372_v22 = vcombine.low %v9204_v40, %v9207_v34  ;;  %v14411_v4 = vld [vmem:[%s17873_s17 + $0x50] sm:$0xff]  }
 0x617   : >> { %13556 = vmatprep.mubr.msk.bf16.mxu1 %vm8891_vm3, %v12350_v28  ;;  %13648 = vmatprep.mubr.msk.bf16.mxu0 %vm8891_vm3, %v14402_v29  ;;  %v18342_v28 = vld [vmem:[%s17873_s17 + $0x34] sm:$0xf]  ;;  %v10510_v29 = vrot.slane %v10508_v20, 4  ;;  %v10513_v45 = vrot.slane %v10511_v51, 5  ;;  %v18344_v42 = vrot.slane %v10517_v16, 5  ;;  %v10523_v57 = vrot.slane %v10521_v54, 4 }
 0x618   : >> { %v9247_v41 = vrot.slane %v18728_v46, 4  ;;  %v9248_v13 = vrot.slane %v18103_v60, 5  ;;  %v10537_v31 = vshll.u32 %v18342_v28, 16  ;;  %v10552_v35 = vshrl.u32 %v12547_v30, 16  ;;  %v18378_v54 = vld [vmem:[%s17873_s17 + $0x44] sm:$0xf] }
 0x619   : >> { %v10514_v59 = vor.u32 %v10513_v45, %v10510_v29  ;;  %v10524_v20 = vor.u32 %v10523_v57, %v18344_v42  ;;  %v10561_v51 = vshll.u32 %v18355_v10, 16  ;;  %v10565_v16 = vshrl.u32 %v18355_v10, 16  ;;  %v18386_v45 = vld [vmem:[%s17873_s17 + $0x48] sm:$0xf]  ;;  %v14413_v57 = vld [vmem:[%s17873_s17 + $0x58] sm:$0xff]  }
 0x61a   : >> { %v18361_v11 = vsel %vm16139_vm6, %v9247_v41, %v9248_v13  ;;  %v9250_v60 = vrot.slane %v9248_v13, 4  ;;  %v10554_v13 = vrot.slane %v10552_v35, 4  ;;  %v10571_v9 = vshll.u32 %v18378_v54, 16  ;;  %v18401_v35 = vld [vmem:[%s17873_s17 + $0x54] sm:$0xf] }
 0x61b   : >> { %v10515_v41 = vrot.slane %v10514_v59, 4  ;;  %v10581_v43 = vshll.u32 %v18386_v45, 16  ;;  %v10585_v59 = vshrl.u32 %v18386_v45, 16  ;;  %v9189_v46 = vld [vmem:[%s17873_s17 + $0x3c] sm:$0xe] }
 0x61e   : >> { %13557 = vmatmul.mubr.msk.bf16.gmra.mrb[8].mxu1 %vm8891_vm3, %v12351_v52  ;;  %13649 = vmatmul.mubr.msk.bf16.vlgmr.msra.gmra.mrb[0].mxu0 %vm8891_vm3, %v14405_v3  ;;  %v9251_v52 = vrot.slane %v18107_v8, 5  ;;  %v10527_v3 = vshll.u32 %v18338_v55, 16  ;;  %v18366_v8 = vld [vmem:[%s17873_s17 + $0x38] sm:$0x1] }
 0x61f   : >> { %13665 = vmatpush3.bf16.msra.mxu0 %v18141_v32  ;;  %13560 = vmatprep.mubr.msk.bf16.mxu1 %vm8891_vm3, %v12352_v39  ;;  %v18332_v32 = vld [vmem:[%s18721_s4 + $0x80] sm:$0xff]   ;;  %v10531_v39 = vshrl.u32 %v18338_v55, 16  ;;  %v10547_v29 = vshll.u32 %v18366_v8, 16 }
 0x620   : >> { %13652 = vmatprep.mubr.msk.bf16.mxu0 %vm8891_vm3, %v14407_v6  ;;  %13666 = vmatprep.subr.bf16.mxu0 %v14412_v15  ;;  %v10541_v6 = vshrl.u32 %v18342_v28, 16  ;;  %v18375_v40 = vsel %vm16139_vm6, %v9250_v60, %v9251_v52  ;;  %v10529_v34 = vrot.slane %v10527_v3, 5  ;;  %v14416_v3 = vld [vmem:[%s18721_s4 + $0x38] sm:$0xff]   ;;  %v10525_v60 = vrot.slane %v10524_v20, 4 }
 0x621   : >> { %v18404_v20 = vrot.slane %v10547_v29, 5  ;;  %v10587_v29 = vrot.slane %v10585_v59, 4 }
 0x622   : >> { %v10530_v18 = vsel %vm15631_vm9, %v10525_v60, %v10529_v34  ;;  %v14415_v60 = vld [vmem:[%s17873_s17 + $0x6c] sm:$0xff]  }
 0x623   : >> { %13667 = vmatpush3.bf16.msra.mxu0 %v14412_v15  ;;  %v10555_v15 = vshll.u32 %v12547_v30, 16  ;;  %v14414_v30 = vld [vmem:[%s17873_s17 + $0x64] sm:$0xff]  }
 0x624   : >> { %13684 = vmatprep.subr.bf16.mxu0 %v18332_v32 }
 0x625   : >> { %v10557_v52 = vrot.slane %v10555_v15, 5 }
 0x626   : >> { %13561 = vmatmul.mubr.msk.bf16.gmra.mrb[12].mxu1 %vm8891_vm3, %v12353_v25  ;;  %13653 = vmatmul.mubr.msk.bf16.gmra.mrb[4].mxu0 %vm8891_vm3, %v14409_v48  ;;  %v10533_v48 = vrot.slane %v10531_v39, 4  ;;  %v18393_v39 = vrot.slane %v10561_v51, 5  ;;  %v10575_v25 = vshrl.u32 %v18378_v54, 16  ;;  %v9242_v51 = vrot.slane %v18072_v26, 5 }
 0x627   : >> { %13568 = vmatprep.mubr.msk.bf16.mxu1 %vm8891_vm3, %v12372_v22  ;;  %13656 = vmatprep.mubr.msk.bf16.mxu0 %vm8891_vm3, %v14411_v4  ;;  %v18382_v22 = vrot.slane %v10537_v31, 5  ;;  %v10543_v4 = vrot.slane %v10541_v6, 4  ;;  %v10567_v31 = vrot.slane %v10565_v16, 4  ;;  %v12552_v6 = vld [vmem:[%s17873_s17 + $0x50] sm:$0xf]  ;;  %v10520_v16 = vsel %vm15631_vm9, %v10515_v41, %v18344_v42 }
 0x628   : >> { %v10534_v15 = vor.u32 %v10533_v48, %v10529_v34  ;;  %v10558_v33 = vor.u32 %v10557_v52, %v10554_v13  ;;  %v10596_v48 = vshrl.u32 %v12552_v6, 16  ;;  %v10599_v21 = vshll.u32 %v12552_v6, 16  ;;  %v18433_v52 = vld [vmem:[%s17873_s17 + $0x58] sm:$0xf] }
 0x629   : >> { %v10544_v38 = vor.u32 %v10543_v4, %v18382_v22  ;;  %v18763_v26 = vcombine.low %v18240_v49, %v18255_v19  ;;  %v10568_v53 = vor.u32 %v10567_v31, %v18393_v39  ;;  %v10605_v42 = vshll.u32 %v18401_v35, 16 }
 0x62a   : >> { %v10609_v4 = vshrl.u32 %v18401_v35, 16  ;;  %v10577_v49 = vrot.slane %v10575_v25, 4  ;;  %v18430_v19 = vrot.slane %v10581_v43, 5  ;;  %v12367_v34 = vrot.slane %v9189_v46, 9  ;;  %v18443_v46 = vld [vmem:[%s18721_s4 + $0x40] sm:$0xff]  }
 0x62b   : >> { %v10545_v41 = vrot.slane %v10544_v38, 4  ;;  %v9244_v13 = vrot.slane %v9242_v51, 4  ;;  %v10559_v31 = vrot.slane %v10558_v33, 4  ;;  %v10601_v5 = vrot.slane %v10599_v21, 5  ;;  %v18448_v33 = vld [vmem:[%s17873_s17 + $0x5c] sm:$0xf] }
 0x62c   : >> { %v18437_v25 = vrot.slane %v10605_v42, 5  ;;  %v10611_v43 = vrot.slane %v10609_v4, 4  ;;  %v10588_v38 = vor.u32 %v10587_v29, %v18430_v19  ;;  %v10615_v21 = vshll.u32 %v18433_v52, 16 }
 0x62d   : >> { %v10625_v29 = vshll.u32 %v18448_v33, 16 }
 0x62e   : >> { %13569 = vmatmul.mubr.msk.bf16.vlgmr.msra.gmra.mrb[0].mxu1 %vm8891_vm3, %v12373_v2  ;;  %13657 = vmatmul.mubr.msk.bf16.gmra.mrb[8].mxu0 %vm8891_vm3, %v14413_v57  ;;  %v18425_v2 = vld [vmem:[%s17873_s17 + $0x4c] sm:$0x1]  ;;  %v10535_v57 = vrot.slane %v10534_v15, 4 }
 0x62f   : >> { %13585 = vmatpush3.bf16.msra.mxu1 %v18236_v0  ;;  %13572 = vmatprep.mubr.msk.bf16.mxu1 %vm8891_vm3, %v18763_v26  ;;  %v10573_v0 = vrot.slane %v10571_v9, 5  ;;  %v10591_v6 = vshll.u32 %v18425_v2, 16  ;;  %v10598_v26 = vrot.slane %v10596_v48, 4  ;;  %v10569_v9 = vrot.slane %v10568_v53, 4 }
 0x630   : >> { %13660 = vmatprep.mubr.msk.bf16.mxu0 %vm8891_vm3, %v14414_v30  ;;  %13586 = vmatprep.subr.bf16.mxu1 %v14416_v3  ;;  %v12566_v30 = vcombine.low %v10520_v16, %v10530_v18  ;;  %v10540_v15 = vsel %vm15631_vm9, %v10535_v57, %v18382_v22  ;;  %v10550_v16 = vsel %vm15631_vm9, %v10545_v41, %v18404_v20  ;;  %v18765_v53 = vrot.slane %v18082_v56, 5 }
 0x631   : >> { %v10578_v59 = vor.u32 %v10577_v49, %v10573_v0  ;;  %v9243_v48 = vsel %vm16139_vm6, %v12367_v34, %v9242_v51  ;;  %v18764_v18 = vcombine.low %v18259_v12, %v18268_v36  ;;  %v10564_v22 = vsel %vm15631_vm9, %v10559_v31, %v18393_v39  ;;  %v12557_v51 = vld [vmem:[%s17873_s17 + $0x64] sm:$0xf]  ;;  %v18473_v49 = vld [vmem:[%s17873_s17 + $0x68] sm:$0xf] }
 0x632   : >> { %v9246_v42 = vsel %vm16139_vm6, %v9244_v13, %v18765_v53  ;;  %v10593_v20 = vrot.slane %v10591_v6, 5  ;;  %v10602_v4 = vor.u32 %v10601_v5, %v10598_v26  ;;  %v18766_v12 = vcombine.low %v18275_v37, %v18282_v17  ;;  %v18486_v13 = vld [vmem:[%s17873_s17 + $0x60] sm:$0x1] }
 0x633   : >> { %13587 = vmatpush3.bf16.msra.mxu1 %v14416_v3  ;;  %v10619_v3 = vshrl.u32 %v18433_v52, 16  ;;  %v10574_v56 = vsel %vm15631_vm9, %v10569_v9, %v10573_v0  ;;  %v10612_v36 = vor.u32 %v10611_v43, %v18437_v25  ;;  %v10629_v39 = vshrl.u32 %v18448_v33, 16 }
 0x634   : >> { %14094 = vmatprep.subr.bf16.mxu1 %v18443_v46  ;;  %v10579_v5 = vrot.slane %v10578_v59, 4  ;;  %v10589_v57 = vrot.slane %v10588_v38, 4  ;;  %v10617_v41 = vrot.slane %v10615_v21, 5  ;;  %v10640_v37 = vshrl.u32 %v12557_v51, 16  ;;  %v18493_v38 = vld [vmem:[%s17873_s17 + $0x6c] sm:$0xf] }
 0x635   : >> { %v10621_v34 = vrot.slane %v10619_v3, 4  ;;  %v10643_v17 = vshll.u32 %v12557_v51, 16  ;;  %v10653_v0 = vshrl.u32 %v18473_v49, 16  ;;  %v12567_v31 = vcombine.low %v10540_v15, %v10550_v16  ;;  %v14419_v15 = vld [vmem:[%s18721_s4 + $0x88] sm:$0xff]  }
 0x636   : >> { %13573 = vmatmul.mubr.msk.bf16.gmra.mrb[4].mxu1 %vm8891_vm3, %v18764_v18  ;;  %13661 = vmatmul.mubr.msk.bf16.gmra.mrb[12].mxu0 %vm8891_vm3, %v14415_v60  ;;  %v10649_v60 = vshll.u32 %v18473_v49, 16  ;;  %v12378_v6 = vcombine.low %v9243_v48, %v9246_v42  ;;  %v10603_v26 = vrot.slane %v10602_v4, 4  ;;  %v10613_v9 = vrot.slane %v10612_v36, 4  ;;  %v18505_v18 = vld [vmem:[%s17873_s17 + $0x70] sm:$0xf] }
 0x637   : >> { %13576 = vmatprep.mubr.msk.bf16.mxu1 %vm8891_vm3, %v18766_v12  ;;  %13668 = vmatprep.mubr.msk.bf16.mxu0 %vm8891_vm3, %v12566_v30  ;;  %v12568_v30 = vcombine.low %v10564_v22, %v10574_v56  ;;  %v18490_v43 = vrot.slane %v10625_v29, 5  ;;  %v10631_v59 = vrot.slane %v10629_v39, 4  ;;  %v10584_v21 = vsel %vm15631_vm9, %v10579_v5, %v18430_v19 }
 0x638   : >> { %v10594_v3 = vsel %vm15631_vm9, %v10589_v57, %v10593_v20  ;;  %v10622_v16 = vor.u32 %v10621_v34, %v10617_v41  ;;  %v10635_v48 = vshll.u32 %v18486_v13, 16  ;;  %v10642_v53 = vrot.slane %v10640_v37, 4 }
 0x639   : >> { %v10645_v42 = vrot.slane %v10643_v17, 5  ;;  %v10651_v22 = vrot.slane %v10649_v60, 5  ;;  %v10655_v4 = vrot.slane %v10653_v0, 4  ;;  %v18767_v51 = vcombine.low %v18304_v24, %v18311_v63  ;;  %v14418_v17 = vld [vmem:[%s17873_s17 + $0x14] sm:$0xff]  }
 0x63a   : >> { %v10608_v19 = vsel %vm15631_vm9, %v10603_v26, %v18437_v25  ;;  %v10659_v20 = vshll.u32 %v18493_v38, 16  ;;  %v10663_v12 = vshrl.u32 %v18493_v38, 16  ;;  %v10618_v24 = vsel %vm15631_vm9, %v10613_v9, %v10617_v41  ;;  %v18529_v26 = vld [vmem:[%s17873_s17 + $0x74] sm:$0x1] }
 0x63b   : >> { %v10632_v63 = vor.u32 %v10631_v59, %v18490_v43  ;;  %v10669_v56 = vshll.u32 %v18505_v18, 16  ;;  %v10673_v36 = vshrl.u32 %v18505_v18, 16  ;;  %v12569_v25 = vcombine.low %v10584_v21, %v10594_v3 }
 0x63c   : >> { %v10623_v29 = vrot.slane %v10622_v16, 4  ;;  %v10637_v39 = vrot.slane %v10635_v48, 5  ;;  %v10656_v5 = vor.u32 %v10655_v4, %v10651_v22  ;;  %v12570_v57 = vcombine.low %v10608_v19, %v10618_v24  ;;  %v12584_v16 = vld [vmem:[%s17873_s17 + $0x28] sm:$0xe]  ;;  %v14420_v19 = vld [vmem:[%s17873_s17 + $0x1c] sm:$0xff]  }
 0x63d   : >> { %v10661_v34 = vrot.slane %v10659_v20, 5  ;;  %v10665_v37 = vrot.slane %v10663_v12, 4  ;;  %v9773_v41 = vshll.u32 %v18132_v7, 16  ;;  %v10633_v60 = vrot.slane %v10632_v63, 4 }
 0x63e   : >> { %13577 = vmatmul.mubr.msk.bf16.gmra.mrb[8].mxu1 %vm8891_vm3, %v18767_v51  ;;  %13669 = vmatmul.mubr.msk.bf16.vlgmr.msra.gmra.mrb[0].mxu0 %vm8891_vm3, %v12567_v31  ;;  %v10671_v0 = vrot.slane %v10669_v56, 5  ;;  %v10675_v31 = vrot.slane %v10673_v36, 4  ;;  %v10657_v59 = vrot.slane %v10656_v5, 4  ;;  %v18768_v3 = vcombine.low %v18361_v11, %v18375_v40  ;;  %v14421_v56 = vld [vmem:[%s17873_s17 + $0x28] sm:$0xff]  }
 0x63f   : >> { %13685 = vmatpush3.bf16.msra.mxu0 %v18332_v32  ;;  %13580 = vmatprep.mubr.msk.bf16.mxu1 %vm8891_vm3, %v12378_v6  ;;  %v10646_v32 = vor.u32 %v10645_v42, %v10642_v53  ;;  %v9777_v6 = vshrl.u32 %v18132_v7, 16  ;;  %v10666_v7 = vor.u32 %v10665_v37, %v10661_v34  ;;  %v10887_v48 = vrot.slane %v18300_v50, 5  ;;  %v12585_v37 = vld [vmem:[%s17873_s17 + $0x3c] sm:$0xe] }
 0x640   : >> { %13672 = vmatprep.mubr.msk.bf16.mxu0 %vm8891_vm3, %v12568_v30  ;;  %13686 = vmatprep.subr.bf16.mxu0 %v14419_v15  ;;  %v18531_v30 = vrot.slane %v9773_v41, 5  ;;  %v10638_v11 = vsel %vm15631_vm9, %v10633_v60, %v10637_v39  ;;  %v10676_v40 = vor.u32 %v10675_v31, %v10671_v0  ;;  %v10679_v53 = vshll.u32 %v18529_v26, 16 }
 0x641   : >> { %v10647_v9 = vrot.slane %v10646_v32, 4  ;;  %v9779_v21 = vrot.slane %v9777_v6, 4  ;;  %v10662_v50 = vsel %vm15631_vm9, %v10657_v59, %v10661_v34  ;;  %v12588_v4 = vrot.slane %v12584_v16, 9  ;;  %v14422_v59 = vld [vmem:[%s17873_s17 + $0x30] sm:$0xff]  }
 0x642   : >> { %v10667_v12 = vrot.slane %v10666_v7, 4  ;;  %v10889_v24 = vrot.slane %v10887_v48, 4  ;;  %v10890_v63 = vrot.slane %v18338_v55, 5  ;;  %v10677_v36 = vrot.slane %v10676_v40, 4 }
 0x643   : >> { %13687 = vmatpush3.bf16.msra.mxu0 %v14419_v15  ;;  %v10628_v15 = vsel %vm15631_vm9, %v10623_v29, %v18490_v43  ;;  %v9780_v42 = vor.u32 %v9779_v21, %v18531_v30  ;;  %v10652_v43 = vsel %vm15631_vm9, %v10647_v9, %v10651_v22  ;;  %v12440_v29 = vld [vmem:[%s17873_s17 + $0x3c] sm:$0xf]  ;;  %v18769_v32 = vsel %vm15631_vm9, %v18193_v1, %v18180_v61 }
 0x644   : >> { %v12571_v20 = vcombine.low %v10628_v15, %v10638_v11  ;;  %v12572_v39 = vcombine.low %v10652_v43, %v10662_v50  ;;  %v10893_v55 = vrot.slane %v18342_v28, 5  ;;  %v10891_v34 = vsel %vm16139_vm6, %v10889_v24, %v10890_v63  ;;  %v12586_v50 = vld [vmem:[%s17873_s17 + $0x50] sm:$0xe] }
 0x645   : >> { %v9781_v51 = vrot.slane %v9780_v42, 4  ;;  %v9754_v61 = vshrl.u32 %v12440_v29, 16  ;;  %v9757_v1 = vshll.u32 %v12440_v29, 16  ;;  %v10900_v41 = vrot.slane %v18355_v10, 5  ;;  %v14424_v29 = vld [vmem:[%s17873_s17 + $0x44] sm:$0xff]  }
 0x646   : >> { %13581 = vmatmul.mubr.msk.bf16.gmra.mrb[12].mxu1 %vm8891_vm3, %v18768_v3  ;;  %13673 = vmatmul.mubr.msk.bf16.gmra.mrb[4].mxu0 %vm8891_vm3, %v12569_v25  ;;  %v10681_v25 = vrot.slane %v10679_v53, 5  ;;  %v9767_v60 = vshrl.u32 %v18129_v14, 16  ;;  %v10895_v31 = vrot.slane %v10893_v55, 4  ;;  %v10896_v6 = vrot.slane %v18366_v8, 5  ;;  %v12445_v53 = vld [vmem:[%s17873_s17 + $0x50] sm:$0xf] }
 0x647   : >> { %13588 = vmatprep.mubr.msk.bf16.mxu1 %vm8891_vm3, %v14418_v17  ;;  %13676 = vmatprep.mubr.msk.bf16.mxu0 %vm8891_vm3, %v12570_v57  ;;  %v9786_v22 = vsel %vm15631_vm9, %v9781_v51, %v18163_v62  ;;  %v10888_v57 = vsel %vm16139_vm6, %v12588_v4, %v10887_v48  ;;  %v10672_v62 = vsel %vm15631_vm9, %v10667_v12, %v10671_v0  ;;  %v9763_v17 = vshll.u32 %v18129_v14, 16  ;;  %v14428_v0 = vld [vmem:[%s18721_s4 + $0x48] sm:$0xff]   ;;  %v14423_v14 = vld [vmem:[%s17873_s17 + $0x3c] sm:$0xff]  }
 0x648   : >> { %v18565_v5 = vcombine.low %v9786_v22, %v18769_v32  ;;  %v10682_v28 = vsel %vm15631_vm9, %v10677_v36, %v10681_v25  ;;  %v12589_v9 = vrot.slane %v12585_v37, 9  ;;  %v12596_v10 = vcombine.low %v10888_v57, %v10891_v34  ;;  %v14425_v57 = vld [vmem:[%s17873_s17 + $0x50] sm:$0xff]  }
 0x649   : >> { %v12573_v21 = vcombine.low %v10672_v62, %v10682_v28  ;;  %v9756_v3 = vrot.slane %v9754_v61, 4  ;;  %v9759_v15 = vrot.slane %v9757_v1, 5  ;;  %v10902_v7 = vrot.slane %v10900_v41, 4 }
 0x64a   : >> { %v10903_v16 = vrot.slane %v18378_v54, 5  ;;  %v9765_v48 = vrot.slane %v9763_v17, 5  ;;  %v9769_v11 = vrot.slane %v9767_v60, 4  ;;  %v10906_v40 = vrot.slane %v18386_v45, 5 }
 0x64b   : >> { %v10897_v42 = vsel %vm16139_vm6, %v10895_v31, %v10896_v6  ;;  %v9760_v43 = vor.u32 %v9759_v15, %v9756_v3  ;;  %v10913_v54 = vrot.slane %v18401_v35, 5  ;;  %v10901_v45 = vsel %vm16139_vm6, %v12589_v9, %v10900_v41 }
 0x64c   : >> { %v10904_v4 = vsel %vm16139_vm6, %v10902_v7, %v10903_v16  ;;  %v9770_v51 = vor.u32 %v9769_v11, %v9765_v48  ;;  %v9807_v12 = vshll.u32 %v18166_v27, 16  ;;  %v9811_v24 = vshrl.u32 %v18166_v27, 16  ;;  %v14426_v7 = vld [vmem:[%s17873_s17 + $0x58] sm:$0xff]  }
 0x64d   : >> { %v10908_v35 = vrot.slane %v10906_v40, 4  ;;  %v12590_v36 = vrot.slane %v12586_v50, 9  ;;  %v9761_v22 = vrot.slane %v9760_v43, 4  ;;  %v10916_v32 = vrot.slane %v18433_v52, 5 }
 0x64e   : >> { %13589 = vmatmul.mubr.msk.bf16.vlgmr.msra.gmra.mrb[0].mxu1 %vm8891_vm3, %v14420_v19  ;;  %13677 = vmatmul.mubr.msk.bf16.gmra.mrb[8].mxu0 %vm8891_vm3, %v12571_v20  ;;  %v9798_v19 = vshrl.u32 %v12445_v53, 16  ;;  %v9801_v20 = vshll.u32 %v12445_v53, 16  ;;  %v9771_v62 = vrot.slane %v9770_v51, 4  ;;  %v9809_v61 = vrot.slane %v9807_v12, 5 }
 0x64f   : >> { %14096 = vmatpush3.bf16.msra.mxu1 %v18443_v46  ;;  %13592 = vmatprep.mubr.msk.bf16.mxu1 %vm8891_vm3, %v14421_v56  ;;  %v10892_v46 = vrot.slane %v10890_v63, 4  ;;  %v10905_v63 = vrot.slane %v10903_v16, 4  ;;  %v10909_v56 = vrot.slane %v18425_v2, 5  ;;  %v9813_v1 = vrot.slane %v9811_v24, 4 }
 0x650   : >> { %13680 = vmatprep.mubr.msk.bf16.mxu0 %vm8891_vm3, %v12572_v39  ;;  %14095 = vmatprep.subr.bf16.mxu1 %v14428_v0  ;;  %v10915_v39 = vrot.slane %v10913_v54, 4  ;;  %v9800_v34 = vrot.slane %v9798_v19, 4  ;;  %v9803_v37 = vrot.slane %v9801_v20, 5  ;;  %v10914_v28 = vsel %vm16139_vm6, %v12590_v36, %v10913_v54  ;;  %v18770_v54 = vld [vmem:[#allocation7_spill] sm:$0xff] }
 0x651   : >> { %v10894_v8 = vsel %vm16139_vm6, %v10892_v46, %v10893_v55  ;;  %v12598_v55 = vcombine.low %v10901_v45, %v10904_v4  ;;  %v10907_v27 = vsel %vm16139_vm6, %v10905_v63, %v10906_v40  ;;  %v10910_v2 = vsel %vm16139_vm6, %v10908_v35, %v10909_v56  ;;  %v12587_v46 = vld [vmem:[%s17873_s17 + $0x64] sm:$0xe]  ;;  %s12704_s17 = sshll.u32 %s14467_s9, 6  ;;  %s8642_s9 = sadd.s32 1, %s14467_s9  }
 0x652   : >> { %v12597_v25 = vcombine.low %v10894_v8, %v10897_v42  ;;  %v10919_v41 = vrot.slane %v18448_v33, 5  ;;  %v9766_v52 = vsel %vm15631_vm9, %v9761_v22, %v9765_v48  ;;  %v10917_v17 = vsel %vm16139_vm6, %v10915_v39, %v10916_v32  ;;  %s18677_s8 = scalar_lea.vmem %s15546_s25, %s12704_s17  ;;  %p8639_p7 = scmp.ge.s32.totalorder %s8642_s9, 8  }
 0x653   : >> { %14097 = vmatpush3.bf16.msra.mxu1 %v14428_v0  ;;  %v9817_v60 = vshll.u32 %v18172_v47, 16  ;;  %v9821_v0 = vshrl.u32 %v18172_v47, 16  ;;  %v9776_v33 = vsel %vm15631_vm9, %v9771_v62, %v18531_v30  ;;  %v10926_v31 = vrot.slane %v18473_v49, 5 }
 0x654   : >> { %v9827_v6 = vshll.u32 %v18175_v23, 16  ;;  %v9831_v9 = vshrl.u32 %v18175_v23, 16  ;;  %v12600_v3 = vcombine.low %v10914_v28, %v10917_v17  ;;  %v10918_v47 = vrot.slane %v10916_v32, 4 }
 0x655   : >> { %v10921_v15 = vrot.slane %v10919_v41, 4  ;;  %v12458_v16 = vcombine.low %v9766_v52, %v9776_v33  ;;  %v9819_v48 = vrot.slane %v9817_v60, 5  ;;  %v12591_v11 = vrot.slane %v12587_v46, 9 }
 0x656   : >> { %13593 = vmatmul.mubr.msk.bf16.gmra.mrb[4].mxu1 %vm8891_vm3, %v14422_v59  ;;  %13681 = vmatmul.mubr.msk.bf16.gmra.mrb[12].mxu0 %vm8891_vm3, %v12573_v21  ;;  %v12599_v59 = vcombine.low %v10907_v27, %v10910_v2  ;;  %v9804_v21 = vor.u32 %v9803_v37, %v9800_v34  ;;  %v9823_v30 = vrot.slane %v9821_v0, 4  ;;  %v10928_v40 = vrot.slane %v10926_v31, 4 }
 0x657   : >> { %13596 = vmatprep.mubr.msk.bf16.mxu1 %vm8891_vm3, %v14423_v14  ;;  %13688 = vmatprep.mubr.msk.bf16.mxu0 %vm8891_vm3, %v12596_v10  ;;  %v9814_v10 = vor.u32 %v9813_v1, %v9809_v61  ;;  %v10922_v14 = vrot.slane %v18486_v13, 5  ;;  %v10929_v49 = vrot.slane %v18493_v38, 5  ;;  %v9829_v53 = vrot.slane %v9827_v6, 5 }
 0x658   : >> { %v9833_v8 = vrot.slane %v9831_v9, 4  ;;  %v9805_v42 = vrot.slane %v9804_v21, 4  ;;  %v10920_v43 = vsel %vm16139_vm6, %v10918_v47, %v10919_v41  ;;  %v9824_v50 = vor.u32 %v9823_v30, %v9819_v48 }
 0x659   : >> { %v9815_v23 = vrot.slane %v9814_v10, 4  ;;  %v10923_v13 = vsel %vm16139_vm6, %v10921_v15, %v10922_v14  ;;  %v9837_v45 = vshll.u32 %v18770_v54, 16  ;;  %v10927_v38 = vsel %vm16139_vm6, %v12591_v11, %v10926_v31 }
 0x65a   : >> { %v10930_v4 = vsel %vm16139_vm6, %v10928_v40, %v10929_v49  ;;  %v9834_v51 = vor.u32 %v9833_v8, %v9829_v53  ;;  %v10932_v19 = vrot.slane %v18505_v18, 5  ;;  %v9810_v20 = vsel %vm15631_vm9, %v9805_v42, %v9809_v61 }
 0x65b   : >> { %v9820_v12 = vsel %vm15631_vm9, %v9815_v23, %v9819_v48  ;;  %v12601_v24 = vcombine.low %v10920_v43, %v10923_v13  ;;  %v12602_v63 = vcombine.low %v10927_v38, %v10930_v4  ;;  %v9825_v35 = vrot.slane %v9824_v50, 4 }
 0x65c   : >> { %v9839_v56 = vrot.slane %v9837_v45, 5  ;;  %v10931_v36 = vrot.slane %v10929_v49, 4  ;;  %v10934_v22 = vrot.slane %v10932_v19, 4  ;;  %v10935_v39 = vrot.slane %v18529_v26, 5 }
 0x65d   : >> { %v9830_v18 = vsel %vm15631_vm9, %v9825_v35, %v9829_v53 }
 0x65e   : >> { %13597 = vmatmul.mubr.msk.bf16.gmra.mrb[8].mxu1 %vm8891_vm3, %v14424_v29  ;;  %13689 = vmatmul.mubr.msk.bf16.vlgmr.msra.gmra.mrb[0].mxu0 %vm8891_vm3, %v12597_v25  ;;  %v12460_v25 = vcombine.low %v9810_v20, %v9820_v12  ;;  %v9835_v29 = vrot.slane %v9834_v51, 4  ;;  %v10936_v26 = vsel %vm16139_vm6, %v10934_v22, %v10935_v39 }
 0x65f   : >> { %13600 = vmatprep.mubr.msk.bf16.mxu1 %vm8891_vm3, %v14425_v57  ;;  %13692 = vmatprep.mubr.msk.bf16.mxu0 %vm8891_vm3, %v12598_v55  ;;  %v10933_v57 = vsel %vm16139_vm6, %v10931_v36, %v10932_v19 }
 0x660   : >> { %v9840_v32 = vsel %vm15631_vm9, %v9835_v29, %v9839_v56  ;;  %v12603_v55 = vcombine.low %v10933_v57, %v10936_v26 }
 0x666   : >> { %13601 = vmatmul.mubr.msk.bf16.gmra.mrb[12].mxu1 %vm8891_vm3, %v14426_v7  ;;  %13693 = vmatmul.mubr.msk.bf16.gmra.mrb[4].mxu0 %vm8891_vm3, %v12599_v59 }
 0x667   : >> { %13616 = vmatprep.mubr.msk.bf16.mxu1 %vm8891_vm3, %v12458_v16  ;;  %13696 = vmatprep.mubr.msk.bf16.mxu0 %vm8891_vm3, %v12600_v3 }
 0x66e   : >> { %13617 = vmatmul.mubr.msk.bf16.vlgmr.msra.gmra.mrb[8].mxu1 %vm8891_vm3, %v18565_v5  ;;  %13697 = vmatmul.mubr.msk.bf16.gmra.mrb[8].mxu0 %vm8891_vm3, %v12601_v24  ;;  %v12461_v5 = vcombine.low %v9830_v18, %v9840_v32 }
 0x66f   : >> { %13620 = vmatprep.mubr.msk.bf16.mxu1 %vm8891_vm3, %v12460_v25  ;;  %13700 = vmatprep.mubr.msk.bf16.mxu0 %vm8891_vm3, %v12602_v63 }
 0x676   : >> { %13621 = vmatmul.mubr.msk.bf16.gmra.mrb[12].mxu1 %vm8891_vm3, %v12461_v5  ;;  %13701 = vmatmul.mubr.msk.bf16.gmra.mrb[12].mxu0 %vm8891_vm3, %v12603_v55 }
 0x721   : >> { %v13590_v62 = vpop.f32.mrb[0].mxu1 }
 0x722   : >> { %v9566_v34 = vpop.f32.mrb[1].mxu1 }
 0x723   : >> { %v13591_v37 = vpop.f32.mrb[2].mxu1 }
 0x724   : >> { %v9569_v61 = vpop.f32.mrb[3].mxu1 }
 0x729   : >> { %v13594_v1 = vpop.f32.mrb[4].mxu1 }
 0x72a   : >> { %v9582_v27 = vpop.f32.mrb[5].mxu1 }
 0x72b   : >> { %v13595_v2 = vpop.f32.mrb[6].mxu1 }
 0x72c   : >> { %v9585_v28 = vpop.f32.mrb[7].mxu1 }
 0x731   : >> { %v13690_v41 = vpop.f32.mrb[0].mxu0 }
 0x732   : >> { %v14098_v52 = vadd.f32 %v13690_v41, %v13590_v62  ;;  %v11036_v17 = vpop.f32.mrb[1].mxu0 }
 0x733   : >> { %v14099_v60 = vadd.f32 %v11036_v17, %v9566_v34  ;;  %v13691_v0 = vpop.f32.mrb[2].mxu0 }
 0x734   : >> { %v11117_v33 = vmax.f32 %v14098_v52, 0.0  ;;  %v14100_v46 = vadd.f32 %v13691_v0, %v13591_v37  ;;  %v11039_v31 = vpop.f32.mrb[3].mxu0 }
 0x735   : >> { %v11115_v6 = vmax.f32 %v14099_v60, 0.0  ;;  %v14101_v9 = vadd.f32 %v11039_v31, %v9569_v61 }
 0x736   : >> { %v12689_v59 = vpack.c.bf16 %v11117_v33, %v11117_v33  ;;  %v11118_v21 = vmax.f32 %v14100_v46, 0.0 }
 0x737   : >> { %v12687_v10 = vpack.c.bf16 %v11115_v6, %v11115_v6  ;;  %v11116_v3 = vmax.f32 %v14101_v9, 0.0 }
 0x738   : >> { %11200 = vst.msk [vmem:[%s18677_s8 + $0x8] sm:$0xf] %vm568_vm2, %v12689_v59  ;;  %v12690_v47 = vpack.c.bf16 %v11118_v21, %v11118_v21 }
 0x739   : >> { %11198 = vst.msk [vmem:[%s18677_s8] sm:$0xf] %vm568_vm2, %v12687_v10  ;;  %v12688_v15 = vpack.c.bf16 %v11116_v3, %v11116_v3  ;;  %v13694_v14 = vpop.f32.mrb[4].mxu0 }
 0x73a   : >> { %11201 = vst.msk [vmem:[%s18677_s8 + $0xc] sm:$0xf] %vm568_vm2, %v12690_v47  ;;  %v14102_v7 = vadd.f32 %v13694_v14, %v13594_v1  ;;  %v11052_v16 = vpop.f32.mrb[5].mxu0 }
 0x73b   : >> { %11199 = vst.msk [vmem:[%s18677_s8 + $0x4] sm:$0xf] %vm568_vm2, %v12688_v15  ;;  %v14103_v48 = vadd.f32 %v11052_v16, %v9582_v27  ;;  %v13695_v11 = vpop.f32.mrb[6].mxu0 }
 0x73c   : >> { %v11121_v30 = vmax.f32 %v14102_v7, 0.0  ;;  %v14104_v40 = vadd.f32 %v13695_v11, %v13595_v2  ;;  %v11055_v49 = vpop.f32.mrb[7].mxu0 }
 0x73d   : >> { %v11119_v53 = vmax.f32 %v14103_v48, 0.0  ;;  %v14105_v8 = vadd.f32 %v11055_v49, %v9585_v28 }
 0x73e   : >> { %v12693_v42 = vpack.c.bf16 %v11121_v30, %v11121_v30  ;;  %v11122_v23 = vmax.f32 %v14104_v40, 0.0 }
 0x73f   : >> { %v12691_v43 = vpack.c.bf16 %v11119_v53, %v11119_v53  ;;  %v11120_v13 = vmax.f32 %v14105_v8, 0.0 }
 0x740   : >> { %11204 = vst.msk [vmem:[%s18677_s8 + $0x18] sm:$0xf] %vm568_vm2, %v12693_v42  ;;  %v12694_v50 = vpack.c.bf16 %v11122_v23, %v11122_v23 }
 0x741   : >> { %11202 = vst.msk [vmem:[%s18677_s8 + $0x10] sm:$0xf] %vm568_vm2, %v12691_v43  ;;  %v12692_v54 = vpack.c.bf16 %v11120_v13, %v11120_v13  ;;  %v13618_v45 = vpop.f32.mrb[8].mxu1  ;;  %v13698_v38 = vpop.f32.mrb[8].mxu0 }
 0x742   : >> { %11205 = vst.msk [vmem:[%s18677_s8 + $0x1c] sm:$0xf] %vm568_vm2, %v12694_v50  ;;  %v14106_v4 = vadd.f32 %v13698_v38, %v13618_v45  ;;  %v9972_v51 = vpop.f32.mrb[9].mxu1  ;;  %v11068_v19 = vpop.f32.mrb[9].mxu0 }
 0x743   : >> { %11203 = vst.msk [vmem:[%s18677_s8 + $0x14] sm:$0xf] %vm568_vm2, %v12692_v54  ;;  %v14107_v20 = vadd.f32 %v11068_v19, %v9972_v51  ;;  %v13619_v12 = vpop.f32.mrb[10].mxu1  ;;  %v13699_v24 = vpop.f32.mrb[10].mxu0 }
 0x744   : >> { %v11125_v63 = vmax.f32 %v14106_v4, 0.0  ;;  %v14108_v35 = vadd.f32 %v13699_v24, %v13619_v12  ;;  %v9975_v56 = vpop.f32.mrb[11].mxu1  ;;  %v11071_v36 = vpop.f32.mrb[11].mxu0 }
 0x745   : >> { %v11123_v25 = vmax.f32 %v14107_v20, 0.0  ;;  %v14109_v29 = vadd.f32 %v11071_v36, %v9975_v56 }
 0x746   : >> { %v12697_v22 = vpack.c.bf16 %v11125_v63, %v11125_v63  ;;  %v11126_v39 = vmax.f32 %v14108_v35, 0.0 }
 0x747   : >> { %v12695_v18 = vpack.c.bf16 %v11123_v25, %v11123_v25  ;;  %v11124_v32 = vmax.f32 %v14109_v29, 0.0 }
 0x748   : >> { %11208 = vst.msk [vmem:[%s18677_s8 + $0x28] sm:$0xf] %vm568_vm2, %v12697_v22  ;;  %v12698_v57 = vpack.c.bf16 %v11126_v39, %v11126_v39 }
 0x749   : >> { %11206 = vst.msk [vmem:[%s18677_s8 + $0x20] sm:$0xf] %vm568_vm2, %v12695_v18  ;;  %v12696_v26 = vpack.c.bf16 %v11124_v32, %v11124_v32  ;;  %v13622_v5 = vpop.f32.mrb[12].mxu1  ;;  %v13702_v55 = vpop.f32.mrb[12].mxu0 }
 0x74a   : >> { %11209 = vst.msk [vmem:[%s18677_s8 + $0x2c] sm:$0xf] %vm568_vm2, %v12698_v57  ;;  %v14110_v62 = vadd.f32 %v13702_v55, %v13622_v5  ;;  %v9988_v34 = vpop.f32.mrb[13].mxu1  ;;  %v11084_v37 = vpop.f32.mrb[13].mxu0 }
 0x74b   : >> { %11207 = vst.msk [vmem:[%s18677_s8 + $0x24] sm:$0xf] %vm568_vm2, %v12696_v26  ;;  %v14111_v61 = vadd.f32 %v11084_v37, %v9988_v34  ;;  %v13623_v1 = vpop.f32.mrb[14].mxu1  ;;  %v13703_v27 = vpop.f32.mrb[14].mxu0 }
 0x74c   : >> { %v11129_v2 = vmax.f32 %v14110_v62, 0.0  ;;  %v14112_v28 = vadd.f32 %v13703_v27, %v13623_v1  ;;  %v9991_v41 = vpop.f32.mrb[15].mxu1  ;;  %v11087_v52 = vpop.f32.mrb[15].mxu0 }
 0x74d   : >> { %v11127_v17 = vmax.f32 %v14111_v61, 0.0  ;;  %v14113_v60 = vadd.f32 %v11087_v52, %v9991_v41  ;;  %8641 = sbr.rel (!%p8639_p7) target bundleno = 1475 (0x5c3), region = 182 }
 0x74e   : >> { %v12701_v0 = vpack.c.bf16 %v11129_v2, %v11129_v2  ;;  %v11130_v33 = vmax.f32 %v14112_v28, 0.0 }
 0x74f   : >> { %v12699_v46 = vpack.c.bf16 %v11127_v17, %v11127_v17  ;;  %v11128_v31 = vmax.f32 %v14113_v60, 0.0 }
 0x750   : >> { %11212 = vst.msk [vmem:[%s18677_s8 + $0x38] sm:$0xf] %vm568_vm2, %v12701_v0  ;;  %v12702_v6 = vpack.c.bf16 %v11130_v33, %v11130_v33 }
 0x751   : >> { %11210 = vst.msk [vmem:[%s18677_s8 + $0x30] sm:$0xf] %vm568_vm2, %v12699_v46  ;;  %v12700_v9 = vpack.c.bf16 %v11128_v31, %v11128_v31 }
 0x752   : >> { %11213 = vst.msk [vmem:[%s18677_s8 + $0x3c] sm:$0xf] %vm568_vm2, %v12702_v6 }
 0x753   : >> { %11211 = vst.msk [vmem:[%s18677_s8 + $0x34] sm:$0xf] %vm568_vm2, %v12700_v9 }
 0x754 PF: > { %s15_s18 = sadd.s32 1, %s14451_s18  }
 0x755   : > { %p12_p8 = scmp.ge.s32.totalorder %s15_s18, 4  }
 0x757   :  { %14 = sbr.rel (!%p12_p8) target bundleno = 1 (0x1), region = 193 }

// kernel: forward.5
= control target key start
LH: loop header
LB: loop body
LE: loop exit
PB: predicated region body
PF: predicated region fallthrough
CT: control target
= control target key end

     0   :  { %10 = vsyncpa [#allocation3], 0  ;;  %s1403_s0 = inlined_call_operand.vmem [shape: f32[2,340,32], index: 0, kind: input, shape index: {}]   ;;  %s1404_s1 = inlined_call_operand.vmem [shape: bf16[2,4,32], index: 1, kind: input, shape index: {}]   ;;  %s1405_s2 = inlined_call_operand.vmem [shape: bf16[32,64], index: 2, kind: input, shape index: {}]   ;;  %s1406_s3 = inlined_call_operand.vmem [shape: bf16[192,128], index: 3, kind: input, shape index: {}]   ;;  %s1407_s4 = inlined_call_operand.vmem [shape: f32[1,128], index: 4, kind: input, shape index: {}]   ;;  %s1408_s5 = inlined_call_operand.hbm [shape: f32[2,1,128], index: 5, kind: output, shape index: {}]  }
   0x1   :  { %12 = vsyncpa [#allocation3 + $0x1], 0  ;;  %s1137_s18 = smov 0   ;;  %s1139_s19 = smov 0  }
   0x2   :  { %s1141_s20 = smov 0   ;;  %s1143_s21 = smov 0  }
   0x3 LB: > { %s1158_s22 = sadd.s32 4294967295, %s1102_s21   ;;  %s869_s23 = sadd.s32 4294967294, %s1102_s21   ;;  %s1102_s21 = sphi %s1143_s21, %s1414_s21   ;;  %s1098_s20 = sphi %s1141_s20, %s1413_s20   ;;  %s1094_s19 = sphi %s1139_s19, %s1412_s19   ;;  %s1090_s18 = sphi %s1137_s18, %s1411_s18  }
   0x4   : > { %s1162_s24 = sadd.s32 1, %s1102_s21   ;;  %s140_s25 = sadd.s32 1, %s1098_s20 }
   0x5   : > { %s137_s26 = ssub.s32 %s1102_s21, %s1162_s24  ;;  %p150_p0 = scmp.ne.s32.totalorder %s1098_s20, %s1094_s19 }
   0x6   : > { %p138_p1 = scmp.eq.s32.totalorder %s137_s26, 0  ;;  %p151_p2 = scmp.eq.s32.totalorder %s1158_s22, 1 }
   0x7   : > { %p156_p3 = scmp.ne.s32.totalorder %s1094_s19, %s1090_s18  ;;  %p157_p4 = scmp.eq.s32.totalorder %s869_s23, 1 }
   0x8   : > { %s1173_s27 = scalar_select %p138_p1, %s1098_s20, %s140_s25  }
   0x9   : > { %p1175_p5 = por %p151_p2, %p150_p0  ;;  %p1179_p6 = por %p157_p4, %p156_p3 }
   0xa   : > { %p872_p7 = scmp.ge.s32.totalorder %s1102_s21, 1  ;;  %p199_p8 = scmp.lt.s32.totalorder %s1102_s21, 3 }
   0xc   : > { %p200_p9 = pnand %p872_p7, %p199_p8 }
   0xd   : > { %v1026_v0 = vld [vmem:[%s1405_s2] sm:$0xff] (!%p200_p9)   ;;  %v1104_v1 = vmov (!%p200_p9), 0.0   ;;  %v1027_v2 = vld [vmem:[%s1405_s2 + $0x8] sm:$0xff] (!%p200_p9)   ;;  %vm1105_vm0 = vmmov (!%p200_p9), 0   ;;  %p230_p10 = scmp.lt.s32.totalorder (!%p200_p9), %s1158_s22, 1  ;;  %vm272_vm1 = vcmask (!%p200_p9), 261120  }
   0xe   : > { %203 = sbr.rel (%p200_p9) target bundleno = 485 (0x1e5), region = 40  ;;  %918 = vmatprep.subr.bf16.mxu0 (!%p200_p9), %v1104_v1  ;;  %926 = vmatprep.subr.bf16.mxu1 (!%p200_p9), %v1104_v1  ;;  %v1028_v3 = vld [vmem:[%s1406_s3] sm:$0xff] (!%p200_p9)   ;;  %v1029_v4 = vld [vmem:[%s1406_s3 + $0x8] sm:$0xff] (!%p200_p9)   ;;  %vm386_vm2 = vcmask (!%p200_p9), 257024   ;;  %vm456_vm3 = vcmask (!%p200_p9), 519168   ;;  %vm743_vm4 = vcmask (!%p200_p9), 523264  }
   0xf   : > { %919 = vmatpush3.bf16.msra.mxu0 (!%p200_p9), %v1026_v0  ;;  %922 = vmatprep.mubr.msk.bf16.mxu0 (!%p200_p9), %vm1105_vm0, %v1104_v1  ;;  %s228_s10 = sand.u32 (!%p200_p9), 1, %s1094_s19   ;;  %s895_s13 = sshll.u32 (!%p200_p9), %s1158_s22, 4 }
  0x10   : > { %920 = vmatprep.subr.bf16.mxu0 (!%p200_p9), %v1104_v1  ;;  %930 = vmatprep.mubr.msk.bf16.mxu1 (!%p200_p9), %vm1105_vm0, %v1104_v1  ;;  %s1106_s26 = smov (!%p200_p9), [#allocation2]  }
  0x11   : > { %927 = vmatpush3.bf16.msra.mxu1 (!%p200_p9), %v1028_v3 }
  0x12   : > { %928 = vmatprep.subr.bf16.mxu1 (!%p200_p9), %v1104_v1 }
  0x13   : > { %921 = vmatpush3.bf16.msra.mxu0 (!%p200_p9), %v1027_v2 }
  0x14   : > { %958 = vmatprep.subr.bf16.mxu0 (!%p200_p9), %v1104_v1 }
  0x15   : > { %s231_s11 = scalar_select %p230_p10, %s1158_s22, 1  ;;  %929 = vmatpush3.bf16.msra.mxu1 %v1029_v4 }
  0x16   : > { %934 = vmatprep.subr.bf16.mxu1 %v1104_v1  ;;  %s790_s22 = scalar_lea.sflag [#allocation3], %s228_s10 }
  0x17   : > { %s984_s14 = smul.u32 344, %s231_s11  ;;  %s874_s15 = sshll.u32 %s231_s11, 1 }
  0x18   : > { %s238_s23 = scalar_lea.vmem %s1404_s1, %s874_s15 }
  0x19   : > { %s1214_s30 = scalar_lea.vmem %s1403_s0, %s984_s14  ;;  %v395_v5 = vld [vmem:[%s238_s23] sm:$0x3]  ;;  %s229_s14 = scalar_lea.vmem [#allocation2], %s228_s10 }
  0x1a   : > { %923 = vmatmul.mubr.msk.bf16.vlgmr.msra.gmra.mrb[0].mxu0 %vm272_vm1, %v395_v5  ;;  %v240_v6 = vld [vmem:[%s1214_s30] sm:$0xff]  ;;  %v241_v7 = vld [vmem:[%s1214_s30 + $0x8] sm:$0xff]  ;;  %v242_v8 = vld [vmem:[%s1214_s30 + $0x10] sm:$0xff]  ;;  %s802_s15 = sshll.u32 %s229_s14, 4  ;;  %s1361_s23 = scalar_lea.hbm %s1408_s5, %s895_s13  ;;  %s1363_s15 = int_to_ptr.vmem [resolvable:$true] %s802_s15 }
  0x1b   : > { %v243_v9 = vld [vmem:[%s1214_s30 + $0x18] sm:$0xff]  ;;  %v273_v10 = vsel %vm272_vm1, %v240_v6, 0.0  ;;  %v274_v11 = vsel %vm272_vm1, %v241_v7, 0.0  ;;  %v276_v12 = vsel %vm272_vm1, %v242_v8, 0.0  ;;  %966 = vmatprep.mubr.msk.bf16.mxu0 %vm1105_vm0, %v1104_v1  ;;  %v244_v13 = vld [vmem:[%s1214_s30 + $0x20] sm:$0xff]  ;;  %v245_v16 = vld [vmem:[%s1214_s30 + $0x28] sm:$0xff] }
  0x1c   : > { %v275_v14 = vadd.f32 %v274_v11, %v273_v10  ;;  %v278_v15 = vsel %vm272_vm1, %v243_v9, 0.0  ;;  %v280_v18 = vsel %vm272_vm1, %v244_v13, 0.0  ;;  %v246_v19 = vld [vmem:[%s1214_s30 + $0x30] sm:$0xff]  ;;  %v282_v21 = vsel %vm272_vm1, %v245_v16, 0.0  ;;  %v247_v22 = vld [vmem:[%s1214_s30 + $0x38] sm:$0xff]  ;;  %v248_v25 = vld [vmem:[%s1214_s30 + $0x40] sm:$0xff] }
  0x1d   : > { %v284_v24 = vsel %vm272_vm1, %v246_v19, 0.0  ;;  %v286_v27 = vsel %vm272_vm1, %v247_v22, 0.0  ;;  %v249_v28 = vld [vmem:[%s1214_s30 + $0x48] sm:$0xff]  ;;  %v288_v30 = vsel %vm272_vm1, %v248_v25, 0.0  ;;  %v250_v31 = vld [vmem:[%s1214_s30 + $0x50] sm:$0xff]  ;;  %v251_v34 = vld [vmem:[%s1214_s30 + $0x58] sm:$0xff] }
  0x1e   : > { %v277_v17 = vadd.f32 %v276_v12, %v275_v14  ;;  %v290_v33 = vsel %vm272_vm1, %v249_v28, 0.0  ;;  %v292_v36 = vsel %vm272_vm1, %v250_v31, 0.0  ;;  %v252_v37 = vld [vmem:[%s1214_s30 + $0x60] sm:$0xff]  ;;  %v294_v39 = vsel %vm272_vm1, %v251_v34, 0.0  ;;  %v253_v40 = vld [vmem:[%s1214_s30 + $0x68] sm:$0xff]  ;;  %v254_v43 = vld [vmem:[%s1214_s30 + $0x70] sm:$0xff] }
  0x1f   : > { %v296_v42 = vsel %vm272_vm1, %v252_v37, 0.0  ;;  %v298_v45 = vsel %vm272_vm1, %v253_v40, 0.0  ;;  %v255_v46 = vld [vmem:[%s1214_s30 + $0x78] sm:$0xff]  ;;  %v300_v48 = vsel %vm272_vm1, %v254_v43, 0.0  ;;  %v256_v49 = vld [vmem:[%s1214_s30 + $0x80] sm:$0xff]  ;;  %v344_v52 = vld [vmem:[%s1214_s30 + $0x108] sm:$0xff] }
  0x20   : > { %v279_v20 = vadd.f32 %v278_v15, %v277_v17  ;;  %v343_v51 = vld [vmem:[%s1214_s30 + $0x100] sm:$0xff]  ;;  %v302_v53 = vsel %vm272_vm1, %v255_v46, 0.0  ;;  %v257_v54 = vld [vmem:[%s1214_s30 + $0x88] sm:$0xff]  ;;  %v304_v56 = vsel %vm272_vm1, %v256_v49, 0.0  ;;  %v352_v58 = vsel %vm272_vm1, %v344_v52, 0.0  ;;  %v258_v59 = vld [vmem:[%s1214_s30 + $0x90] sm:$0xff] }
  0x21   : > { %v351_v57 = vsel %vm272_vm1, %v343_v51, 0.0  ;;  %v345_v61 = vld [vmem:[%s1214_s30 + $0x110] sm:$0xff]  ;;  %v306_v62 = vsel %vm272_vm1, %v257_v54, 0.0  ;;  %v259_v63 = vld [vmem:[%s1214_s30 + $0x98] sm:$0xff]  ;;  %v308_v3 = vsel %vm272_vm1, %v258_v59, 0.0  ;;  %v260_v5 = vld [vmem:[%s1214_s30 + $0xa0] sm:$0xff] }
  0x22   : > { %v281_v23 = vadd.f32 %v280_v18, %v279_v20  ;;  %v353_v2 = vadd.f32 %v352_v58, %v351_v57  ;;  %v354_v4 = vsel %vm272_vm1, %v345_v61, 0.0  ;;  %v346_v7 = vld [vmem:[%s1214_s30 + $0x118] sm:$0xff]  ;;  %v310_v8 = vsel %vm272_vm1, %v259_v63, 0.0  ;;  %v261_v9 = vld [vmem:[%s1214_s30 + $0xa8] sm:$0xff]  ;;  %v262_v14 = vld [vmem:[%s1214_s30 + $0xb0] sm:$0xff]  ;;  %s1040_s25 = scalar_lea.vmem %s1363_s15, 16 }
  0x23   : > { %v312_v12 = vsel %vm272_vm1, %v260_v5, 0.0  ;;  %v356_v13 = vsel %vm272_vm1, %v346_v7, 0.0  ;;  %v347_v16 = vld [vmem:[%s1214_s30 + $0x120] sm:$0xff]  ;;  %v314_v17 = vsel %vm272_vm1, %v261_v9, 0.0  ;;  %v263_v18 = vld [vmem:[%s1214_s30 + $0xb8] sm:$0xff]  ;;  %v348_v25 = vld [vmem:[%s1214_s30 + $0x128] sm:$0xff]  ;;  %p1041_p11 = scmp.ne.s32.totalorder %s1363_s15, %s1040_s25 }
  0x24   : > { %v283_v26 = vadd.f32 %v282_v21, %v281_v23  ;;  %v355_v11 = vadd.f32 %v354_v4, %v353_v2  ;;  %v316_v21 = vsel %vm272_vm1, %v262_v14, 0.0  ;;  %v358_v22 = vsel %vm272_vm1, %v347_v16, 0.0  ;;  %v264_v23 = vld [vmem:[%s1214_s30 + $0xc0] sm:$0xff]  ;;  %v349_v34 = vld [vmem:[%s1214_s30 + $0x130] sm:$0xff]  ;;  %v350_v43 = vld [vmem:[%s1214_s30 + $0x138] sm:$0xff] }
  0x25   : > { %v360_v31 = vsel %vm272_vm1, %v348_v25, 0.0  ;;  %v362_v40 = vsel %vm272_vm1, %v349_v34, 0.0  ;;  %v364_v49 = vsel %vm272_vm1, %v350_v43, 0.0  ;;  %v374_v63 = vld [vmem:[%s1214_s30 + $0x148] sm:$0xff]  ;;  %p1042_p12 = pnand %p1041_p11, %p1175_p5 }
  0x26   : > { %v285_v29 = vadd.f32 %v284_v24, %v283_v26  ;;  %v357_v20 = vadd.f32 %v356_v13, %v355_v11  ;;  %v318_v26 = vsel %vm272_vm1, %v263_v18, 0.0  ;;  %v376_v4 = vsel %vm272_vm1, %v374_v63, 0.0 }
  0x27   : > { %p1043_p13 = pneg %p1042_p12 }
  0x28   : > { %v287_v32 = vadd.f32 %v286_v27, %v285_v29  ;;  %v265_v27 = vld [vmem:[%s1214_s30 + $0xc8] sm:$0xff]  ;;  %v359_v29 = vadd.f32 %v358_v22, %v357_v20  ;;  %v1031_v22 = vld [vmem:[%s1406_s3 + $0x18] sm:$0xff]  }
  0x2a   : > { %v289_v35 = vadd.f32 %v288_v30, %v287_v32  ;;  %v320_v30 = vsel %vm272_vm1, %v264_v23, 0.0  ;;  %v266_v32 = vld [vmem:[%s1214_s30 + $0xd0] sm:$0xff] }
  0x2c   : > { %v291_v38 = vadd.f32 %v290_v33, %v289_v35  ;;  %v322_v35 = vsel %vm272_vm1, %v265_v27, 0.0  ;;  %v1036_v27 = vld [vmem:[%s1406_s3 + $0x40] sm:$0xff]  }
  0x2d   : > { %959 = vmatpush3.bf16.msra.mxu0 %v1036_v27 }
  0x2e   : > { %v293_v41 = vadd.f32 %v292_v36, %v291_v38  ;;  %v267_v36 = vld [vmem:[%s1214_s30 + $0xd8] sm:$0xff]  ;;  %v361_v38 = vadd.f32 %v360_v31, %v359_v29  ;;  %v1032_v31 = vld [vmem:[%s1406_s3 + $0x20] sm:$0xff]   ;;  %960 = vmatprep.subr.bf16.mxu0 %v1104_v1 }
  0x30   : > { %v295_v44 = vadd.f32 %v294_v39, %v293_v41  ;;  %v324_v39 = vsel %vm272_vm1, %v266_v32, 0.0  ;;  %v268_v41 = vld [vmem:[%s1214_s30 + $0xe0] sm:$0xff]  ;;  %v1037_v32 = vld [vmem:[%s1406_s3 + $0x48] sm:$0xff]  }
  0x31   : > { %961 = vmatpush3.bf16.msra.mxu0 %v1037_v32 }
  0x32   : > { %v297_v47 = vadd.f32 %v296_v42, %v295_v44  ;;  %v326_v44 = vsel %vm272_vm1, %v267_v36, 0.0  ;;  %962 = vmatprep.subr.bf16.mxu0 %v1104_v1  ;;  %v1038_v36 = vld [vmem:[%s1406_s3 + $0x50] sm:$0xff]  }
  0x34   : > { %v299_v50 = vadd.f32 %v298_v45, %v297_v47  ;;  %v269_v45 = vld [vmem:[%s1214_s30 + $0xe8] sm:$0xff]  ;;  %v363_v47 = vadd.f32 %v362_v40, %v361_v38 }
  0x35   : > { %v330_v52 = vsel %vm272_vm1, %v269_v45, 0.0  ;;  %963 = vmatpush3.bf16.msra.mxu0 %v1038_v36 }
  0x36   : > { %v301_v55 = vadd.f32 %v300_v48, %v299_v50  ;;  %v328_v48 = vsel %vm272_vm1, %v268_v41, 0.0  ;;  %v270_v50 = vld [vmem:[%s1214_s30 + $0xf0] sm:$0xff]  ;;  %964 = vmatprep.subr.bf16.mxu0 %v1104_v1 }
  0x38   : > { %v303_v60 = vadd.f32 %v302_v53, %v301_v55  ;;  %v271_v53 = vld [vmem:[%s1214_s30 + $0xf8] sm:$0xff]  ;;  %v365_v55 = vadd.f32 %v364_v49, %v363_v47 }
  0x39   : > { %v334_v58 = vsel %vm272_vm1, %v271_v53, 0.0 }
  0x3a   : > { %v305_v0 = vadd.f32 %v304_v56, %v303_v60  ;;  %v332_v56 = vsel %vm272_vm1, %v270_v50, 0.0  ;;  %v366_v60 = vrot.slane %v365_v55, 4 }
  0x3c   : > { %v307_v6 = vadd.f32 %v306_v62, %v305_v0  ;;  %v373_v62 = vld [vmem:[%s1214_s30 + $0x140] sm:$0xff]  ;;  %v367_v2 = vadd.f32 %v366_v60, %v365_v55 }
  0x3e   : > { %v309_v10 = vadd.f32 %v308_v3, %v307_v6  ;;  %v375_v3 = vsel %vm272_vm1, %v373_v62, 0.0  ;;  %v368_v7 = vrot.slane %v367_v2, 2 }
  0x40   : > { %v311_v15 = vadd.f32 %v310_v8, %v309_v10  ;;  %v377_v8 = vadd.f32 %v376_v4, %v375_v3  ;;  %v369_v11 = vadd.f32 %v368_v7, %v367_v2 }
  0x42   : > { %v313_v19 = vadd.f32 %v312_v12, %v311_v15  ;;  %v378_v12 = vrot.slane %v377_v8, 4  ;;  %v370_v15 = vrot.slane %v369_v11, 1 }
  0x44   : > { %v315_v24 = vadd.f32 %v314_v17, %v313_v19  ;;  %v379_v16 = vadd.f32 %v378_v12, %v377_v8  ;;  %v1030_v17 = vld [vmem:[%s1406_s3 + $0x10] sm:$0xff]   ;;  %v371_v20 = vadd.f32 %v370_v15, %v369_v11 }
  0x45   : > { %v385_v19 = vld [vmem:[%s1214_s30 + $0x150] sm:$0xf]  ;;  %s1044_s30 = sshll.u32 %s1106_s26, 4  ;;  %s1045_s30 = int_to_ptr.vmem [resolvable:$false] %s1044_s30 }
  0x46   : > { %v317_v28 = vadd.f32 %v316_v21, %v315_v24  ;;  %v380_v21 = vrot.slane %v379_v16, 2  ;;  %v387_v23 = vsel %vm386_vm2, %v385_v19, 0.0  ;;  %v372_v24 = vmul.f32 0.015624922, %v371_v20  ;;  %s1046_s6 = scalar_lea.vmem %s1045_s30, 32  ;;  %p1047_p0 = scmp.lt.s32.totalorder %s1363_s15, %s1045_s30 }
  0x47   : > { %p1048_p1 = scmp.lt.s32.totalorder %s1046_s6, %s1040_s25 }
  0x48   : > { %v319_v33 = vadd.f32 %v318_v26, %v317_v28  ;;  %v381_v25 = vadd.f32 %v380_v21, %v379_v16  ;;  %v388_v26 = vrot.slane %v387_v23, 4  ;;  %v531_v28 = vpack.c.bf16 %v372_v24, %v372_v24 }
  0x49   : > { %p1049_p2 = por %p1048_p1, %p1047_p0 }
  0x4a   : > { %v321_v37 = vadd.f32 %v320_v30, %v319_v33  ;;  %v382_v29 = vrot.slane %v381_v25, 1  ;;  %v389_v30 = vadd.f32 %v388_v26, %v387_v23 }
  0x4b   : > { %p1050_p3 = pnand %p1049_p2, %p1043_p13 }
  0x4c   : > { %v323_v42 = vadd.f32 %v322_v35, %v321_v37  ;;  %v383_v33 = vadd.f32 %v382_v29, %v381_v25  ;;  %v390_v34 = vrot.slane %v389_v30, 2  ;;  %v1033_v35 = vld [vmem:[%s1406_s3 + $0x28] sm:$0xff]  }
  0x4e   : > { %v325_v46 = vadd.f32 %v324_v39, %v323_v42  ;;  %v384_v37 = vmul.f32 0.062499687, %v383_v33  ;;  %v391_v38 = vadd.f32 %v390_v34, %v389_v30  ;;  %v1039_v39 = vld [vmem:[%s1406_s3 + $0x58] sm:$0xff]   ;;  %v1034_v42 = vld [vmem:[%s1406_s3 + $0x30] sm:$0xff]  }
  0x4f   : > { %965 = vmatpush3.bf16.msra.mxu0 %v1039_v39 }
  0x50   : > { %v327_v51 = vadd.f32 %v326_v44, %v325_v46  ;;  %v592_v40 = vpack.c.bf16 %v384_v37, %v384_v37  ;;  %v392_v41 = vrot.slane %v391_v38, 1  ;;  %v1035_v44 = vld [vmem:[%s1406_s3 + $0x38] sm:$0xff]  }
  0x52   : > { %v329_v54 = vadd.f32 %v328_v48, %v327_v51  ;;  %v393_v43 = vadd.f32 %v392_v41, %v391_v38 }
  0x54   : > { %v331_v57 = vadd.f32 %v330_v52, %v329_v54  ;;  %v394_v45 = vmul.f32 0.24999875, %v393_v43 }
  0x56   : > { %v333_v59 = vadd.f32 %v332_v56, %v331_v57  ;;  %v653_v46 = vpack.c.bf16 %v394_v45, %v394_v45 }
  0x58   : > { %v335_v61 = vadd.f32 %v334_v58, %v333_v59 }
  0x5a   : > { %v336_v0 = vrot.slane %v335_v61, 4 }
  0x5c   : > { %v337_v5 = vadd.f32 %v336_v0, %v335_v61  ;;  %v465_v0 = vld [vmem:[%s1407_s4] sm:$0x1] }
  0x5e   : > { %v338_v6 = vrot.slane %v337_v5, 2 }
  0x60   : > { %v339_v9 = vadd.f32 %v338_v6, %v337_v5 }
  0x62   : > { %v340_v10 = vrot.slane %v339_v9, 1 }
  0x64   : > { %v341_v13 = vadd.f32 %v340_v10, %v339_v9 }
  0x66   : > { %v342_v14 = vmul.f32 0.0039062304, %v341_v13 }
  0x68   : > { %v470_v18 = vpack.c.bf16 %v342_v14, %v342_v14 }
  0x6a   : > { %931 = vmatmul.mubr.msk.bf16.vlgmr.msra.gmra.mrb[0].mxu1 %vm272_vm1, %v470_v18 }
  0x6b   : > { %935 = vmatpush3.bf16.msra.mxu1 %v1030_v17  ;;  %938 = vmatprep.mubr.msk.bf16.mxu1 %vm1105_vm0, %v1104_v1 }
  0x6c   : > { %936 = vmatprep.subr.bf16.mxu1 %v1104_v1 }
  0x6f   : > { %937 = vmatpush3.bf16.msra.mxu1 %v1031_v22 }
  0x70   : > { %942 = vmatprep.subr.bf16.mxu1 %v1104_v1 }
  0x76   : > { %939 = vmatmul.mubr.msk.bf16.vlgmr.msra.gmra.mrb[0].mxu1 %vm272_vm1, %v531_v28 }
  0x77   : > { %943 = vmatpush3.bf16.msra.mxu1 %v1032_v31  ;;  %946 = vmatprep.mubr.msk.bf16.mxu1 %vm1105_vm0, %v1104_v1 }
  0x78   : > { %944 = vmatprep.subr.bf16.mxu1 %v1104_v1 }
  0x7b   : > { %945 = vmatpush3.bf16.msra.mxu1 %v1033_v35 }
  0x7c   : > { %950 = vmatprep.subr.bf16.mxu1 %v1104_v1 }
  0x82   : > { %947 = vmatmul.mubr.msk.bf16.vlgmr.msra.gmra.mrb[0].mxu1 %vm272_vm1, %v592_v40 }
  0x83   : > { %951 = vmatpush3.bf16.msra.mxu1 %v1034_v42  ;;  %954 = vmatprep.mubr.msk.bf16.mxu1 %vm1105_vm0, %v1104_v1 }
  0x84   : > { %952 = vmatprep.subr.bf16.mxu1 %v1104_v1 }
  0x87   : > { %953 = vmatpush3.bf16.msra.mxu1 %v1035_v44 }
  0x8e   : > { %955 = vmatmul.mubr.msk.bf16.vlgmr.msra.gmra.mrb[0].mxu1 %vm272_vm1, %v653_v46 }
  0xed   : > { %v449_v47 = vpop.f32.mrb[0].mxu0 }
  0xee   : > { %v455_v48 = vmax.f32 %v449_v47, 0.0  ;;  %v924_v49 = vpop.f32.mrb[1].mxu0 }
  0xef   : > { %v452_v50 = vpop.f32.mrb[2].mxu0 }
  0xf0   : > { %v457_v51 = vsel %vm456_vm3, %v455_v48, 0.0  ;;  %v925_v52 = vpop.f32.mrb[3].mxu0 }
  0xf1   : > { %v458_v53 = vrot.slane %v457_v51, 4 }
  0xf3   : > { %v459_v54 = vadd.f32 %v458_v53, %v457_v51 }
  0xf5   : > { %v460_v55 = vrot.slane %v459_v54, 2 }
  0xf7   : > { %v461_v56 = vadd.f32 %v460_v55, %v459_v54 }
  0xf9   : > { %v462_v57 = vrot.slane %v461_v56, 1 }
  0xfb   : > { %v463_v1 = vadd.f32 %v462_v57, %v461_v56 }
  0xfd   : > { %v464_v58 = vmul.f32 0.24999875, %v463_v1 }
  0xff   : > { %v718_v59 = vpack.c.bf16 %v464_v58, %v464_v58 }
 0x101   : > { %967 = vmatmul.mubr.msk.bf16.vlgmr.msra.gmra.mrb[4].mxu0 %vm743_vm4, %v718_v59 }
 0x161   : > { %v703_v60 = vpop.f32.mrb[0].mxu1 }
 0x162   : > { %v956_v61 = vpop.f32.mrb[1].mxu1  ;;  %v970_v2 = vadd.f32 %v703_v60, %v465_v0 }
 0x163   : > { %v706_v62 = vpop.f32.mrb[2].mxu1 }
 0x164   : > { %v957_v63 = vpop.f32.mrb[3].mxu1 }
 0x1d4   : > { %v781_v3 = vpop.f32.mrb[4].mxu0 }
 0x1d5   : > { %v971_v4 = vadd.f32 %v970_v2, %v781_v3  ;;  %v968_v5 = vpop.f32.mrb[5].mxu0 }
 0x1d6   : > { %v784_v6 = vpop.f32.mrb[6].mxu0 }
 0x1d7   : > { %788 = vst [vmem:[%s229_s14] sm:$0x1] %v971_v4  ;;  %v969_v7 = vpop.f32.mrb[7].mxu0 }
 0x1d8   : > { %1053 = shalt.err (!%p1050_p3)
}
 0x1d9   : > { %s1054_s7 = scalar_lea.hbm %s1361_s23, 16  ;;  %s1058_s10 = scalar_lea.hbm %s1408_s5, 32 }
 0x1da   : > { %p1055_p4 = scmp.ne.s32.totalorder %s1361_s23, %s1054_s7  ;;  %p1059_p9 = scmp.lt.u32.totalorder %s1361_s23, %s1408_s5 }
 0x1db   : > { %p1060_p10 = scmp.lt.u32.totalorder %s1058_s10, %s1054_s7  ;;  %p1062_p12 = scmp.lt.u32.totalorder %s1054_s7, %s1361_s23 }
 0x1dc   : > { %p1056_p7 = pnand %p1055_p4, %p1175_p5 }
 0x1dd   : > { %p1061_p11 = por %p1060_p10, %p1059_p9 }
 0x1de   : > { %p1057_p8 = pneg %p1056_p7 }
 0x1df   : > { %p1063_p13 = por %p1062_p12, %p1061_p11 }
 0x1e1   : > { %p1064_p0 = pnand %p1063_p13, %p1057_p8 }
 0x1e3   : > { %1067 = shalt.err (!%p1064_p0)
}
 0x1e4   : > { %985 = dma.vmem_to_hbm [thread:$0]  (%p1175_p5), %s1363_s15, 16, %s1361_s23, %s790_s22  }
 0x1e5 PF: > { %p991_p1 = scmp.ge.s32.totalorder %s1102_s21, 2  ;;  %s814_s13 = sand.u32 1, %s1090_s18  }
 0x1e6   : > { %s815_s14 = scalar_lea.sflag [#allocation3], %s814_s13 }
 0x1e7   : > { %p988_p2 = pnand %p991_p1, %p1179_p6 }
 0x1e9   : > { %1085 = dma.done.wait (!%p988_p2), %s815_s14, 16  }
 0x1ea   : > { %1087 = vsyncadd (!%p988_p2), %s815_s14, 4294967280  ;;  %p15_p3 = scmp.ge.s32.totalorder %s1162_s24, 4   ;;  %s1411_s18 = smov %s1094_s19 }
 0x1eb   : > { %s1412_s19 = smov %s1098_s20  ;;  %s1413_s20 = smov %s1173_s27 }
 0x1ec   : > { %s1414_s21 = smov %s1162_s24  ;;  %17 = sbr.rel (!%p15_p3) target bundleno = 3 (0x3), region = 78 }
 0x1f3   :  { %819 = vsyncpa [#allocation3], 1 }
 0x1f4   :  { %821 = vsyncpa [#allocation3 + $0x1], 1 }

</bundles_post_ra>
